<compile_context>
chip_gen: v7x
topology: tpu7x:2x2x1
jax: 0.10.0
libtpu: 0.0.40
codegen_flags: <defaults>
</compile_context>

<pallas_src>
import jax
import jax.numpy as jnp
from jax import lax
from jax.experimental import pallas as pl
from jax.experimental.pallas import tpu as pltpu


MATMUL_DTYPE = jnp.bfloat16   # MXU operand dtype (f32 accumulation). Use jnp.float32 for exact parity.
LANE = 128                    # lane-dense output width


def _leaky(x):
    return jnp.where(x > 0, x, 0.01 * x)


def _mlp2(x, w1, b1, w2, b2, mxdt):
    """Two-layer LeakyReLU MLP; mxdt matmul operands, f32 accumulate."""
    h = _leaky(jnp.dot(x.astype(mxdt), w1, preferred_element_type=jnp.float32) + b1)
    return _leaky(jnp.dot(h.astype(mxdt), w2, preferred_element_type=jnp.float32) + b2)


def _select_rows(w, x):
    """out[..., d] = sum_k w[..., k] * x[..., k, d].  K = x.shape[-2], static & small."""
    out = w[..., 0:1] * x[..., 0, :]
    for k in range(1, x.shape[-2]):
        out = out + w[..., k:k + 1] * x[..., k, :]
    return out


def _build_kernel(OB, NI, NF, NB, D, mxdt):
    C = NI + NB
    f32 = jnp.float32

    def kernel(x_ref, oi_ref, cand_ref,
               cw1_ref, cb1_ref, cw2_ref, cb2_ref,
               mw1_ref, mb1_ref, mw2_ref, mb2_ref,
               o2s_w_ref, o2s_b_ref,
               out_ref):
        X2 = x_ref[0]                                   # (OB*NI, D) f32 features
        oi = oi_ref[0]                                  # (OB, NI)   int32 slot ids (-1 = pad)
        cand_all = cand_ref[0]                          # (NI, OB, C) int32 candidate ids per slot

        # f2f / f2i / i2i weights, stacked along the leading axis.
        Wf2f = (mw1_ref[0], mb1_ref[0], mw2_ref[0], mb2_ref[0])
        Wf2i = (mw1_ref[1], mb1_ref[1], mw2_ref[1], mb2_ref[1])
        Wi2i = (mw1_ref[2], mb1_ref[2], mw2_ref[2], mb2_ref[2])

        # Index structures rebuilt on the VPU (nothing O(NI^2) comes from HBM).
        iota_oni = lax.broadcasted_iota(jnp.int32, (OB, NI), 1)
        iota_ocn = lax.broadcasted_iota(jnp.int32, (OB, C, NI), 2)
        slot_okf = (oi != -1).astype(f32)               # (OB, NI) slot-position validity

        # ---- stage 1: creat_factors — per-factor MLP over all OB*NI item rows.
        Xm = X2.astype(mxdt)
        FZ = []                                         # factor-major: NF x (OB, NI, D)
        for j in range(NF):
            h = _leaky(jnp.dot(Xm, cw1_ref[j], preferred_element_type=f32) + cb1_ref[j])
            z = _leaky(jnp.dot(h.astype(mxdt), cw2_ref[j], preferred_element_type=f32)
                       + cb2_ref[j])
            FZ.append(z.reshape(OB, NI, D))

        # ---- stage 2: inter_factors — sequential over outfit slots (in-place
        # semantics), batched over OB outfits, NF factors and C candidates.
        ohs, vfs = [], []
        cnt = jnp.zeros((OB, NI), f32)                  # valid-occurrence count per item id
        for pos in range(NI):
            sid = oi[:, pos:pos + 1]                    # (OB, 1) this slot's item id
            vb = sid != -1                              # (OB, 1) slot valid
            oh = ((sid == iota_oni) & vb).astype(f32)   # (OB, NI) one-hot of the slot's id
            cid = cand_all[pos]                         # (OB, C) candidate ids (outfit ++ nbrs)
            # exclusion by id (matches reference: n == -1 or n == i)
            cok = ((cid != -1) & (cid != sid) & vb).astype(f32)                 # (OB, C)
            coh = (cid[:, :, None] == iota_ocn).astype(f32) * cok[:, :, None]   # (OB, C, NI)

            xin_parts = []
            for j in range(NF):
                fz_j = FZ[j]                                             # (OB, NI, D)
                t_j = _select_rows(oh, fz_j)                             # (OB, D) slot row
                xc_j = coh[:, :, 0:1] * fz_j[:, 0:1, :]                  # candidate gather
                for n in range(1, NI):
                    xc_j = xc_j + coh[:, :, n:n + 1] * fz_j[:, n:n + 1, :]
                xin_parts.append((t_j[:, None, :] * xc_j).reshape(OB * C, D))
            xin = jnp.concatenate(xin_parts, axis=0)                     # (NF*OB*C, D)
            y = _mlp2(xin, *Wf2f, mxdt)                                  # one batched f2f MLP

            for j in range(NF):
                y_j = y[j * OB * C:(j + 1) * OB * C].reshape(OB, C, D)
                acc = _select_rows(cok, y_j)                             # (OB, D) masked reduce
                FZ[j] = FZ[j] + oh[:, :, None] * acc[:, None, :]         # rank-1 row update

            ohs.append(oh)
            vfs.append(vb.astype(f32))
            cnt = cnt + oh

        # ---- stage 3: infer_items — one batched f2i MLP, scaled by occurrence counts.
        z_all = jnp.concatenate([FZ[j].reshape(OB * NI, D) for j in range(NF)], axis=0)
        y3 = _mlp2(z_all, *Wf2i, mxdt)                                   # (NF*OB*NI, D)
        S = y3[0:OB * NI].reshape(OB, NI, D)
        for j in range(1, NF):
            S = S + y3[j * OB * NI:(j + 1) * OB * NI].reshape(OB, NI, D)
        FX = X2.reshape(OB, NI, D) + cnt[:, :, None] * S                 # (OB, NI, D)

        # ---- stage 4: inter_items — sequential over slots; batched i2i MLP per slot.
        for pos in range(NI):
            oh, vf = ohs[pos], vfs[pos]
            Y = _mlp2(FX.reshape(OB * NI, D), *Wi2i, mxdt).reshape(OB, NI, D)
            wcnt = cnt * (vf - oh)                       # candidate multiplicity, id != self
            acc = _select_rows(wcnt, Y)                                  # (OB, D)
            FX = FX + oh[:, :, None] * acc[:, None, :]

        # ---- stage 5/6: infer_outfit (count-weighted row sum) + o2s score.
        OF = _select_rows(cnt, FX)                                       # (OB, D)
        logit = jnp.sum(OF * o2s_w_ref[...], axis=1, keepdims=True) + o2s_b_ref[...]
        score = 1.0 / (1.0 + jnp.exp(-logit))                            # (OB, 1)

        # ---- stage 7: per-outfit com_loss partials from row-wise Gram entries.
        comp = jnp.zeros((OB, 1), f32)
        for j1 in range(NF):
            for j2 in range(NF):
                g = jnp.sum(FZ[j1] * FZ[j2], axis=2)                     # (OB, NI)
                d = g - (1.0 if j1 == j2 else 0.0)
                comp = comp + jnp.sum(d * d * slot_okf, axis=1, keepdims=True)

        # ---- lane-dense output slab: lane 0 = score, lane 1 = com partial.
        lane = lax.broadcasted_iota(jnp.int32, (OB, LANE), 1)
        out_ref[0] = jnp.where(lane == 0, score, 0.0) + jnp.where(lane == 1, comp, 0.0)

    return kernel


def _pack_params(params, mxdt):
    """Pack weights: creat MLPs stacked per factor; f2f/f2i/i2i stacked on axis 0."""
    NF, D, H = params["cw1"].shape
    f32 = jnp.float32
    return (
        params["cw1"].astype(mxdt),                               # (NF, D, H)
        params["cb1"].reshape(NF, 1, H).astype(f32),              # (NF, 1, H)
        params["cw2"].astype(mxdt),                               # (NF, H, D)
        params["cb2"].reshape(NF, 1, D).astype(f32),              # (NF, 1, D)
        jnp.stack([params["f2f_w1"], params["f2i_w1"], params["i2i_w1"]]).astype(mxdt),
        jnp.stack([params["f2f_b1"], params["f2i_b1"], params["i2i_b1"]]
                  ).reshape(3, 1, D).astype(f32),
        jnp.stack([params["f2f_w2"], params["f2i_w2"], params["i2i_w2"]]).astype(mxdt),
        jnp.stack([params["f2f_b2"], params["f2i_b2"], params["i2i_b2"]]
                  ).reshape(3, 1, D).astype(f32),
        params["o2s_w"].reshape(1, D).astype(f32),
        params["o2s_b"].reshape(1, 1).astype(f32),
    )


def init_params(key, dim, n_factors):
    H = dim // 2

    def lin(k, fan_in, fan_out):
        k1, k2 = jax.random.split(k)
        bound = 1.0 / (fan_in ** 0.5)
        w = jax.random.uniform(k1, (fan_in, fan_out), jnp.float32, -bound, bound)
        b = jax.random.uniform(k2, (fan_out,), jnp.float32, -bound, bound)
        return w, b

    keys = jax.random.split(key, 2 * n_factors + 7)
    cw1, cb1, cw2, cb2 = [], [], [], []
    for j in range(n_factors):
        w1, b1 = lin(keys[2 * j], dim, H)
        w2, b2 = lin(keys[2 * j + 1], H, dim)
        cw1.append(w1); cb1.append(b1); cw2.append(w2); cb2.append(b2)
    p = {"cw1": jnp.stack(cw1), "cb1": jnp.stack(cb1),
         "cw2": jnp.stack(cw2), "cb2": jnp.stack(cb2)}
    base = 2 * n_factors
    for idx, name in enumerate(["f2f", "f2i", "i2i"]):
        w1, b1 = lin(keys[base + 2 * idx], dim, dim)
        w2, b2 = lin(keys[base + 2 * idx + 1], dim, dim)
        p[f"{name}_w1"] = w1; p[f"{name}_b1"] = b1
        p[f"{name}_w2"] = w2; p[f"{name}_b2"] = b2
    w, b = lin(keys[base + 6], dim, 1)
    p["o2s_w"] = w            # (dim, 1)
    p["o2s_b"] = b            # (1,)
    return p


def mfgn_forward(params, outfit_items, items_feature, items_neighbor,
                 items_factors=None, block_outfits=None):
    # items_factors is fully overwritten by creat_factors in the torch forward,
    # so its input values never influence the outputs; accepted and ignored.
    NO, NI = outfit_items.shape
    D = items_feature.shape[-1]
    NB = items_neighbor.shape[-1]
    NF = params["cw1"].shape[0]
    C = NI + NB
    f32 = jnp.float32

    # Outfit block size: OB outfits are batched per grid step so the shared-MLP
    # matmuls see M = OB*NI .. OB*NF*C rows.  Choose OB so ceil(NO/OB) >= 2 on
    # v7x (megacore) and the carried (NF+1)*OB*NI*D f32 state stays small.
    OB = block_outfits if block_outfits is not None else min(NO, 64)
    NBLK = -(-NO // OB)
    NOP = NBLK * OB

    oi = outfit_items.astype(jnp.int32)
    nb = items_neighbor.astype(jnp.int32)
    feat = items_feature.reshape(NO, NI, D).astype(f32)
    if NOP != NO:  # pad the outfit axis with empty (-1) outfits
        oi = jnp.concatenate([oi, jnp.full((NOP - NO, NI), -1, jnp.int32)], axis=0)
        nb = jnp.concatenate([nb, jnp.full((NOP - NO, NI, NB), -1, jnp.int32)], axis=0)
        feat = jnp.concatenate([feat, jnp.zeros((NOP - NO, NI, D), f32)], axis=0)

    # Per-slot candidate id lists: outfit ids ++ neighbors of the slot's id.
    safe = jnp.clip(oi, 0, NI - 1)
    nbr = nb[jnp.arange(NOP)[:, None], safe, :]                              # (NOP, NI, NB)
    cand = jnp.concatenate(
        [jnp.broadcast_to(oi[:, None, :], (NOP, NI, NI)), nbr], axis=-1)     # (NOP, NI, C)

    x_blk = feat.reshape(NBLK, OB * NI, D)
    oi_blk = oi.reshape(NBLK, OB, NI)
    cand_blk = cand.reshape(NBLK, OB, NI, C).transpose(0, 2, 1, 3)           # slot-major

    consts = _pack_params(params, MATMUL_DTYPE)
    kernel = _build_kernel(OB, NI, NF, NB, D, MATMUL_DTYPE)

    def blk_spec(a):
        nd = a.ndim
        return pl.BlockSpec((1,) + tuple(a.shape[1:]),
                            lambda k, n=nd: (k,) + (0,) * (n - 1))

    def const_spec(a):
        zeros = (0,) * a.ndim
        return pl.BlockSpec(tuple(a.shape), lambda k, z=zeros: z)

    per_block = (x_blk, oi_blk, cand_blk)
    in_specs = [blk_spec(a) for a in per_block] + [const_spec(a) for a in consts]

    out = pl.pallas_call(
        kernel,
        out_shape=jax.ShapeDtypeStruct((NBLK, OB, LANE), f32),
        grid_spec=pltpu.PrefetchScalarGridSpec(
            num_scalar_prefetch=0,
            grid=(NBLK,),
            in_specs=in_specs,
            out_specs=pl.BlockSpec((1, OB, LANE), lambda k: (k, 0, 0))),
        compiler_params=pltpu.CompilerParams(
            dimension_semantics=("parallel",)),
    )(*per_block, *consts)

    scores = out[:, :, 0].reshape(NOP)[:NO]
    com_loss = (jnp.sum(out[:, :, 1]) / NO).reshape(1)   # padded outfits contribute 0
    return scores, com_loss


if __name__ == "__main__":
    NO, NI, NF, NB, D = 4, 4, 2, 3, 32   # n_outfits, n_items, n_factors, n_neighbors, dim

    key = jax.random.PRNGKey(0)
    kp, kf, kn = jax.random.split(key, 3)

    params = init_params(kp, D, NF)
    items_feature = jax.random.normal(kf, (NO, NI, D), jnp.float32)
    outfit_items = jnp.array([[0, 1, 2, -1],
                              [3, 1, 0, -1],
                              [2, 2, 1, 0],
                              [1, -1, -1, -1]], dtype=jnp.int32)
    items_neighbor = jax.random.randint(kn, (NO, NI, NB), -1, NI).astype(jnp.int32)
    items_factors = jnp.zeros((NO, NI, NF, D), jnp.float32)  # overwritten inside forward

    scores, com_loss = mfgn_forward(params, outfit_items, items_feature,
                                    items_neighbor, items_factors,
                                    block_outfits=2)          # grid = (2,)
    jax.block_until_ready((scores, com_loss))
    print("KERNEL_OK")
</pallas_src>

<mosaic_0001>
module attributes {stable_mosaic.version = 11 : i64} {
  func.func @kernel(%arg0: i32, %arg1: memref<1x8x32xf32, #tpu.memory_space<vmem>>, %arg2: memref<1x2x4xi32, #tpu.memory_space<vmem>>, %arg3: memref<1x4x2x7xi32, #tpu.memory_space<vmem>>, %arg4: memref<2x32x16xbf16, #tpu.memory_space<vmem>>, %arg5: memref<2x1x16xf32, #tpu.memory_space<vmem>>, %arg6: memref<2x16x32xbf16, #tpu.memory_space<vmem>>, %arg7: memref<2x1x32xf32, #tpu.memory_space<vmem>>, %arg8: memref<3x32x32xbf16, #tpu.memory_space<vmem>>, %arg9: memref<3x1x32xf32, #tpu.memory_space<vmem>>, %arg10: memref<3x32x32xbf16, #tpu.memory_space<vmem>>, %arg11: memref<3x1x32xf32, #tpu.memory_space<vmem>>, %arg12: memref<1x32xf32, #tpu.memory_space<vmem>>, %arg13: memref<1x1xf32, #tpu.memory_space<vmem>>, %arg14: memref<1x2x128xf32, #tpu.memory_space<vmem>>) attributes {dimension_semantics = [#tpu.dimension_semantics<parallel>], iteration_bounds = array<i64: 2>, scalar_prefetch = 0 : i64, scratch_operands = 0 : i64, tpu.core_type = #tpu.core_type<tc>, window_params = [{transform_indices = @transform_0, window_bounds = array<i64: 1, 8, 32>}, {transform_indices = @transform_1, window_bounds = array<i64: 1, 2, 4>}, {transform_indices = @transform_2, window_bounds = array<i64: 1, 4, 2, 7>}, {pipeline_mode = #tpu.pipeline_mode<synchronous>, transform_indices = @transform_3, window_bounds = array<i64: 2, 32, 16>}, {pipeline_mode = #tpu.pipeline_mode<synchronous>, transform_indices = @transform_4, window_bounds = array<i64: 2, 1, 16>}, {pipeline_mode = #tpu.pipeline_mode<synchronous>, transform_indices = @transform_5, window_bounds = array<i64: 2, 16, 32>}, {pipeline_mode = #tpu.pipeline_mode<synchronous>, transform_indices = @transform_6, window_bounds = array<i64: 2, 1, 32>}, {pipeline_mode = #tpu.pipeline_mode<synchronous>, transform_indices = @transform_7, window_bounds = array<i64: 3, 32, 32>}, {pipeline_mode = #tpu.pipeline_mode<synchronous>, transform_indices = @transform_8, window_bounds = array<i64: 3, 1, 32>}, {pipeline_mode = #tpu.pipeline_mode<synchronous>, transform_indices = @transform_9, window_bounds = array<i64: 3, 32, 32>}, {pipeline_mode = #tpu.pipeline_mode<synchronous>, transform_indices = @transform_10, window_bounds = array<i64: 3, 1, 32>}, {pipeline_mode = #tpu.pipeline_mode<synchronous>, transform_indices = @transform_11, window_bounds = array<i64: 1, 32>}, {pipeline_mode = #tpu.pipeline_mode<synchronous>, transform_indices = @transform_12, window_bounds = array<i64: 1, 1>}, {transform_indices = @transform_13, window_bounds = array<i64: 1, 2, 128>}]} {
    %c0 = arith.constant 0 : index
    %c0_0 = arith.constant 0 : index
    %c0_1 = arith.constant 0 : index
    %0 = vector.load %arg1[%c0, %c0_0, %c0_1] : memref<1x8x32xf32, #tpu.memory_space<vmem>>, vector<1x8x32xf32>
    %1 = vector.shape_cast %0 : vector<1x8x32xf32> to vector<8x32xf32>
    %c0_2 = arith.constant 0 : index
    %c0_3 = arith.constant 0 : index
    %c0_4 = arith.constant 0 : index
    %2 = vector.load %arg2[%c0_2, %c0_3, %c0_4] : memref<1x2x4xi32, #tpu.memory_space<vmem>>, vector<1x2x4xi32>
    %3 = vector.shape_cast %2 : vector<1x2x4xi32> to vector<2x4xi32>
    %c0_5 = arith.constant 0 : index
    %c0_6 = arith.constant 0 : index
    %c0_7 = arith.constant 0 : index
    %c0_8 = arith.constant 0 : index
    %4 = vector.load %arg3[%c0_5, %c0_6, %c0_7, %c0_8] : memref<1x4x2x7xi32, #tpu.memory_space<vmem>>, vector<1x4x2x7xi32>
    %5 = vector.shape_cast %4 : vector<1x4x2x7xi32> to vector<4x2x7xi32>
    %c0_9 = arith.constant 0 : index
    %c0_10 = arith.constant 0 : index
    %c0_11 = arith.constant 0 : index
    %6 = vector.load %arg8[%c0_9, %c0_10, %c0_11] : memref<3x32x32xbf16, #tpu.memory_space<vmem>>, vector<1x32x32xbf16>
    %7 = vector.shape_cast %6 : vector<1x32x32xbf16> to vector<32x32xbf16>
    %c0_12 = arith.constant 0 : index
    %c0_13 = arith.constant 0 : index
    %c0_14 = arith.constant 0 : index
    %8 = vector.load %arg9[%c0_12, %c0_13, %c0_14] : memref<3x1x32xf32, #tpu.memory_space<vmem>>, vector<1x1x32xf32>
    %9 = vector.shape_cast %8 : vector<1x1x32xf32> to vector<1x32xf32>
    %c0_15 = arith.constant 0 : index
    %c0_16 = arith.constant 0 : index
    %c0_17 = arith.constant 0 : index
    %10 = vector.load %arg10[%c0_15, %c0_16, %c0_17] : memref<3x32x32xbf16, #tpu.memory_space<vmem>>, vector<1x32x32xbf16>
    %11 = vector.shape_cast %10 : vector<1x32x32xbf16> to vector<32x32xbf16>
    %c0_18 = arith.constant 0 : index
    %c0_19 = arith.constant 0 : index
    %c0_20 = arith.constant 0 : index
    %12 = vector.load %arg11[%c0_18, %c0_19, %c0_20] : memref<3x1x32xf32, #tpu.memory_space<vmem>>, vector<1x1x32xf32>
    %13 = vector.shape_cast %12 : vector<1x1x32xf32> to vector<1x32xf32>
    %c1 = arith.constant 1 : index
    %c0_21 = arith.constant 0 : index
    %c0_22 = arith.constant 0 : index
    %14 = vector.load %arg8[%c1, %c0_21, %c0_22] : memref<3x32x32xbf16, #tpu.memory_space<vmem>>, vector<1x32x32xbf16>
    %15 = vector.shape_cast %14 : vector<1x32x32xbf16> to vector<32x32xbf16>
    %c1_23 = arith.constant 1 : index
    %c0_24 = arith.constant 0 : index
    %c0_25 = arith.constant 0 : index
    %16 = vector.load %arg9[%c1_23, %c0_24, %c0_25] : memref<3x1x32xf32, #tpu.memory_space<vmem>>, vector<1x1x32xf32>
    %17 = vector.shape_cast %16 : vector<1x1x32xf32> to vector<1x32xf32>
    %c1_26 = arith.constant 1 : index
    %c0_27 = arith.constant 0 : index
    %c0_28 = arith.constant 0 : index
    %18 = vector.load %arg10[%c1_26, %c0_27, %c0_28] : memref<3x32x32xbf16, #tpu.memory_space<vmem>>, vector<1x32x32xbf16>
    %19 = vector.shape_cast %18 : vector<1x32x32xbf16> to vector<32x32xbf16>
    %c1_29 = arith.constant 1 : index
    %c0_30 = arith.constant 0 : index
    %c0_31 = arith.constant 0 : index
    %20 = vector.load %arg11[%c1_29, %c0_30, %c0_31] : memref<3x1x32xf32, #tpu.memory_space<vmem>>, vector<1x1x32xf32>
    %21 = vector.shape_cast %20 : vector<1x1x32xf32> to vector<1x32xf32>
    %c2 = arith.constant 2 : index
    %c0_32 = arith.constant 0 : index
    %c0_33 = arith.constant 0 : index
    %22 = vector.load %arg8[%c2, %c0_32, %c0_33] : memref<3x32x32xbf16, #tpu.memory_space<vmem>>, vector<1x32x32xbf16>
    %23 = vector.shape_cast %22 : vector<1x32x32xbf16> to vector<32x32xbf16>
    %c2_34 = arith.constant 2 : index
    %c0_35 = arith.constant 0 : index
    %c0_36 = arith.constant 0 : index
    %24 = vector.load %arg9[%c2_34, %c0_35, %c0_36] : memref<3x1x32xf32, #tpu.memory_space<vmem>>, vector<1x1x32xf32>
    %25 = vector.shape_cast %24 : vector<1x1x32xf32> to vector<1x32xf32>
    %c2_37 = arith.constant 2 : index
    %c0_38 = arith.constant 0 : index
    %c0_39 = arith.constant 0 : index
    %26 = vector.load %arg10[%c2_37, %c0_38, %c0_39] : memref<3x32x32xbf16, #tpu.memory_space<vmem>>, vector<1x32x32xbf16>
    %27 = vector.shape_cast %26 : vector<1x32x32xbf16> to vector<32x32xbf16>
    %c2_40 = arith.constant 2 : index
    %c0_41 = arith.constant 0 : index
    %c0_42 = arith.constant 0 : index
    %28 = vector.load %arg11[%c2_40, %c0_41, %c0_42] : memref<3x1x32xf32, #tpu.memory_space<vmem>>, vector<1x1x32xf32>
    %29 = vector.shape_cast %28 : vector<1x1x32xf32> to vector<1x32xf32>
    %30 = tpu.iota {dimensions = array<i32: 1>} : vector<2x4xi32>
    %31 = tpu.iota {dimensions = array<i32: 2>} : vector<2x7x4xi32>
    %c-1_i32 = arith.constant -1 : i32
    %32 = vector.broadcast %c-1_i32 : i32 to vector<2x4xi32>
    %33 = arith.cmpi ne, %3, %32 : vector<2x4xi32>
    %34 = arith.extui %33 : vector<2x4xi1> to vector<2x4xi32>
    %35 = arith.sitofp %34 : vector<2x4xi32> to vector<2x4xf32>
    %36 = arith.truncf %1 : vector<8x32xf32> to vector<8x32xbf16>
    %c0_43 = arith.constant 0 : index
    %c0_44 = arith.constant 0 : index
    %c0_45 = arith.constant 0 : index
    %37 = vector.load %arg4[%c0_43, %c0_44, %c0_45] : memref<2x32x16xbf16, #tpu.memory_space<vmem>>, vector<1x32x16xbf16>
    %38 = vector.shape_cast %37 : vector<1x32x16xbf16> to vector<32x16xbf16>
    %cst = arith.constant dense<0.000000e+00> : vector<8x16xf32>
    %39 = tpu.matmul %36, %38, %cst {dimension_numbers = #tpu.dot_dimension_numbers<[1], [0], [0], [1], [0, 0, 1, 1], [], []>} : vector<8x32xbf16>, vector<32x16xbf16>, vector<8x16xf32> -> vector<8x16xf32>
    %c0_46 = arith.constant 0 : index
    %c0_47 = arith.constant 0 : index
    %c0_48 = arith.constant 0 : index
    %40 = vector.load %arg5[%c0_46, %c0_47, %c0_48] : memref<2x1x16xf32, #tpu.memory_space<vmem>>, vector<1x1x16xf32>
    %41 = vector.shape_cast %40 : vector<1x1x16xf32> to vector<1x16xf32>
    %42 = vector.broadcast %41 : vector<1x16xf32> to vector<8x16xf32>
    %43 = arith.addf %39, %42 : vector<8x16xf32>
    %cst_49 = arith.constant 0.000000e+00 : f32
    %44 = vector.broadcast %cst_49 : f32 to vector<8x16xf32>
    %45 = arith.cmpf ogt, %43, %44 : vector<8x16xf32>
    %cst_50 = arith.constant 0.00999999977 : f32
    %46 = vector.broadcast %cst_50 : f32 to vector<8x16xf32>
    %47 = arith.mulf %46, %43 : vector<8x16xf32>
    %48 = arith.select %45, %43, %47 : vector<8x16xi1>, vector<8x16xf32>
    %49 = arith.truncf %48 : vector<8x16xf32> to vector<8x16xbf16>
    %c0_51 = arith.constant 0 : index
    %c0_52 = arith.constant 0 : index
    %c0_53 = arith.constant 0 : index
    %50 = vector.load %arg6[%c0_51, %c0_52, %c0_53] : memref<2x16x32xbf16, #tpu.memory_space<vmem>>, vector<1x16x32xbf16>
    %51 = vector.shape_cast %50 : vector<1x16x32xbf16> to vector<16x32xbf16>
    %cst_54 = arith.constant dense<0.000000e+00> : vector<8x32xf32>
    %52 = tpu.matmul %49, %51, %cst_54 {dimension_numbers = #tpu.dot_dimension_numbers<[1], [0], [0], [1], [0, 0, 1, 1], [], []>} : vector<8x16xbf16>, vector<16x32xbf16>, vector<8x32xf32> -> vector<8x32xf32>
    %c0_55 = arith.constant 0 : index
    %c0_56 = arith.constant 0 : index
    %c0_57 = arith.constant 0 : index
    %53 = vector.load %arg7[%c0_55, %c0_56, %c0_57] : memref<2x1x32xf32, #tpu.memory_space<vmem>>, vector<1x1x32xf32>
    %54 = vector.shape_cast %53 : vector<1x1x32xf32> to vector<1x32xf32>
    %55 = vector.broadcast %54 : vector<1x32xf32> to vector<8x32xf32>
    %56 = arith.addf %52, %55 : vector<8x32xf32>
    %cst_58 = arith.constant 0.000000e+00 : f32
    %57 = vector.broadcast %cst_58 : f32 to vector<8x32xf32>
    %58 = arith.cmpf ogt, %56, %57 : vector<8x32xf32>
    %cst_59 = arith.constant 0.00999999977 : f32
    %59 = vector.broadcast %cst_59 : f32 to vector<8x32xf32>
    %60 = arith.mulf %59, %56 : vector<8x32xf32>
    %61 = arith.select %58, %56, %60 : vector<8x32xi1>, vector<8x32xf32>
    %62 = vector.shape_cast %61 : vector<8x32xf32> to vector<2x4x32xf32>
    %c1_60 = arith.constant 1 : index
    %c0_61 = arith.constant 0 : index
    %c0_62 = arith.constant 0 : index
    %63 = vector.load %arg4[%c1_60, %c0_61, %c0_62] : memref<2x32x16xbf16, #tpu.memory_space<vmem>>, vector<1x32x16xbf16>
    %64 = vector.shape_cast %63 : vector<1x32x16xbf16> to vector<32x16xbf16>
    %cst_63 = arith.constant dense<0.000000e+00> : vector<8x16xf32>
    %65 = tpu.matmul %36, %64, %cst_63 {dimension_numbers = #tpu.dot_dimension_numbers<[1], [0], [0], [1], [0, 0, 1, 1], [], []>} : vector<8x32xbf16>, vector<32x16xbf16>, vector<8x16xf32> -> vector<8x16xf32>
    %c1_64 = arith.constant 1 : index
    %c0_65 = arith.constant 0 : index
    %c0_66 = arith.constant 0 : index
    %66 = vector.load %arg5[%c1_64, %c0_65, %c0_66] : memref<2x1x16xf32, #tpu.memory_space<vmem>>, vector<1x1x16xf32>
    %67 = vector.shape_cast %66 : vector<1x1x16xf32> to vector<1x16xf32>
    %68 = vector.broadcast %67 : vector<1x16xf32> to vector<8x16xf32>
    %69 = arith.addf %65, %68 : vector<8x16xf32>
    %cst_67 = arith.constant 0.000000e+00 : f32
    %70 = vector.broadcast %cst_67 : f32 to vector<8x16xf32>
    %71 = arith.cmpf ogt, %69, %70 : vector<8x16xf32>
    %cst_68 = arith.constant 0.00999999977 : f32
    %72 = vector.broadcast %cst_68 : f32 to vector<8x16xf32>
    %73 = arith.mulf %72, %69 : vector<8x16xf32>
    %74 = arith.select %71, %69, %73 : vector<8x16xi1>, vector<8x16xf32>
    %75 = arith.truncf %74 : vector<8x16xf32> to vector<8x16xbf16>
    %c1_69 = arith.constant 1 : index
    %c0_70 = arith.constant 0 : index
    %c0_71 = arith.constant 0 : index
    %76 = vector.load %arg6[%c1_69, %c0_70, %c0_71] : memref<2x16x32xbf16, #tpu.memory_space<vmem>>, vector<1x16x32xbf16>
    %77 = vector.shape_cast %76 : vector<1x16x32xbf16> to vector<16x32xbf16>
    %cst_72 = arith.constant dense<0.000000e+00> : vector<8x32xf32>
    %78 = tpu.matmul %75, %77, %cst_72 {dimension_numbers = #tpu.dot_dimension_numbers<[1], [0], [0], [1], [0, 0, 1, 1], [], []>} : vector<8x16xbf16>, vector<16x32xbf16>, vector<8x32xf32> -> vector<8x32xf32>
    %c1_73 = arith.constant 1 : index
    %c0_74 = arith.constant 0 : index
    %c0_75 = arith.constant 0 : index
    %79 = vector.load %arg7[%c1_73, %c0_74, %c0_75] : memref<2x1x32xf32, #tpu.memory_space<vmem>>, vector<1x1x32xf32>
    %80 = vector.shape_cast %79 : vector<1x1x32xf32> to vector<1x32xf32>
    %81 = vector.broadcast %80 : vector<1x32xf32> to vector<8x32xf32>
    %82 = arith.addf %78, %81 : vector<8x32xf32>
    %cst_76 = arith.constant 0.000000e+00 : f32
    %83 = vector.broadcast %cst_76 : f32 to vector<8x32xf32>
    %84 = arith.cmpf ogt, %82, %83 : vector<8x32xf32>
    %cst_77 = arith.constant 0.00999999977 : f32
    %85 = vector.broadcast %cst_77 : f32 to vector<8x32xf32>
    %86 = arith.mulf %85, %82 : vector<8x32xf32>
    %87 = arith.select %84, %82, %86 : vector<8x32xi1>, vector<8x32xf32>
    %88 = vector.shape_cast %87 : vector<8x32xf32> to vector<2x4x32xf32>
    %cst_78 = arith.constant 0.000000e+00 : f32
    %89 = vector.broadcast %cst_78 : f32 to vector<2x4xf32>
    %90 = vector.extract_strided_slice %3 {offsets = [0, 0], sizes = [2, 1], strides = [1, 1]} : vector<2x4xi32> to vector<2x1xi32>
    %c-1_i32_79 = arith.constant -1 : i32
    %91 = vector.broadcast %c-1_i32_79 : i32 to vector<2x1xi32>
    %92 = arith.cmpi ne, %90, %91 : vector<2x1xi32>
    %93 = vector.broadcast %90 : vector<2x1xi32> to vector<2x4xi32>
    %94 = arith.cmpi eq, %93, %30 : vector<2x4xi32>
    %95 = vector.broadcast %92 : vector<2x1xi1> to vector<2x4xi1>
    %96 = arith.andi %94, %95 : vector<2x4xi1>
    %97 = arith.extui %96 : vector<2x4xi1> to vector<2x4xi32>
    %98 = arith.sitofp %97 : vector<2x4xi32> to vector<2x4xf32>
    %99 = vector.extract_strided_slice %5 {offsets = [0, 0, 0], sizes = [1, 2, 7], strides = [1, 1, 1]} : vector<4x2x7xi32> to vector<1x2x7xi32>
    %100 = vector.shape_cast %99 : vector<1x2x7xi32> to vector<2x7xi32>
    %c-1_i32_80 = arith.constant -1 : i32
    %101 = vector.broadcast %c-1_i32_80 : i32 to vector<2x7xi32>
    %102 = arith.cmpi ne, %100, %101 : vector<2x7xi32>
    %103 = vector.broadcast %90 : vector<2x1xi32> to vector<2x7xi32>
    %104 = arith.cmpi ne, %100, %103 : vector<2x7xi32>
    %105 = arith.andi %102, %104 : vector<2x7xi1>
    %106 = vector.broadcast %92 : vector<2x1xi1> to vector<2x7xi1>
    %107 = arith.andi %105, %106 : vector<2x7xi1>
    %108 = arith.extui %107 : vector<2x7xi1> to vector<2x7xi32>
    %109 = arith.sitofp %108 : vector<2x7xi32> to vector<2x7xf32>
    %110 = vector.shape_cast %100 : vector<2x7xi32> to vector<2x7x1xi32>
    %111 = vector.broadcast %110 : vector<2x7x1xi32> to vector<2x7x4xi32>
    %112 = arith.cmpi eq, %111, %31 : vector<2x7x4xi32>
    %113 = arith.extui %112 : vector<2x7x4xi1> to vector<2x7x4xi32>
    %114 = arith.sitofp %113 : vector<2x7x4xi32> to vector<2x7x4xf32>
    %115 = vector.shape_cast %109 : vector<2x7xf32> to vector<2x7x1xf32>
    %116 = vector.broadcast %115 : vector<2x7x1xf32> to vector<2x7x4xf32>
    %117 = arith.mulf %114, %116 : vector<2x7x4xf32>
    %118 = vector.extract_strided_slice %98 {offsets = [0, 0], sizes = [2, 1], strides = [1, 1]} : vector<2x4xf32> to vector<2x1xf32>
    %119 = vector.extract_strided_slice %62 {offsets = [0, 0, 0], sizes = [2, 1, 32], strides = [1, 1, 1]} : vector<2x4x32xf32> to vector<2x1x32xf32>
    %120 = vector.shape_cast %119 : vector<2x1x32xf32> to vector<2x32xf32>
    %121 = vector.broadcast %118 : vector<2x1xf32> to vector<2x32xf32>
    %122 = arith.mulf %121, %120 : vector<2x32xf32>
    %123 = vector.extract_strided_slice %98 {offsets = [0, 1], sizes = [2, 1], strides = [1, 1]} : vector<2x4xf32> to vector<2x1xf32>
    %124 = vector.extract_strided_slice %62 {offsets = [0, 1, 0], sizes = [2, 1, 32], strides = [1, 1, 1]} : vector<2x4x32xf32> to vector<2x1x32xf32>
    %125 = vector.shape_cast %124 : vector<2x1x32xf32> to vector<2x32xf32>
    %126 = vector.broadcast %123 : vector<2x1xf32> to vector<2x32xf32>
    %127 = arith.mulf %126, %125 : vector<2x32xf32>
    %128 = arith.addf %122, %127 : vector<2x32xf32>
    %129 = vector.extract_strided_slice %98 {offsets = [0, 2], sizes = [2, 1], strides = [1, 1]} : vector<2x4xf32> to vector<2x1xf32>
    %130 = vector.extract_strided_slice %62 {offsets = [0, 2, 0], sizes = [2, 1, 32], strides = [1, 1, 1]} : vector<2x4x32xf32> to vector<2x1x32xf32>
    %131 = vector.shape_cast %130 : vector<2x1x32xf32> to vector<2x32xf32>
    %132 = vector.broadcast %129 : vector<2x1xf32> to vector<2x32xf32>
    %133 = arith.mulf %132, %131 : vector<2x32xf32>
    %134 = arith.addf %128, %133 : vector<2x32xf32>
    %135 = vector.extract_strided_slice %98 {offsets = [0, 3], sizes = [2, 1], strides = [1, 1]} : vector<2x4xf32> to vector<2x1xf32>
    %136 = vector.extract_strided_slice %62 {offsets = [0, 3, 0], sizes = [2, 1, 32], strides = [1, 1, 1]} : vector<2x4x32xf32> to vector<2x1x32xf32>
    %137 = vector.shape_cast %136 : vector<2x1x32xf32> to vector<2x32xf32>
    %138 = vector.broadcast %135 : vector<2x1xf32> to vector<2x32xf32>
    %139 = arith.mulf %138, %137 : vector<2x32xf32>
    %140 = arith.addf %134, %139 : vector<2x32xf32>
    %141 = vector.extract_strided_slice %117 {offsets = [0, 0, 0], sizes = [2, 7, 1], strides = [1, 1, 1]} : vector<2x7x4xf32> to vector<2x7x1xf32>
    %142 = vector.extract_strided_slice %62 {offsets = [0, 0, 0], sizes = [2, 1, 32], strides = [1, 1, 1]} : vector<2x4x32xf32> to vector<2x1x32xf32>
    %143 = vector.broadcast %141 : vector<2x7x1xf32> to vector<2x7x32xf32>
    %144 = vector.broadcast %142 : vector<2x1x32xf32> to vector<2x7x32xf32>
    %145 = arith.mulf %143, %144 : vector<2x7x32xf32>
    %146 = vector.extract_strided_slice %117 {offsets = [0, 0, 1], sizes = [2, 7, 1], strides = [1, 1, 1]} : vector<2x7x4xf32> to vector<2x7x1xf32>
    %147 = vector.extract_strided_slice %62 {offsets = [0, 1, 0], sizes = [2, 1, 32], strides = [1, 1, 1]} : vector<2x4x32xf32> to vector<2x1x32xf32>
    %148 = vector.broadcast %146 : vector<2x7x1xf32> to vector<2x7x32xf32>
    %149 = vector.broadcast %147 : vector<2x1x32xf32> to vector<2x7x32xf32>
    %150 = arith.mulf %148, %149 : vector<2x7x32xf32>
    %151 = arith.addf %145, %150 : vector<2x7x32xf32>
    %152 = vector.extract_strided_slice %117 {offsets = [0, 0, 2], sizes = [2, 7, 1], strides = [1, 1, 1]} : vector<2x7x4xf32> to vector<2x7x1xf32>
    %153 = vector.extract_strided_slice %62 {offsets = [0, 2, 0], sizes = [2, 1, 32], strides = [1, 1, 1]} : vector<2x4x32xf32> to vector<2x1x32xf32>
    %154 = vector.broadcast %152 : vector<2x7x1xf32> to vector<2x7x32xf32>
    %155 = vector.broadcast %153 : vector<2x1x32xf32> to vector<2x7x32xf32>
    %156 = arith.mulf %154, %155 : vector<2x7x32xf32>
    %157 = arith.addf %151, %156 : vector<2x7x32xf32>
    %158 = vector.extract_strided_slice %117 {offsets = [0, 0, 3], sizes = [2, 7, 1], strides = [1, 1, 1]} : vector<2x7x4xf32> to vector<2x7x1xf32>
    %159 = vector.extract_strided_slice %62 {offsets = [0, 3, 0], sizes = [2, 1, 32], strides = [1, 1, 1]} : vector<2x4x32xf32> to vector<2x1x32xf32>
    %160 = vector.broadcast %158 : vector<2x7x1xf32> to vector<2x7x32xf32>
    %161 = vector.broadcast %159 : vector<2x1x32xf32> to vector<2x7x32xf32>
    %162 = arith.mulf %160, %161 : vector<2x7x32xf32>
    %163 = arith.addf %157, %162 : vector<2x7x32xf32>
    %164 = vector.shape_cast %140 : vector<2x32xf32> to vector<2x1x32xf32>
    %165 = vector.broadcast %164 : vector<2x1x32xf32> to vector<2x7x32xf32>
    %166 = arith.mulf %165, %163 : vector<2x7x32xf32>
    %167 = vector.shape_cast %166 : vector<2x7x32xf32> to vector<14x32xf32>
    %168 = vector.extract_strided_slice %98 {offsets = [0, 0], sizes = [2, 1], strides = [1, 1]} : vector<2x4xf32> to vector<2x1xf32>
    %169 = vector.extract_strided_slice %88 {offsets = [0, 0, 0], sizes = [2, 1, 32], strides = [1, 1, 1]} : vector<2x4x32xf32> to vector<2x1x32xf32>
    %170 = vector.shape_cast %169 : vector<2x1x32xf32> to vector<2x32xf32>
    %171 = vector.broadcast %168 : vector<2x1xf32> to vector<2x32xf32>
    %172 = arith.mulf %171, %170 : vector<2x32xf32>
    %173 = vector.extract_strided_slice %98 {offsets = [0, 1], sizes = [2, 1], strides = [1, 1]} : vector<2x4xf32> to vector<2x1xf32>
    %174 = vector.extract_strided_slice %88 {offsets = [0, 1, 0], sizes = [2, 1, 32], strides = [1, 1, 1]} : vector<2x4x32xf32> to vector<2x1x32xf32>
    %175 = vector.shape_cast %174 : vector<2x1x32xf32> to vector<2x32xf32>
    %176 = vector.broadcast %173 : vector<2x1xf32> to vector<2x32xf32>
    %177 = arith.mulf %176, %175 : vector<2x32xf32>
    %178 = arith.addf %172, %177 : vector<2x32xf32>
    %179 = vector.extract_strided_slice %98 {offsets = [0, 2], sizes = [2, 1], strides = [1, 1]} : vector<2x4xf32> to vector<2x1xf32>
    %180 = vector.extract_strided_slice %88 {offsets = [0, 2, 0], sizes = [2, 1, 32], strides = [1, 1, 1]} : vector<2x4x32xf32> to vector<2x1x32xf32>
    %181 = vector.shape_cast %180 : vector<2x1x32xf32> to vector<2x32xf32>
    %182 = vector.broadcast %179 : vector<2x1xf32> to vector<2x32xf32>
    %183 = arith.mulf %182, %181 : vector<2x32xf32>
    %184 = arith.addf %178, %183 : vector<2x32xf32>
    %185 = vector.extract_strided_slice %98 {offsets = [0, 3], sizes = [2, 1], strides = [1, 1]} : vector<2x4xf32> to vector<2x1xf32>
    %186 = vector.extract_strided_slice %88 {offsets = [0, 3, 0], sizes = [2, 1, 32], strides = [1, 1, 1]} : vector<2x4x32xf32> to vector<2x1x32xf32>
    %187 = vector.shape_cast %186 : vector<2x1x32xf32> to vector<2x32xf32>
    %188 = vector.broadcast %185 : vector<2x1xf32> to vector<2x32xf32>
    %189 = arith.mulf %188, %187 : vector<2x32xf32>
    %190 = arith.addf %184, %189 : vector<2x32xf32>
    %191 = vector.extract_strided_slice %117 {offsets = [0, 0, 0], sizes = [2, 7, 1], strides = [1, 1, 1]} : vector<2x7x4xf32> to vector<2x7x1xf32>
    %192 = vector.extract_strided_slice %88 {offsets = [0, 0, 0], sizes = [2, 1, 32], strides = [1, 1, 1]} : vector<2x4x32xf32> to vector<2x1x32xf32>
    %193 = vector.broadcast %191 : vector<2x7x1xf32> to vector<2x7x32xf32>
    %194 = vector.broadcast %192 : vector<2x1x32xf32> to vector<2x7x32xf32>
    %195 = arith.mulf %193, %194 : vector<2x7x32xf32>
    %196 = vector.extract_strided_slice %117 {offsets = [0, 0, 1], sizes = [2, 7, 1], strides = [1, 1, 1]} : vector<2x7x4xf32> to vector<2x7x1xf32>
    %197 = vector.extract_strided_slice %88 {offsets = [0, 1, 0], sizes = [2, 1, 32], strides = [1, 1, 1]} : vector<2x4x32xf32> to vector<2x1x32xf32>
    %198 = vector.broadcast %196 : vector<2x7x1xf32> to vector<2x7x32xf32>
    %199 = vector.broadcast %197 : vector<2x1x32xf32> to vector<2x7x32xf32>
    %200 = arith.mulf %198, %199 : vector<2x7x32xf32>
    %201 = arith.addf %195, %200 : vector<2x7x32xf32>
    %202 = vector.extract_strided_slice %117 {offsets = [0, 0, 2], sizes = [2, 7, 1], strides = [1, 1, 1]} : vector<2x7x4xf32> to vector<2x7x1xf32>
    %203 = vector.extract_strided_slice %88 {offsets = [0, 2, 0], sizes = [2, 1, 32], strides = [1, 1, 1]} : vector<2x4x32xf32> to vector<2x1x32xf32>
    %204 = vector.broadcast %202 : vector<2x7x1xf32> to vector<2x7x32xf32>
    %205 = vector.broadcast %203 : vector<2x1x32xf32> to vector<2x7x32xf32>
    %206 = arith.mulf %204, %205 : vector<2x7x32xf32>
    %207 = arith.addf %201, %206 : vector<2x7x32xf32>
    %208 = vector.extract_strided_slice %117 {offsets = [0, 0, 3], sizes = [2, 7, 1], strides = [1, 1, 1]} : vector<2x7x4xf32> to vector<2x7x1xf32>
    %209 = vector.extract_strided_slice %88 {offsets = [0, 3, 0], sizes = [2, 1, 32], strides = [1, 1, 1]} : vector<2x4x32xf32> to vector<2x1x32xf32>
    %210 = vector.broadcast %208 : vector<2x7x1xf32> to vector<2x7x32xf32>
    %211 = vector.broadcast %209 : vector<2x1x32xf32> to vector<2x7x32xf32>
    %212 = arith.mulf %210, %211 : vector<2x7x32xf32>
    %213 = arith.addf %207, %212 : vector<2x7x32xf32>
    %214 = vector.shape_cast %190 : vector<2x32xf32> to vector<2x1x32xf32>
    %215 = vector.broadcast %214 : vector<2x1x32xf32> to vector<2x7x32xf32>
    %216 = arith.mulf %215, %213 : vector<2x7x32xf32>
    %217 = vector.shape_cast %216 : vector<2x7x32xf32> to vector<14x32xf32>
    %218 = tpu.concatenate %167, %217 in 0 : vector<14x32xf32>, vector<14x32xf32> -> vector<28x32xf32>
    %219 = arith.truncf %218 : vector<28x32xf32> to vector<28x32xbf16>
    %cst_81 = arith.constant dense<0.000000e+00> : vector<28x32xf32>
    %220 = tpu.matmul %219, %7, %cst_81 {dimension_numbers = #tpu.dot_dimension_numbers<[1], [0], [0], [1], [0, 0, 1, 1], [], []>} : vector<28x32xbf16>, vector<32x32xbf16>, vector<28x32xf32> -> vector<28x32xf32>
    %221 = vector.broadcast %9 : vector<1x32xf32> to vector<28x32xf32>
    %222 = arith.addf %220, %221 : vector<28x32xf32>
    %cst_82 = arith.constant 0.000000e+00 : f32
    %223 = vector.broadcast %cst_82 : f32 to vector<28x32xf32>
    %224 = arith.cmpf ogt, %222, %223 : vector<28x32xf32>
    %cst_83 = arith.constant 0.00999999977 : f32
    %225 = vector.broadcast %cst_83 : f32 to vector<28x32xf32>
    %226 = arith.mulf %225, %222 : vector<28x32xf32>
    %227 = arith.select %224, %222, %226 : vector<28x32xi1>, vector<28x32xf32>
    %228 = arith.truncf %227 : vector<28x32xf32> to vector<28x32xbf16>
    %cst_84 = arith.constant dense<0.000000e+00> : vector<28x32xf32>
    %229 = tpu.matmul %228, %11, %cst_84 {dimension_numbers = #tpu.dot_dimension_numbers<[1], [0], [0], [1], [0, 0, 1, 1], [], []>} : vector<28x32xbf16>, vector<32x32xbf16>, vector<28x32xf32> -> vector<28x32xf32>
    %230 = vector.broadcast %13 : vector<1x32xf32> to vector<28x32xf32>
    %231 = arith.addf %229, %230 : vector<28x32xf32>
    %cst_85 = arith.constant 0.000000e+00 : f32
    %232 = vector.broadcast %cst_85 : f32 to vector<28x32xf32>
    %233 = arith.cmpf ogt, %231, %232 : vector<28x32xf32>
    %cst_86 = arith.constant 0.00999999977 : f32
    %234 = vector.broadcast %cst_86 : f32 to vector<28x32xf32>
    %235 = arith.mulf %234, %231 : vector<28x32xf32>
    %236 = arith.select %233, %231, %235 : vector<28x32xi1>, vector<28x32xf32>
    %237 = vector.extract_strided_slice %236 {offsets = [0, 0], sizes = [14, 32], strides = [1, 1]} : vector<28x32xf32> to vector<14x32xf32>
    %238 = vector.shape_cast %237 : vector<14x32xf32> to vector<2x7x32xf32>
    %239 = vector.extract_strided_slice %109 {offsets = [0, 0], sizes = [2, 1], strides = [1, 1]} : vector<2x7xf32> to vector<2x1xf32>
    %240 = vector.extract_strided_slice %238 {offsets = [0, 0, 0], sizes = [2, 1, 32], strides = [1, 1, 1]} : vector<2x7x32xf32> to vector<2x1x32xf32>
    %241 = vector.shape_cast %240 : vector<2x1x32xf32> to vector<2x32xf32>
    %242 = vector.broadcast %239 : vector<2x1xf32> to vector<2x32xf32>
    %243 = arith.mulf %242, %241 : vector<2x32xf32>
    %244 = vector.extract_strided_slice %109 {offsets = [0, 1], sizes = [2, 1], strides = [1, 1]} : vector<2x7xf32> to vector<2x1xf32>
    %245 = vector.extract_strided_slice %238 {offsets = [0, 1, 0], sizes = [2, 1, 32], strides = [1, 1, 1]} : vector<2x7x32xf32> to vector<2x1x32xf32>
    %246 = vector.shape_cast %245 : vector<2x1x32xf32> to vector<2x32xf32>
    %247 = vector.broadcast %244 : vector<2x1xf32> to vector<2x32xf32>
    %248 = arith.mulf %247, %246 : vector<2x32xf32>
    %249 = arith.addf %243, %248 : vector<2x32xf32>
    %250 = vector.extract_strided_slice %109 {offsets = [0, 2], sizes = [2, 1], strides = [1, 1]} : vector<2x7xf32> to vector<2x1xf32>
    %251 = vector.extract_strided_slice %238 {offsets = [0, 2, 0], sizes = [2, 1, 32], strides = [1, 1, 1]} : vector<2x7x32xf32> to vector<2x1x32xf32>
    %252 = vector.shape_cast %251 : vector<2x1x32xf32> to vector<2x32xf32>
    %253 = vector.broadcast %250 : vector<2x1xf32> to vector<2x32xf32>
    %254 = arith.mulf %253, %252 : vector<2x32xf32>
    %255 = arith.addf %249, %254 : vector<2x32xf32>
    %256 = vector.extract_strided_slice %109 {offsets = [0, 3], sizes = [2, 1], strides = [1, 1]} : vector<2x7xf32> to vector<2x1xf32>
    %257 = vector.extract_strided_slice %238 {offsets = [0, 3, 0], sizes = [2, 1, 32], strides = [1, 1, 1]} : vector<2x7x32xf32> to vector<2x1x32xf32>
    %258 = vector.shape_cast %257 : vector<2x1x32xf32> to vector<2x32xf32>
    %259 = vector.broadcast %256 : vector<2x1xf32> to vector<2x32xf32>
    %260 = arith.mulf %259, %258 : vector<2x32xf32>
    %261 = arith.addf %255, %260 : vector<2x32xf32>
    %262 = vector.extract_strided_slice %109 {offsets = [0, 4], sizes = [2, 1], strides = [1, 1]} : vector<2x7xf32> to vector<2x1xf32>
    %263 = vector.extract_strided_slice %238 {offsets = [0, 4, 0], sizes = [2, 1, 32], strides = [1, 1, 1]} : vector<2x7x32xf32> to vector<2x1x32xf32>
    %264 = vector.shape_cast %263 : vector<2x1x32xf32> to vector<2x32xf32>
    %265 = vector.broadcast %262 : vector<2x1xf32> to vector<2x32xf32>
    %266 = arith.mulf %265, %264 : vector<2x32xf32>
    %267 = arith.addf %261, %266 : vector<2x32xf32>
    %268 = vector.extract_strided_slice %109 {offsets = [0, 5], sizes = [2, 1], strides = [1, 1]} : vector<2x7xf32> to vector<2x1xf32>
    %269 = vector.extract_strided_slice %238 {offsets = [0, 5, 0], sizes = [2, 1, 32], strides = [1, 1, 1]} : vector<2x7x32xf32> to vector<2x1x32xf32>
    %270 = vector.shape_cast %269 : vector<2x1x32xf32> to vector<2x32xf32>
    %271 = vector.broadcast %268 : vector<2x1xf32> to vector<2x32xf32>
    %272 = arith.mulf %271, %270 : vector<2x32xf32>
    %273 = arith.addf %267, %272 : vector<2x32xf32>
    %274 = vector.extract_strided_slice %109 {offsets = [0, 6], sizes = [2, 1], strides = [1, 1]} : vector<2x7xf32> to vector<2x1xf32>
    %275 = vector.extract_strided_slice %238 {offsets = [0, 6, 0], sizes = [2, 1, 32], strides = [1, 1, 1]} : vector<2x7x32xf32> to vector<2x1x32xf32>
    %276 = vector.shape_cast %275 : vector<2x1x32xf32> to vector<2x32xf32>
    %277 = vector.broadcast %274 : vector<2x1xf32> to vector<2x32xf32>
    %278 = arith.mulf %277, %276 : vector<2x32xf32>
    %279 = arith.addf %273, %278 : vector<2x32xf32>
    %280 = vector.shape_cast %98 : vector<2x4xf32> to vector<2x4x1xf32>
    %281 = vector.shape_cast %279 : vector<2x32xf32> to vector<2x1x32xf32>
    %282 = vector.broadcast %280 : vector<2x4x1xf32> to vector<2x4x32xf32>
    %283 = vector.broadcast %281 : vector<2x1x32xf32> to vector<2x4x32xf32>
    %284 = arith.mulf %282, %283 : vector<2x4x32xf32>
    %285 = arith.addf %62, %284 : vector<2x4x32xf32>
    %286 = vector.extract_strided_slice %236 {offsets = [14, 0], sizes = [14, 32], strides = [1, 1]} : vector<28x32xf32> to vector<14x32xf32>
    %287 = vector.shape_cast %286 : vector<14x32xf32> to vector<2x7x32xf32>
    %288 = vector.extract_strided_slice %109 {offsets = [0, 0], sizes = [2, 1], strides = [1, 1]} : vector<2x7xf32> to vector<2x1xf32>
    %289 = vector.extract_strided_slice %287 {offsets = [0, 0, 0], sizes = [2, 1, 32], strides = [1, 1, 1]} : vector<2x7x32xf32> to vector<2x1x32xf32>
    %290 = vector.shape_cast %289 : vector<2x1x32xf32> to vector<2x32xf32>
    %291 = vector.broadcast %288 : vector<2x1xf32> to vector<2x32xf32>
    %292 = arith.mulf %291, %290 : vector<2x32xf32>
    %293 = vector.extract_strided_slice %109 {offsets = [0, 1], sizes = [2, 1], strides = [1, 1]} : vector<2x7xf32> to vector<2x1xf32>
    %294 = vector.extract_strided_slice %287 {offsets = [0, 1, 0], sizes = [2, 1, 32], strides = [1, 1, 1]} : vector<2x7x32xf32> to vector<2x1x32xf32>
    %295 = vector.shape_cast %294 : vector<2x1x32xf32> to vector<2x32xf32>
    %296 = vector.broadcast %293 : vector<2x1xf32> to vector<2x32xf32>
    %297 = arith.mulf %296, %295 : vector<2x32xf32>
    %298 = arith.addf %292, %297 : vector<2x32xf32>
    %299 = vector.extract_strided_slice %109 {offsets = [0, 2], sizes = [2, 1], strides = [1, 1]} : vector<2x7xf32> to vector<2x1xf32>
    %300 = vector.extract_strided_slice %287 {offsets = [0, 2, 0], sizes = [2, 1, 32], strides = [1, 1, 1]} : vector<2x7x32xf32> to vector<2x1x32xf32>
    %301 = vector.shape_cast %300 : vector<2x1x32xf32> to vector<2x32xf32>
    %302 = vector.broadcast %299 : vector<2x1xf32> to vector<2x32xf32>
    %303 = arith.mulf %302, %301 : vector<2x32xf32>
    %304 = arith.addf %298, %303 : vector<2x32xf32>
    %305 = vector.extract_strided_slice %109 {offsets = [0, 3], sizes = [2, 1], strides = [1, 1]} : vector<2x7xf32> to vector<2x1xf32>
    %306 = vector.extract_strided_slice %287 {offsets = [0, 3, 0], sizes = [2, 1, 32], strides = [1, 1, 1]} : vector<2x7x32xf32> to vector<2x1x32xf32>
    %307 = vector.shape_cast %306 : vector<2x1x32xf32> to vector<2x32xf32>
    %308 = vector.broadcast %305 : vector<2x1xf32> to vector<2x32xf32>
    %309 = arith.mulf %308, %307 : vector<2x32xf32>
    %310 = arith.addf %304, %309 : vector<2x32xf32>
    %311 = vector.extract_strided_slice %109 {offsets = [0, 4], sizes = [2, 1], strides = [1, 1]} : vector<2x7xf32> to vector<2x1xf32>
    %312 = vector.extract_strided_slice %287 {offsets = [0, 4, 0], sizes = [2, 1, 32], strides = [1, 1, 1]} : vector<2x7x32xf32> to vector<2x1x32xf32>
    %313 = vector.shape_cast %312 : vector<2x1x32xf32> to vector<2x32xf32>
    %314 = vector.broadcast %311 : vector<2x1xf32> to vector<2x32xf32>
    %315 = arith.mulf %314, %313 : vector<2x32xf32>
    %316 = arith.addf %310, %315 : vector<2x32xf32>
    %317 = vector.extract_strided_slice %109 {offsets = [0, 5], sizes = [2, 1], strides = [1, 1]} : vector<2x7xf32> to vector<2x1xf32>
    %318 = vector.extract_strided_slice %287 {offsets = [0, 5, 0], sizes = [2, 1, 32], strides = [1, 1, 1]} : vector<2x7x32xf32> to vector<2x1x32xf32>
    %319 = vector.shape_cast %318 : vector<2x1x32xf32> to vector<2x32xf32>
    %320 = vector.broadcast %317 : vector<2x1xf32> to vector<2x32xf32>
    %321 = arith.mulf %320, %319 : vector<2x32xf32>
    %322 = arith.addf %316, %321 : vector<2x32xf32>
    %323 = vector.extract_strided_slice %109 {offsets = [0, 6], sizes = [2, 1], strides = [1, 1]} : vector<2x7xf32> to vector<2x1xf32>
    %324 = vector.extract_strided_slice %287 {offsets = [0, 6, 0], sizes = [2, 1, 32], strides = [1, 1, 1]} : vector<2x7x32xf32> to vector<2x1x32xf32>
    %325 = vector.shape_cast %324 : vector<2x1x32xf32> to vector<2x32xf32>
    %326 = vector.broadcast %323 : vector<2x1xf32> to vector<2x32xf32>
    %327 = arith.mulf %326, %325 : vector<2x32xf32>
    %328 = arith.addf %322, %327 : vector<2x32xf32>
    %329 = vector.shape_cast %98 : vector<2x4xf32> to vector<2x4x1xf32>
    %330 = vector.shape_cast %328 : vector<2x32xf32> to vector<2x1x32xf32>
    %331 = vector.broadcast %329 : vector<2x4x1xf32> to vector<2x4x32xf32>
    %332 = vector.broadcast %330 : vector<2x1x32xf32> to vector<2x4x32xf32>
    %333 = arith.mulf %331, %332 : vector<2x4x32xf32>
    %334 = arith.addf %88, %333 : vector<2x4x32xf32>
    %335 = arith.extui %92 : vector<2x1xi1> to vector<2x1xi32>
    %336 = arith.sitofp %335 : vector<2x1xi32> to vector<2x1xf32>
    %337 = arith.addf %89, %98 : vector<2x4xf32>
    %338 = vector.extract_strided_slice %3 {offsets = [0, 1], sizes = [2, 1], strides = [1, 1]} : vector<2x4xi32> to vector<2x1xi32>
    %c-1_i32_87 = arith.constant -1 : i32
    %339 = vector.broadcast %c-1_i32_87 : i32 to vector<2x1xi32>
    %340 = arith.cmpi ne, %338, %339 : vector<2x1xi32>
    %341 = vector.broadcast %338 : vector<2x1xi32> to vector<2x4xi32>
    %342 = arith.cmpi eq, %341, %30 : vector<2x4xi32>
    %343 = vector.broadcast %340 : vector<2x1xi1> to vector<2x4xi1>
    %344 = arith.andi %342, %343 : vector<2x4xi1>
    %345 = arith.extui %344 : vector<2x4xi1> to vector<2x4xi32>
    %346 = arith.sitofp %345 : vector<2x4xi32> to vector<2x4xf32>
    %347 = vector.extract_strided_slice %5 {offsets = [1, 0, 0], sizes = [1, 2, 7], strides = [1, 1, 1]} : vector<4x2x7xi32> to vector<1x2x7xi32>
    %348 = vector.shape_cast %347 : vector<1x2x7xi32> to vector<2x7xi32>
    %c-1_i32_88 = arith.constant -1 : i32
    %349 = vector.broadcast %c-1_i32_88 : i32 to vector<2x7xi32>
    %350 = arith.cmpi ne, %348, %349 : vector<2x7xi32>
    %351 = vector.broadcast %338 : vector<2x1xi32> to vector<2x7xi32>
    %352 = arith.cmpi ne, %348, %351 : vector<2x7xi32>
    %353 = arith.andi %350, %352 : vector<2x7xi1>
    %354 = vector.broadcast %340 : vector<2x1xi1> to vector<2x7xi1>
    %355 = arith.andi %353, %354 : vector<2x7xi1>
    %356 = arith.extui %355 : vector<2x7xi1> to vector<2x7xi32>
    %357 = arith.sitofp %356 : vector<2x7xi32> to vector<2x7xf32>
    %358 = vector.shape_cast %348 : vector<2x7xi32> to vector<2x7x1xi32>
    %359 = vector.broadcast %358 : vector<2x7x1xi32> to vector<2x7x4xi32>
    %360 = arith.cmpi eq, %359, %31 : vector<2x7x4xi32>
    %361 = arith.extui %360 : vector<2x7x4xi1> to vector<2x7x4xi32>
    %362 = arith.sitofp %361 : vector<2x7x4xi32> to vector<2x7x4xf32>
    %363 = vector.shape_cast %357 : vector<2x7xf32> to vector<2x7x1xf32>
    %364 = vector.broadcast %363 : vector<2x7x1xf32> to vector<2x7x4xf32>
    %365 = arith.mulf %362, %364 : vector<2x7x4xf32>
    %366 = vector.extract_strided_slice %346 {offsets = [0, 0], sizes = [2, 1], strides = [1, 1]} : vector<2x4xf32> to vector<2x1xf32>
    %367 = vector.extract_strided_slice %285 {offsets = [0, 0, 0], sizes = [2, 1, 32], strides = [1, 1, 1]} : vector<2x4x32xf32> to vector<2x1x32xf32>
    %368 = vector.shape_cast %367 : vector<2x1x32xf32> to vector<2x32xf32>
    %369 = vector.broadcast %366 : vector<2x1xf32> to vector<2x32xf32>
    %370 = arith.mulf %369, %368 : vector<2x32xf32>
    %371 = vector.extract_strided_slice %346 {offsets = [0, 1], sizes = [2, 1], strides = [1, 1]} : vector<2x4xf32> to vector<2x1xf32>
    %372 = vector.extract_strided_slice %285 {offsets = [0, 1, 0], sizes = [2, 1, 32], strides = [1, 1, 1]} : vector<2x4x32xf32> to vector<2x1x32xf32>
    %373 = vector.shape_cast %372 : vector<2x1x32xf32> to vector<2x32xf32>
    %374 = vector.broadcast %371 : vector<2x1xf32> to vector<2x32xf32>
    %375 = arith.mulf %374, %373 : vector<2x32xf32>
    %376 = arith.addf %370, %375 : vector<2x32xf32>
    %377 = vector.extract_strided_slice %346 {offsets = [0, 2], sizes = [2, 1], strides = [1, 1]} : vector<2x4xf32> to vector<2x1xf32>
    %378 = vector.extract_strided_slice %285 {offsets = [0, 2, 0], sizes = [2, 1, 32], strides = [1, 1, 1]} : vector<2x4x32xf32> to vector<2x1x32xf32>
    %379 = vector.shape_cast %378 : vector<2x1x32xf32> to vector<2x32xf32>
    %380 = vector.broadcast %377 : vector<2x1xf32> to vector<2x32xf32>
    %381 = arith.mulf %380, %379 : vector<2x32xf32>
    %382 = arith.addf %376, %381 : vector<2x32xf32>
    %383 = vector.extract_strided_slice %346 {offsets = [0, 3], sizes = [2, 1], strides = [1, 1]} : vector<2x4xf32> to vector<2x1xf32>
    %384 = vector.extract_strided_slice %285 {offsets = [0, 3, 0], sizes = [2, 1, 32], strides = [1, 1, 1]} : vector<2x4x32xf32> to vector<2x1x32xf32>
    %385 = vector.shape_cast %384 : vector<2x1x32xf32> to vector<2x32xf32>
    %386 = vector.broadcast %383 : vector<2x1xf32> to vector<2x32xf32>
    %387 = arith.mulf %386, %385 : vector<2x32xf32>
    %388 = arith.addf %382, %387 : vector<2x32xf32>
    %389 = vector.extract_strided_slice %365 {offsets = [0, 0, 0], sizes = [2, 7, 1], strides = [1, 1, 1]} : vector<2x7x4xf32> to vector<2x7x1xf32>
    %390 = vector.extract_strided_slice %285 {offsets = [0, 0, 0], sizes = [2, 1, 32], strides = [1, 1, 1]} : vector<2x4x32xf32> to vector<2x1x32xf32>
    %391 = vector.broadcast %389 : vector<2x7x1xf32> to vector<2x7x32xf32>
    %392 = vector.broadcast %390 : vector<2x1x32xf32> to vector<2x7x32xf32>
    %393 = arith.mulf %391, %392 : vector<2x7x32xf32>
    %394 = vector.extract_strided_slice %365 {offsets = [0, 0, 1], sizes = [2, 7, 1], strides = [1, 1, 1]} : vector<2x7x4xf32> to vector<2x7x1xf32>
    %395 = vector.extract_strided_slice %285 {offsets = [0, 1, 0], sizes = [2, 1, 32], strides = [1, 1, 1]} : vector<2x4x32xf32> to vector<2x1x32xf32>
    %396 = vector.broadcast %394 : vector<2x7x1xf32> to vector<2x7x32xf32>
    %397 = vector.broadcast %395 : vector<2x1x32xf32> to vector<2x7x32xf32>
    %398 = arith.mulf %396, %397 : vector<2x7x32xf32>
    %399 = arith.addf %393, %398 : vector<2x7x32xf32>
    %400 = vector.extract_strided_slice %365 {offsets = [0, 0, 2], sizes = [2, 7, 1], strides = [1, 1, 1]} : vector<2x7x4xf32> to vector<2x7x1xf32>
    %401 = vector.extract_strided_slice %285 {offsets = [0, 2, 0], sizes = [2, 1, 32], strides = [1, 1, 1]} : vector<2x4x32xf32> to vector<2x1x32xf32>
    %402 = vector.broadcast %400 : vector<2x7x1xf32> to vector<2x7x32xf32>
    %403 = vector.broadcast %401 : vector<2x1x32xf32> to vector<2x7x32xf32>
    %404 = arith.mulf %402, %403 : vector<2x7x32xf32>
    %405 = arith.addf %399, %404 : vector<2x7x32xf32>
    %406 = vector.extract_strided_slice %365 {offsets = [0, 0, 3], sizes = [2, 7, 1], strides = [1, 1, 1]} : vector<2x7x4xf32> to vector<2x7x1xf32>
    %407 = vector.extract_strided_slice %285 {offsets = [0, 3, 0], sizes = [2, 1, 32], strides = [1, 1, 1]} : vector<2x4x32xf32> to vector<2x1x32xf32>
    %408 = vector.broadcast %406 : vector<2x7x1xf32> to vector<2x7x32xf32>
    %409 = vector.broadcast %407 : vector<2x1x32xf32> to vector<2x7x32xf32>
    %410 = arith.mulf %408, %409 : vector<2x7x32xf32>
    %411 = arith.addf %405, %410 : vector<2x7x32xf32>
    %412 = vector.shape_cast %388 : vector<2x32xf32> to vector<2x1x32xf32>
    %413 = vector.broadcast %412 : vector<2x1x32xf32> to vector<2x7x32xf32>
    %414 = arith.mulf %413, %411 : vector<2x7x32xf32>
    %415 = vector.shape_cast %414 : vector<2x7x32xf32> to vector<14x32xf32>
    %416 = vector.extract_strided_slice %346 {offsets = [0, 0], sizes = [2, 1], strides = [1, 1]} : vector<2x4xf32> to vector<2x1xf32>
    %417 = vector.extract_strided_slice %334 {offsets = [0, 0, 0], sizes = [2, 1, 32], strides = [1, 1, 1]} : vector<2x4x32xf32> to vector<2x1x32xf32>
    %418 = vector.shape_cast %417 : vector<2x1x32xf32> to vector<2x32xf32>
    %419 = vector.broadcast %416 : vector<2x1xf32> to vector<2x32xf32>
    %420 = arith.mulf %419, %418 : vector<2x32xf32>
    %421 = vector.extract_strided_slice %346 {offsets = [0, 1], sizes = [2, 1], strides = [1, 1]} : vector<2x4xf32> to vector<2x1xf32>
    %422 = vector.extract_strided_slice %334 {offsets = [0, 1, 0], sizes = [2, 1, 32], strides = [1, 1, 1]} : vector<2x4x32xf32> to vector<2x1x32xf32>
    %423 = vector.shape_cast %422 : vector<2x1x32xf32> to vector<2x32xf32>
    %424 = vector.broadcast %421 : vector<2x1xf32> to vector<2x32xf32>
    %425 = arith.mulf %424, %423 : vector<2x32xf32>
    %426 = arith.addf %420, %425 : vector<2x32xf32>
    %427 = vector.extract_strided_slice %346 {offsets = [0, 2], sizes = [2, 1], strides = [1, 1]} : vector<2x4xf32> to vector<2x1xf32>
    %428 = vector.extract_strided_slice %334 {offsets = [0, 2, 0], sizes = [2, 1, 32], strides = [1, 1, 1]} : vector<2x4x32xf32> to vector<2x1x32xf32>
    %429 = vector.shape_cast %428 : vector<2x1x32xf32> to vector<2x32xf32>
    %430 = vector.broadcast %427 : vector<2x1xf32> to vector<2x32xf32>
    %431 = arith.mulf %430, %429 : vector<2x32xf32>
    %432 = arith.addf %426, %431 : vector<2x32xf32>
    %433 = vector.extract_strided_slice %346 {offsets = [0, 3], sizes = [2, 1], strides = [1, 1]} : vector<2x4xf32> to vector<2x1xf32>
    %434 = vector.extract_strided_slice %334 {offsets = [0, 3, 0], sizes = [2, 1, 32], strides = [1, 1, 1]} : vector<2x4x32xf32> to vector<2x1x32xf32>
    %435 = vector.shape_cast %434 : vector<2x1x32xf32> to vector<2x32xf32>
    %436 = vector.broadcast %433 : vector<2x1xf32> to vector<2x32xf32>
    %437 = arith.mulf %436, %435 : vector<2x32xf32>
    %438 = arith.addf %432, %437 : vector<2x32xf32>
    %439 = vector.extract_strided_slice %365 {offsets = [0, 0, 0], sizes = [2, 7, 1], strides = [1, 1, 1]} : vector<2x7x4xf32> to vector<2x7x1xf32>
    %440 = vector.extract_strided_slice %334 {offsets = [0, 0, 0], sizes = [2, 1, 32], strides = [1, 1, 1]} : vector<2x4x32xf32> to vector<2x1x32xf32>
    %441 = vector.broadcast %439 : vector<2x7x1xf32> to vector<2x7x32xf32>
    %442 = vector.broadcast %440 : vector<2x1x32xf32> to vector<2x7x32xf32>
    %443 = arith.mulf %441, %442 : vector<2x7x32xf32>
    %444 = vector.extract_strided_slice %365 {offsets = [0, 0, 1], sizes = [2, 7, 1], strides = [1, 1, 1]} : vector<2x7x4xf32> to vector<2x7x1xf32>
    %445 = vector.extract_strided_slice %334 {offsets = [0, 1, 0], sizes = [2, 1, 32], strides = [1, 1, 1]} : vector<2x4x32xf32> to vector<2x1x32xf32>
    %446 = vector.broadcast %444 : vector<2x7x1xf32> to vector<2x7x32xf32>
    %447 = vector.broadcast %445 : vector<2x1x32xf32> to vector<2x7x32xf32>
    %448 = arith.mulf %446, %447 : vector<2x7x32xf32>
    %449 = arith.addf %443, %448 : vector<2x7x32xf32>
    %450 = vector.extract_strided_slice %365 {offsets = [0, 0, 2], sizes = [2, 7, 1], strides = [1, 1, 1]} : vector<2x7x4xf32> to vector<2x7x1xf32>
    %451 = vector.extract_strided_slice %334 {offsets = [0, 2, 0], sizes = [2, 1, 32], strides = [1, 1, 1]} : vector<2x4x32xf32> to vector<2x1x32xf32>
    %452 = vector.broadcast %450 : vector<2x7x1xf32> to vector<2x7x32xf32>
    %453 = vector.broadcast %451 : vector<2x1x32xf32> to vector<2x7x32xf32>
    %454 = arith.mulf %452, %453 : vector<2x7x32xf32>
    %455 = arith.addf %449, %454 : vector<2x7x32xf32>
    %456 = vector.extract_strided_slice %365 {offsets = [0, 0, 3], sizes = [2, 7, 1], strides = [1, 1, 1]} : vector<2x7x4xf32> to vector<2x7x1xf32>
    %457 = vector.extract_strided_slice %334 {offsets = [0, 3, 0], sizes = [2, 1, 32], strides = [1, 1, 1]} : vector<2x4x32xf32> to vector<2x1x32xf32>
    %458 = vector.broadcast %456 : vector<2x7x1xf32> to vector<2x7x32xf32>
    %459 = vector.broadcast %457 : vector<2x1x32xf32> to vector<2x7x32xf32>
    %460 = arith.mulf %458, %459 : vector<2x7x32xf32>
    %461 = arith.addf %455, %460 : vector<2x7x32xf32>
    %462 = vector.shape_cast %438 : vector<2x32xf32> to vector<2x1x32xf32>
    %463 = vector.broadcast %462 : vector<2x1x32xf32> to vector<2x7x32xf32>
    %464 = arith.mulf %463, %461 : vector<2x7x32xf32>
    %465 = vector.shape_cast %464 : vector<2x7x32xf32> to vector<14x32xf32>
    %466 = tpu.concatenate %415, %465 in 0 : vector<14x32xf32>, vector<14x32xf32> -> vector<28x32xf32>
    %467 = arith.truncf %466 : vector<28x32xf32> to vector<28x32xbf16>
    %cst_89 = arith.constant dense<0.000000e+00> : vector<28x32xf32>
    %468 = tpu.matmul %467, %7, %cst_89 {dimension_numbers = #tpu.dot_dimension_numbers<[1], [0], [0], [1], [0, 0, 1, 1], [], []>} : vector<28x32xbf16>, vector<32x32xbf16>, vector<28x32xf32> -> vector<28x32xf32>
    %469 = vector.broadcast %9 : vector<1x32xf32> to vector<28x32xf32>
    %470 = arith.addf %468, %469 : vector<28x32xf32>
    %cst_90 = arith.constant 0.000000e+00 : f32
    %471 = vector.broadcast %cst_90 : f32 to vector<28x32xf32>
    %472 = arith.cmpf ogt, %470, %471 : vector<28x32xf32>
    %cst_91 = arith.constant 0.00999999977 : f32
    %473 = vector.broadcast %cst_91 : f32 to vector<28x32xf32>
    %474 = arith.mulf %473, %470 : vector<28x32xf32>
    %475 = arith.select %472, %470, %474 : vector<28x32xi1>, vector<28x32xf32>
    %476 = arith.truncf %475 : vector<28x32xf32> to vector<28x32xbf16>
    %cst_92 = arith.constant dense<0.000000e+00> : vector<28x32xf32>
    %477 = tpu.matmul %476, %11, %cst_92 {dimension_numbers = #tpu.dot_dimension_numbers<[1], [0], [0], [1], [0, 0, 1, 1], [], []>} : vector<28x32xbf16>, vector<32x32xbf16>, vector<28x32xf32> -> vector<28x32xf32>
    %478 = vector.broadcast %13 : vector<1x32xf32> to vector<28x32xf32>
    %479 = arith.addf %477, %478 : vector<28x32xf32>
    %cst_93 = arith.constant 0.000000e+00 : f32
    %480 = vector.broadcast %cst_93 : f32 to vector<28x32xf32>
    %481 = arith.cmpf ogt, %479, %480 : vector<28x32xf32>
    %cst_94 = arith.constant 0.00999999977 : f32
    %482 = vector.broadcast %cst_94 : f32 to vector<28x32xf32>
    %483 = arith.mulf %482, %479 : vector<28x32xf32>
    %484 = arith.select %481, %479, %483 : vector<28x32xi1>, vector<28x32xf32>
    %485 = vector.extract_strided_slice %484 {offsets = [0, 0], sizes = [14, 32], strides = [1, 1]} : vector<28x32xf32> to vector<14x32xf32>
    %486 = vector.shape_cast %485 : vector<14x32xf32> to vector<2x7x32xf32>
    %487 = vector.extract_strided_slice %357 {offsets = [0, 0], sizes = [2, 1], strides = [1, 1]} : vector<2x7xf32> to vector<2x1xf32>
    %488 = vector.extract_strided_slice %486 {offsets = [0, 0, 0], sizes = [2, 1, 32], strides = [1, 1, 1]} : vector<2x7x32xf32> to vector<2x1x32xf32>
    %489 = vector.shape_cast %488 : vector<2x1x32xf32> to vector<2x32xf32>
    %490 = vector.broadcast %487 : vector<2x1xf32> to vector<2x32xf32>
    %491 = arith.mulf %490, %489 : vector<2x32xf32>
    %492 = vector.extract_strided_slice %357 {offsets = [0, 1], sizes = [2, 1], strides = [1, 1]} : vector<2x7xf32> to vector<2x1xf32>
    %493 = vector.extract_strided_slice %486 {offsets = [0, 1, 0], sizes = [2, 1, 32], strides = [1, 1, 1]} : vector<2x7x32xf32> to vector<2x1x32xf32>
    %494 = vector.shape_cast %493 : vector<2x1x32xf32> to vector<2x32xf32>
    %495 = vector.broadcast %492 : vector<2x1xf32> to vector<2x32xf32>
    %496 = arith.mulf %495, %494 : vector<2x32xf32>
    %497 = arith.addf %491, %496 : vector<2x32xf32>
    %498 = vector.extract_strided_slice %357 {offsets = [0, 2], sizes = [2, 1], strides = [1, 1]} : vector<2x7xf32> to vector<2x1xf32>
    %499 = vector.extract_strided_slice %486 {offsets = [0, 2, 0], sizes = [2, 1, 32], strides = [1, 1, 1]} : vector<2x7x32xf32> to vector<2x1x32xf32>
    %500 = vector.shape_cast %499 : vector<2x1x32xf32> to vector<2x32xf32>
    %501 = vector.broadcast %498 : vector<2x1xf32> to vector<2x32xf32>
    %502 = arith.mulf %501, %500 : vector<2x32xf32>
    %503 = arith.addf %497, %502 : vector<2x32xf32>
    %504 = vector.extract_strided_slice %357 {offsets = [0, 3], sizes = [2, 1], strides = [1, 1]} : vector<2x7xf32> to vector<2x1xf32>
    %505 = vector.extract_strided_slice %486 {offsets = [0, 3, 0], sizes = [2, 1, 32], strides = [1, 1, 1]} : vector<2x7x32xf32> to vector<2x1x32xf32>
    %506 = vector.shape_cast %505 : vector<2x1x32xf32> to vector<2x32xf32>
    %507 = vector.broadcast %504 : vector<2x1xf32> to vector<2x32xf32>
    %508 = arith.mulf %507, %506 : vector<2x32xf32>
    %509 = arith.addf %503, %508 : vector<2x32xf32>
    %510 = vector.extract_strided_slice %357 {offsets = [0, 4], sizes = [2, 1], strides = [1, 1]} : vector<2x7xf32> to vector<2x1xf32>
    %511 = vector.extract_strided_slice %486 {offsets = [0, 4, 0], sizes = [2, 1, 32], strides = [1, 1, 1]} : vector<2x7x32xf32> to vector<2x1x32xf32>
    %512 = vector.shape_cast %511 : vector<2x1x32xf32> to vector<2x32xf32>
    %513 = vector.broadcast %510 : vector<2x1xf32> to vector<2x32xf32>
    %514 = arith.mulf %513, %512 : vector<2x32xf32>
    %515 = arith.addf %509, %514 : vector<2x32xf32>
    %516 = vector.extract_strided_slice %357 {offsets = [0, 5], sizes = [2, 1], strides = [1, 1]} : vector<2x7xf32> to vector<2x1xf32>
    %517 = vector.extract_strided_slice %486 {offsets = [0, 5, 0], sizes = [2, 1, 32], strides = [1, 1, 1]} : vector<2x7x32xf32> to vector<2x1x32xf32>
    %518 = vector.shape_cast %517 : vector<2x1x32xf32> to vector<2x32xf32>
    %519 = vector.broadcast %516 : vector<2x1xf32> to vector<2x32xf32>
    %520 = arith.mulf %519, %518 : vector<2x32xf32>
    %521 = arith.addf %515, %520 : vector<2x32xf32>
    %522 = vector.extract_strided_slice %357 {offsets = [0, 6], sizes = [2, 1], strides = [1, 1]} : vector<2x7xf32> to vector<2x1xf32>
    %523 = vector.extract_strided_slice %486 {offsets = [0, 6, 0], sizes = [2, 1, 32], strides = [1, 1, 1]} : vector<2x7x32xf32> to vector<2x1x32xf32>
    %524 = vector.shape_cast %523 : vector<2x1x32xf32> to vector<2x32xf32>
    %525 = vector.broadcast %522 : vector<2x1xf32> to vector<2x32xf32>
    %526 = arith.mulf %525, %524 : vector<2x32xf32>
    %527 = arith.addf %521, %526 : vector<2x32xf32>
    %528 = vector.shape_cast %346 : vector<2x4xf32> to vector<2x4x1xf32>
    %529 = vector.shape_cast %527 : vector<2x32xf32> to vector<2x1x32xf32>
    %530 = vector.broadcast %528 : vector<2x4x1xf32> to vector<2x4x32xf32>
    %531 = vector.broadcast %529 : vector<2x1x32xf32> to vector<2x4x32xf32>
    %532 = arith.mulf %530, %531 : vector<2x4x32xf32>
    %533 = arith.addf %285, %532 : vector<2x4x32xf32>
    %534 = vector.extract_strided_slice %484 {offsets = [14, 0], sizes = [14, 32], strides = [1, 1]} : vector<28x32xf32> to vector<14x32xf32>
    %535 = vector.shape_cast %534 : vector<14x32xf32> to vector<2x7x32xf32>
    %536 = vector.extract_strided_slice %357 {offsets = [0, 0], sizes = [2, 1], strides = [1, 1]} : vector<2x7xf32> to vector<2x1xf32>
    %537 = vector.extract_strided_slice %535 {offsets = [0, 0, 0], sizes = [2, 1, 32], strides = [1, 1, 1]} : vector<2x7x32xf32> to vector<2x1x32xf32>
    %538 = vector.shape_cast %537 : vector<2x1x32xf32> to vector<2x32xf32>
    %539 = vector.broadcast %536 : vector<2x1xf32> to vector<2x32xf32>
    %540 = arith.mulf %539, %538 : vector<2x32xf32>
    %541 = vector.extract_strided_slice %357 {offsets = [0, 1], sizes = [2, 1], strides = [1, 1]} : vector<2x7xf32> to vector<2x1xf32>
    %542 = vector.extract_strided_slice %535 {offsets = [0, 1, 0], sizes = [2, 1, 32], strides = [1, 1, 1]} : vector<2x7x32xf32> to vector<2x1x32xf32>
    %543 = vector.shape_cast %542 : vector<2x1x32xf32> to vector<2x32xf32>
    %544 = vector.broadcast %541 : vector<2x1xf32> to vector<2x32xf32>
    %545 = arith.mulf %544, %543 : vector<2x32xf32>
    %546 = arith.addf %540, %545 : vector<2x32xf32>
    %547 = vector.extract_strided_slice %357 {offsets = [0, 2], sizes = [2, 1], strides = [1, 1]} : vector<2x7xf32> to vector<2x1xf32>
    %548 = vector.extract_strided_slice %535 {offsets = [0, 2, 0], sizes = [2, 1, 32], strides = [1, 1, 1]} : vector<2x7x32xf32> to vector<2x1x32xf32>
    %549 = vector.shape_cast %548 : vector<2x1x32xf32> to vector<2x32xf32>
    %550 = vector.broadcast %547 : vector<2x1xf32> to vector<2x32xf32>
    %551 = arith.mulf %550, %549 : vector<2x32xf32>
    %552 = arith.addf %546, %551 : vector<2x32xf32>
    %553 = vector.extract_strided_slice %357 {offsets = [0, 3], sizes = [2, 1], strides = [1, 1]} : vector<2x7xf32> to vector<2x1xf32>
    %554 = vector.extract_strided_slice %535 {offsets = [0, 3, 0], sizes = [2, 1, 32], strides = [1, 1, 1]} : vector<2x7x32xf32> to vector<2x1x32xf32>
    %555 = vector.shape_cast %554 : vector<2x1x32xf32> to vector<2x32xf32>
    %556 = vector.broadcast %553 : vector<2x1xf32> to vector<2x32xf32>
    %557 = arith.mulf %556, %555 : vector<2x32xf32>
    %558 = arith.addf %552, %557 : vector<2x32xf32>
    %559 = vector.extract_strided_slice %357 {offsets = [0, 4], sizes = [2, 1], strides = [1, 1]} : vector<2x7xf32> to vector<2x1xf32>
    %560 = vector.extract_strided_slice %535 {offsets = [0, 4, 0], sizes = [2, 1, 32], strides = [1, 1, 1]} : vector<2x7x32xf32> to vector<2x1x32xf32>
    %561 = vector.shape_cast %560 : vector<2x1x32xf32> to vector<2x32xf32>
    %562 = vector.broadcast %559 : vector<2x1xf32> to vector<2x32xf32>
    %563 = arith.mulf %562, %561 : vector<2x32xf32>
    %564 = arith.addf %558, %563 : vector<2x32xf32>
    %565 = vector.extract_strided_slice %357 {offsets = [0, 5], sizes = [2, 1], strides = [1, 1]} : vector<2x7xf32> to vector<2x1xf32>
    %566 = vector.extract_strided_slice %535 {offsets = [0, 5, 0], sizes = [2, 1, 32], strides = [1, 1, 1]} : vector<2x7x32xf32> to vector<2x1x32xf32>
    %567 = vector.shape_cast %566 : vector<2x1x32xf32> to vector<2x32xf32>
    %568 = vector.broadcast %565 : vector<2x1xf32> to vector<2x32xf32>
    %569 = arith.mulf %568, %567 : vector<2x32xf32>
    %570 = arith.addf %564, %569 : vector<2x32xf32>
    %571 = vector.extract_strided_slice %357 {offsets = [0, 6], sizes = [2, 1], strides = [1, 1]} : vector<2x7xf32> to vector<2x1xf32>
    %572 = vector.extract_strided_slice %535 {offsets = [0, 6, 0], sizes = [2, 1, 32], strides = [1, 1, 1]} : vector<2x7x32xf32> to vector<2x1x32xf32>
    %573 = vector.shape_cast %572 : vector<2x1x32xf32> to vector<2x32xf32>
    %574 = vector.broadcast %571 : vector<2x1xf32> to vector<2x32xf32>
    %575 = arith.mulf %574, %573 : vector<2x32xf32>
    %576 = arith.addf %570, %575 : vector<2x32xf32>
    %577 = vector.shape_cast %346 : vector<2x4xf32> to vector<2x4x1xf32>
    %578 = vector.shape_cast %576 : vector<2x32xf32> to vector<2x1x32xf32>
    %579 = vector.broadcast %577 : vector<2x4x1xf32> to vector<2x4x32xf32>
    %580 = vector.broadcast %578 : vector<2x1x32xf32> to vector<2x4x32xf32>
    %581 = arith.mulf %579, %580 : vector<2x4x32xf32>
    %582 = arith.addf %334, %581 : vector<2x4x32xf32>
    %583 = arith.extui %340 : vector<2x1xi1> to vector<2x1xi32>
    %584 = arith.sitofp %583 : vector<2x1xi32> to vector<2x1xf32>
    %585 = arith.addf %337, %346 : vector<2x4xf32>
    %586 = vector.extract_strided_slice %3 {offsets = [0, 2], sizes = [2, 1], strides = [1, 1]} : vector<2x4xi32> to vector<2x1xi32>
    %c-1_i32_95 = arith.constant -1 : i32
    %587 = vector.broadcast %c-1_i32_95 : i32 to vector<2x1xi32>
    %588 = arith.cmpi ne, %586, %587 : vector<2x1xi32>
    %589 = vector.broadcast %586 : vector<2x1xi32> to vector<2x4xi32>
    %590 = arith.cmpi eq, %589, %30 : vector<2x4xi32>
    %591 = vector.broadcast %588 : vector<2x1xi1> to vector<2x4xi1>
    %592 = arith.andi %590, %591 : vector<2x4xi1>
    %593 = arith.extui %592 : vector<2x4xi1> to vector<2x4xi32>
    %594 = arith.sitofp %593 : vector<2x4xi32> to vector<2x4xf32>
    %595 = vector.extract_strided_slice %5 {offsets = [2, 0, 0], sizes = [1, 2, 7], strides = [1, 1, 1]} : vector<4x2x7xi32> to vector<1x2x7xi32>
    %596 = vector.shape_cast %595 : vector<1x2x7xi32> to vector<2x7xi32>
    %c-1_i32_96 = arith.constant -1 : i32
    %597 = vector.broadcast %c-1_i32_96 : i32 to vector<2x7xi32>
    %598 = arith.cmpi ne, %596, %597 : vector<2x7xi32>
    %599 = vector.broadcast %586 : vector<2x1xi32> to vector<2x7xi32>
    %600 = arith.cmpi ne, %596, %599 : vector<2x7xi32>
    %601 = arith.andi %598, %600 : vector<2x7xi1>
    %602 = vector.broadcast %588 : vector<2x1xi1> to vector<2x7xi1>
    %603 = arith.andi %601, %602 : vector<2x7xi1>
    %604 = arith.extui %603 : vector<2x7xi1> to vector<2x7xi32>
    %605 = arith.sitofp %604 : vector<2x7xi32> to vector<2x7xf32>
    %606 = vector.shape_cast %596 : vector<2x7xi32> to vector<2x7x1xi32>
    %607 = vector.broadcast %606 : vector<2x7x1xi32> to vector<2x7x4xi32>
    %608 = arith.cmpi eq, %607, %31 : vector<2x7x4xi32>
    %609 = arith.extui %608 : vector<2x7x4xi1> to vector<2x7x4xi32>
    %610 = arith.sitofp %609 : vector<2x7x4xi32> to vector<2x7x4xf32>
    %611 = vector.shape_cast %605 : vector<2x7xf32> to vector<2x7x1xf32>
    %612 = vector.broadcast %611 : vector<2x7x1xf32> to vector<2x7x4xf32>
    %613 = arith.mulf %610, %612 : vector<2x7x4xf32>
    %614 = vector.extract_strided_slice %594 {offsets = [0, 0], sizes = [2, 1], strides = [1, 1]} : vector<2x4xf32> to vector<2x1xf32>
    %615 = vector.extract_strided_slice %533 {offsets = [0, 0, 0], sizes = [2, 1, 32], strides = [1, 1, 1]} : vector<2x4x32xf32> to vector<2x1x32xf32>
    %616 = vector.shape_cast %615 : vector<2x1x32xf32> to vector<2x32xf32>
    %617 = vector.broadcast %614 : vector<2x1xf32> to vector<2x32xf32>
    %618 = arith.mulf %617, %616 : vector<2x32xf32>
    %619 = vector.extract_strided_slice %594 {offsets = [0, 1], sizes = [2, 1], strides = [1, 1]} : vector<2x4xf32> to vector<2x1xf32>
    %620 = vector.extract_strided_slice %533 {offsets = [0, 1, 0], sizes = [2, 1, 32], strides = [1, 1, 1]} : vector<2x4x32xf32> to vector<2x1x32xf32>
    %621 = vector.shape_cast %620 : vector<2x1x32xf32> to vector<2x32xf32>
    %622 = vector.broadcast %619 : vector<2x1xf32> to vector<2x32xf32>
    %623 = arith.mulf %622, %621 : vector<2x32xf32>
    %624 = arith.addf %618, %623 : vector<2x32xf32>
    %625 = vector.extract_strided_slice %594 {offsets = [0, 2], sizes = [2, 1], strides = [1, 1]} : vector<2x4xf32> to vector<2x1xf32>
    %626 = vector.extract_strided_slice %533 {offsets = [0, 2, 0], sizes = [2, 1, 32], strides = [1, 1, 1]} : vector<2x4x32xf32> to vector<2x1x32xf32>
    %627 = vector.shape_cast %626 : vector<2x1x32xf32> to vector<2x32xf32>
    %628 = vector.broadcast %625 : vector<2x1xf32> to vector<2x32xf32>
    %629 = arith.mulf %628, %627 : vector<2x32xf32>
    %630 = arith.addf %624, %629 : vector<2x32xf32>
    %631 = vector.extract_strided_slice %594 {offsets = [0, 3], sizes = [2, 1], strides = [1, 1]} : vector<2x4xf32> to vector<2x1xf32>
    %632 = vector.extract_strided_slice %533 {offsets = [0, 3, 0], sizes = [2, 1, 32], strides = [1, 1, 1]} : vector<2x4x32xf32> to vector<2x1x32xf32>
    %633 = vector.shape_cast %632 : vector<2x1x32xf32> to vector<2x32xf32>
    %634 = vector.broadcast %631 : vector<2x1xf32> to vector<2x32xf32>
    %635 = arith.mulf %634, %633 : vector<2x32xf32>
    %636 = arith.addf %630, %635 : vector<2x32xf32>
    %637 = vector.extract_strided_slice %613 {offsets = [0, 0, 0], sizes = [2, 7, 1], strides = [1, 1, 1]} : vector<2x7x4xf32> to vector<2x7x1xf32>
    %638 = vector.extract_strided_slice %533 {offsets = [0, 0, 0], sizes = [2, 1, 32], strides = [1, 1, 1]} : vector<2x4x32xf32> to vector<2x1x32xf32>
    %639 = vector.broadcast %637 : vector<2x7x1xf32> to vector<2x7x32xf32>
    %640 = vector.broadcast %638 : vector<2x1x32xf32> to vector<2x7x32xf32>
    %641 = arith.mulf %639, %640 : vector<2x7x32xf32>
    %642 = vector.extract_strided_slice %613 {offsets = [0, 0, 1], sizes = [2, 7, 1], strides = [1, 1, 1]} : vector<2x7x4xf32> to vector<2x7x1xf32>
    %643 = vector.extract_strided_slice %533 {offsets = [0, 1, 0], sizes = [2, 1, 32], strides = [1, 1, 1]} : vector<2x4x32xf32> to vector<2x1x32xf32>
    %644 = vector.broadcast %642 : vector<2x7x1xf32> to vector<2x7x32xf32>
    %645 = vector.broadcast %643 : vector<2x1x32xf32> to vector<2x7x32xf32>
    %646 = arith.mulf %644, %645 : vector<2x7x32xf32>
    %647 = arith.addf %641, %646 : vector<2x7x32xf32>
    %648 = vector.extract_strided_slice %613 {offsets = [0, 0, 2], sizes = [2, 7, 1], strides = [1, 1, 1]} : vector<2x7x4xf32> to vector<2x7x1xf32>
    %649 = vector.extract_strided_slice %533 {offsets = [0, 2, 0], sizes = [2, 1, 32], strides = [1, 1, 1]} : vector<2x4x32xf32> to vector<2x1x32xf32>
    %650 = vector.broadcast %648 : vector<2x7x1xf32> to vector<2x7x32xf32>
    %651 = vector.broadcast %649 : vector<2x1x32xf32> to vector<2x7x32xf32>
    %652 = arith.mulf %650, %651 : vector<2x7x32xf32>
    %653 = arith.addf %647, %652 : vector<2x7x32xf32>
    %654 = vector.extract_strided_slice %613 {offsets = [0, 0, 3], sizes = [2, 7, 1], strides = [1, 1, 1]} : vector<2x7x4xf32> to vector<2x7x1xf32>
    %655 = vector.extract_strided_slice %533 {offsets = [0, 3, 0], sizes = [2, 1, 32], strides = [1, 1, 1]} : vector<2x4x32xf32> to vector<2x1x32xf32>
    %656 = vector.broadcast %654 : vector<2x7x1xf32> to vector<2x7x32xf32>
    %657 = vector.broadcast %655 : vector<2x1x32xf32> to vector<2x7x32xf32>
    %658 = arith.mulf %656, %657 : vector<2x7x32xf32>
    %659 = arith.addf %653, %658 : vector<2x7x32xf32>
    %660 = vector.shape_cast %636 : vector<2x32xf32> to vector<2x1x32xf32>
    %661 = vector.broadcast %660 : vector<2x1x32xf32> to vector<2x7x32xf32>
    %662 = arith.mulf %661, %659 : vector<2x7x32xf32>
    %663 = vector.shape_cast %662 : vector<2x7x32xf32> to vector<14x32xf32>
    %664 = vector.extract_strided_slice %594 {offsets = [0, 0], sizes = [2, 1], strides = [1, 1]} : vector<2x4xf32> to vector<2x1xf32>
    %665 = vector.extract_strided_slice %582 {offsets = [0, 0, 0], sizes = [2, 1, 32], strides = [1, 1, 1]} : vector<2x4x32xf32> to vector<2x1x32xf32>
    %666 = vector.shape_cast %665 : vector<2x1x32xf32> to vector<2x32xf32>
    %667 = vector.broadcast %664 : vector<2x1xf32> to vector<2x32xf32>
    %668 = arith.mulf %667, %666 : vector<2x32xf32>
    %669 = vector.extract_strided_slice %594 {offsets = [0, 1], sizes = [2, 1], strides = [1, 1]} : vector<2x4xf32> to vector<2x1xf32>
    %670 = vector.extract_strided_slice %582 {offsets = [0, 1, 0], sizes = [2, 1, 32], strides = [1, 1, 1]} : vector<2x4x32xf32> to vector<2x1x32xf32>
    %671 = vector.shape_cast %670 : vector<2x1x32xf32> to vector<2x32xf32>
    %672 = vector.broadcast %669 : vector<2x1xf32> to vector<2x32xf32>
    %673 = arith.mulf %672, %671 : vector<2x32xf32>
    %674 = arith.addf %668, %673 : vector<2x32xf32>
    %675 = vector.extract_strided_slice %594 {offsets = [0, 2], sizes = [2, 1], strides = [1, 1]} : vector<2x4xf32> to vector<2x1xf32>
    %676 = vector.extract_strided_slice %582 {offsets = [0, 2, 0], sizes = [2, 1, 32], strides = [1, 1, 1]} : vector<2x4x32xf32> to vector<2x1x32xf32>
    %677 = vector.shape_cast %676 : vector<2x1x32xf32> to vector<2x32xf32>
    %678 = vector.broadcast %675 : vector<2x1xf32> to vector<2x32xf32>
    %679 = arith.mulf %678, %677 : vector<2x32xf32>
    %680 = arith.addf %674, %679 : vector<2x32xf32>
    %681 = vector.extract_strided_slice %594 {offsets = [0, 3], sizes = [2, 1], strides = [1, 1]} : vector<2x4xf32> to vector<2x1xf32>
    %682 = vector.extract_strided_slice %582 {offsets = [0, 3, 0], sizes = [2, 1, 32], strides = [1, 1, 1]} : vector<2x4x32xf32> to vector<2x1x32xf32>
    %683 = vector.shape_cast %682 : vector<2x1x32xf32> to vector<2x32xf32>
    %684 = vector.broadcast %681 : vector<2x1xf32> to vector<2x32xf32>
    %685 = arith.mulf %684, %683 : vector<2x32xf32>
    %686 = arith.addf %680, %685 : vector<2x32xf32>
    %687 = vector.extract_strided_slice %613 {offsets = [0, 0, 0], sizes = [2, 7, 1], strides = [1, 1, 1]} : vector<2x7x4xf32> to vector<2x7x1xf32>
    %688 = vector.extract_strided_slice %582 {offsets = [0, 0, 0], sizes = [2, 1, 32], strides = [1, 1, 1]} : vector<2x4x32xf32> to vector<2x1x32xf32>
    %689 = vector.broadcast %687 : vector<2x7x1xf32> to vector<2x7x32xf32>
    %690 = vector.broadcast %688 : vector<2x1x32xf32> to vector<2x7x32xf32>
    %691 = arith.mulf %689, %690 : vector<2x7x32xf32>
    %692 = vector.extract_strided_slice %613 {offsets = [0, 0, 1], sizes = [2, 7, 1], strides = [1, 1, 1]} : vector<2x7x4xf32> to vector<2x7x1xf32>
    %693 = vector.extract_strided_slice %582 {offsets = [0, 1, 0], sizes = [2, 1, 32], strides = [1, 1, 1]} : vector<2x4x32xf32> to vector<2x1x32xf32>
    %694 = vector.broadcast %692 : vector<2x7x1xf32> to vector<2x7x32xf32>
    %695 = vector.broadcast %693 : vector<2x1x32xf32> to vector<2x7x32xf32>
    %696 = arith.mulf %694, %695 : vector<2x7x32xf32>
    %697 = arith.addf %691, %696 : vector<2x7x32xf32>
    %698 = vector.extract_strided_slice %613 {offsets = [0, 0, 2], sizes = [2, 7, 1], strides = [1, 1, 1]} : vector<2x7x4xf32> to vector<2x7x1xf32>
    %699 = vector.extract_strided_slice %582 {offsets = [0, 2, 0], sizes = [2, 1, 32], strides = [1, 1, 1]} : vector<2x4x32xf32> to vector<2x1x32xf32>
    %700 = vector.broadcast %698 : vector<2x7x1xf32> to vector<2x7x32xf32>
    %701 = vector.broadcast %699 : vector<2x1x32xf32> to vector<2x7x32xf32>
    %702 = arith.mulf %700, %701 : vector<2x7x32xf32>
    %703 = arith.addf %697, %702 : vector<2x7x32xf32>
    %704 = vector.extract_strided_slice %613 {offsets = [0, 0, 3], sizes = [2, 7, 1], strides = [1, 1, 1]} : vector<2x7x4xf32> to vector<2x7x1xf32>
    %705 = vector.extract_strided_slice %582 {offsets = [0, 3, 0], sizes = [2, 1, 32], strides = [1, 1, 1]} : vector<2x4x32xf32> to vector<2x1x32xf32>
    %706 = vector.broadcast %704 : vector<2x7x1xf32> to vector<2x7x32xf32>
    %707 = vector.broadcast %705 : vector<2x1x32xf32> to vector<2x7x32xf32>
    %708 = arith.mulf %706, %707 : vector<2x7x32xf32>
    %709 = arith.addf %703, %708 : vector<2x7x32xf32>
    %710 = vector.shape_cast %686 : vector<2x32xf32> to vector<2x1x32xf32>
    %711 = vector.broadcast %710 : vector<2x1x32xf32> to vector<2x7x32xf32>
    %712 = arith.mulf %711, %709 : vector<2x7x32xf32>
    %713 = vector.shape_cast %712 : vector<2x7x32xf32> to vector<14x32xf32>
    %714 = tpu.concatenate %663, %713 in 0 : vector<14x32xf32>, vector<14x32xf32> -> vector<28x32xf32>
    %715 = arith.truncf %714 : vector<28x32xf32> to vector<28x32xbf16>
    %cst_97 = arith.constant dense<0.000000e+00> : vector<28x32xf32>
    %716 = tpu.matmul %715, %7, %cst_97 {dimension_numbers = #tpu.dot_dimension_numbers<[1], [0], [0], [1], [0, 0, 1, 1], [], []>} : vector<28x32xbf16>, vector<32x32xbf16>, vector<28x32xf32> -> vector<28x32xf32>
    %717 = vector.broadcast %9 : vector<1x32xf32> to vector<28x32xf32>
    %718 = arith.addf %716, %717 : vector<28x32xf32>
    %cst_98 = arith.constant 0.000000e+00 : f32
    %719 = vector.broadcast %cst_98 : f32 to vector<28x32xf32>
    %720 = arith.cmpf ogt, %718, %719 : vector<28x32xf32>
    %cst_99 = arith.constant 0.00999999977 : f32
    %721 = vector.broadcast %cst_99 : f32 to vector<28x32xf32>
    %722 = arith.mulf %721, %718 : vector<28x32xf32>
    %723 = arith.select %720, %718, %722 : vector<28x32xi1>, vector<28x32xf32>
    %724 = arith.truncf %723 : vector<28x32xf32> to vector<28x32xbf16>
    %cst_100 = arith.constant dense<0.000000e+00> : vector<28x32xf32>
    %725 = tpu.matmul %724, %11, %cst_100 {dimension_numbers = #tpu.dot_dimension_numbers<[1], [0], [0], [1], [0, 0, 1, 1], [], []>} : vector<28x32xbf16>, vector<32x32xbf16>, vector<28x32xf32> -> vector<28x32xf32>
    %726 = vector.broadcast %13 : vector<1x32xf32> to vector<28x32xf32>
    %727 = arith.addf %725, %726 : vector<28x32xf32>
    %cst_101 = arith.constant 0.000000e+00 : f32
    %728 = vector.broadcast %cst_101 : f32 to vector<28x32xf32>
    %729 = arith.cmpf ogt, %727, %728 : vector<28x32xf32>
    %cst_102 = arith.constant 0.00999999977 : f32
    %730 = vector.broadcast %cst_102 : f32 to vector<28x32xf32>
    %731 = arith.mulf %730, %727 : vector<28x32xf32>
    %732 = arith.select %729, %727, %731 : vector<28x32xi1>, vector<28x32xf32>
    %733 = vector.extract_strided_slice %732 {offsets = [0, 0], sizes = [14, 32], strides = [1, 1]} : vector<28x32xf32> to vector<14x32xf32>
    %734 = vector.shape_cast %733 : vector<14x32xf32> to vector<2x7x32xf32>
    %735 = vector.extract_strided_slice %605 {offsets = [0, 0], sizes = [2, 1], strides = [1, 1]} : vector<2x7xf32> to vector<2x1xf32>
    %736 = vector.extract_strided_slice %734 {offsets = [0, 0, 0], sizes = [2, 1, 32], strides = [1, 1, 1]} : vector<2x7x32xf32> to vector<2x1x32xf32>
    %737 = vector.shape_cast %736 : vector<2x1x32xf32> to vector<2x32xf32>
    %738 = vector.broadcast %735 : vector<2x1xf32> to vector<2x32xf32>
    %739 = arith.mulf %738, %737 : vector<2x32xf32>
    %740 = vector.extract_strided_slice %605 {offsets = [0, 1], sizes = [2, 1], strides = [1, 1]} : vector<2x7xf32> to vector<2x1xf32>
    %741 = vector.extract_strided_slice %734 {offsets = [0, 1, 0], sizes = [2, 1, 32], strides = [1, 1, 1]} : vector<2x7x32xf32> to vector<2x1x32xf32>
    %742 = vector.shape_cast %741 : vector<2x1x32xf32> to vector<2x32xf32>
    %743 = vector.broadcast %740 : vector<2x1xf32> to vector<2x32xf32>
    %744 = arith.mulf %743, %742 : vector<2x32xf32>
    %745 = arith.addf %739, %744 : vector<2x32xf32>
    %746 = vector.extract_strided_slice %605 {offsets = [0, 2], sizes = [2, 1], strides = [1, 1]} : vector<2x7xf32> to vector<2x1xf32>
    %747 = vector.extract_strided_slice %734 {offsets = [0, 2, 0], sizes = [2, 1, 32], strides = [1, 1, 1]} : vector<2x7x32xf32> to vector<2x1x32xf32>
    %748 = vector.shape_cast %747 : vector<2x1x32xf32> to vector<2x32xf32>
    %749 = vector.broadcast %746 : vector<2x1xf32> to vector<2x32xf32>
    %750 = arith.mulf %749, %748 : vector<2x32xf32>
    %751 = arith.addf %745, %750 : vector<2x32xf32>
    %752 = vector.extract_strided_slice %605 {offsets = [0, 3], sizes = [2, 1], strides = [1, 1]} : vector<2x7xf32> to vector<2x1xf32>
    %753 = vector.extract_strided_slice %734 {offsets = [0, 3, 0], sizes = [2, 1, 32], strides = [1, 1, 1]} : vector<2x7x32xf32> to vector<2x1x32xf32>
    %754 = vector.shape_cast %753 : vector<2x1x32xf32> to vector<2x32xf32>
    %755 = vector.broadcast %752 : vector<2x1xf32> to vector<2x32xf32>
    %756 = arith.mulf %755, %754 : vector<2x32xf32>
    %757 = arith.addf %751, %756 : vector<2x32xf32>
    %758 = vector.extract_strided_slice %605 {offsets = [0, 4], sizes = [2, 1], strides = [1, 1]} : vector<2x7xf32> to vector<2x1xf32>
    %759 = vector.extract_strided_slice %734 {offsets = [0, 4, 0], sizes = [2, 1, 32], strides = [1, 1, 1]} : vector<2x7x32xf32> to vector<2x1x32xf32>
    %760 = vector.shape_cast %759 : vector<2x1x32xf32> to vector<2x32xf32>
    %761 = vector.broadcast %758 : vector<2x1xf32> to vector<2x32xf32>
    %762 = arith.mulf %761, %760 : vector<2x32xf32>
    %763 = arith.addf %757, %762 : vector<2x32xf32>
    %764 = vector.extract_strided_slice %605 {offsets = [0, 5], sizes = [2, 1], strides = [1, 1]} : vector<2x7xf32> to vector<2x1xf32>
    %765 = vector.extract_strided_slice %734 {offsets = [0, 5, 0], sizes = [2, 1, 32], strides = [1, 1, 1]} : vector<2x7x32xf32> to vector<2x1x32xf32>
    %766 = vector.shape_cast %765 : vector<2x1x32xf32> to vector<2x32xf32>
    %767 = vector.broadcast %764 : vector<2x1xf32> to vector<2x32xf32>
    %768 = arith.mulf %767, %766 : vector<2x32xf32>
    %769 = arith.addf %763, %768 : vector<2x32xf32>
    %770 = vector.extract_strided_slice %605 {offsets = [0, 6], sizes = [2, 1], strides = [1, 1]} : vector<2x7xf32> to vector<2x1xf32>
    %771 = vector.extract_strided_slice %734 {offsets = [0, 6, 0], sizes = [2, 1, 32], strides = [1, 1, 1]} : vector<2x7x32xf32> to vector<2x1x32xf32>
    %772 = vector.shape_cast %771 : vector<2x1x32xf32> to vector<2x32xf32>
    %773 = vector.broadcast %770 : vector<2x1xf32> to vector<2x32xf32>
    %774 = arith.mulf %773, %772 : vector<2x32xf32>
    %775 = arith.addf %769, %774 : vector<2x32xf32>
    %776 = vector.shape_cast %594 : vector<2x4xf32> to vector<2x4x1xf32>
    %777 = vector.shape_cast %775 : vector<2x32xf32> to vector<2x1x32xf32>
    %778 = vector.broadcast %776 : vector<2x4x1xf32> to vector<2x4x32xf32>
    %779 = vector.broadcast %777 : vector<2x1x32xf32> to vector<2x4x32xf32>
    %780 = arith.mulf %778, %779 : vector<2x4x32xf32>
    %781 = arith.addf %533, %780 : vector<2x4x32xf32>
    %782 = vector.extract_strided_slice %732 {offsets = [14, 0], sizes = [14, 32], strides = [1, 1]} : vector<28x32xf32> to vector<14x32xf32>
    %783 = vector.shape_cast %782 : vector<14x32xf32> to vector<2x7x32xf32>
    %784 = vector.extract_strided_slice %605 {offsets = [0, 0], sizes = [2, 1], strides = [1, 1]} : vector<2x7xf32> to vector<2x1xf32>
    %785 = vector.extract_strided_slice %783 {offsets = [0, 0, 0], sizes = [2, 1, 32], strides = [1, 1, 1]} : vector<2x7x32xf32> to vector<2x1x32xf32>
    %786 = vector.shape_cast %785 : vector<2x1x32xf32> to vector<2x32xf32>
    %787 = vector.broadcast %784 : vector<2x1xf32> to vector<2x32xf32>
    %788 = arith.mulf %787, %786 : vector<2x32xf32>
    %789 = vector.extract_strided_slice %605 {offsets = [0, 1], sizes = [2, 1], strides = [1, 1]} : vector<2x7xf32> to vector<2x1xf32>
    %790 = vector.extract_strided_slice %783 {offsets = [0, 1, 0], sizes = [2, 1, 32], strides = [1, 1, 1]} : vector<2x7x32xf32> to vector<2x1x32xf32>
    %791 = vector.shape_cast %790 : vector<2x1x32xf32> to vector<2x32xf32>
    %792 = vector.broadcast %789 : vector<2x1xf32> to vector<2x32xf32>
    %793 = arith.mulf %792, %791 : vector<2x32xf32>
    %794 = arith.addf %788, %793 : vector<2x32xf32>
    %795 = vector.extract_strided_slice %605 {offsets = [0, 2], sizes = [2, 1], strides = [1, 1]} : vector<2x7xf32> to vector<2x1xf32>
    %796 = vector.extract_strided_slice %783 {offsets = [0, 2, 0], sizes = [2, 1, 32], strides = [1, 1, 1]} : vector<2x7x32xf32> to vector<2x1x32xf32>
    %797 = vector.shape_cast %796 : vector<2x1x32xf32> to vector<2x32xf32>
    %798 = vector.broadcast %795 : vector<2x1xf32> to vector<2x32xf32>
    %799 = arith.mulf %798, %797 : vector<2x32xf32>
    %800 = arith.addf %794, %799 : vector<2x32xf32>
    %801 = vector.extract_strided_slice %605 {offsets = [0, 3], sizes = [2, 1], strides = [1, 1]} : vector<2x7xf32> to vector<2x1xf32>
    %802 = vector.extract_strided_slice %783 {offsets = [0, 3, 0], sizes = [2, 1, 32], strides = [1, 1, 1]} : vector<2x7x32xf32> to vector<2x1x32xf32>
    %803 = vector.shape_cast %802 : vector<2x1x32xf32> to vector<2x32xf32>
    %804 = vector.broadcast %801 : vector<2x1xf32> to vector<2x32xf32>
    %805 = arith.mulf %804, %803 : vector<2x32xf32>
    %806 = arith.addf %800, %805 : vector<2x32xf32>
    %807 = vector.extract_strided_slice %605 {offsets = [0, 4], sizes = [2, 1], strides = [1, 1]} : vector<2x7xf32> to vector<2x1xf32>
    %808 = vector.extract_strided_slice %783 {offsets = [0, 4, 0], sizes = [2, 1, 32], strides = [1, 1, 1]} : vector<2x7x32xf32> to vector<2x1x32xf32>
    %809 = vector.shape_cast %808 : vector<2x1x32xf32> to vector<2x32xf32>
    %810 = vector.broadcast %807 : vector<2x1xf32> to vector<2x32xf32>
    %811 = arith.mulf %810, %809 : vector<2x32xf32>
    %812 = arith.addf %806, %811 : vector<2x32xf32>
    %813 = vector.extract_strided_slice %605 {offsets = [0, 5], sizes = [2, 1], strides = [1, 1]} : vector<2x7xf32> to vector<2x1xf32>
    %814 = vector.extract_strided_slice %783 {offsets = [0, 5, 0], sizes = [2, 1, 32], strides = [1, 1, 1]} : vector<2x7x32xf32> to vector<2x1x32xf32>
    %815 = vector.shape_cast %814 : vector<2x1x32xf32> to vector<2x32xf32>
    %816 = vector.broadcast %813 : vector<2x1xf32> to vector<2x32xf32>
    %817 = arith.mulf %816, %815 : vector<2x32xf32>
    %818 = arith.addf %812, %817 : vector<2x32xf32>
    %819 = vector.extract_strided_slice %605 {offsets = [0, 6], sizes = [2, 1], strides = [1, 1]} : vector<2x7xf32> to vector<2x1xf32>
    %820 = vector.extract_strided_slice %783 {offsets = [0, 6, 0], sizes = [2, 1, 32], strides = [1, 1, 1]} : vector<2x7x32xf32> to vector<2x1x32xf32>
    %821 = vector.shape_cast %820 : vector<2x1x32xf32> to vector<2x32xf32>
    %822 = vector.broadcast %819 : vector<2x1xf32> to vector<2x32xf32>
    %823 = arith.mulf %822, %821 : vector<2x32xf32>
    %824 = arith.addf %818, %823 : vector<2x32xf32>
    %825 = vector.shape_cast %594 : vector<2x4xf32> to vector<2x4x1xf32>
    %826 = vector.shape_cast %824 : vector<2x32xf32> to vector<2x1x32xf32>
    %827 = vector.broadcast %825 : vector<2x4x1xf32> to vector<2x4x32xf32>
    %828 = vector.broadcast %826 : vector<2x1x32xf32> to vector<2x4x32xf32>
    %829 = arith.mulf %827, %828 : vector<2x4x32xf32>
    %830 = arith.addf %582, %829 : vector<2x4x32xf32>
    %831 = arith.extui %588 : vector<2x1xi1> to vector<2x1xi32>
    %832 = arith.sitofp %831 : vector<2x1xi32> to vector<2x1xf32>
    %833 = arith.addf %585, %594 : vector<2x4xf32>
    %834 = vector.extract_strided_slice %3 {offsets = [0, 3], sizes = [2, 1], strides = [1, 1]} : vector<2x4xi32> to vector<2x1xi32>
    %c-1_i32_103 = arith.constant -1 : i32
    %835 = vector.broadcast %c-1_i32_103 : i32 to vector<2x1xi32>
    %836 = arith.cmpi ne, %834, %835 : vector<2x1xi32>
    %837 = vector.broadcast %834 : vector<2x1xi32> to vector<2x4xi32>
    %838 = arith.cmpi eq, %837, %30 : vector<2x4xi32>
    %839 = vector.broadcast %836 : vector<2x1xi1> to vector<2x4xi1>
    %840 = arith.andi %838, %839 : vector<2x4xi1>
    %841 = arith.extui %840 : vector<2x4xi1> to vector<2x4xi32>
    %842 = arith.sitofp %841 : vector<2x4xi32> to vector<2x4xf32>
    %843 = vector.extract_strided_slice %5 {offsets = [3, 0, 0], sizes = [1, 2, 7], strides = [1, 1, 1]} : vector<4x2x7xi32> to vector<1x2x7xi32>
    %844 = vector.shape_cast %843 : vector<1x2x7xi32> to vector<2x7xi32>
    %c-1_i32_104 = arith.constant -1 : i32
    %845 = vector.broadcast %c-1_i32_104 : i32 to vector<2x7xi32>
    %846 = arith.cmpi ne, %844, %845 : vector<2x7xi32>
    %847 = vector.broadcast %834 : vector<2x1xi32> to vector<2x7xi32>
    %848 = arith.cmpi ne, %844, %847 : vector<2x7xi32>
    %849 = arith.andi %846, %848 : vector<2x7xi1>
    %850 = vector.broadcast %836 : vector<2x1xi1> to vector<2x7xi1>
    %851 = arith.andi %849, %850 : vector<2x7xi1>
    %852 = arith.extui %851 : vector<2x7xi1> to vector<2x7xi32>
    %853 = arith.sitofp %852 : vector<2x7xi32> to vector<2x7xf32>
    %854 = vector.shape_cast %844 : vector<2x7xi32> to vector<2x7x1xi32>
    %855 = vector.broadcast %854 : vector<2x7x1xi32> to vector<2x7x4xi32>
    %856 = arith.cmpi eq, %855, %31 : vector<2x7x4xi32>
    %857 = arith.extui %856 : vector<2x7x4xi1> to vector<2x7x4xi32>
    %858 = arith.sitofp %857 : vector<2x7x4xi32> to vector<2x7x4xf32>
    %859 = vector.shape_cast %853 : vector<2x7xf32> to vector<2x7x1xf32>
    %860 = vector.broadcast %859 : vector<2x7x1xf32> to vector<2x7x4xf32>
    %861 = arith.mulf %858, %860 : vector<2x7x4xf32>
    %862 = vector.extract_strided_slice %842 {offsets = [0, 0], sizes = [2, 1], strides = [1, 1]} : vector<2x4xf32> to vector<2x1xf32>
    %863 = vector.extract_strided_slice %781 {offsets = [0, 0, 0], sizes = [2, 1, 32], strides = [1, 1, 1]} : vector<2x4x32xf32> to vector<2x1x32xf32>
    %864 = vector.shape_cast %863 : vector<2x1x32xf32> to vector<2x32xf32>
    %865 = vector.broadcast %862 : vector<2x1xf32> to vector<2x32xf32>
    %866 = arith.mulf %865, %864 : vector<2x32xf32>
    %867 = vector.extract_strided_slice %842 {offsets = [0, 1], sizes = [2, 1], strides = [1, 1]} : vector<2x4xf32> to vector<2x1xf32>
    %868 = vector.extract_strided_slice %781 {offsets = [0, 1, 0], sizes = [2, 1, 32], strides = [1, 1, 1]} : vector<2x4x32xf32> to vector<2x1x32xf32>
    %869 = vector.shape_cast %868 : vector<2x1x32xf32> to vector<2x32xf32>
    %870 = vector.broadcast %867 : vector<2x1xf32> to vector<2x32xf32>
    %871 = arith.mulf %870, %869 : vector<2x32xf32>
    %872 = arith.addf %866, %871 : vector<2x32xf32>
    %873 = vector.extract_strided_slice %842 {offsets = [0, 2], sizes = [2, 1], strides = [1, 1]} : vector<2x4xf32> to vector<2x1xf32>
    %874 = vector.extract_strided_slice %781 {offsets = [0, 2, 0], sizes = [2, 1, 32], strides = [1, 1, 1]} : vector<2x4x32xf32> to vector<2x1x32xf32>
    %875 = vector.shape_cast %874 : vector<2x1x32xf32> to vector<2x32xf32>
    %876 = vector.broadcast %873 : vector<2x1xf32> to vector<2x32xf32>
    %877 = arith.mulf %876, %875 : vector<2x32xf32>
    %878 = arith.addf %872, %877 : vector<2x32xf32>
    %879 = vector.extract_strided_slice %842 {offsets = [0, 3], sizes = [2, 1], strides = [1, 1]} : vector<2x4xf32> to vector<2x1xf32>
    %880 = vector.extract_strided_slice %781 {offsets = [0, 3, 0], sizes = [2, 1, 32], strides = [1, 1, 1]} : vector<2x4x32xf32> to vector<2x1x32xf32>
    %881 = vector.shape_cast %880 : vector<2x1x32xf32> to vector<2x32xf32>
    %882 = vector.broadcast %879 : vector<2x1xf32> to vector<2x32xf32>
    %883 = arith.mulf %882, %881 : vector<2x32xf32>
    %884 = arith.addf %878, %883 : vector<2x32xf32>
    %885 = vector.extract_strided_slice %861 {offsets = [0, 0, 0], sizes = [2, 7, 1], strides = [1, 1, 1]} : vector<2x7x4xf32> to vector<2x7x1xf32>
    %886 = vector.extract_strided_slice %781 {offsets = [0, 0, 0], sizes = [2, 1, 32], strides = [1, 1, 1]} : vector<2x4x32xf32> to vector<2x1x32xf32>
    %887 = vector.broadcast %885 : vector<2x7x1xf32> to vector<2x7x32xf32>
    %888 = vector.broadcast %886 : vector<2x1x32xf32> to vector<2x7x32xf32>
    %889 = arith.mulf %887, %888 : vector<2x7x32xf32>
    %890 = vector.extract_strided_slice %861 {offsets = [0, 0, 1], sizes = [2, 7, 1], strides = [1, 1, 1]} : vector<2x7x4xf32> to vector<2x7x1xf32>
    %891 = vector.extract_strided_slice %781 {offsets = [0, 1, 0], sizes = [2, 1, 32], strides = [1, 1, 1]} : vector<2x4x32xf32> to vector<2x1x32xf32>
    %892 = vector.broadcast %890 : vector<2x7x1xf32> to vector<2x7x32xf32>
    %893 = vector.broadcast %891 : vector<2x1x32xf32> to vector<2x7x32xf32>
    %894 = arith.mulf %892, %893 : vector<2x7x32xf32>
    %895 = arith.addf %889, %894 : vector<2x7x32xf32>
    %896 = vector.extract_strided_slice %861 {offsets = [0, 0, 2], sizes = [2, 7, 1], strides = [1, 1, 1]} : vector<2x7x4xf32> to vector<2x7x1xf32>
    %897 = vector.extract_strided_slice %781 {offsets = [0, 2, 0], sizes = [2, 1, 32], strides = [1, 1, 1]} : vector<2x4x32xf32> to vector<2x1x32xf32>
    %898 = vector.broadcast %896 : vector<2x7x1xf32> to vector<2x7x32xf32>
    %899 = vector.broadcast %897 : vector<2x1x32xf32> to vector<2x7x32xf32>
    %900 = arith.mulf %898, %899 : vector<2x7x32xf32>
    %901 = arith.addf %895, %900 : vector<2x7x32xf32>
    %902 = vector.extract_strided_slice %861 {offsets = [0, 0, 3], sizes = [2, 7, 1], strides = [1, 1, 1]} : vector<2x7x4xf32> to vector<2x7x1xf32>
    %903 = vector.extract_strided_slice %781 {offsets = [0, 3, 0], sizes = [2, 1, 32], strides = [1, 1, 1]} : vector<2x4x32xf32> to vector<2x1x32xf32>
    %904 = vector.broadcast %902 : vector<2x7x1xf32> to vector<2x7x32xf32>
    %905 = vector.broadcast %903 : vector<2x1x32xf32> to vector<2x7x32xf32>
    %906 = arith.mulf %904, %905 : vector<2x7x32xf32>
    %907 = arith.addf %901, %906 : vector<2x7x32xf32>
    %908 = vector.shape_cast %884 : vector<2x32xf32> to vector<2x1x32xf32>
    %909 = vector.broadcast %908 : vector<2x1x32xf32> to vector<2x7x32xf32>
    %910 = arith.mulf %909, %907 : vector<2x7x32xf32>
    %911 = vector.shape_cast %910 : vector<2x7x32xf32> to vector<14x32xf32>
    %912 = vector.extract_strided_slice %842 {offsets = [0, 0], sizes = [2, 1], strides = [1, 1]} : vector<2x4xf32> to vector<2x1xf32>
    %913 = vector.extract_strided_slice %830 {offsets = [0, 0, 0], sizes = [2, 1, 32], strides = [1, 1, 1]} : vector<2x4x32xf32> to vector<2x1x32xf32>
    %914 = vector.shape_cast %913 : vector<2x1x32xf32> to vector<2x32xf32>
    %915 = vector.broadcast %912 : vector<2x1xf32> to vector<2x32xf32>
    %916 = arith.mulf %915, %914 : vector<2x32xf32>
    %917 = vector.extract_strided_slice %842 {offsets = [0, 1], sizes = [2, 1], strides = [1, 1]} : vector<2x4xf32> to vector<2x1xf32>
    %918 = vector.extract_strided_slice %830 {offsets = [0, 1, 0], sizes = [2, 1, 32], strides = [1, 1, 1]} : vector<2x4x32xf32> to vector<2x1x32xf32>
    %919 = vector.shape_cast %918 : vector<2x1x32xf32> to vector<2x32xf32>
    %920 = vector.broadcast %917 : vector<2x1xf32> to vector<2x32xf32>
    %921 = arith.mulf %920, %919 : vector<2x32xf32>
    %922 = arith.addf %916, %921 : vector<2x32xf32>
    %923 = vector.extract_strided_slice %842 {offsets = [0, 2], sizes = [2, 1], strides = [1, 1]} : vector<2x4xf32> to vector<2x1xf32>
    %924 = vector.extract_strided_slice %830 {offsets = [0, 2, 0], sizes = [2, 1, 32], strides = [1, 1, 1]} : vector<2x4x32xf32> to vector<2x1x32xf32>
    %925 = vector.shape_cast %924 : vector<2x1x32xf32> to vector<2x32xf32>
    %926 = vector.broadcast %923 : vector<2x1xf32> to vector<2x32xf32>
    %927 = arith.mulf %926, %925 : vector<2x32xf32>
    %928 = arith.addf %922, %927 : vector<2x32xf32>
    %929 = vector.extract_strided_slice %842 {offsets = [0, 3], sizes = [2, 1], strides = [1, 1]} : vector<2x4xf32> to vector<2x1xf32>
    %930 = vector.extract_strided_slice %830 {offsets = [0, 3, 0], sizes = [2, 1, 32], strides = [1, 1, 1]} : vector<2x4x32xf32> to vector<2x1x32xf32>
    %931 = vector.shape_cast %930 : vector<2x1x32xf32> to vector<2x32xf32>
    %932 = vector.broadcast %929 : vector<2x1xf32> to vector<2x32xf32>
    %933 = arith.mulf %932, %931 : vector<2x32xf32>
    %934 = arith.addf %928, %933 : vector<2x32xf32>
    %935 = vector.extract_strided_slice %861 {offsets = [0, 0, 0], sizes = [2, 7, 1], strides = [1, 1, 1]} : vector<2x7x4xf32> to vector<2x7x1xf32>
    %936 = vector.extract_strided_slice %830 {offsets = [0, 0, 0], sizes = [2, 1, 32], strides = [1, 1, 1]} : vector<2x4x32xf32> to vector<2x1x32xf32>
    %937 = vector.broadcast %935 : vector<2x7x1xf32> to vector<2x7x32xf32>
    %938 = vector.broadcast %936 : vector<2x1x32xf32> to vector<2x7x32xf32>
    %939 = arith.mulf %937, %938 : vector<2x7x32xf32>
    %940 = vector.extract_strided_slice %861 {offsets = [0, 0, 1], sizes = [2, 7, 1], strides = [1, 1, 1]} : vector<2x7x4xf32> to vector<2x7x1xf32>
    %941 = vector.extract_strided_slice %830 {offsets = [0, 1, 0], sizes = [2, 1, 32], strides = [1, 1, 1]} : vector<2x4x32xf32> to vector<2x1x32xf32>
    %942 = vector.broadcast %940 : vector<2x7x1xf32> to vector<2x7x32xf32>
    %943 = vector.broadcast %941 : vector<2x1x32xf32> to vector<2x7x32xf32>
    %944 = arith.mulf %942, %943 : vector<2x7x32xf32>
    %945 = arith.addf %939, %944 : vector<2x7x32xf32>
    %946 = vector.extract_strided_slice %861 {offsets = [0, 0, 2], sizes = [2, 7, 1], strides = [1, 1, 1]} : vector<2x7x4xf32> to vector<2x7x1xf32>
    %947 = vector.extract_strided_slice %830 {offsets = [0, 2, 0], sizes = [2, 1, 32], strides = [1, 1, 1]} : vector<2x4x32xf32> to vector<2x1x32xf32>
    %948 = vector.broadcast %946 : vector<2x7x1xf32> to vector<2x7x32xf32>
    %949 = vector.broadcast %947 : vector<2x1x32xf32> to vector<2x7x32xf32>
    %950 = arith.mulf %948, %949 : vector<2x7x32xf32>
    %951 = arith.addf %945, %950 : vector<2x7x32xf32>
    %952 = vector.extract_strided_slice %861 {offsets = [0, 0, 3], sizes = [2, 7, 1], strides = [1, 1, 1]} : vector<2x7x4xf32> to vector<2x7x1xf32>
    %953 = vector.extract_strided_slice %830 {offsets = [0, 3, 0], sizes = [2, 1, 32], strides = [1, 1, 1]} : vector<2x4x32xf32> to vector<2x1x32xf32>
    %954 = vector.broadcast %952 : vector<2x7x1xf32> to vector<2x7x32xf32>
    %955 = vector.broadcast %953 : vector<2x1x32xf32> to vector<2x7x32xf32>
    %956 = arith.mulf %954, %955 : vector<2x7x32xf32>
    %957 = arith.addf %951, %956 : vector<2x7x32xf32>
    %958 = vector.shape_cast %934 : vector<2x32xf32> to vector<2x1x32xf32>
    %959 = vector.broadcast %958 : vector<2x1x32xf32> to vector<2x7x32xf32>
    %960 = arith.mulf %959, %957 : vector<2x7x32xf32>
    %961 = vector.shape_cast %960 : vector<2x7x32xf32> to vector<14x32xf32>
    %962 = tpu.concatenate %911, %961 in 0 : vector<14x32xf32>, vector<14x32xf32> -> vector<28x32xf32>
    %963 = arith.truncf %962 : vector<28x32xf32> to vector<28x32xbf16>
    %cst_105 = arith.constant dense<0.000000e+00> : vector<28x32xf32>
    %964 = tpu.matmul %963, %7, %cst_105 {dimension_numbers = #tpu.dot_dimension_numbers<[1], [0], [0], [1], [0, 0, 1, 1], [], []>} : vector<28x32xbf16>, vector<32x32xbf16>, vector<28x32xf32> -> vector<28x32xf32>
    %965 = vector.broadcast %9 : vector<1x32xf32> to vector<28x32xf32>
    %966 = arith.addf %964, %965 : vector<28x32xf32>
    %cst_106 = arith.constant 0.000000e+00 : f32
    %967 = vector.broadcast %cst_106 : f32 to vector<28x32xf32>
    %968 = arith.cmpf ogt, %966, %967 : vector<28x32xf32>
    %cst_107 = arith.constant 0.00999999977 : f32
    %969 = vector.broadcast %cst_107 : f32 to vector<28x32xf32>
    %970 = arith.mulf %969, %966 : vector<28x32xf32>
    %971 = arith.select %968, %966, %970 : vector<28x32xi1>, vector<28x32xf32>
    %972 = arith.truncf %971 : vector<28x32xf32> to vector<28x32xbf16>
    %cst_108 = arith.constant dense<0.000000e+00> : vector<28x32xf32>
    %973 = tpu.matmul %972, %11, %cst_108 {dimension_numbers = #tpu.dot_dimension_numbers<[1], [0], [0], [1], [0, 0, 1, 1], [], []>} : vector<28x32xbf16>, vector<32x32xbf16>, vector<28x32xf32> -> vector<28x32xf32>
    %974 = vector.broadcast %13 : vector<1x32xf32> to vector<28x32xf32>
    %975 = arith.addf %973, %974 : vector<28x32xf32>
    %cst_109 = arith.constant 0.000000e+00 : f32
    %976 = vector.broadcast %cst_109 : f32 to vector<28x32xf32>
    %977 = arith.cmpf ogt, %975, %976 : vector<28x32xf32>
    %cst_110 = arith.constant 0.00999999977 : f32
    %978 = vector.broadcast %cst_110 : f32 to vector<28x32xf32>
    %979 = arith.mulf %978, %975 : vector<28x32xf32>
    %980 = arith.select %977, %975, %979 : vector<28x32xi1>, vector<28x32xf32>
    %981 = vector.extract_strided_slice %980 {offsets = [0, 0], sizes = [14, 32], strides = [1, 1]} : vector<28x32xf32> to vector<14x32xf32>
    %982 = vector.shape_cast %981 : vector<14x32xf32> to vector<2x7x32xf32>
    %983 = vector.extract_strided_slice %853 {offsets = [0, 0], sizes = [2, 1], strides = [1, 1]} : vector<2x7xf32> to vector<2x1xf32>
    %984 = vector.extract_strided_slice %982 {offsets = [0, 0, 0], sizes = [2, 1, 32], strides = [1, 1, 1]} : vector<2x7x32xf32> to vector<2x1x32xf32>
    %985 = vector.shape_cast %984 : vector<2x1x32xf32> to vector<2x32xf32>
    %986 = vector.broadcast %983 : vector<2x1xf32> to vector<2x32xf32>
    %987 = arith.mulf %986, %985 : vector<2x32xf32>
    %988 = vector.extract_strided_slice %853 {offsets = [0, 1], sizes = [2, 1], strides = [1, 1]} : vector<2x7xf32> to vector<2x1xf32>
    %989 = vector.extract_strided_slice %982 {offsets = [0, 1, 0], sizes = [2, 1, 32], strides = [1, 1, 1]} : vector<2x7x32xf32> to vector<2x1x32xf32>
    %990 = vector.shape_cast %989 : vector<2x1x32xf32> to vector<2x32xf32>
    %991 = vector.broadcast %988 : vector<2x1xf32> to vector<2x32xf32>
    %992 = arith.mulf %991, %990 : vector<2x32xf32>
    %993 = arith.addf %987, %992 : vector<2x32xf32>
    %994 = vector.extract_strided_slice %853 {offsets = [0, 2], sizes = [2, 1], strides = [1, 1]} : vector<2x7xf32> to vector<2x1xf32>
    %995 = vector.extract_strided_slice %982 {offsets = [0, 2, 0], sizes = [2, 1, 32], strides = [1, 1, 1]} : vector<2x7x32xf32> to vector<2x1x32xf32>
    %996 = vector.shape_cast %995 : vector<2x1x32xf32> to vector<2x32xf32>
    %997 = vector.broadcast %994 : vector<2x1xf32> to vector<2x32xf32>
    %998 = arith.mulf %997, %996 : vector<2x32xf32>
    %999 = arith.addf %993, %998 : vector<2x32xf32>
    %1000 = vector.extract_strided_slice %853 {offsets = [0, 3], sizes = [2, 1], strides = [1, 1]} : vector<2x7xf32> to vector<2x1xf32>
    %1001 = vector.extract_strided_slice %982 {offsets = [0, 3, 0], sizes = [2, 1, 32], strides = [1, 1, 1]} : vector<2x7x32xf32> to vector<2x1x32xf32>
    %1002 = vector.shape_cast %1001 : vector<2x1x32xf32> to vector<2x32xf32>
    %1003 = vector.broadcast %1000 : vector<2x1xf32> to vector<2x32xf32>
    %1004 = arith.mulf %1003, %1002 : vector<2x32xf32>
    %1005 = arith.addf %999, %1004 : vector<2x32xf32>
    %1006 = vector.extract_strided_slice %853 {offsets = [0, 4], sizes = [2, 1], strides = [1, 1]} : vector<2x7xf32> to vector<2x1xf32>
    %1007 = vector.extract_strided_slice %982 {offsets = [0, 4, 0], sizes = [2, 1, 32], strides = [1, 1, 1]} : vector<2x7x32xf32> to vector<2x1x32xf32>
    %1008 = vector.shape_cast %1007 : vector<2x1x32xf32> to vector<2x32xf32>
    %1009 = vector.broadcast %1006 : vector<2x1xf32> to vector<2x32xf32>
    %1010 = arith.mulf %1009, %1008 : vector<2x32xf32>
    %1011 = arith.addf %1005, %1010 : vector<2x32xf32>
    %1012 = vector.extract_strided_slice %853 {offsets = [0, 5], sizes = [2, 1], strides = [1, 1]} : vector<2x7xf32> to vector<2x1xf32>
    %1013 = vector.extract_strided_slice %982 {offsets = [0, 5, 0], sizes = [2, 1, 32], strides = [1, 1, 1]} : vector<2x7x32xf32> to vector<2x1x32xf32>
    %1014 = vector.shape_cast %1013 : vector<2x1x32xf32> to vector<2x32xf32>
    %1015 = vector.broadcast %1012 : vector<2x1xf32> to vector<2x32xf32>
    %1016 = arith.mulf %1015, %1014 : vector<2x32xf32>
    %1017 = arith.addf %1011, %1016 : vector<2x32xf32>
    %1018 = vector.extract_strided_slice %853 {offsets = [0, 6], sizes = [2, 1], strides = [1, 1]} : vector<2x7xf32> to vector<2x1xf32>
    %1019 = vector.extract_strided_slice %982 {offsets = [0, 6, 0], sizes = [2, 1, 32], strides = [1, 1, 1]} : vector<2x7x32xf32> to vector<2x1x32xf32>
    %1020 = vector.shape_cast %1019 : vector<2x1x32xf32> to vector<2x32xf32>
    %1021 = vector.broadcast %1018 : vector<2x1xf32> to vector<2x32xf32>
    %1022 = arith.mulf %1021, %1020 : vector<2x32xf32>
    %1023 = arith.addf %1017, %1022 : vector<2x32xf32>
    %1024 = vector.shape_cast %842 : vector<2x4xf32> to vector<2x4x1xf32>
    %1025 = vector.shape_cast %1023 : vector<2x32xf32> to vector<2x1x32xf32>
    %1026 = vector.broadcast %1024 : vector<2x4x1xf32> to vector<2x4x32xf32>
    %1027 = vector.broadcast %1025 : vector<2x1x32xf32> to vector<2x4x32xf32>
    %1028 = arith.mulf %1026, %1027 : vector<2x4x32xf32>
    %1029 = arith.addf %781, %1028 : vector<2x4x32xf32>
    %1030 = vector.extract_strided_slice %980 {offsets = [14, 0], sizes = [14, 32], strides = [1, 1]} : vector<28x32xf32> to vector<14x32xf32>
    %1031 = vector.shape_cast %1030 : vector<14x32xf32> to vector<2x7x32xf32>
    %1032 = vector.extract_strided_slice %853 {offsets = [0, 0], sizes = [2, 1], strides = [1, 1]} : vector<2x7xf32> to vector<2x1xf32>
    %1033 = vector.extract_strided_slice %1031 {offsets = [0, 0, 0], sizes = [2, 1, 32], strides = [1, 1, 1]} : vector<2x7x32xf32> to vector<2x1x32xf32>
    %1034 = vector.shape_cast %1033 : vector<2x1x32xf32> to vector<2x32xf32>
    %1035 = vector.broadcast %1032 : vector<2x1xf32> to vector<2x32xf32>
    %1036 = arith.mulf %1035, %1034 : vector<2x32xf32>
    %1037 = vector.extract_strided_slice %853 {offsets = [0, 1], sizes = [2, 1], strides = [1, 1]} : vector<2x7xf32> to vector<2x1xf32>
    %1038 = vector.extract_strided_slice %1031 {offsets = [0, 1, 0], sizes = [2, 1, 32], strides = [1, 1, 1]} : vector<2x7x32xf32> to vector<2x1x32xf32>
    %1039 = vector.shape_cast %1038 : vector<2x1x32xf32> to vector<2x32xf32>
    %1040 = vector.broadcast %1037 : vector<2x1xf32> to vector<2x32xf32>
    %1041 = arith.mulf %1040, %1039 : vector<2x32xf32>
    %1042 = arith.addf %1036, %1041 : vector<2x32xf32>
    %1043 = vector.extract_strided_slice %853 {offsets = [0, 2], sizes = [2, 1], strides = [1, 1]} : vector<2x7xf32> to vector<2x1xf32>
    %1044 = vector.extract_strided_slice %1031 {offsets = [0, 2, 0], sizes = [2, 1, 32], strides = [1, 1, 1]} : vector<2x7x32xf32> to vector<2x1x32xf32>
    %1045 = vector.shape_cast %1044 : vector<2x1x32xf32> to vector<2x32xf32>
    %1046 = vector.broadcast %1043 : vector<2x1xf32> to vector<2x32xf32>
    %1047 = arith.mulf %1046, %1045 : vector<2x32xf32>
    %1048 = arith.addf %1042, %1047 : vector<2x32xf32>
    %1049 = vector.extract_strided_slice %853 {offsets = [0, 3], sizes = [2, 1], strides = [1, 1]} : vector<2x7xf32> to vector<2x1xf32>
    %1050 = vector.extract_strided_slice %1031 {offsets = [0, 3, 0], sizes = [2, 1, 32], strides = [1, 1, 1]} : vector<2x7x32xf32> to vector<2x1x32xf32>
    %1051 = vector.shape_cast %1050 : vector<2x1x32xf32> to vector<2x32xf32>
    %1052 = vector.broadcast %1049 : vector<2x1xf32> to vector<2x32xf32>
    %1053 = arith.mulf %1052, %1051 : vector<2x32xf32>
    %1054 = arith.addf %1048, %1053 : vector<2x32xf32>
    %1055 = vector.extract_strided_slice %853 {offsets = [0, 4], sizes = [2, 1], strides = [1, 1]} : vector<2x7xf32> to vector<2x1xf32>
    %1056 = vector.extract_strided_slice %1031 {offsets = [0, 4, 0], sizes = [2, 1, 32], strides = [1, 1, 1]} : vector<2x7x32xf32> to vector<2x1x32xf32>
    %1057 = vector.shape_cast %1056 : vector<2x1x32xf32> to vector<2x32xf32>
    %1058 = vector.broadcast %1055 : vector<2x1xf32> to vector<2x32xf32>
    %1059 = arith.mulf %1058, %1057 : vector<2x32xf32>
    %1060 = arith.addf %1054, %1059 : vector<2x32xf32>
    %1061 = vector.extract_strided_slice %853 {offsets = [0, 5], sizes = [2, 1], strides = [1, 1]} : vector<2x7xf32> to vector<2x1xf32>
    %1062 = vector.extract_strided_slice %1031 {offsets = [0, 5, 0], sizes = [2, 1, 32], strides = [1, 1, 1]} : vector<2x7x32xf32> to vector<2x1x32xf32>
    %1063 = vector.shape_cast %1062 : vector<2x1x32xf32> to vector<2x32xf32>
    %1064 = vector.broadcast %1061 : vector<2x1xf32> to vector<2x32xf32>
    %1065 = arith.mulf %1064, %1063 : vector<2x32xf32>
    %1066 = arith.addf %1060, %1065 : vector<2x32xf32>
    %1067 = vector.extract_strided_slice %853 {offsets = [0, 6], sizes = [2, 1], strides = [1, 1]} : vector<2x7xf32> to vector<2x1xf32>
    %1068 = vector.extract_strided_slice %1031 {offsets = [0, 6, 0], sizes = [2, 1, 32], strides = [1, 1, 1]} : vector<2x7x32xf32> to vector<2x1x32xf32>
    %1069 = vector.shape_cast %1068 : vector<2x1x32xf32> to vector<2x32xf32>
    %1070 = vector.broadcast %1067 : vector<2x1xf32> to vector<2x32xf32>
    %1071 = arith.mulf %1070, %1069 : vector<2x32xf32>
    %1072 = arith.addf %1066, %1071 : vector<2x32xf32>
    %1073 = vector.shape_cast %842 : vector<2x4xf32> to vector<2x4x1xf32>
    %1074 = vector.shape_cast %1072 : vector<2x32xf32> to vector<2x1x32xf32>
    %1075 = vector.broadcast %1073 : vector<2x4x1xf32> to vector<2x4x32xf32>
    %1076 = vector.broadcast %1074 : vector<2x1x32xf32> to vector<2x4x32xf32>
    %1077 = arith.mulf %1075, %1076 : vector<2x4x32xf32>
    %1078 = arith.addf %830, %1077 : vector<2x4x32xf32>
    %1079 = arith.extui %836 : vector<2x1xi1> to vector<2x1xi32>
    %1080 = arith.sitofp %1079 : vector<2x1xi32> to vector<2x1xf32>
    %1081 = arith.addf %833, %842 : vector<2x4xf32>
    %1082 = vector.shape_cast %1029 : vector<2x4x32xf32> to vector<8x32xf32>
    %1083 = vector.shape_cast %1078 : vector<2x4x32xf32> to vector<8x32xf32>
    %1084 = tpu.concatenate %1082, %1083 in 0 : vector<8x32xf32>, vector<8x32xf32> -> vector<16x32xf32>
    %1085 = arith.truncf %1084 : vector<16x32xf32> to vector<16x32xbf16>
    %cst_111 = arith.constant dense<0.000000e+00> : vector<16x32xf32>
    %1086 = tpu.matmul %1085, %15, %cst_111 {dimension_numbers = #tpu.dot_dimension_numbers<[1], [0], [0], [1], [0, 0, 1, 1], [], []>} : vector<16x32xbf16>, vector<32x32xbf16>, vector<16x32xf32> -> vector<16x32xf32>
    %1087 = vector.broadcast %17 : vector<1x32xf32> to vector<16x32xf32>
    %1088 = arith.addf %1086, %1087 : vector<16x32xf32>
    %cst_112 = arith.constant 0.000000e+00 : f32
    %1089 = vector.broadcast %cst_112 : f32 to vector<16x32xf32>
    %1090 = arith.cmpf ogt, %1088, %1089 : vector<16x32xf32>
    %cst_113 = arith.constant 0.00999999977 : f32
    %1091 = vector.broadcast %cst_113 : f32 to vector<16x32xf32>
    %1092 = arith.mulf %1091, %1088 : vector<16x32xf32>
    %1093 = arith.select %1090, %1088, %1092 : vector<16x32xi1>, vector<16x32xf32>
    %1094 = arith.truncf %1093 : vector<16x32xf32> to vector<16x32xbf16>
    %cst_114 = arith.constant dense<0.000000e+00> : vector<16x32xf32>
    %1095 = tpu.matmul %1094, %19, %cst_114 {dimension_numbers = #tpu.dot_dimension_numbers<[1], [0], [0], [1], [0, 0, 1, 1], [], []>} : vector<16x32xbf16>, vector<32x32xbf16>, vector<16x32xf32> -> vector<16x32xf32>
    %1096 = vector.broadcast %21 : vector<1x32xf32> to vector<16x32xf32>
    %1097 = arith.addf %1095, %1096 : vector<16x32xf32>
    %cst_115 = arith.constant 0.000000e+00 : f32
    %1098 = vector.broadcast %cst_115 : f32 to vector<16x32xf32>
    %1099 = arith.cmpf ogt, %1097, %1098 : vector<16x32xf32>
    %cst_116 = arith.constant 0.00999999977 : f32
    %1100 = vector.broadcast %cst_116 : f32 to vector<16x32xf32>
    %1101 = arith.mulf %1100, %1097 : vector<16x32xf32>
    %1102 = arith.select %1099, %1097, %1101 : vector<16x32xi1>, vector<16x32xf32>
    %1103 = vector.extract_strided_slice %1102 {offsets = [0, 0], sizes = [8, 32], strides = [1, 1]} : vector<16x32xf32> to vector<8x32xf32>
    %1104 = vector.shape_cast %1103 : vector<8x32xf32> to vector<2x4x32xf32>
    %1105 = vector.extract_strided_slice %1102 {offsets = [8, 0], sizes = [8, 32], strides = [1, 1]} : vector<16x32xf32> to vector<8x32xf32>
    %1106 = vector.shape_cast %1105 : vector<8x32xf32> to vector<2x4x32xf32>
    %1107 = arith.addf %1104, %1106 : vector<2x4x32xf32>
    %1108 = vector.shape_cast %1 : vector<8x32xf32> to vector<2x4x32xf32>
    %1109 = vector.shape_cast %1081 : vector<2x4xf32> to vector<2x4x1xf32>
    %1110 = vector.broadcast %1109 : vector<2x4x1xf32> to vector<2x4x32xf32>
    %1111 = arith.mulf %1110, %1107 : vector<2x4x32xf32>
    %1112 = arith.addf %1108, %1111 : vector<2x4x32xf32>
    %1113 = vector.shape_cast %1112 : vector<2x4x32xf32> to vector<8x32xf32>
    %1114 = arith.truncf %1113 : vector<8x32xf32> to vector<8x32xbf16>
    %cst_117 = arith.constant dense<0.000000e+00> : vector<8x32xf32>
    %1115 = tpu.matmul %1114, %23, %cst_117 {dimension_numbers = #tpu.dot_dimension_numbers<[1], [0], [0], [1], [0, 0, 1, 1], [], []>} : vector<8x32xbf16>, vector<32x32xbf16>, vector<8x32xf32> -> vector<8x32xf32>
    %1116 = vector.broadcast %25 : vector<1x32xf32> to vector<8x32xf32>
    %1117 = arith.addf %1115, %1116 : vector<8x32xf32>
    %cst_118 = arith.constant 0.000000e+00 : f32
    %1118 = vector.broadcast %cst_118 : f32 to vector<8x32xf32>
    %1119 = arith.cmpf ogt, %1117, %1118 : vector<8x32xf32>
    %cst_119 = arith.constant 0.00999999977 : f32
    %1120 = vector.broadcast %cst_119 : f32 to vector<8x32xf32>
    %1121 = arith.mulf %1120, %1117 : vector<8x32xf32>
    %1122 = arith.select %1119, %1117, %1121 : vector<8x32xi1>, vector<8x32xf32>
    %1123 = arith.truncf %1122 : vector<8x32xf32> to vector<8x32xbf16>
    %cst_120 = arith.constant dense<0.000000e+00> : vector<8x32xf32>
    %1124 = tpu.matmul %1123, %27, %cst_120 {dimension_numbers = #tpu.dot_dimension_numbers<[1], [0], [0], [1], [0, 0, 1, 1], [], []>} : vector<8x32xbf16>, vector<32x32xbf16>, vector<8x32xf32> -> vector<8x32xf32>
    %1125 = vector.broadcast %29 : vector<1x32xf32> to vector<8x32xf32>
    %1126 = arith.addf %1124, %1125 : vector<8x32xf32>
    %cst_121 = arith.constant 0.000000e+00 : f32
    %1127 = vector.broadcast %cst_121 : f32 to vector<8x32xf32>
    %1128 = arith.cmpf ogt, %1126, %1127 : vector<8x32xf32>
    %cst_122 = arith.constant 0.00999999977 : f32
    %1129 = vector.broadcast %cst_122 : f32 to vector<8x32xf32>
    %1130 = arith.mulf %1129, %1126 : vector<8x32xf32>
    %1131 = arith.select %1128, %1126, %1130 : vector<8x32xi1>, vector<8x32xf32>
    %1132 = vector.shape_cast %1131 : vector<8x32xf32> to vector<2x4x32xf32>
    %1133 = vector.broadcast %336 : vector<2x1xf32> to vector<2x4xf32>
    %1134 = arith.subf %1133, %98 : vector<2x4xf32>
    %1135 = arith.mulf %1081, %1134 : vector<2x4xf32>
    %1136 = vector.extract_strided_slice %1135 {offsets = [0, 0], sizes = [2, 1], strides = [1, 1]} : vector<2x4xf32> to vector<2x1xf32>
    %1137 = vector.extract_strided_slice %1132 {offsets = [0, 0, 0], sizes = [2, 1, 32], strides = [1, 1, 1]} : vector<2x4x32xf32> to vector<2x1x32xf32>
    %1138 = vector.shape_cast %1137 : vector<2x1x32xf32> to vector<2x32xf32>
    %1139 = vector.broadcast %1136 : vector<2x1xf32> to vector<2x32xf32>
    %1140 = arith.mulf %1139, %1138 : vector<2x32xf32>
    %1141 = vector.extract_strided_slice %1135 {offsets = [0, 1], sizes = [2, 1], strides = [1, 1]} : vector<2x4xf32> to vector<2x1xf32>
    %1142 = vector.extract_strided_slice %1132 {offsets = [0, 1, 0], sizes = [2, 1, 32], strides = [1, 1, 1]} : vector<2x4x32xf32> to vector<2x1x32xf32>
    %1143 = vector.shape_cast %1142 : vector<2x1x32xf32> to vector<2x32xf32>
    %1144 = vector.broadcast %1141 : vector<2x1xf32> to vector<2x32xf32>
    %1145 = arith.mulf %1144, %1143 : vector<2x32xf32>
    %1146 = arith.addf %1140, %1145 : vector<2x32xf32>
    %1147 = vector.extract_strided_slice %1135 {offsets = [0, 2], sizes = [2, 1], strides = [1, 1]} : vector<2x4xf32> to vector<2x1xf32>
    %1148 = vector.extract_strided_slice %1132 {offsets = [0, 2, 0], sizes = [2, 1, 32], strides = [1, 1, 1]} : vector<2x4x32xf32> to vector<2x1x32xf32>
    %1149 = vector.shape_cast %1148 : vector<2x1x32xf32> to vector<2x32xf32>
    %1150 = vector.broadcast %1147 : vector<2x1xf32> to vector<2x32xf32>
    %1151 = arith.mulf %1150, %1149 : vector<2x32xf32>
    %1152 = arith.addf %1146, %1151 : vector<2x32xf32>
    %1153 = vector.extract_strided_slice %1135 {offsets = [0, 3], sizes = [2, 1], strides = [1, 1]} : vector<2x4xf32> to vector<2x1xf32>
    %1154 = vector.extract_strided_slice %1132 {offsets = [0, 3, 0], sizes = [2, 1, 32], strides = [1, 1, 1]} : vector<2x4x32xf32> to vector<2x1x32xf32>
    %1155 = vector.shape_cast %1154 : vector<2x1x32xf32> to vector<2x32xf32>
    %1156 = vector.broadcast %1153 : vector<2x1xf32> to vector<2x32xf32>
    %1157 = arith.mulf %1156, %1155 : vector<2x32xf32>
    %1158 = arith.addf %1152, %1157 : vector<2x32xf32>
    %1159 = vector.shape_cast %98 : vector<2x4xf32> to vector<2x4x1xf32>
    %1160 = vector.shape_cast %1158 : vector<2x32xf32> to vector<2x1x32xf32>
    %1161 = vector.broadcast %1159 : vector<2x4x1xf32> to vector<2x4x32xf32>
    %1162 = vector.broadcast %1160 : vector<2x1x32xf32> to vector<2x4x32xf32>
    %1163 = arith.mulf %1161, %1162 : vector<2x4x32xf32>
    %1164 = arith.addf %1112, %1163 : vector<2x4x32xf32>
    %1165 = vector.shape_cast %1164 : vector<2x4x32xf32> to vector<8x32xf32>
    %1166 = arith.truncf %1165 : vector<8x32xf32> to vector<8x32xbf16>
    %cst_123 = arith.constant dense<0.000000e+00> : vector<8x32xf32>
    %1167 = tpu.matmul %1166, %23, %cst_123 {dimension_numbers = #tpu.dot_dimension_numbers<[1], [0], [0], [1], [0, 0, 1, 1], [], []>} : vector<8x32xbf16>, vector<32x32xbf16>, vector<8x32xf32> -> vector<8x32xf32>
    %1168 = vector.broadcast %25 : vector<1x32xf32> to vector<8x32xf32>
    %1169 = arith.addf %1167, %1168 : vector<8x32xf32>
    %cst_124 = arith.constant 0.000000e+00 : f32
    %1170 = vector.broadcast %cst_124 : f32 to vector<8x32xf32>
    %1171 = arith.cmpf ogt, %1169, %1170 : vector<8x32xf32>
    %cst_125 = arith.constant 0.00999999977 : f32
    %1172 = vector.broadcast %cst_125 : f32 to vector<8x32xf32>
    %1173 = arith.mulf %1172, %1169 : vector<8x32xf32>
    %1174 = arith.select %1171, %1169, %1173 : vector<8x32xi1>, vector<8x32xf32>
    %1175 = arith.truncf %1174 : vector<8x32xf32> to vector<8x32xbf16>
    %cst_126 = arith.constant dense<0.000000e+00> : vector<8x32xf32>
    %1176 = tpu.matmul %1175, %27, %cst_126 {dimension_numbers = #tpu.dot_dimension_numbers<[1], [0], [0], [1], [0, 0, 1, 1], [], []>} : vector<8x32xbf16>, vector<32x32xbf16>, vector<8x32xf32> -> vector<8x32xf32>
    %1177 = vector.broadcast %29 : vector<1x32xf32> to vector<8x32xf32>
    %1178 = arith.addf %1176, %1177 : vector<8x32xf32>
    %cst_127 = arith.constant 0.000000e+00 : f32
    %1179 = vector.broadcast %cst_127 : f32 to vector<8x32xf32>
    %1180 = arith.cmpf ogt, %1178, %1179 : vector<8x32xf32>
    %cst_128 = arith.constant 0.00999999977 : f32
    %1181 = vector.broadcast %cst_128 : f32 to vector<8x32xf32>
    %1182 = arith.mulf %1181, %1178 : vector<8x32xf32>
    %1183 = arith.select %1180, %1178, %1182 : vector<8x32xi1>, vector<8x32xf32>
    %1184 = vector.shape_cast %1183 : vector<8x32xf32> to vector<2x4x32xf32>
    %1185 = vector.broadcast %584 : vector<2x1xf32> to vector<2x4xf32>
    %1186 = arith.subf %1185, %346 : vector<2x4xf32>
    %1187 = arith.mulf %1081, %1186 : vector<2x4xf32>
    %1188 = vector.extract_strided_slice %1187 {offsets = [0, 0], sizes = [2, 1], strides = [1, 1]} : vector<2x4xf32> to vector<2x1xf32>
    %1189 = vector.extract_strided_slice %1184 {offsets = [0, 0, 0], sizes = [2, 1, 32], strides = [1, 1, 1]} : vector<2x4x32xf32> to vector<2x1x32xf32>
    %1190 = vector.shape_cast %1189 : vector<2x1x32xf32> to vector<2x32xf32>
    %1191 = vector.broadcast %1188 : vector<2x1xf32> to vector<2x32xf32>
    %1192 = arith.mulf %1191, %1190 : vector<2x32xf32>
    %1193 = vector.extract_strided_slice %1187 {offsets = [0, 1], sizes = [2, 1], strides = [1, 1]} : vector<2x4xf32> to vector<2x1xf32>
    %1194 = vector.extract_strided_slice %1184 {offsets = [0, 1, 0], sizes = [2, 1, 32], strides = [1, 1, 1]} : vector<2x4x32xf32> to vector<2x1x32xf32>
    %1195 = vector.shape_cast %1194 : vector<2x1x32xf32> to vector<2x32xf32>
    %1196 = vector.broadcast %1193 : vector<2x1xf32> to vector<2x32xf32>
    %1197 = arith.mulf %1196, %1195 : vector<2x32xf32>
    %1198 = arith.addf %1192, %1197 : vector<2x32xf32>
    %1199 = vector.extract_strided_slice %1187 {offsets = [0, 2], sizes = [2, 1], strides = [1, 1]} : vector<2x4xf32> to vector<2x1xf32>
    %1200 = vector.extract_strided_slice %1184 {offsets = [0, 2, 0], sizes = [2, 1, 32], strides = [1, 1, 1]} : vector<2x4x32xf32> to vector<2x1x32xf32>
    %1201 = vector.shape_cast %1200 : vector<2x1x32xf32> to vector<2x32xf32>
    %1202 = vector.broadcast %1199 : vector<2x1xf32> to vector<2x32xf32>
    %1203 = arith.mulf %1202, %1201 : vector<2x32xf32>
    %1204 = arith.addf %1198, %1203 : vector<2x32xf32>
    %1205 = vector.extract_strided_slice %1187 {offsets = [0, 3], sizes = [2, 1], strides = [1, 1]} : vector<2x4xf32> to vector<2x1xf32>
    %1206 = vector.extract_strided_slice %1184 {offsets = [0, 3, 0], sizes = [2, 1, 32], strides = [1, 1, 1]} : vector<2x4x32xf32> to vector<2x1x32xf32>
    %1207 = vector.shape_cast %1206 : vector<2x1x32xf32> to vector<2x32xf32>
    %1208 = vector.broadcast %1205 : vector<2x1xf32> to vector<2x32xf32>
    %1209 = arith.mulf %1208, %1207 : vector<2x32xf32>
    %1210 = arith.addf %1204, %1209 : vector<2x32xf32>
    %1211 = vector.shape_cast %346 : vector<2x4xf32> to vector<2x4x1xf32>
    %1212 = vector.shape_cast %1210 : vector<2x32xf32> to vector<2x1x32xf32>
    %1213 = vector.broadcast %1211 : vector<2x4x1xf32> to vector<2x4x32xf32>
    %1214 = vector.broadcast %1212 : vector<2x1x32xf32> to vector<2x4x32xf32>
    %1215 = arith.mulf %1213, %1214 : vector<2x4x32xf32>
    %1216 = arith.addf %1164, %1215 : vector<2x4x32xf32>
    %1217 = vector.shape_cast %1216 : vector<2x4x32xf32> to vector<8x32xf32>
    %1218 = arith.truncf %1217 : vector<8x32xf32> to vector<8x32xbf16>
    %cst_129 = arith.constant dense<0.000000e+00> : vector<8x32xf32>
    %1219 = tpu.matmul %1218, %23, %cst_129 {dimension_numbers = #tpu.dot_dimension_numbers<[1], [0], [0], [1], [0, 0, 1, 1], [], []>} : vector<8x32xbf16>, vector<32x32xbf16>, vector<8x32xf32> -> vector<8x32xf32>
    %1220 = vector.broadcast %25 : vector<1x32xf32> to vector<8x32xf32>
    %1221 = arith.addf %1219, %1220 : vector<8x32xf32>
    %cst_130 = arith.constant 0.000000e+00 : f32
    %1222 = vector.broadcast %cst_130 : f32 to vector<8x32xf32>
    %1223 = arith.cmpf ogt, %1221, %1222 : vector<8x32xf32>
    %cst_131 = arith.constant 0.00999999977 : f32
    %1224 = vector.broadcast %cst_131 : f32 to vector<8x32xf32>
    %1225 = arith.mulf %1224, %1221 : vector<8x32xf32>
    %1226 = arith.select %1223, %1221, %1225 : vector<8x32xi1>, vector<8x32xf32>
    %1227 = arith.truncf %1226 : vector<8x32xf32> to vector<8x32xbf16>
    %cst_132 = arith.constant dense<0.000000e+00> : vector<8x32xf32>
    %1228 = tpu.matmul %1227, %27, %cst_132 {dimension_numbers = #tpu.dot_dimension_numbers<[1], [0], [0], [1], [0, 0, 1, 1], [], []>} : vector<8x32xbf16>, vector<32x32xbf16>, vector<8x32xf32> -> vector<8x32xf32>
    %1229 = vector.broadcast %29 : vector<1x32xf32> to vector<8x32xf32>
    %1230 = arith.addf %1228, %1229 : vector<8x32xf32>
    %cst_133 = arith.constant 0.000000e+00 : f32
    %1231 = vector.broadcast %cst_133 : f32 to vector<8x32xf32>
    %1232 = arith.cmpf ogt, %1230, %1231 : vector<8x32xf32>
    %cst_134 = arith.constant 0.00999999977 : f32
    %1233 = vector.broadcast %cst_134 : f32 to vector<8x32xf32>
    %1234 = arith.mulf %1233, %1230 : vector<8x32xf32>
    %1235 = arith.select %1232, %1230, %1234 : vector<8x32xi1>, vector<8x32xf32>
    %1236 = vector.shape_cast %1235 : vector<8x32xf32> to vector<2x4x32xf32>
    %1237 = vector.broadcast %832 : vector<2x1xf32> to vector<2x4xf32>
    %1238 = arith.subf %1237, %594 : vector<2x4xf32>
    %1239 = arith.mulf %1081, %1238 : vector<2x4xf32>
    %1240 = vector.extract_strided_slice %1239 {offsets = [0, 0], sizes = [2, 1], strides = [1, 1]} : vector<2x4xf32> to vector<2x1xf32>
    %1241 = vector.extract_strided_slice %1236 {offsets = [0, 0, 0], sizes = [2, 1, 32], strides = [1, 1, 1]} : vector<2x4x32xf32> to vector<2x1x32xf32>
    %1242 = vector.shape_cast %1241 : vector<2x1x32xf32> to vector<2x32xf32>
    %1243 = vector.broadcast %1240 : vector<2x1xf32> to vector<2x32xf32>
    %1244 = arith.mulf %1243, %1242 : vector<2x32xf32>
    %1245 = vector.extract_strided_slice %1239 {offsets = [0, 1], sizes = [2, 1], strides = [1, 1]} : vector<2x4xf32> to vector<2x1xf32>
    %1246 = vector.extract_strided_slice %1236 {offsets = [0, 1, 0], sizes = [2, 1, 32], strides = [1, 1, 1]} : vector<2x4x32xf32> to vector<2x1x32xf32>
    %1247 = vector.shape_cast %1246 : vector<2x1x32xf32> to vector<2x32xf32>
    %1248 = vector.broadcast %1245 : vector<2x1xf32> to vector<2x32xf32>
    %1249 = arith.mulf %1248, %1247 : vector<2x32xf32>
    %1250 = arith.addf %1244, %1249 : vector<2x32xf32>
    %1251 = vector.extract_strided_slice %1239 {offsets = [0, 2], sizes = [2, 1], strides = [1, 1]} : vector<2x4xf32> to vector<2x1xf32>
    %1252 = vector.extract_strided_slice %1236 {offsets = [0, 2, 0], sizes = [2, 1, 32], strides = [1, 1, 1]} : vector<2x4x32xf32> to vector<2x1x32xf32>
    %1253 = vector.shape_cast %1252 : vector<2x1x32xf32> to vector<2x32xf32>
    %1254 = vector.broadcast %1251 : vector<2x1xf32> to vector<2x32xf32>
    %1255 = arith.mulf %1254, %1253 : vector<2x32xf32>
    %1256 = arith.addf %1250, %1255 : vector<2x32xf32>
    %1257 = vector.extract_strided_slice %1239 {offsets = [0, 3], sizes = [2, 1], strides = [1, 1]} : vector<2x4xf32> to vector<2x1xf32>
    %1258 = vector.extract_strided_slice %1236 {offsets = [0, 3, 0], sizes = [2, 1, 32], strides = [1, 1, 1]} : vector<2x4x32xf32> to vector<2x1x32xf32>
    %1259 = vector.shape_cast %1258 : vector<2x1x32xf32> to vector<2x32xf32>
    %1260 = vector.broadcast %1257 : vector<2x1xf32> to vector<2x32xf32>
    %1261 = arith.mulf %1260, %1259 : vector<2x32xf32>
    %1262 = arith.addf %1256, %1261 : vector<2x32xf32>
    %1263 = vector.shape_cast %594 : vector<2x4xf32> to vector<2x4x1xf32>
    %1264 = vector.shape_cast %1262 : vector<2x32xf32> to vector<2x1x32xf32>
    %1265 = vector.broadcast %1263 : vector<2x4x1xf32> to vector<2x4x32xf32>
    %1266 = vector.broadcast %1264 : vector<2x1x32xf32> to vector<2x4x32xf32>
    %1267 = arith.mulf %1265, %1266 : vector<2x4x32xf32>
    %1268 = arith.addf %1216, %1267 : vector<2x4x32xf32>
    %1269 = vector.shape_cast %1268 : vector<2x4x32xf32> to vector<8x32xf32>
    %1270 = arith.truncf %1269 : vector<8x32xf32> to vector<8x32xbf16>
    %cst_135 = arith.constant dense<0.000000e+00> : vector<8x32xf32>
    %1271 = tpu.matmul %1270, %23, %cst_135 {dimension_numbers = #tpu.dot_dimension_numbers<[1], [0], [0], [1], [0, 0, 1, 1], [], []>} : vector<8x32xbf16>, vector<32x32xbf16>, vector<8x32xf32> -> vector<8x32xf32>
    %1272 = vector.broadcast %25 : vector<1x32xf32> to vector<8x32xf32>
    %1273 = arith.addf %1271, %1272 : vector<8x32xf32>
    %cst_136 = arith.constant 0.000000e+00 : f32
    %1274 = vector.broadcast %cst_136 : f32 to vector<8x32xf32>
    %1275 = arith.cmpf ogt, %1273, %1274 : vector<8x32xf32>
    %cst_137 = arith.constant 0.00999999977 : f32
    %1276 = vector.broadcast %cst_137 : f32 to vector<8x32xf32>
    %1277 = arith.mulf %1276, %1273 : vector<8x32xf32>
    %1278 = arith.select %1275, %1273, %1277 : vector<8x32xi1>, vector<8x32xf32>
    %1279 = arith.truncf %1278 : vector<8x32xf32> to vector<8x32xbf16>
    %cst_138 = arith.constant dense<0.000000e+00> : vector<8x32xf32>
    %1280 = tpu.matmul %1279, %27, %cst_138 {dimension_numbers = #tpu.dot_dimension_numbers<[1], [0], [0], [1], [0, 0, 1, 1], [], []>} : vector<8x32xbf16>, vector<32x32xbf16>, vector<8x32xf32> -> vector<8x32xf32>
    %1281 = vector.broadcast %29 : vector<1x32xf32> to vector<8x32xf32>
    %1282 = arith.addf %1280, %1281 : vector<8x32xf32>
    %cst_139 = arith.constant 0.000000e+00 : f32
    %1283 = vector.broadcast %cst_139 : f32 to vector<8x32xf32>
    %1284 = arith.cmpf ogt, %1282, %1283 : vector<8x32xf32>
    %cst_140 = arith.constant 0.00999999977 : f32
    %1285 = vector.broadcast %cst_140 : f32 to vector<8x32xf32>
    %1286 = arith.mulf %1285, %1282 : vector<8x32xf32>
    %1287 = arith.select %1284, %1282, %1286 : vector<8x32xi1>, vector<8x32xf32>
    %1288 = vector.shape_cast %1287 : vector<8x32xf32> to vector<2x4x32xf32>
    %1289 = vector.broadcast %1080 : vector<2x1xf32> to vector<2x4xf32>
    %1290 = arith.subf %1289, %842 : vector<2x4xf32>
    %1291 = arith.mulf %1081, %1290 : vector<2x4xf32>
    %1292 = vector.extract_strided_slice %1291 {offsets = [0, 0], sizes = [2, 1], strides = [1, 1]} : vector<2x4xf32> to vector<2x1xf32>
    %1293 = vector.extract_strided_slice %1288 {offsets = [0, 0, 0], sizes = [2, 1, 32], strides = [1, 1, 1]} : vector<2x4x32xf32> to vector<2x1x32xf32>
    %1294 = vector.shape_cast %1293 : vector<2x1x32xf32> to vector<2x32xf32>
    %1295 = vector.broadcast %1292 : vector<2x1xf32> to vector<2x32xf32>
    %1296 = arith.mulf %1295, %1294 : vector<2x32xf32>
    %1297 = vector.extract_strided_slice %1291 {offsets = [0, 1], sizes = [2, 1], strides = [1, 1]} : vector<2x4xf32> to vector<2x1xf32>
    %1298 = vector.extract_strided_slice %1288 {offsets = [0, 1, 0], sizes = [2, 1, 32], strides = [1, 1, 1]} : vector<2x4x32xf32> to vector<2x1x32xf32>
    %1299 = vector.shape_cast %1298 : vector<2x1x32xf32> to vector<2x32xf32>
    %1300 = vector.broadcast %1297 : vector<2x1xf32> to vector<2x32xf32>
    %1301 = arith.mulf %1300, %1299 : vector<2x32xf32>
    %1302 = arith.addf %1296, %1301 : vector<2x32xf32>
    %1303 = vector.extract_strided_slice %1291 {offsets = [0, 2], sizes = [2, 1], strides = [1, 1]} : vector<2x4xf32> to vector<2x1xf32>
    %1304 = vector.extract_strided_slice %1288 {offsets = [0, 2, 0], sizes = [2, 1, 32], strides = [1, 1, 1]} : vector<2x4x32xf32> to vector<2x1x32xf32>
    %1305 = vector.shape_cast %1304 : vector<2x1x32xf32> to vector<2x32xf32>
    %1306 = vector.broadcast %1303 : vector<2x1xf32> to vector<2x32xf32>
    %1307 = arith.mulf %1306, %1305 : vector<2x32xf32>
    %1308 = arith.addf %1302, %1307 : vector<2x32xf32>
    %1309 = vector.extract_strided_slice %1291 {offsets = [0, 3], sizes = [2, 1], strides = [1, 1]} : vector<2x4xf32> to vector<2x1xf32>
    %1310 = vector.extract_strided_slice %1288 {offsets = [0, 3, 0], sizes = [2, 1, 32], strides = [1, 1, 1]} : vector<2x4x32xf32> to vector<2x1x32xf32>
    %1311 = vector.shape_cast %1310 : vector<2x1x32xf32> to vector<2x32xf32>
    %1312 = vector.broadcast %1309 : vector<2x1xf32> to vector<2x32xf32>
    %1313 = arith.mulf %1312, %1311 : vector<2x32xf32>
    %1314 = arith.addf %1308, %1313 : vector<2x32xf32>
    %1315 = vector.shape_cast %842 : vector<2x4xf32> to vector<2x4x1xf32>
    %1316 = vector.shape_cast %1314 : vector<2x32xf32> to vector<2x1x32xf32>
    %1317 = vector.broadcast %1315 : vector<2x4x1xf32> to vector<2x4x32xf32>
    %1318 = vector.broadcast %1316 : vector<2x1x32xf32> to vector<2x4x32xf32>
    %1319 = arith.mulf %1317, %1318 : vector<2x4x32xf32>
    %1320 = arith.addf %1268, %1319 : vector<2x4x32xf32>
    %1321 = vector.extract_strided_slice %1081 {offsets = [0, 0], sizes = [2, 1], strides = [1, 1]} : vector<2x4xf32> to vector<2x1xf32>
    %1322 = vector.extract_strided_slice %1320 {offsets = [0, 0, 0], sizes = [2, 1, 32], strides = [1, 1, 1]} : vector<2x4x32xf32> to vector<2x1x32xf32>
    %1323 = vector.shape_cast %1322 : vector<2x1x32xf32> to vector<2x32xf32>
    %1324 = vector.broadcast %1321 : vector<2x1xf32> to vector<2x32xf32>
    %1325 = arith.mulf %1324, %1323 : vector<2x32xf32>
    %1326 = vector.extract_strided_slice %1081 {offsets = [0, 1], sizes = [2, 1], strides = [1, 1]} : vector<2x4xf32> to vector<2x1xf32>
    %1327 = vector.extract_strided_slice %1320 {offsets = [0, 1, 0], sizes = [2, 1, 32], strides = [1, 1, 1]} : vector<2x4x32xf32> to vector<2x1x32xf32>
    %1328 = vector.shape_cast %1327 : vector<2x1x32xf32> to vector<2x32xf32>
    %1329 = vector.broadcast %1326 : vector<2x1xf32> to vector<2x32xf32>
    %1330 = arith.mulf %1329, %1328 : vector<2x32xf32>
    %1331 = arith.addf %1325, %1330 : vector<2x32xf32>
    %1332 = vector.extract_strided_slice %1081 {offsets = [0, 2], sizes = [2, 1], strides = [1, 1]} : vector<2x4xf32> to vector<2x1xf32>
    %1333 = vector.extract_strided_slice %1320 {offsets = [0, 2, 0], sizes = [2, 1, 32], strides = [1, 1, 1]} : vector<2x4x32xf32> to vector<2x1x32xf32>
    %1334 = vector.shape_cast %1333 : vector<2x1x32xf32> to vector<2x32xf32>
    %1335 = vector.broadcast %1332 : vector<2x1xf32> to vector<2x32xf32>
    %1336 = arith.mulf %1335, %1334 : vector<2x32xf32>
    %1337 = arith.addf %1331, %1336 : vector<2x32xf32>
    %1338 = vector.extract_strided_slice %1081 {offsets = [0, 3], sizes = [2, 1], strides = [1, 1]} : vector<2x4xf32> to vector<2x1xf32>
    %1339 = vector.extract_strided_slice %1320 {offsets = [0, 3, 0], sizes = [2, 1, 32], strides = [1, 1, 1]} : vector<2x4x32xf32> to vector<2x1x32xf32>
    %1340 = vector.shape_cast %1339 : vector<2x1x32xf32> to vector<2x32xf32>
    %1341 = vector.broadcast %1338 : vector<2x1xf32> to vector<2x32xf32>
    %1342 = arith.mulf %1341, %1340 : vector<2x32xf32>
    %1343 = arith.addf %1337, %1342 : vector<2x32xf32>
    %c0_141 = arith.constant 0 : index
    %c0_142 = arith.constant 0 : index
    %1344 = vector.load %arg12[%c0_141, %c0_142] : memref<1x32xf32, #tpu.memory_space<vmem>>, vector<1x32xf32>
    %1345 = vector.broadcast %1344 : vector<1x32xf32> to vector<2x32xf32>
    %1346 = arith.mulf %1343, %1345 : vector<2x32xf32>
    %cst_143 = arith.constant dense<0.000000e+00> : vector<2xf32>
    %1347 = vector.multi_reduction <add>, %1346, %cst_143 [1] : vector<2x32xf32> to vector<2xf32>
    %1348 = vector.shape_cast %1347 : vector<2xf32> to vector<2x1xf32>
    %c0_144 = arith.constant 0 : index
    %c0_145 = arith.constant 0 : index
    %1349 = vector.load %arg13[%c0_144, %c0_145] : memref<1x1xf32, #tpu.memory_space<vmem>>, vector<1x1xf32>
    %1350 = vector.broadcast %1349 : vector<1x1xf32> to vector<2x1xf32>
    %1351 = arith.addf %1348, %1350 : vector<2x1xf32>
    %cst_146 = arith.constant 0.000000e+00 : f32
    %1352 = vector.broadcast %cst_146 : f32 to vector<2x1xf32>
    %1353 = arith.subf %1352, %1351 : vector<2x1xf32>
    %1354 = math.exp %1353 : vector<2x1xf32>
    %cst_147 = arith.constant 1.000000e+00 : f32
    %1355 = vector.broadcast %cst_147 : f32 to vector<2x1xf32>
    %1356 = arith.addf %1355, %1354 : vector<2x1xf32>
    %cst_148 = arith.constant 1.000000e+00 : f32
    %1357 = vector.broadcast %cst_148 : f32 to vector<2x1xf32>
    %1358 = arith.divf %1357, %1356 : vector<2x1xf32>
    %cst_149 = arith.constant 0.000000e+00 : f32
    %1359 = vector.broadcast %cst_149 : f32 to vector<2x1xf32>
    %1360 = arith.mulf %1029, %1029 : vector<2x4x32xf32>
    %cst_150 = arith.constant dense<0.000000e+00> : vector<2x4xf32>
    %1361 = vector.multi_reduction <add>, %1360, %cst_150 [2] : vector<2x4x32xf32> to vector<2x4xf32>
    %cst_151 = arith.constant 1.000000e+00 : f32
    %1362 = vector.broadcast %cst_151 : f32 to vector<2x4xf32>
    %1363 = arith.subf %1361, %1362 : vector<2x4xf32>
    %1364 = arith.mulf %1363, %1363 : vector<2x4xf32>
    %1365 = arith.mulf %1364, %35 : vector<2x4xf32>
    %cst_152 = arith.constant dense<0.000000e+00> : vector<2xf32>
    %1366 = vector.multi_reduction <add>, %1365, %cst_152 [1] : vector<2x4xf32> to vector<2xf32>
    %1367 = vector.shape_cast %1366 : vector<2xf32> to vector<2x1xf32>
    %1368 = arith.addf %1359, %1367 : vector<2x1xf32>
    %1369 = arith.mulf %1029, %1078 : vector<2x4x32xf32>
    %cst_153 = arith.constant dense<0.000000e+00> : vector<2x4xf32>
    %1370 = vector.multi_reduction <add>, %1369, %cst_153 [2] : vector<2x4x32xf32> to vector<2x4xf32>
    %cst_154 = arith.constant 0.000000e+00 : f32
    %1371 = vector.broadcast %cst_154 : f32 to vector<2x4xf32>
    %1372 = arith.subf %1370, %1371 : vector<2x4xf32>
    %1373 = arith.mulf %1372, %1372 : vector<2x4xf32>
    %1374 = arith.mulf %1373, %35 : vector<2x4xf32>
    %cst_155 = arith.constant dense<0.000000e+00> : vector<2xf32>
    %1375 = vector.multi_reduction <add>, %1374, %cst_155 [1] : vector<2x4xf32> to vector<2xf32>
    %1376 = vector.shape_cast %1375 : vector<2xf32> to vector<2x1xf32>
    %1377 = arith.addf %1368, %1376 : vector<2x1xf32>
    %1378 = arith.mulf %1078, %1029 : vector<2x4x32xf32>
    %cst_156 = arith.constant dense<0.000000e+00> : vector<2x4xf32>
    %1379 = vector.multi_reduction <add>, %1378, %cst_156 [2] : vector<2x4x32xf32> to vector<2x4xf32>
    %cst_157 = arith.constant 0.000000e+00 : f32
    %1380 = vector.broadcast %cst_157 : f32 to vector<2x4xf32>
    %1381 = arith.subf %1379, %1380 : vector<2x4xf32>
    %1382 = arith.mulf %1381, %1381 : vector<2x4xf32>
    %1383 = arith.mulf %1382, %35 : vector<2x4xf32>
    %cst_158 = arith.constant dense<0.000000e+00> : vector<2xf32>
    %1384 = vector.multi_reduction <add>, %1383, %cst_158 [1] : vector<2x4xf32> to vector<2xf32>
    %1385 = vector.shape_cast %1384 : vector<2xf32> to vector<2x1xf32>
    %1386 = arith.addf %1377, %1385 : vector<2x1xf32>
    %1387 = arith.mulf %1078, %1078 : vector<2x4x32xf32>
    %cst_159 = arith.constant dense<0.000000e+00> : vector<2x4xf32>
    %1388 = vector.multi_reduction <add>, %1387, %cst_159 [2] : vector<2x4x32xf32> to vector<2x4xf32>
    %cst_160 = arith.constant 1.000000e+00 : f32
    %1389 = vector.broadcast %cst_160 : f32 to vector<2x4xf32>
    %1390 = arith.subf %1388, %1389 : vector<2x4xf32>
    %1391 = arith.mulf %1390, %1390 : vector<2x4xf32>
    %1392 = arith.mulf %1391, %35 : vector<2x4xf32>
    %cst_161 = arith.constant dense<0.000000e+00> : vector<2xf32>
    %1393 = vector.multi_reduction <add>, %1392, %cst_161 [1] : vector<2x4xf32> to vector<2xf32>
    %1394 = vector.shape_cast %1393 : vector<2xf32> to vector<2x1xf32>
    %1395 = arith.addf %1386, %1394 : vector<2x1xf32>
    %1396 = tpu.iota {dimensions = array<i32: 1>} : vector<2x128xi32>
    %c0_i32 = arith.constant 0 : i32
    %1397 = vector.broadcast %c0_i32 : i32 to vector<2x128xi32>
    %1398 = arith.cmpi eq, %1396, %1397 : vector<2x128xi32>
    %cst_162 = arith.constant 0.000000e+00 : f32
    %1399 = vector.shape_cast %1358 : vector<2x1xf32> to vector<2x1xf32>
    %1400 = vector.broadcast %1399 : vector<2x1xf32> to vector<2x128xf32>
    %1401 = vector.broadcast %cst_162 : f32 to vector<2x128xf32>
    %1402 = arith.select %1398, %1400, %1401 : vector<2x128xi1>, vector<2x128xf32>
    %c1_i32 = arith.constant 1 : i32
    %1403 = vector.broadcast %c1_i32 : i32 to vector<2x128xi32>
    %1404 = arith.cmpi eq, %1396, %1403 : vector<2x128xi32>
    %cst_163 = arith.constant 0.000000e+00 : f32
    %1405 = vector.shape_cast %1395 : vector<2x1xf32> to vector<2x1xf32>
    %1406 = vector.broadcast %1405 : vector<2x1xf32> to vector<2x128xf32>
    %1407 = vector.broadcast %cst_163 : f32 to vector<2x128xf32>
    %1408 = arith.select %1404, %1406, %1407 : vector<2x128xi1>, vector<2x128xf32>
    %1409 = arith.addf %1402, %1408 : vector<2x128xf32>
    %c0_164 = arith.constant 0 : index
    %c0_165 = arith.constant 0 : index
    %c0_166 = arith.constant 0 : index
    %1410 = vector.load %arg14[%c0_164, %c0_165, %c0_166] : memref<1x2x128xf32, #tpu.memory_space<vmem>>, vector<1x2x128xf32>
    %1411 = vector.shape_cast %1410 : vector<1x2x128xf32> to vector<2x128xf32>
    %1412 = vector.shape_cast %1409 : vector<2x128xf32> to vector<1x2x128xf32>
    tpu.vector_store %arg14[%c0_164, %c0_165, %c0_166], %1412 {strides = array<i32>} : memref<1x2x128xf32, #tpu.memory_space<vmem>>, vector<1x2x128xf32>,
    return
  }
  func.func @transform_0(%arg0: i32) -> (i32, i32, i32) {
    %c0_i32 = arith.constant 0 : i32
    %c0_i32_0 = arith.constant 0 : i32
    %c0_i32_1 = arith.constant 0 : i32
    return %arg0, %c0_i32, %c0_i32_0 : i32, i32, i32
  }
  func.func @transform_1(%arg0: i32) -> (i32, i32, i32) {
    %c0_i32 = arith.constant 0 : i32
    %c0_i32_0 = arith.constant 0 : i32
    %c0_i32_1 = arith.constant 0 : i32
    return %arg0, %c0_i32, %c0_i32_0 : i32, i32, i32
  }
  func.func @transform_2(%arg0: i32) -> (i32, i32, i32, i32) {
    %c0_i32 = arith.constant 0 : i32
    %c0_i32_0 = arith.constant 0 : i32
    %c0_i32_1 = arith.constant 0 : i32
    %c0_i32_2 = arith.constant 0 : i32
    return %arg0, %c0_i32, %c0_i32_0, %c0_i32_1 : i32, i32, i32, i32
  }
  func.func @transform_3(%arg0: i32) -> (i32, i32, i32) {
    %c0_i32 = arith.constant 0 : i32
    %c0_i32_0 = arith.constant 0 : i32
    %c0_i32_1 = arith.constant 0 : i32
    %c0_i32_2 = arith.constant 0 : i32
    return %c0_i32, %c0_i32_0, %c0_i32_1 : i32, i32, i32
  }
  func.func @transform_4(%arg0: i32) -> (i32, i32, i32) {
    %c0_i32 = arith.constant 0 : i32
    %c0_i32_0 = arith.constant 0 : i32
    %c0_i32_1 = arith.constant 0 : i32
    %c0_i32_2 = arith.constant 0 : i32
    return %c0_i32, %c0_i32_0, %c0_i32_1 : i32, i32, i32
  }
  func.func @transform_5(%arg0: i32) -> (i32, i32, i32) {
    %c0_i32 = arith.constant 0 : i32
    %c0_i32_0 = arith.constant 0 : i32
    %c0_i32_1 = arith.constant 0 : i32
    %c0_i32_2 = arith.constant 0 : i32
    return %c0_i32, %c0_i32_0, %c0_i32_1 : i32, i32, i32
  }
  func.func @transform_6(%arg0: i32) -> (i32, i32, i32) {
    %c0_i32 = arith.constant 0 : i32
    %c0_i32_0 = arith.constant 0 : i32
    %c0_i32_1 = arith.constant 0 : i32
    %c0_i32_2 = arith.constant 0 : i32
    return %c0_i32, %c0_i32_0, %c0_i32_1 : i32, i32, i32
  }
  func.func @transform_7(%arg0: i32) -> (i32, i32, i32) {
    %c0_i32 = arith.constant 0 : i32
    %c0_i32_0 = arith.constant 0 : i32
    %c0_i32_1 = arith.constant 0 : i32
    %c0_i32_2 = arith.constant 0 : i32
    return %c0_i32, %c0_i32_0, %c0_i32_1 : i32, i32, i32
  }
  func.func @transform_8(%arg0: i32) -> (i32, i32, i32) {
    %c0_i32 = arith.constant 0 : i32
    %c0_i32_0 = arith.constant 0 : i32
    %c0_i32_1 = arith.constant 0 : i32
    %c0_i32_2 = arith.constant 0 : i32
    return %c0_i32, %c0_i32_0, %c0_i32_1 : i32, i32, i32
  }
  func.func @transform_9(%arg0: i32) -> (i32, i32, i32) {
    %c0_i32 = arith.constant 0 : i32
    %c0_i32_0 = arith.constant 0 : i32
    %c0_i32_1 = arith.constant 0 : i32
    %c0_i32_2 = arith.constant 0 : i32
    return %c0_i32, %c0_i32_0, %c0_i32_1 : i32, i32, i32
  }
  func.func @transform_10(%arg0: i32) -> (i32, i32, i32) {
    %c0_i32 = arith.constant 0 : i32
    %c0_i32_0 = arith.constant 0 : i32
    %c0_i32_1 = arith.constant 0 : i32
    %c0_i32_2 = arith.constant 0 : i32
    return %c0_i32, %c0_i32_0, %c0_i32_1 : i32, i32, i32
  }
  func.func @transform_11(%arg0: i32) -> (i32, i32) {
    %c0_i32 = arith.constant 0 : i32
    %c0_i32_0 = arith.constant 0 : i32
    %c0_i32_1 = arith.constant 0 : i32
    return %c0_i32, %c0_i32_0 : i32, i32
  }
  func.func @transform_12(%arg0: i32) -> (i32, i32) {
    %c0_i32 = arith.constant 0 : i32
    %c0_i32_0 = arith.constant 0 : i32
    %c0_i32_1 = arith.constant 0 : i32
    return %c0_i32, %c0_i32_0 : i32, i32
  }
  func.func @transform_13(%arg0: i32) -> (i32, i32, i32) {
    %c0_i32 = arith.constant 0 : i32
    %c0_i32_0 = arith.constant 0 : i32
    %c0_i32_1 = arith.constant 0 : i32
    return %arg0, %c0_i32, %c0_i32_0 : i32, i32, i32
  }
}

</mosaic_0001>

<bundles_post_ra>
// kernel: tpu_custom_call.1
= control target key start
LH: loop header
LB: loop body
LE: loop exit
PB: predicated region body
PF: predicated region fallthrough
CT: control target
= control target key end

     0   :  { %s10910_s0 = inlined_call_operand.vmem [shape: f32[2,8,32], index: 0, kind: input, shape index: {}]   ;;  %s10911_s1 = inlined_call_operand.vmem [shape: s32[2,2,4], index: 1, kind: input, shape index: {}]   ;;  %s10912_s2 = inlined_call_operand.hbm [shape: s32[2,4,2,7], index: 2, kind: input, shape index: {}]   ;;  %s10913_s3 = inlined_call_operand.vmem [shape: bf16[2,32,16], index: 3, kind: input, shape index: {}]   ;;  %s10914_s4 = inlined_call_operand.vmem [shape: f32[2,1,16], index: 4, kind: input, shape index: {}]   ;;  %s10915_s5 = inlined_call_operand.hbm [shape: bf16[2,16,32], index: 5, kind: input, shape index: {}]   ;;  %s10916_s6 = inlined_call_operand.vmem [shape: f32[2,1,32], index: 6, kind: input, shape index: {}]   ;;  %s10917_s7 = inlined_call_operand.vmem [shape: bf16[3,32,32], index: 7, kind: input, shape index: {}]   ;;  %s10918_s8 = inlined_call_operand.vmem [shape: f32[3,1,32], index: 8, kind: input, shape index: {}]   ;;  %s10919_s9 = inlined_call_operand.hbm [shape: bf16[3,32,32], index: 9, kind: input, shape index: {}]   ;;  %s10920_s10 = inlined_call_operand.vmem [shape: f32[3,1,32], index: 10, kind: input, shape index: {}]   ;;  %s10921_s11 = inlined_call_operand.vmem [shape: f32[1,32], index: 11, kind: input, shape index: {}]   ;;  %s10922_s12 = inlined_call_operand.<no memory space> [shape: f32[1,1], index: 12, kind: input, shape index: {}]   ;;  %s10923_s13 = inlined_call_operand.hbm [shape: f32[2,2,128], index: 13, kind: output, shape index: {}]  }
   0x1   :  { %11005 = sst [smem:[#allocation64_spill]] %s10921_s11  ;;  %v18_v0 = vstv %s10922_s12 }
   0x2   :  { %11006 = sst [smem:[#allocation65_spill]] %s10923_s13  ;;  %19 = vst [vmem:[#allocation2] sm:$0x1] %v18_v0 }
   0x3   :  { %20 = vsyncpa [#allocation4], 0 }
   0x4   :  { %22 = vsyncpa [#allocation4 + $0x1], 0 }
   0x5   :  { %23 = vsyncpa [#allocation7], 0 }
   0x6   :  { %24 = vsyncpa [#allocation5], 0 }
   0x7   :  { %26 = vsyncpa [#allocation5 + $0x1], 0  ;;  %s8834_s27 = smov 0   ;;  %s8836_s28 = smov 0  }
   0x8   :  { %s8838_s29 = smov 0   ;;  %s8840_s30 = smov 0  }
   0x9 LB: > { %11007 = sst [smem:[#allocation13_spill]] %s8729_s27  ;;  %s8855_s12 = sadd.s32 4294967295, %s8741_s30   ;;  %s8741_s30 = sphi %s8840_s30, %s11171_s30   ;;  %s8737_s29 = sphi %s8838_s29, %s11170_s29   ;;  %s8733_s28 = sphi %s8836_s28, %s11169_s28   ;;  %s8729_s27 = sphi %s8834_s27, %s11168_s27  }
   0xa   : > { %s7979_s14 = sadd.s32 4294967294, %s8741_s30   ;;  %p104_p0 = scmp.ne.s32.totalorder %s8733_s28, %s8729_s27 }
   0xb   : > { %p10925_p1 = scmp.eq.s32.totalorder %s8855_s12, 0  ;;  %p344_p3 = scmp.eq.s32.totalorder %s7979_s14, 1 }
   0xc   : > { %p7980_p5 = scmp.ge.s32.totalorder %s8741_s30, 1  ;;  %p351_p7 = scmp.lt.s32.totalorder %s8741_s30, 3 }
   0xd   : > { %p8864_p4 = por %p10925_p1, %p104_p0  ;;  %p8869_p6 = por %p344_p3, %p104_p0 }
   0xe   : > { %p8874_p8 = pnand %p7980_p5, %p351_p7  ;;  %s8743_s18 = smov [#allocation6]  }
   0xf   : > { %s11008_s15 = scalar_select %p8864_p4, 1, 0 }
  0x10   : > { %s11009_s16 = scalar_select %p8869_p6, 1, 0 }
  0x11   : > { %s369_s19 = sshll.u32 %s8743_s18, 4  ;;  %p8374_p9 = pneg %p8874_p8  ;;  %s8878_s19 = int_to_ptr.vmem [resolvable:$true] %s369_s19 }
  0x12   : > { %11010 = sst [smem:[#allocation14_spill]] %s11009_s16  ;;  %s8744_s21 = smov [#allocation8]  }
  0x13   : > { %p8885_p11 = pnand %p8374_p9, %p10925_p1  ;;  %s391_s22 = sshll.u32 %s8744_s21, 4  ;;  %s8889_s22 = int_to_ptr.vmem [resolvable:$true] %s391_s22 }
  0x14   : > { %s8585_s25 = scalar_lea.hbm %s10915_s5, 256 }
  0x15   : > { %p8586_p12 = scmp.ne.s32.totalorder %s10915_s5, %s8585_s25  ;;  %p8587_p13 = pneg %p8885_p11 }
  0x16   : > { %p8592_p5 = scmp.lt.u32.totalorder %s8585_s25, %s10915_s5 }
  0x17   : > { %p8588_p0 = pnand %p8587_p13, %p8586_p12 }
  0x19   : > { %p8589_p3 = pneg %p8588_p0 }
  0x1b   : > { %p8594_p7 = pnand %p8592_p5, %p8589_p3 }
  0x1d   : > { %8597 = shalt.err (!%p8594_p7)
}
  0x1e   : > { %s8598_s21 = scalar_lea.vmem %s8878_s19, 256  ;;  %p8606_p2 = scmp.lt.s32.totalorder %s8878_s19, %s8878_s19 }
  0x1f   : > { %p8599_p9 = scmp.ne.s32.totalorder %s8878_s19, %s8598_s21  ;;  %p8607_p12 = scmp.lt.s32.totalorder %s8598_s21, %s8598_s21 }
  0x21   : > { %p8601_p10 = pnand %p8599_p9, %p8587_p13  ;;  %p8608_p0 = por %p8607_p12, %p8606_p2 }
  0x23   : > { %p8602_p1 = pneg %p8601_p10 }
  0x25   : > { %p8609_p6 = pnand %p8608_p0, %p8602_p1 }
  0x27   : > { %8612 = shalt.err (!%p8609_p6)
}
  0x28   : > { %s8745_s16 = smov 64   ;;  %s8746_s23 = smov 4  }
  0x29   : > { %8377 = dma.hbm_to_vmem [thread:$0]  (!%p8885_p11), %s10915_s5, 256, %s8878_s19, [#allocation7], %s8745_s16, %s8745_s16, %s8746_s23  }
  0x2a   : > { %s8613_s18 = scalar_lea.hbm %s10919_s9, 768 }
  0x2b   : > { %p8614_p2 = scmp.ne.s32.totalorder %s10919_s9, %s8613_s18  ;;  %p8620_p10 = scmp.lt.u32.totalorder %s8613_s18, %s10919_s9 }
  0x2d   : > { %p8616_p1 = pnand %p8614_p2, %p8587_p13 }
  0x2f   : > { %p8617_p6 = pneg %p8616_p1 }
  0x31   : > { %p8622_p3 = pnand %p8620_p10, %p8617_p6 }
  0x33   : > { %8625 = shalt.err (!%p8622_p3)
}
  0x34   : > { %s8626_s19 = scalar_lea.vmem %s8889_s22, 768  ;;  %p8634_p12 = scmp.lt.s32.totalorder %s8889_s22, %s8889_s22 }
  0x35   : > { %p8627_p5 = scmp.ne.s32.totalorder %s8889_s22, %s8626_s19  ;;  %p8635_p0 = scmp.lt.s32.totalorder %s8626_s19, %s8626_s19 }
  0x37   : > { %p8629_p7 = pnand %p8627_p5, %p8587_p13  ;;  %p8636_p2 = por %p8635_p0, %p8634_p12 }
  0x39   : > { %p8630_p9 = pneg %p8629_p7 }
  0x3b   : > { %p8637_p1 = pnand %p8636_p2, %p8630_p9 }
  0x3d   : > { %8640 = shalt.err (!%p8637_p1)
}
  0x3e   : > { %8380 = dma.hbm_to_vmem [thread:$0]  (!%p8885_p11), %s10919_s9, 768, %s8889_s22, [#allocation7], %s8745_s16, %s8745_s16, %s8746_s23  }
  0x3f   : > { %s8944_s27 = sadd.s32 1, %s8741_s30   ;;  %s91_s20 = sadd.s32 1, %s8737_s29 }
  0x40   : > { %s88_s24 = ssub.s32 %s8741_s30, %s8944_s27  ;;  %p98_p13 = scmp.ne.s32.totalorder %s8737_s29, %s8733_s28 }
  0x41   : > { %p89_p6 = scmp.eq.s32.totalorder %s88_s24, 0  ;;  %p99_p10 = scmp.eq.s32.totalorder %s8741_s30, 0 }
  0x42   : > { %p11013_p3 = scmp.eq.s32.totalorder %s8855_s12, 1  ;;  %p8391_p7 = scmp.lt.s32.totalorder %s8741_s30, 2 }
  0x43   : > { %s8960_s26 = scalar_select %p89_p6, %s8737_s29, %s91_s20  }
  0x44   : > { %p8954_p5 = por %p11013_p3, %p98_p13  ;;  %p100_p9 = por %p99_p10, %p98_p13 }
  0x45   : > { %s428_s14 = sand.u32 1, %s8737_s29   ;;  %s8117_s22 = sshll.u32 %s8741_s30, 7 }
  0x46   : > { %s11014_s25 = scalar_select %p8954_p5, 1, 0 }
  0x47   : > { %s7984_s18 = sshll.u32 %s428_s14, 3  ;;  %s8967_s21 = scalar_lea.hbm %s10912_s2, %s8117_s22 }
  0x48   : > { %s432_s19 = scalar_lea.vmem [#allocation3], %s7984_s18  ;;  %p8971_p11 = pnand %p8391_p7, %p100_p9 }
  0x49   : > { %s439_s11 = sshll.u32 %s432_s19, 4  ;;  %s8975_s20 = scalar_lea.sflag [#allocation4], %s428_s14  ;;  %s8969_s11 = int_to_ptr.vmem [resolvable:$true] %s439_s11 }
  0x4a   : > { %s8641_s24 = scalar_lea.hbm %s8967_s21, 128  ;;  %p8643_p0 = pneg %p8971_p11 }
  0x4b   : > { %p8642_p12 = scmp.ne.s32.totalorder %s8967_s21, %s8641_s24  ;;  %s8646_s16 = scalar_lea.hbm %s10912_s2, 256 }
  0x4c   : > { %p8647_p13 = scmp.lt.u32.totalorder %s8967_s21, %s10912_s2  ;;  %p8648_p6 = scmp.lt.u32.totalorder %s8646_s16, %s8641_s24 }
  0x4d   : > { %p8644_p2 = pnand %p8643_p0, %p8642_p12  ;;  %p8650_p3 = scmp.lt.u32.totalorder %s8641_s24, %s8967_s21 }
  0x4e   : > { %p8649_p10 = por %p8648_p6, %p8647_p13 }
  0x4f   : > { %p8645_p1 = pneg %p8644_p2 }
  0x50   : > { %p8651_p7 = por %p8650_p3, %p8649_p10 }
  0x52   : > { %p8652_p9 = pnand %p8651_p7, %p8645_p1 }
  0x54   : > { %8655 = shalt.err (!%p8652_p9)
}
  0x55   : > { %s8656_s14 = scalar_lea.vmem %s8969_s11, 128  ;;  %s8747_s18 = smov [#allocation3]  }
  0x56   : > { %p8657_p12 = scmp.ne.s32.totalorder %s8969_s11, %s8656_s14  ;;  %s8661_s22 = sshll.u32 %s8747_s18, 4  ;;  %s8662_s22 = int_to_ptr.vmem [resolvable:$false] %s8661_s22 }
  0x57   : > { %s8663_s23 = scalar_lea.vmem %s8662_s22, 256  ;;  %p8664_p4 = scmp.lt.s32.totalorder %s8969_s11, %s8662_s22 }
  0x58   : > { %p8659_p2 = pnand %p8657_p12, %p8643_p0  ;;  %p8665_p13 = scmp.lt.s32.totalorder %s8663_s23, %s8656_s14 }
  0x5a   : > { %p8660_p5 = pneg %p8659_p2  ;;  %p8666_p6 = por %p8665_p13, %p8664_p4 }
  0x5c   : > { %p8667_p10 = pnand %p8666_p6, %p8660_p5 }
  0x5e   : > { %8670 = shalt.err (!%p8667_p10)
}
  0x5f   : > { %s8748_s24 = smov 32   ;;  %s8749_s16 = smov 2  }
  0x60   : > { %8384 = dma.hbm_to_vmem [thread:$0]  (!%p8971_p11), %s8967_s21, 128, %s8969_s11, %s8975_s20, %s8748_s24, %s8748_s24, %s8749_s16  }
  0x61   : > { %451 = sbr.rel (%p8874_p8) target bundleno = 5575 (0x15c7), region = 72 }
  0x68   : > { %s9006_s19 = sand.u32 1, %s8733_s28   ;;  %p11016_p4 = scmp.ne.s32.totalorder %s11008_s15, 0 }
  0x69   : > { %s7988_s14 = sshll.u32 %s9006_s19, 3  ;;  %s454_s18 = scalar_lea.sflag [#allocation4], %s9006_s19 }
  0x6a   : > { %s9010_s22 = scalar_lea.vmem [#allocation3], %s7988_s14 }
  0x6b   : > { %8716 = dma.done.wait (%p11016_p4), %s454_s18, 128  }
  0x6c   : > { %8718 = vsyncadd (%p11016_p4), %s454_s18, 4294967168  ;;  %p11017_p5 = scmp.eq.s32.totalorder %s8855_s12, 0 }
  0x6e   : > { %8720 = dma.done.wait (%p11017_p5), [#allocation7], 1024   ;;  %p11018_p8 = pmov %p11017_p5 }
  0x6f   : > { %p516_p11 = scmp.lt.s32.totalorder %s8855_s12, 1  ;;  %v10930_v1 = vmov 0   ;;  %v10944_v2 = vmov 0.0   ;;  %vm8752_vm0 = vmmov 0   ;;  %v569_v3 = vlaneseq  ;;  %v8553_v5 = vld [vmem:[%s10913_s3] sm:$0xff]   ;;  %v8554_v7 = vld [vmem:[%s10913_s3 + $0x8] sm:$0xff]  }
  0x70   : > { %8722 = vsyncadd (%p11018_p8), [#allocation7], 4294966272  ;;  %8443 = vset.pattern.permute.xlu0 %v10930_v1  ;;  %8190 = vmatprep.subr.bf16.mxu0 %v10944_v2  ;;  %v527_v8 = vld [vmem:[%s9010_s22] sm:$0x3]  ;;  %vm598_vm2 = vcmask 261120   ;;  %v8556_v16 = vld [vmem:[#allocation6] sm:$0xff]  }
  0x71   : > { %s517_s17 = scalar_select %p516_p11, %s8855_s12, 1  ;;  %8194 = vmatprep.mubr.msk.bf16.mxu0 %vm8752_vm0, %v10944_v2  ;;  %8198 = vmatprep.subr.bf16.mxu1 %v10944_v2  ;;  %v9057_v10 = vshrl.u32 %v569_v3, 7  ;;  %v10932_v17 = vmov 1   ;;  %vm857_vm4 = vcmp.ne.s32.totalorder %v527_v8, 4294967295  ;;  %v9075_v19 = vand.u32 127, %v569_v3  ;;  %v8557_v35 = vld [vmem:[%s10913_s3 + $0x10] sm:$0xff]  }
  0x72   : > { %8200 = vmatprep.mubr.msk.bf16.mxu1 %vm8752_vm0, %v10944_v2  ;;  %8191 = vmatpush3.bf16.msra.mxu0 %v8553_v5  ;;  %v10940_v25 = vmov 3   ;;  %v10942_v26 = vmov 2   ;;  %v8007_v27 = vld [vmem:[%s10914_s4] ss:$0 sm:$0xff]  ;;  %vm661_vm11 = vcmask 130048   ;;  %v8558_v37 = vld [vmem:[%s10913_s3 + $0x18] sm:$0xff]  }
  0x73   : > { %s7993_s15 = sshll.u32 %s517_s17, 1  ;;  %s7992_s21 = sshll.u32 %s517_s17, 3  ;;  %11019 = vst [vmem:[#allocation15_spill] sm:$0xff] %v9057_v10  ;;  %8192 = vmatprep.subr.bf16.mxu0 %v10944_v2  ;;  %v9062_v11 = vsub.s32 1, %v9057_v10  ;;  %v9065_v13 = vsub.s32 0, %v9057_v10  ;;  %8199 = vmatpush3.bf16.msra.mxu1 %v8556_v16  ;;  %11020 = vst [vmem:[#allocation16_spill] sm:$0xff] %v9075_v19 }
  0x74   : > { %s9032_s20 = scalar_lea.vmem %s10911_s1, %s7993_s15  ;;  %s9040_s16 = scalar_lea.vmem %s10910_s0, %s7992_s21  ;;  %8204 = vmatprep.subr.bf16.mxu1 %v10944_v2  ;;  %8444 = vset.pattern.permute.xlu1 %v10932_v17  ;;  %v528_v46 = vld [vmem:[%s9010_s22 + $0x2] sm:$0x3]  ;;  %v8559_v49 = vld [vmem:[#allocation6 + $0x8] sm:$0xff]   ;;  %v10938_v0 = vmov 4   ;;  %v10936_v3 = vmov 6   ;;  %v10934_v5 = vmov 5  }
  0x75   : > { %v9035_v4 = vld [vmem:[%s9032_s20] sm:$0x3]  ;;  %v873_v14 = vrot.slane %v527_v8, %v9062_v11  ;;  %v866_v15 = vrot.slane %v527_v8, %v9065_v13  ;;  %v2326_v47 = vrot.slane %v528_v46, %v9065_v13  ;;  %v2333_v48 = vrot.slane %v528_v46, %v9062_v11  ;;  %s11160_s14 = sld [smem:[#allocation64_spill]]  ;;  %s7991_s18 = sshll.u32 %s9006_s19, 1 }
  0x76   : > { %847 = vperm.xlu0 %8443, %v9035_v4   ;;  %vm571_vm1 = vcmp.ne.s32.totalorder %v9035_v4, 4294967295  ;;  %v525_v9 = vld [vmem:[%s9040_s16] sm:$0xff]  ;;  %8193 = vmatpush3.bf16.msra.mxu0 %v8554_v7  ;;  %vm2317_vm15 = vcmp.ne.s32.totalorder %v528_v46, 4294967295  ;;  %s11161_s21 = sld [smem:[#allocation65_spill]]  ;;  %s7853_s13 = scalar_lea.sflag [#allocation5], %s9006_s19 }
  0x77   : > { %v9050_v6 = vsel %vm571_vm1, 1, %v10930_v1  ;;  %v574_v12 = vpack.c.bf16 %v525_v9, %v525_v9  ;;  %8212 = vmatprep.subr.bf16.mxu0 %v10944_v2  ;;  %875 = vbcast.lane.b32.xlu1 %v873_v14, 256  ;;  %p11162_p1 = scmp.ne.s32.totalorder %s11014_s25, 0 }
  0x79   : > { %8195 = vmatmul.mubr.msk.bf16.vlgmr.msra.gmra.mrb[0].mxu0 %vm598_vm2, %v574_v12 }
  0x7a   : > { %851 = vperm.xlu0 %8443, %v9050_v6   ;;  %8214 = vmatprep.mubr.msk.bf16.mxu0 %vm8752_vm0, %v10944_v2 }
  0x7b   : > { %868 = vbcast.lane.b32.xlu1 %v866_v15, 256  ;;  %8213 = vmatpush3.bf16.msra.mxu0 %v8559_v49 }
  0xe9   : > { %v876_v38 = vpop.permute.xlu1 %875 }
  0xea   : > { %vm878_vm12 = vcmp.eq.s32.totalorder %v876_v38, %v9075_v19 }
  0xeb   : > { %v8030_v40 = vsel %vm878_vm12, 1.0, %v10944_v2  ;;  %vm912_vm12 = vcmask 1041409  }
  0xed   : > { %v869_v39 = vpop.permute.xlu1 %868 }
  0xee   : > { %vm877_vm13 = vcmp.eq.s32.totalorder %v869_v39, %v9075_v19 }
  0xef   : > { %v8029_v42 = vsel %vm877_vm13, 1.0, %v10944_v2 }
  0xf5   : > { %v848_v18 = vpop.permute.xlu0 %847 }
  0xf6   : > { %vm858_vm3 = vcmp.ne.s32.totalorder %v527_v8, %v848_v18  ;;  %vm849_vm7 = vcmp.eq.s32.totalorder %v848_v18, %v9075_v19 }
  0xf7   : > { %vm859_vm5 = vmand %vm857_vm4, %vm858_vm3 }
  0xf9   : > { %v852_v20 = vpop.permute.xlu0 %851 }
  0xfa   : > { %vm853_vm6 = vcmp.eq.s32.totalorder %v852_v20, 1  ;;  %v8019_v20 = vld [vmem:[%s10914_s4 + $0x1] ss:$0 sm:$0xff] }
  0xfb   : > { %vm860_vm8 = vmand %vm859_vm5, %vm853_vm6 }
  0xfc   : > { %v9079_v21 = vsel %vm860_vm8, 1.0, %v10944_v2  ;;  %vm854_vm9 = vmand %vm849_vm7, %vm853_vm6 }
  0xfd   : > { %v893_v22 = vrot.slane %v9079_v21, %v9062_v11  ;;  %v886_v23 = vrot.slane %v9079_v21, %v9065_v13  ;;  %v9086_v24 = vsel %vm854_vm9, 1.0, %v10944_v2 }
  0xfe   : > { %v2018_v7 = vrot.slane %v9086_v24, %v9065_v13  ;;  %v2025_v14 = vrot.slane %v9086_v24, %v9062_v11 }
  0xff   : > { %895 = vbcast.lane.b32.xlu0 %v893_v22, 256  ;;  %888 = vbcast.lane.b32.xlu1 %v886_v23, 256 }
 0x103   : > { %917 = vperm.xlu1 %8444, %v9086_v24   ;;  %901 = vperm.xlu0 %8443, %v9086_v24  }
 0x107   : > { %8446 = vset.pattern.permute.xlu1 %v10940_v25  ;;  %8445 = vset.pattern.permute.xlu0 %v10942_v26 }
 0x108   : > { %949 = vperm.xlu1 %8446, %v9086_v24   ;;  %933 = vperm.xlu0 %8445, %v9086_v24  }
 0x10c   : > { %8447 = vset.pattern.permute.xlu1 %v10930_v1  ;;  %8448 = vset.pattern.permute.xlu0 %v10932_v17 }
 0x14c   : > { %v636_v28 = vpop.f32.mrb[0].mxu0 }
 0x14d   : > { %v637_v29 = vadd.f32 %v8007_v27, %v636_v28  ;;  %v8196_v30 = vpop.f32.mrb[1].mxu0 }
 0x14e   : > { %v639_v31 = vpop.f32.mrb[2].mxu0 }
 0x14f   : > { %vm642_vm10 = vcmp.gt.f32.partialorder %v637_v29, 0.0  ;;  %v643_v32 = vmul.f32 0.01, %v637_v29  ;;  %v8197_v33 = vpop.f32.mrb[3].mxu0 }
 0x151   : > { %v644_v34 = vsel %vm642_vm10, %v637_v29, %v643_v32 }
 0x152   : > { %v645_v36 = vpack.c.bf16 %v644_v34, %v644_v34 }
 0x154   : > { %8201 = vmatmul.mubr.msk.bf16.vlgmr.msra.gmra.mrb[0].mxu1 %vm661_vm11, %v645_v36 }
 0x155   : > { %8205 = vmatpush3.bf16.msra.mxu1 %v8557_v35  ;;  %8208 = vmatprep.mubr.msk.bf16.mxu1 %vm8752_vm0, %v10944_v2 }
 0x156   : > { %8206 = vmatprep.subr.bf16.mxu1 %v10944_v2 }
 0x159   : > { %8207 = vmatpush3.bf16.msra.mxu1 %v8558_v37 }
 0x15c   : > { %8209 = vmatmul.mubr.msk.bf16.vlgmr.msra.gmra.mrb[4].mxu1 %vm598_vm2, %v574_v12 }
 0x171   : > { %v896_v41 = vpop.permute.xlu0 %895  ;;  %v889_v43 = vpop.permute.xlu1 %888 }
 0x172   : > { %v898_v44 = vmul.f32 %v8030_v40, %v896_v41  ;;  %v897_v45 = vmul.f32 %v8029_v42, %v889_v43  ;;  %v9208_v43 = vld [vmem:[%s9010_s22 + $0x4] sm:$0x3] }
 0x174   : > { %971 = vperm.xlu1 %8447, %v898_v44   ;;  %989 = vperm.xlu0 %8448, %v898_v44  }
 0x178   : > { %966 = vperm.xlu1 %8447, %v897_v45   ;;  %8450 = vset.pattern.permute.xlu0 %v10942_v26 }
 0x179   : > { %1009 = vperm.xlu0 %8450, %v898_v44  }
 0x17c   : > { %8449 = vset.pattern.permute.xlu1 %v10932_v17 }
 0x17d   : > { %985 = vperm.xlu1 %8449, %v897_v45   ;;  %8453 = vset.pattern.permute.xlu0 %v10940_v25 }
 0x17e   : > { %1025 = vperm.xlu0 %8453, %v897_v45  }
 0x181   : > { %8451 = vset.pattern.permute.xlu1 %v10942_v26 }
 0x182   : > { %1005 = vperm.xlu1 %8451, %v897_v45   ;;  %8455 = vset.pattern.permute.xlu0 %v10930_v1  ;;  %v9126_v50 = vpop.permute.xlu1 %917  ;;  %v9182_v30 = vpop.permute.xlu0 %901  ;;  %v3752_v45 = vrot.slane %v9208_v43, %v9065_v13 }
 0x183   : > { %2335 = vbcast.lane.b32.xlu0 %v2333_v48, 256  ;;  %v8011_v48 = vld [vmem:[%s10916_s6] ss:$0 sm:$0xff] }
 0x186   : > { %8452 = vset.pattern.permute.xlu1 %v10940_v25 }
 0x187   : > { %1029 = vperm.xlu1 %8452, %v898_v44   ;;  %v9128_v51 = vpop.permute.xlu1 %949  ;;  %v9184_v31 = vpop.permute.xlu0 %933  ;;  %v3759_v44 = vrot.slane %v9208_v43, %v9062_v11 }
 0x18b   : > { %8454 = vset.pattern.permute.xlu1 %v10932_v17 }
 0x18c   : > { %2307 = vperm.xlu1 %8454, %v9035_v4  }
 0x190   : > { %2311 = vperm.xlu1 %8454, %v9050_v6  }
 0x194   : > { %2328 = vbcast.lane.b32.xlu1 %v2326_v47, 256  ;;  %v9222_v47 = vld [vmem:[%s10917_s7 + $0x8] sm:$0xff]  }
 0x1f3   : > { %v9130_v52 = vpop.permute.xlu1 %971  ;;  %v9186_v32 = vpop.permute.xlu0 %989 }
 0x1f7   : > { %v9132_v53 = vpop.permute.xlu1 %966 }
 0x1f8   : > { %v9188_v33 = vpop.permute.xlu0 %1009 }
 0x1fc   : > { %v9134_v54 = vpop.permute.xlu1 %985 }
 0x1fd   : > { %v9190_v34 = vpop.permute.xlu0 %1025 }
 0x201   : > { %v9136_v55 = vpop.permute.xlu1 %1005  ;;  %v2336_v35 = vpop.permute.xlu0 %2335 }
 0x202   : > { %vm2338_vm9 = vcmp.eq.s32.totalorder %v2336_v35, %v9075_v19 }
 0x203   : > { %v8049_v37 = vsel %vm2338_vm9, 1.0, %v10944_v2 }
 0x206   : > { %v9138_v56 = vpop.permute.xlu1 %1029 }
 0x20b   : > { %v2308_v57 = vpop.permute.xlu1 %2307 }
 0x20c   : > { %vm2318_vm14 = vcmp.ne.s32.totalorder %v528_v46, %v2308_v57  ;;  %vm2309_vm3 = vcmp.eq.s32.totalorder %v2308_v57, %v9075_v19  ;;  %v9217_v46 = vld [vmem:[%s10917_s7] sm:$0xff]  }
 0x20d   : > { %vm2319_vm4 = vmand %vm2317_vm15, %vm2318_vm14  ;;  %8218 = vmatprep.subr.bf16.mxu1 %v9217_v46  ;;  %vm3743_vm15 = vcmp.ne.s32.totalorder %v9208_v43, 4294967295 }
 0x20e   : > { %8219 = vmatpush3.bf16.msra.mxu1 %v9217_v46 }
 0x20f   : > { %v2312_v58 = vpop.permute.xlu1 %2311  ;;  %8220 = vmatprep.subr.bf16.mxu1 %v9222_v47 }
 0x210   : > { %vm2313_vm5 = vcmp.eq.s32.totalorder %v2312_v58, 1 }
 0x211   : > { %vm2314_vm6 = vmand %vm2309_vm3, %vm2313_vm5 }
 0x212   : > { %vm2320_vm7 = vmand %vm2319_vm4, %vm2313_vm5  ;;  %v9149_v62 = vsel %vm2314_vm6, 1.0, %v10944_v2  ;;  %8221 = vmatpush3.bf16.msra.mxu1 %v9222_v47 }
 0x213   : > { %v9142_v59 = vsel %vm2320_vm7, 1.0, %v10944_v2  ;;  %v8456_v63 = vpack.i.bf16 %v9149_v62, %v9079_v21  ;;  %v2329_v36 = vpop.permute.xlu1 %2328  ;;  %8234 = vmatprep.subr.bf16.mxu1 %v9217_v46 }
 0x214   : > { %v2346_v60 = vrot.slane %v9142_v59, %v9065_v13  ;;  %v2353_v61 = vrot.slane %v9142_v59, %v9062_v11  ;;  %vm2337_vm10 = vcmp.eq.s32.totalorder %v2329_v36, %v9075_v19  ;;  %v8759_v36 = vmov 1966171168  }
 0x215   : > { %v8048_v40 = vsel %vm2337_vm10, 1.0, %v10944_v2 }
 0x216   : > { %2348 = vbcast.lane.b32.xlu1 %v2346_v60, 256  ;;  %2355 = vbcast.lane.b32.xlu0 %v2353_v61, 256 }
 0x21a   : > { %1884 = vperm.xlu1 %8454, %v9079_v21   ;;  %8457 = vperm.xlu0 %8455, %v8456_v63  }
 0x21e   : > { %8461 = vset.pattern.permute.xlu1 %v10942_v26  ;;  %8462 = vset.pattern.permute.xlu0 %v10940_v25 }
 0x21f   : > { %1906 = vperm.xlu1 %8461, %v9079_v21   ;;  %1928 = vperm.xlu0 %8462, %v9079_v21  }
 0x223   : > { %8463 = vset.pattern.permute.xlu1 %v10938_v0  ;;  %8465 = vset.pattern.permute.xlu0 %v10936_v3 }
 0x224   : > { %1950 = vperm.xlu1 %8463, %v9079_v21   ;;  %1994 = vperm.xlu0 %8465, %v9079_v21  }
 0x227   : > { %v9168_v8 = vpop.f32.mrb[0].mxu1 }
 0x228   : > { %8464 = vset.pattern.permute.xlu1 %v10934_v5  ;;  %8466 = vset.pattern.permute.xlu0 %v10932_v17  ;;  %v8202_v9 = vpop.f32.mrb[1].mxu1  ;;  %v700_v49 = vadd.f32 %v8011_v48, %v9168_v8 }
 0x229   : > { %1972 = vperm.xlu1 %8464, %v9079_v21   ;;  %2378 = vperm.xlu0 %8466, %v9149_v62   ;;  %v702_v12 = vpop.f32.mrb[2].mxu1 }
 0x22a   : > { %v8203_v15 = vpop.f32.mrb[3].mxu1  ;;  %v706_v58 = vmul.f32 0.01, %v700_v49 }
 0x22b   : > { %v9254_v15 = vsub.s32 2, %v9057_v10 }
 0x22d   : > { %2020 = vbcast.lane.b32.xlu1 %v2018_v7, 256  ;;  %8469 = vset.pattern.permute.xlu0 %v10930_v1  ;;  %11022 = vst [vmem:[#allocation18_spill] sm:$0xff] %v9254_v15 }
 0x22e   : > { %8467 = vset.pattern.permute.xlu1 %v10942_v26 }
 0x22f   : > { %v770_v16 = vpop.f32.mrb[4].mxu1 }
 0x230   : > { %v8210_v18 = vpop.f32.mrb[5].mxu1  ;;  %v771_v23 = vadd.f32 %v8019_v20, %v770_v16 }
 0x231   : > { %2027 = vbcast.lane.b32.xlu1 %v2025_v14, 256  ;;  %v773_v21 = vpop.f32.mrb[6].mxu1 }
 0x232   : > { %v8211_v22 = vpop.f32.mrb[7].mxu1  ;;  %vm776_vm8 = vcmp.gt.f32.partialorder %v771_v23, 0.0  ;;  %v777_v27 = vmul.f32 0.01, %v771_v23 }
 0x234   : > { %v778_v28 = vsel %vm776_vm8, %v771_v23, %v777_v27  ;;  %vm1587_vm8 = vcmask 1045504  }
 0x235   : > { %2394 = vperm.xlu1 %8467, %v9149_v62   ;;  %v779_v29 = vpack.c.bf16 %v778_v28, %v778_v28  ;;  %v9267_v28 = vsub.s32 3, %v9057_v10 }
 0x237   : > { %8215 = vmatmul.mubr.msk.bf16.vlgmr.msra.gmra.mrb[4].mxu0 %vm661_vm11, %v779_v29  ;;  %vm705_vm11 = vcmp.gt.f32.partialorder %v700_v49, 0.0  ;;  %11023 = vst [vmem:[#allocation19_spill] sm:$0xff] %v9267_v28 }
 0x238   : > { %v9235_v60 = vsel %vm705_vm11, %v700_v49, %v706_v58 }
 0x239   : > { %8468 = vset.pattern.permute.xlu1 %v10940_v25  ;;  %v9241_v63 = vcombine.high %v9235_v60, %v9235_v60  ;;  %v907_v12 = vrot.slane %v9235_v60, %v9065_v13  ;;  %v923_v14 = vrot.slane %v9235_v60, %v9062_v11  ;;  %v939_v27 = vrot.slane %v9235_v60, %v9254_v15 }
 0x23a   : > { %2410 = vperm.xlu1 %8468, %v9149_v62  }
 0x23b   : > { %11021 = vst [vmem:[#allocation17_spill] sm:$0xff] %v9241_v63  ;;  %v911_v9 = vrot.slane %v9241_v63, %v9065_v13  ;;  %v927_v8 = vrot.slane %v9241_v63, %v9062_v11  ;;  %v943_v21 = vrot.slane %v9241_v63, %v9254_v15  ;;  %v959_v35 = vrot.slane %v9241_v63, %v9267_v28 }
 0x23d   : > { %v913_v16 = vsel %vm912_vm12, %v911_v9, %v907_v12  ;;  %v928_v18 = vsel %vm912_vm12, %v927_v8, %v923_v14  ;;  %v944_v29 = vsel %vm912_vm12, %v943_v21, %v939_v27 }
 0x23e   : > { %8470 = vset.pattern.permute.xlu1 %v10932_v17  ;;  %v915_v22 = vmul.f32 %v913_v16, %v9182_v30  ;;  %v930_v23 = vmul.f32 %v928_v18, %v9126_v50 }
 0x288   : > { %v2356_v38 = vpop.permute.xlu0 %2355  ;;  %v2349_v41 = vpop.permute.xlu1 %2348 }
 0x289   : > { %v2358_v39 = vmul.f32 %v8049_v37, %v2356_v38  ;;  %v2357_v42 = vmul.f32 %v8048_v40, %v2349_v41  ;;  %v1046_v37 = vunpack.c.l.s4 %v8759_v36  ;;  %v931_v38 = vadd.f32 %v930_v23, %v915_v22 }
 0x28a   : > { %v955_v40 = vrot.slane %v9235_v60, %v9267_v28  ;;  %v946_v41 = vmul.f32 %v944_v29, %v9184_v31  ;;  %v982_v23 = vmul.f32 %v9132_v53, %v907_v12  ;;  %v1000_v29 = vmul.f32 %v9134_v54, %v923_v14 }
 0x28b   : > { %2450 = vperm.xlu1 %8470, %v2358_v39   ;;  %2432 = vperm.xlu0 %8469, %v2358_v39  }
 0x28c   : > { %v947_v48 = vadd.f32 %v946_v41, %v931_v38  ;;  %v983_v41 = vmul.f32 %v9130_v52, %v911_v9 }
 0x28f   : > { %8471 = vset.pattern.permute.xlu1 %v10930_v1  ;;  %8472 = vset.pattern.permute.xlu0 %v10932_v17 }
 0x290   : > { %2427 = vperm.xlu1 %8471, %v2357_v42   ;;  %2446 = vperm.xlu0 %8472, %v2357_v42  }
 0x294   : > { %8473 = vset.pattern.permute.xlu1 %v10942_v26  ;;  %8474 = vset.pattern.permute.xlu0 %v10940_v25 }
 0x295   : > { %2470 = vperm.xlu1 %8473, %v2358_v39   ;;  %2490 = vperm.xlu0 %8474, %v2358_v39  }
 0x299   : > { %2466 = vperm.xlu1 %8473, %v2357_v42   ;;  %8477 = vset.pattern.permute.xlu0 %v10942_v26  ;;  %v9233_v57 = vpop.permute.xlu1 %1884 }
 0x29a   : > { %3737 = vperm.xlu0 %8477, %v9050_v6  }
 0x29d   : > { %8475 = vset.pattern.permute.xlu1 %v10940_v25 }
 0x29e   : > { %2486 = vperm.xlu1 %8475, %v2357_v42   ;;  %8478 = vset.pattern.permute.xlu0 %v10930_v1  ;;  %v9237_v61 = vpop.permute.xlu1 %1906  ;;  %v9277_v42 = vpop.permute.xlu0 %8457 }
 0x2a2   : > { %8476 = vset.pattern.permute.xlu1 %v10942_v26  ;;  %v9286_v22 = vpop.permute.xlu0 %1928 }
 0x2a3   : > { %3733 = vperm.xlu1 %8476, %v9035_v4   ;;  %v9243_v7 = vpop.permute.xlu1 %1950 }
 0x2a6   : > { %v9293_v38 = vpop.permute.xlu0 %1994 }
 0x2a7   : > { %8484 = vset.pattern.permute.xlu1 %v10932_v17 }
 0x2a8   : > { %3761 = vbcast.lane.b32.xlu1 %v3759_v44, 256  ;;  %v9258_v20 = vpop.permute.xlu1 %1972  ;;  %v960_v44 = vsel %vm912_vm12, %v959_v35, %v955_v40 }
 0x2a9   : > { %v962_v49 = vmul.f32 %v960_v44, %v9128_v51  ;;  %v1001_v44 = vmul.f32 %v9186_v32, %v927_v8 }
 0x2aa   : > { %v9301_v14 = vpop.permute.xlu0 %2378 }
 0x2ab   : > { %v963_v18 = vadd.f32 %v962_v49, %v947_v48  ;;  %11028 = vst [vmem:[#allocation24_spill] sm:$0xff] %v9301_v14  ;;  %v1003_v5 = vadd.f32 %v1001_v44, %v983_v41 }
 0x2ac   : > { %3754 = vbcast.lane.b32.xlu1 %v3752_v45, 256  ;;  %v9272_v39 = vpop.permute.xlu1 %2020  ;;  %v1047_v45 = vunpack.c.0.s8 %v1046_v37  ;;  %v1002_v37 = vadd.f32 %v1000_v29, %v982_v23  ;;  %v1021_v29 = vmul.f32 %v9188_v33, %v943_v21  ;;  %v8024_v21 = vld [vmem:[%s10916_s6 + $0x1] ss:$0 sm:$0xff] }
 0x2ad   : > { %11024 = vst [vmem:[#allocation20_spill] sm:$0xff] %v9272_v39 }
 0x2ae   : > { %v9284_v16 = vsub.s32 %v1047_v45, %v9057_v10  ;;  %v1020_v45 = vmul.f32 %v9136_v55, %v939_v27  ;;  %v1023_v27 = vadd.f32 %v1021_v29, %v1003_v5 }
 0x2b0   : > { %v9281_v58 = vpop.permute.xlu1 %2027  ;;  %v1051_v1 = vrot.slane %v963_v18, %v9284_v16  ;;  %v1022_v12 = vadd.f32 %v1020_v45, %v1002_v37  ;;  %v1040_v18 = vmul.f32 %v9190_v34, %v955_v40 }
 0x2b1   : > { %11025 = vst [vmem:[#allocation21_spill] sm:$0xff] %v9281_v58 }
 0x2b2   : > { %v1059_v48 = vrot.slane %v1051_v1, %v9284_v16  ;;  %v1052_v17 = vcombine.high %v1051_v1, %v1051_v1  ;;  %v1042_v9 = vadd.f32 %v1040_v18, %v1022_v12  ;;  %v1041_v1 = vmul.f32 %v9138_v56, %v959_v35 }
 0x2b4   : > { %v9290_v36 = vpop.permute.xlu1 %2394  ;;  %v1070_v23 = vrot.slane %v1059_v48, %v9065_v13  ;;  %v1066_v8 = vrot.slane %v1052_v17, %v9284_v16  ;;  %v1043_v40 = vadd.f32 %v1041_v1, %v1023_v27 }
 0x2b5   : > { %11026 = vst [vmem:[#allocation22_spill] sm:$0xff] %v9290_v36 }
 0x2b6   : > { %v1077_v0 = vmul.f32 %v1070_v23, %v1042_v9  ;;  %v1074_v37 = vrot.slane %v1066_v8, %v9065_v13 }
 0x2b8   : > { %v1081_v44 = vcombine.high %v1077_v0, %v1077_v0  ;;  %v1078_v45 = vmul.f32 %v1074_v37, %v1043_v40  ;;  %v1088_v5 = vrot.slane %v1077_v0, %v9284_v16 }
 0x2b9   : > { %v9299_v49 = vpop.permute.xlu1 %2410 }
 0x2ba   : > { %11027 = vst [vmem:[#allocation23_spill] sm:$0xff] %v9299_v49  ;;  %v1095_v12 = vrot.slane %v1081_v44, %v9284_v16  ;;  %v1129_v9 = vcombine.high %v1078_v45, %v1078_v45  ;;  %v1136_v1 = vrot.slane %v1078_v45, %v9284_v16  ;;  %v1096_v26 = vcombine.high %v1088_v5, %v1088_v5 }
 0x2bb   : > { %v9332_v44 = vrot.slane %v1088_v5, %v9284_v16 }
 0x2bc   : > { %v1097_v37 = vcombine.high %v1095_v12, %v1095_v12  ;;  %v1152_v49 = vrot.slane %v1136_v1, %v9284_v16 }
 0x30a   : > { %v9307_v3 = vpop.permute.xlu1 %2450  ;;  %v9309_v25 = vpop.permute.xlu0 %2432 }
 0x30b   : > { %11029 = vst [vmem:[#allocation25_spill] sm:$0xff] %v9307_v3  ;;  %11030 = vst [vmem:[#allocation26_spill] sm:$0xff] %v9309_v25  ;;  %v834_v48 = vpop.f32.mrb[4].mxu0 }
 0x30c   : > { %v835_v18 = vadd.f32 %v8024_v21, %v834_v48  ;;  %v8216_v35 = vpop.f32.mrb[5].mxu0 }
 0x30d   : > { %v837_v29 = vpop.f32.mrb[6].mxu0 }
 0x30e   : > { %vm840_vm13 = vcmp.gt.f32.partialorder %v835_v18, 0.0  ;;  %v841_v8 = vmul.f32 0.01, %v835_v18  ;;  %v8217_v27 = vpop.f32.mrb[7].mxu0  ;;  %v1143_v29 = vrot.slane %v1129_v9, %v9284_v16 }
 0x30f   : > { %v9313_v41 = vpop.permute.xlu1 %2427  ;;  %v9318_v17 = vpop.permute.xlu0 %2446 }
 0x310   : > { %11031 = vst [vmem:[#allocation27_spill] sm:$0xff] %v9313_v41  ;;  %11032 = vst [vmem:[#allocation28_spill] sm:$0xff] %v9318_v17  ;;  %v9325_v40 = vsel %vm840_vm13, %v835_v18, %v841_v8  ;;  %v1111_v18 = vrot.slane %v1095_v12, %v9284_v16  ;;  %v1144_v8 = vcombine.high %v1136_v1, %v1136_v1 }
 0x311   : > { %11034 = vst [vmem:[#allocation30_spill] sm:$0xff] %v9325_v40  ;;  %v9336_v21 = vcombine.high %v9325_v40, %v9325_v40  ;;  %v1180_v48 = vrot.slane %v9325_v40, %v9065_v13  ;;  %v1191_v45 = vrot.slane %v9325_v40, %v9062_v11  ;;  %v1203_v35 = vrot.slane %v9325_v40, %v9254_v15 }
 0x312   : > { %v1125_v12 = vrot.slane %v1097_v37, %v9284_v16  ;;  %v1166_v1 = vrot.slane %v1144_v8, %v9284_v16  ;;  %v1127_v17 = vcombine.high %v1111_v18, %v1111_v18 }
 0x313   : > { %11037 = vst [vmem:[#allocation33_spill] sm:$0xff] %v9336_v21  ;;  %v1184_v5 = vrot.slane %v9336_v21, %v9065_v13  ;;  %v1195_v27 = vrot.slane %v9336_v21, %v9062_v11  ;;  %v1207_v10 = vrot.slane %v9336_v21, %v9254_v15  ;;  %v1232_v9 = vmul.f32 %v1180_v48, %v9132_v53 }
 0x314   : > { %v9322_v23 = vpop.permute.xlu1 %2470  ;;  %v9329_v0 = vpop.permute.xlu0 %2490  ;;  %v1242_v36 = vmul.f32 %v1191_v45, %v9134_v54  ;;  %v1405_v15 = vcombine.low %v1111_v18, %v1125_v12  ;;  %v1176_v63 = vcombine.high %v1166_v1, %v1166_v1 }
 0x315   : > { %11033 = vst [vmem:[#allocation29_spill] sm:$0xff] %v9322_v23  ;;  %11036 = vst [vmem:[#allocation32_spill] sm:$0xff] %v9329_v0  ;;  %v1219_v0 = vrot.slane %v9336_v21, %v9267_v28  ;;  %v1215_v23 = vrot.slane %v9325_v40, %v9267_v28  ;;  %v1196_v3 = vsel %vm912_vm12, %v1195_v27, %v1191_v45 }
 0x316   : > { %v1208_v25 = vsel %vm912_vm12, %v1207_v10, %v1203_v35  ;;  %v9366_v21 = vrot.slane %v1096_v26, %v9284_v16  ;;  %v1198_v40 = vmul.f32 %v1196_v3, %v9126_v50  ;;  %v1233_v41 = vmul.f32 %v1184_v5, %v9130_v52 }
 0x317   : > { %v1243_v28 = vmul.f32 %v1195_v27, %v9186_v32  ;;  %v1210_v45 = vmul.f32 %v1208_v25, %v9184_v31  ;;  %v1159_v26 = vrot.slane %v1143_v29, %v9284_v16  ;;  %v1174_v50 = vcombine.high %v1152_v49, %v1152_v49 }
 0x318   : > { %v9327_v2 = vpop.permute.xlu1 %2466  ;;  %v1254_v32 = vmul.f32 %v1203_v35, %v9136_v55  ;;  %v1403_v25 = vcombine.low %v9332_v44, %v9366_v21  ;;  %v8031_v31 = vcombine.high %v9332_v44, %v9366_v21  ;;  %v1427_v44 = vrot.slane %v1405_v15, %v9284_v16 }
 0x319   : > { %11035 = vst [vmem:[#allocation31_spill] sm:$0xff] %v9327_v2  ;;  %v1185_v2 = vsel %vm912_vm12, %v1184_v5, %v1180_v48  ;;  %v3738_v53 = vpop.permute.xlu0 %3737  ;;  %v1220_v48 = vsel %vm912_vm12, %v1219_v0, %v1215_v23  ;;  %v1245_v52 = vadd.f32 %v1243_v28, %v1233_v41  ;;  %v1255_v28 = vmul.f32 %v1207_v10, %v9188_v33 }
 0x31a   : > { %v1187_v37 = vmul.f32 %v1185_v2, %v9182_v30  ;;  %v1244_v2 = vadd.f32 %v1242_v36, %v1232_v9  ;;  %vm3739_vm14 = vcmp.eq.s32.totalorder %v3738_v53, 1  ;;  %v1222_v30 = vmul.f32 %v1220_v48, %v9128_v51 }
 0x31b   : > { %v1175_v18 = vcombine.high %v1159_v26, %v1159_v26  ;;  %v1452_v21 = vcombine.low %v1166_v1, %v1174_v50  ;;  %v1257_v35 = vadd.f32 %v1255_v28, %v1245_v52  ;;  %v11041_v5 = vmov 0.0  }
 0x31c   : > { %v1199_v54 = vadd.f32 %v1198_v40, %v1187_v37  ;;  %v1256_v41 = vadd.f32 %v1254_v32, %v1244_v2  ;;  %v1406_v40 = vcombine.low %v1127_v17, %v1152_v49  ;;  %v1453_v10 = vcombine.low %v1176_v63, %v1159_v26 }
 0x31d   : > { %v9363_v14 = vpop.permute.xlu1 %2486  ;;  %v1267_v17 = vmul.f32 %v1219_v0, %v9138_v56  ;;  %v1413_v53 = vrot.slane %v1403_v25, %v9284_v16  ;;  %v1461_v2 = vrot.slane %v1452_v21, %v9284_v16 }
 0x31e   : > { %11038 = vst [vmem:[#allocation34_spill] sm:$0xff] %v9363_v14  ;;  %v1145_v14 = vcombine.high %v1143_v29, %v1143_v29  ;;  %v1211_v3 = vadd.f32 %v1210_v45, %v1199_v54  ;;  %v1266_v29 = vmul.f32 %v1215_v23, %v9190_v34  ;;  %v1434_v23 = vrot.slane %v1406_v40, %v9284_v16 }
 0x31f   : > { %v1468_v56 = vrot.slane %v1453_v10, %v9284_v16  ;;  %v1269_v0 = vadd.f32 %v1267_v17, %v1257_v35  ;;  %v1420_v54 = vrot.slane %v8031_v31, %v9284_v16  ;;  %v11043_v10 = vmov 3  }
 0x320   : > { %v1223_v36 = vadd.f32 %v1222_v30, %v1211_v3  ;;  %v1173_v55 = vrot.slane %v1145_v14, %v9284_v16  ;;  %v1268_v15 = vadd.f32 %v1266_v29, %v1256_v41  ;;  %v9419_v45 = vcombine.low %v1427_v44, %v1434_v23 }
 0x321   : > { %v1435_v25 = vcombine.low %v1413_v53, %v1420_v54  ;;  %v11042_v44 = vmov 2  }
 0x322   : > { %v3734_v8 = vpop.permute.xlu1 %3733  ;;  %v1454_v26 = vcombine.low %v1173_v55, %v1175_v18  ;;  %v1450_v51 = vrot.slane %v9419_v45, %v9284_v16  ;;  %v11044_v45 = vmov 4  }
 0x323   : > { %vm3735_vm3 = vcmp.eq.s32.totalorder %v3734_v8, %v9075_v19  ;;  %vm3744_vm4 = vcmp.ne.s32.totalorder %v9208_v43, %v3734_v8  ;;  %v1277_v43 = vrot.slane %v1223_v36, %v9284_v16  ;;  %v1476_v8 = vcombine.low %v1461_v2, %v1468_v56 }
 0x324   : > { %vm9386_vm5 = vmand %vm3735_vm3, %vm3739_vm14  ;;  %v1475_v28 = vrot.slane %v1454_v26, %v9284_v16 }
 0x325   : > { %vm3745_vm6 = vmand %vm3743_vm15, %vm3744_vm4  ;;  %v1278_v33 = vcombine.high %v1277_v43, %v1277_v43  ;;  %v1285_v12 = vrot.slane %v1277_v43, %v9284_v16  ;;  %v9408_v34 = vsel %vm9386_vm5, 1.0, %v11041_v5  ;;  %v1483_v21 = vrot.slane %v1476_v8, %v9284_v16 }
 0x326   : > { %vm3746_vm7 = vmand %vm3745_vm6, %vm3739_vm14  ;;  %v8479_v37 = vpack.i.bf16 %v9408_v34, %v9142_v59 }
 0x327   : > { %v9397_v27 = vsel %vm3746_vm7, 1.0, %v11041_v5  ;;  %v1292_v63 = vrot.slane %v1278_v33, %v9284_v16  ;;  %v1296_v9 = vrot.slane %v1285_v12, %v9065_v13 }
 0x328   : > { %v3779_v49 = vrot.slane %v9397_v27, %v9062_v11  ;;  %v3772_v14 = vrot.slane %v9397_v27, %v9065_v13 }
 0x329   : > { %v1300_v1 = vrot.slane %v1292_v63, %v9065_v13  ;;  %v1303_v48 = vmul.f32 %v1296_v9, %v1268_v15 }
 0x32a   : > { %3781 = vbcast.lane.b32.xlu0 %v3779_v49, 256  ;;  %3774 = vbcast.lane.b32.xlu1 %v3772_v14, 256 }
 0x32b   : > { %v1307_v50 = vcombine.high %v1303_v48, %v1303_v48  ;;  %v1314_v3 = vrot.slane %v1303_v48, %v9284_v16  ;;  %v1304_v30 = vmul.f32 %v1300_v1, %v1269_v0 }
 0x32d   : > { %v1321_v52 = vrot.slane %v1307_v50, %v9284_v16  ;;  %v1322_v32 = vcombine.high %v1314_v3, %v1314_v3  ;;  %v1355_v36 = vcombine.high %v1304_v30, %v1304_v30  ;;  %v1330_v31 = vrot.slane %v1314_v3, %v9284_v16 }
 0x32e   : > { %3310 = vperm.xlu1 %8484, %v9142_v59   ;;  %8480 = vperm.xlu0 %8478, %v8479_v37   ;;  %v1362_v41 = vrot.slane %v1304_v30, %v9284_v16  ;;  %v11045_v3 = vmov 6  }
 0x32f   : > { %v1344_v55 = vrot.slane %v1322_v32, %v9284_v16  ;;  %v1323_v40 = vcombine.high %v1321_v52, %v1321_v52  ;;  %v1337_v43 = vrot.slane %v1321_v52, %v9284_v16  ;;  %v1369_v18 = vrot.slane %v1355_v36, %v9284_v16 }
 0x330   : > { %v1370_v35 = vcombine.high %v1362_v41, %v1362_v41  ;;  %v1378_v29 = vrot.slane %v1362_v41, %v9284_v16  ;;  %v1443_v32 = vrot.slane %v1435_v25, %v9284_v16  ;;  %v1490_v36 = vrot.slane %v1475_v28, %v9284_v16 }
 0x331   : > { %v1494_v33 = vcombine.low %v1330_v31, %v1344_v55  ;;  %v1351_v12 = vrot.slane %v1323_v40, %v9284_v16  ;;  %v1353_v49 = vcombine.high %v1337_v43, %v1337_v43  ;;  %v1371_v14 = vcombine.high %v1369_v18, %v1369_v18 }
 0x332   : > { %8485 = vset.pattern.permute.xlu1 %v11042_v44  ;;  %8486 = vset.pattern.permute.xlu0 %v11043_v10  ;;  %v1385_v17 = vrot.slane %v1369_v18, %v9284_v16  ;;  %v1392_v15 = vrot.slane %v1370_v35, %v9284_v16  ;;  %v1400_v23 = vcombine.high %v1378_v29, %v1378_v29 }
 0x333   : > { %3332 = vperm.xlu1 %8485, %v9142_v59   ;;  %3354 = vperm.xlu0 %8486, %v9142_v59   ;;  %v8032_v63 = vcombine.high %v1330_v31, %v1344_v55  ;;  %v1501_v9 = vrot.slane %v1494_v33, %v9284_v16  ;;  %v1399_v37 = vrot.slane %v1371_v14, %v9284_v16  ;;  %v11047_v14 = vmov 1  }
 0x334   : > { %v1512_v53 = vcombine.low %v1337_v43, %v1351_v12  ;;  %v1513_v56 = vcombine.low %v1353_v49, %v1378_v29  ;;  %v1401_v0 = vcombine.high %v1385_v17, %v1385_v17  ;;  %v1402_v1 = vcombine.high %v1392_v15, %v1392_v15 }
 0x335   : > { %v1514_v48 = vcombine.low %v1392_v15, %v1400_v23  ;;  %v1521_v54 = vrot.slane %v8032_v63, %v9284_v16  ;;  %v1502_v26 = vcombine.low %v1501_v9, %v1501_v9  ;;  %v1451_v18 = vcombine.low %v1443_v32, %v1450_v51  ;;  %v3762_v9 = vpop.permute.xlu1 %3761 }
 0x336   : > { %v1528_v2 = vrot.slane %v1512_v53, %v9284_v16  ;;  %v1535_v50 = vrot.slane %v1513_v56, %v9284_v16  ;;  %v1560_v8 = vcombine.low %v1402_v1, %v1385_v17  ;;  %v1561_v52 = vcombine.low %v1399_v37, %v1401_v0  ;;  %v9484_v56 = vld [vmem:[#allocation8] sm:$0xff]  }
 0x337   : > { %8487 = vset.pattern.permute.xlu1 %v11044_v45  ;;  %8489 = vset.pattern.permute.xlu0 %v11045_v3  ;;  %v1542_v30 = vrot.slane %v1514_v48, %v9284_v16  ;;  %v1509_v31 = vrot.slane %v1502_v26, %v9284_v16  ;;  %v1491_v35 = vcombine.low %v1483_v21, %v1490_v36  ;;  %v11046_v12 = vmov 5   ;;  %v9489_v48 = vld [vmem:[#allocation8 + $0x8] sm:$0xff]   ;;  %v8576_v26 = vld [vmem:[%s9032_s20] sm:$0x3]  ;;  %s515_s20 = scalar_lea.vmem [#allocation9], %s7991_s18 }
 0x338   : > { %3376 = vperm.xlu1 %8487, %v9142_v59   ;;  %3420 = vperm.xlu0 %8489, %v9142_v59   ;;  %v1543_v41 = vcombine.low %v1521_v54, %v1528_v2  ;;  %v1568_v40 = vrot.slane %v1560_v8, %v9284_v16  ;;  %v1575_v43 = vrot.slane %v1561_v52, %v9284_v16  ;;  %v11048_v63 = vmov 0   ;;  %v530_v2 = vld [vmem:[%s9010_s22 + $0x6] sm:$0x3]  ;;  %s8114_s22 = sshll.u32 %s8855_s12, 5  ;;  %s7866_s17 = sshll.u32 %s515_s20, 4  ;;  %s10868_s17 = int_to_ptr.vmem [resolvable:$true] %s7866_s17 }
 0x339   : > { %v1544_v55 = vcombine.low %v1535_v50, %v1542_v30  ;;  %v1510_v29 = vcombine.low %v1509_v31, %v1509_v31  ;;  %v3444_v28 = vrot.slane %v9149_v62, %v9065_v13  ;;  %vm3764_vm9 = vcmp.eq.s32.totalorder %v3762_v9, %v9075_v19  ;;  %v3755_v37 = vpop.permute.xlu1 %3754  ;;  %8226 = vmatprep.subr.bf16.mxu0 %v9484_v56  ;;  %s10866_s11 = scalar_lea.hbm %s11161_s21, %s8114_s22  ;;  %s8671_s23 = scalar_lea.vmem %s10868_s17, 32 }
 0x33a   : > { %v1551_v33 = vrot.slane %v1543_v41, %v9284_v16  ;;  %v1576_v49 = vcombine.low %v1568_v40, %v1575_v43  ;;  %v8062_v53 = vsel %vm3764_vm9, 1.0, %v11041_v5  ;;  %vm3763_vm10 = vcmp.eq.s32.totalorder %v3755_v37, %v9075_v19  ;;  %8227 = vmatpush3.bf16.msra.mxu0 %v9484_v56  ;;  %p8672_p0 = scmp.ne.s32.totalorder %s10868_s17, %s8671_s23  ;;  %s8760_s12 = smov [#allocation9]  }
 0x33b   : > { %v1558_v25 = vrot.slane %v1544_v55, %v9284_v16  ;;  %v1588_v17 = vsel %vm1587_vm8, %v1491_v35, %v1510_v29  ;;  %v8061_v0 = vsel %vm3763_vm10, 1.0, %v11041_v5  ;;  %8228 = vmatprep.subr.bf16.mxu0 %v9489_v48  ;;  %v5185_v50 = vrot.slane %v530_v2, %v9062_v11  ;;  %s8675_s24 = sshll.u32 %s8760_s12, 4  ;;  %s8676_s24 = int_to_ptr.vmem [resolvable:$false] %s8675_s24 }
 0x33c   : > { %8488 = vset.pattern.permute.xlu1 %v11046_v12  ;;  %8490 = vset.pattern.permute.xlu0 %v11047_v14  ;;  %v1589_v51 = vpack.c.bf16 %v1588_v17, %v1451_v18  ;;  %v1583_v15 = vrot.slane %v1576_v49, %v9284_v16  ;;  %v5178_v30 = vrot.slane %v530_v2, %v9065_v13  ;;  %v8033_v18 = vld [vmem:[%s10918_s8] ss:$0 sm:$0xff]  ;;  %vm5169_vm4 = vcmp.ne.s32.totalorder %v530_v2, 4294967295  ;;  %p8673_p3 = pnand %p8672_p0, %p11162_p1  ;;  %p8678_p9 = scmp.lt.s32.totalorder %s10868_s17, %s8676_s24 }
 0x33d   : > { %3398 = vperm.xlu1 %8488, %v9142_v59   ;;  %3804 = vperm.xlu0 %8490, %v9408_v34   ;;  %v1559_v21 = vcombine.low %v1551_v33, %v1558_v25  ;;  %v3451_v59 = vrot.slane %v9149_v62, %v9062_v11 }
 0x33e   : > { %8222 = vmatprep.mubr.msk.bf16.mxu1 %vm598_vm2, %v1589_v51  ;;  %8229 = vmatpush3.bf16.msra.mxu0 %v9489_v48  ;;  %p8674_p7 = pneg %p8673_p3 }
 0x33f   : > { %v1590_v23 = vpack.c.bf16 %v1583_v15, %v1559_v21  ;;  %8242 = vmatprep.subr.bf16.mxu0 %v9484_v56 }
 0x341   : > { %3446 = vbcast.lane.b32.xlu1 %v3444_v28, 256  ;;  %8493 = vset.pattern.permute.xlu0 %v11048_v63 }
 0x342   : > { %8491 = vset.pattern.permute.xlu1 %v11042_v44  ;;  %8223 = vmatmul.mubr.msk.bf16.vlgmr.msra.gmra.mrb[8].mxu1 %vm598_vm2, %v1590_v23 }
 0x343   : > { %8235 = vmatpush3.bf16.msra.mxu1 %v9217_v46 }
 0x344   : > { %8236 = vmatprep.subr.bf16.mxu1 %v9222_v47 }
 0x345   : > { %3453 = vbcast.lane.b32.xlu1 %v3451_v59, 256 }
 0x347   : > { %8237 = vmatpush3.bf16.msra.mxu1 %v9222_v47 }
 0x348   : > { %8250 = vmatprep.subr.bf16.mxu1 %v9217_v46 }
 0x349   : > { %3820 = vperm.xlu1 %8491, %v9408_v34  }
 0x34d   : > { %8492 = vset.pattern.permute.xlu1 %v11043_v10 }
 0x34e   : > { %3836 = vperm.xlu1 %8492, %v9408_v34  }
 0x352   : > { %8494 = vset.pattern.permute.xlu1 %v11047_v14 }
 0x39c   : > { %v3782_v47 = vpop.permute.xlu0 %3781  ;;  %v3775_v1 = vpop.permute.xlu1 %3774 }
 0x39d   : > { %v3784_v46 = vmul.f32 %v8062_v53, %v3782_v47  ;;  %v3783_v54 = vmul.f32 %v8061_v0, %v3775_v1 }
 0x39f   : > { %3876 = vperm.xlu1 %8494, %v3784_v46   ;;  %3858 = vperm.xlu0 %8493, %v3784_v46  }
 0x3a3   : > { %8495 = vset.pattern.permute.xlu1 %v11048_v63  ;;  %8496 = vset.pattern.permute.xlu0 %v11047_v14 }
 0x3a4   : > { %3853 = vperm.xlu1 %8495, %v3783_v54   ;;  %3872 = vperm.xlu0 %8496, %v3783_v54  }
 0x3a8   : > { %8497 = vset.pattern.permute.xlu1 %v11042_v44  ;;  %8498 = vset.pattern.permute.xlu0 %v11043_v10 }
 0x3a9   : > { %3896 = vperm.xlu1 %8497, %v3784_v46   ;;  %3916 = vperm.xlu0 %8498, %v3784_v46  }
 0x3ad   : > { %3892 = vperm.xlu1 %8497, %v3783_v54   ;;  %5163 = vperm.xlu0 %8498, %v9050_v6   ;;  %v9506_v8 = vpop.permute.xlu1 %3310  ;;  %v9516_v31 = vpop.permute.xlu0 %8480 }
 0x3b1   : > { %8499 = vset.pattern.permute.xlu1 %v11043_v10  ;;  %8506 = vset.pattern.permute.xlu0 %v11047_v14 }
 0x3b2   : > { %3912 = vperm.xlu1 %8499, %v3783_v54   ;;  %5180 = vbcast.lane.b32.xlu0 %v5178_v30, 256  ;;  %v9508_v52 = vpop.permute.xlu1 %3332  ;;  %v9520_v55 = vpop.permute.xlu0 %3354 }
 0x3b6   : > { %5159 = vperm.xlu1 %8499, %v8576_v26  }
 0x3b7   : > { %v9510_v6 = vpop.permute.xlu1 %3376  ;;  %v9524_v43 = vpop.permute.xlu0 %3420 }
 0x3b8   : > { %11052 = vst [vmem:[#allocation38_spill] sm:$0xff] %v9524_v43 }
 0x3ba   : > { %8500 = vset.pattern.permute.xlu1 %v11048_v63 }
 0x3bb   : > { %5187 = vbcast.lane.b32.xlu1 %v5185_v50, 256 }
 0x3bc   : > { %v9512_v32 = vpop.permute.xlu1 %3398  ;;  %v9531_v15 = vpop.permute.xlu0 %3804 }
 0x3bd   : > { %11054 = vst [vmem:[#allocation40_spill] sm:$0xff] %v9531_v15 }
 0x3c0   : > { %v9514_v36 = vpop.permute.xlu1 %3446 }
 0x3c1   : > { %11049 = vst [vmem:[#allocation35_spill] sm:$0xff] %v9514_v36 }
 0x3c4   : > { %v9518_v41 = vpop.permute.xlu1 %3453 }
 0x3c5   : > { %11050 = vst [vmem:[#allocation36_spill] sm:$0xff] %v9518_v41 }
 0x3c8   : > { %v9522_v40 = vpop.permute.xlu1 %3820 }
 0x3c9   : > { %11051 = vst [vmem:[#allocation37_spill] sm:$0xff] %v9522_v40 }
 0x3cd   : > { %v9529_v28 = vpop.permute.xlu1 %3836 }
 0x3ce   : > { %11053 = vst [vmem:[#allocation39_spill] sm:$0xff] %v9529_v28 }
 0x415   : > { %v8224_v35 = vpop.f32.mrb[8].mxu1 }
 0x416   : > { %v1658_v29 = vadd.f32 %v8224_v35, %v8033_v18  ;;  %v1649_v33 = vpop.f32.mrb[9].mxu1 }
 0x417   : > { %v1650_v25 = vadd.f32 %v8033_v18, %v1649_v33  ;;  %v8225_v49 = vpop.f32.mrb[10].mxu1 }
 0x418   : > { %v1670_v17 = vmul.f32 0.01, %v1658_v29  ;;  %v1661_v51 = vadd.f32 %v8225_v49, %v8033_v18  ;;  %v1652_v21 = vpop.f32.mrb[11].mxu1  ;;  %vm1666_vm11 = vcmp.gt.f32.partialorder %v1658_v29, 0.0 }
 0x419   : > { %v1668_v23 = vmul.f32 0.01, %v1650_v25  ;;  %v1653_v59 = vadd.f32 %v8033_v18, %v1652_v21  ;;  %vm1664_vm13 = vcmp.gt.f32.partialorder %v1650_v25, 0.0 }
 0x41a   : > { %vm1667_vm14 = vcmp.gt.f32.partialorder %v1661_v51, 0.0  ;;  %v1671_v9 = vmul.f32 0.01, %v1661_v51  ;;  %v1674_v53 = vsel %vm1666_vm11, %v1658_v29, %v1670_v17 }
 0x41b   : > { %vm1665_vm15 = vcmp.gt.f32.partialorder %v1653_v59, 0.0  ;;  %v1669_v37 = vmul.f32 0.01, %v1653_v59  ;;  %v1672_v46 = vsel %vm1664_vm13, %v1650_v25, %v1668_v23  ;;  %v4870_v23 = vrot.slane %v9408_v34, %v9065_v13 }
 0x41c   : > { %v1675_v47 = vsel %vm1667_vm14, %v1661_v51, %v1671_v9 }
 0x41d   : > { %v1677_v0 = vpack.c.bf16 %v1675_v47, %v1674_v53  ;;  %v1673_v1 = vsel %vm1665_vm15, %v1653_v59, %v1669_v37  ;;  %v4877_v59 = vrot.slane %v9408_v34, %v9062_v11 }
 0x41e   : > { %v9533_v54 = vpop.permute.xlu1 %3876  ;;  %v1676_v26 = vpack.c.bf16 %v1673_v1, %v1672_v46  ;;  %v9535_v50 = vpop.permute.xlu0 %3858 }
 0x41f   : > { %11055 = vst [vmem:[#allocation41_spill] sm:$0xff] %v9533_v54  ;;  %11056 = vst [vmem:[#allocation42_spill] sm:$0xff] %v9535_v50 }
 0x420   : > { %8230 = vmatprep.mubr.msk.bf16.mxu0 %vm598_vm2, %v1676_v26  ;;  %v3731_v26 = vadd.f32 %v9149_v62, %v9086_v24 }
 0x421   : > { %8231 = vmatmul.mubr.msk.bf16.vlgmr.msra.gmra.mrb[8].mxu0 %vm598_vm2, %v1677_v0 }
 0x422   : > { %8243 = vmatpush3.bf16.msra.mxu0 %v9484_v56 }
 0x423   : > { %v9539_v30 = vpop.permute.xlu1 %3853  ;;  %8244 = vmatprep.subr.bf16.mxu0 %v9489_v48  ;;  %v9543_v18 = vpop.permute.xlu0 %3872 }
 0x424   : > { %11057 = vst [vmem:[#allocation43_spill] sm:$0xff] %v9539_v30  ;;  %11058 = vst [vmem:[#allocation44_spill] sm:$0xff] %v9543_v18 }
 0x426   : > { %8245 = vmatpush3.bf16.msra.mxu0 %v9489_v48 }
 0x427   : > { %8258 = vmatprep.subr.bf16.mxu0 %v9484_v56 }
 0x428   : > { %v9546_v35 = vpop.permute.xlu1 %3896  ;;  %v9549_v29 = vpop.permute.xlu0 %3916 }
 0x429   : > { %11059 = vst [vmem:[#allocation45_spill] sm:$0xff] %v9546_v35  ;;  %11060 = vst [vmem:[#allocation46_spill] sm:$0xff] %v9549_v29 }
 0x42c   : > { %v9551_v33 = vpop.permute.xlu1 %3892  ;;  %v5164_v49 = vpop.permute.xlu0 %5163 }
 0x42d   : > { %11061 = vst [vmem:[#allocation47_spill] sm:$0xff] %v9551_v33  ;;  %vm5165_vm3 = vcmp.eq.s32.totalorder %v5164_v49, 1  ;;  %v5157_v49 = vadd.f32 %v9408_v34, %v3731_v26 }
 0x430   : > { %v5181_v37 = vpop.permute.xlu0 %5180 }
 0x431   : > { %v9553_v25 = vpop.permute.xlu1 %3912  ;;  %vm5189_vm13 = vcmp.eq.s32.totalorder %v5181_v37, %v9075_v19 }
 0x432   : > { %11062 = vst [vmem:[#allocation48_spill] sm:$0xff] %v9553_v25  ;;  %v8074_v46 = vsel %vm5189_vm13, 1.0, %v11041_v5 }
 0x435   : > { %v5160_v17 = vpop.permute.xlu1 %5159 }
 0x436   : > { %vm5161_vm5 = vcmp.eq.s32.totalorder %v5160_v17, %v9075_v19  ;;  %vm5170_vm6 = vcmp.ne.s32.totalorder %v530_v2, %v5160_v17 }
 0x437   : > { %vm5166_vm7 = vmand %vm5161_vm5, %vm5165_vm3 }
 0x438   : > { %vm5171_vm9 = vmand %vm5169_vm4, %vm5170_vm6  ;;  %v9564_v21 = vsel %vm5166_vm7, 1.0, %v11041_v5 }
 0x439   : > { %vm5172_vm10 = vmand %vm5171_vm9, %vm5165_vm3  ;;  %v8501_v2 = vpack.i.bf16 %v9564_v21, %v9397_v27  ;;  %v5188_v9 = vpop.permute.xlu1 %5187  ;;  %v6296_v17 = vrot.slane %v9564_v21, %v9065_v13  ;;  %v6303_v4 = vrot.slane %v9564_v21, %v9062_v11 }
 0x43a   : > { %v9557_v48 = vsel %vm5172_vm10, 1.0, %v11041_v5  ;;  %vm5190_vm11 = vcmp.eq.s32.totalorder %v5188_v9, %v9075_v19 }
 0x43b   : > { %v5205_v56 = vrot.slane %v9557_v48, %v9062_v11  ;;  %v5198_v51 = vrot.slane %v9557_v48, %v9065_v13 }
 0x43d   : > { %5207 = vbcast.lane.b32.xlu1 %v5205_v56, 256  ;;  %5200 = vbcast.lane.b32.xlu0 %v5198_v51, 256  ;;  %v9610_v56 = vadd.f32 %v9564_v21, %v5157_v49  ;;  %v9621_v51 = vsel %vm571_vm1, 1.0, %v11041_v5 }
 0x43e   : > { %11063 = vst [vmem:[#allocation49_spill] sm:$0xff] %v9621_v51 }
 0x441   : > { %8502 = vperm.xlu1 %8500, %v8501_v2   ;;  %4736 = vperm.xlu0 %8506, %v9397_v27   ;;  %v6751_v2 = vrot.slane %v9610_v56, %v9062_v11 }
 0x445   : > { %8507 = vset.pattern.permute.xlu1 %v11042_v44  ;;  %8509 = vset.pattern.permute.xlu0 %v11044_v45 }
 0x446   : > { %4758 = vperm.xlu1 %8507, %v9397_v27   ;;  %4802 = vperm.xlu0 %8509, %v9397_v27  }
 0x44a   : > { %8508 = vset.pattern.permute.xlu1 %v11043_v10  ;;  %4872 = vbcast.lane.b32.xlu0 %v4870_v23, 256 }
 0x44b   : > { %4780 = vperm.xlu1 %8508, %v9397_v27   ;;  %8512 = vset.pattern.permute.xlu0 %v11047_v14 }
 0x44e   : > { %5230 = vperm.xlu0 %8512, %v9564_v21  }
 0x44f   : > { %8510 = vset.pattern.permute.xlu1 %v11046_v12 }
 0x450   : > { %4824 = vperm.xlu1 %8510, %v9397_v27  }
 0x452   : > { %8515 = vset.pattern.permute.xlu0 %v11048_v63 }
 0x454   : > { %8511 = vset.pattern.permute.xlu1 %v11045_v3 }
 0x455   : > { %4846 = vperm.xlu1 %8511, %v9397_v27   ;;  %v8075_v27 = vsel %vm5190_vm11, 1.0, %v11041_v5 }
 0x459   : > { %4879 = vbcast.lane.b32.xlu1 %v4877_v59, 256 }
 0x45a   : > { %8513 = vset.pattern.permute.xlu1 %v11042_v44 }
 0x45d   : > { %5246 = vperm.xlu1 %8513, %v9564_v21  }
 0x461   : > { %8514 = vset.pattern.permute.xlu1 %v11043_v10 }
 0x462   : > { %5262 = vperm.xlu1 %8514, %v9564_v21  }
 0x466   : > { %8516 = vset.pattern.permute.xlu1 %v11047_v14 }
 0x4af   : > { %v5208_v53 = vpop.permute.xlu1 %5207  ;;  %v5201_v0 = vpop.permute.xlu0 %5200 }
 0x4b0   : > { %v5210_v47 = vmul.f32 %v8075_v27, %v5208_v53  ;;  %v5209_v1 = vmul.f32 %v8074_v46, %v5201_v0 }
 0x4b2   : > { %5302 = vperm.xlu1 %8516, %v5210_v47   ;;  %5284 = vperm.xlu0 %8515, %v5210_v47  }
 0x4b6   : > { %8517 = vset.pattern.permute.xlu1 %v11048_v63  ;;  %8518 = vset.pattern.permute.xlu0 %v11047_v14 }
 0x4b7   : > { %5279 = vperm.xlu1 %8517, %v5209_v1   ;;  %5298 = vperm.xlu0 %8518, %v5209_v1  }
 0x4bb   : > { %8519 = vset.pattern.permute.xlu1 %v11042_v44  ;;  %8520 = vset.pattern.permute.xlu0 %v11043_v10 }
 0x4bc   : > { %5322 = vperm.xlu1 %8519, %v5210_v47   ;;  %5342 = vperm.xlu0 %8520, %v5210_v47  }
 0x4c0   : > { %5318 = vperm.xlu1 %8519, %v5209_v1   ;;  %8523 = vset.pattern.permute.xlu0 %v11047_v14 }
 0x4c1   : > { %6162 = vperm.xlu0 %8523, %v9557_v48  }
 0x4c4   : > { %8521 = vset.pattern.permute.xlu1 %v11043_v10 }
 0x4c5   : > { %5338 = vperm.xlu1 %8521, %v5209_v1   ;;  %8526 = vset.pattern.permute.xlu0 %v11044_v45  ;;  %v6744_v45 = vrot.slane %v9610_v56, %v9065_v13 }
 0x4c6   : > { %6228 = vperm.xlu0 %8526, %v9557_v48  }
 0x4c9   : > { %8522 = vset.pattern.permute.xlu1 %v11048_v63 }
 0x4ca   : > { %6141 = vperm.xlu1 %8522, %v9557_v48   ;;  %6298 = vbcast.lane.b32.xlu0 %v6296_v17, 256 }
 0x4cb   : > { %8529 = vset.pattern.permute.xlu0 %v11048_v63 }
 0x4ce   : > { %8524 = vset.pattern.permute.xlu1 %v11042_v44  ;;  %6746 = vbcast.lane.b32.xlu0 %v6744_v45, 256 }
 0x4cf   : > { %6184 = vperm.xlu1 %8524, %v9557_v48  }
 0x4d2   : > { %6897 = vperm.xlu0 %8529, %v9621_v51  }
 0x4d3   : > { %8525 = vset.pattern.permute.xlu1 %v11043_v10 }
 0x4d4   : > { %6206 = vperm.xlu1 %8525, %v9557_v48  }
 0x4d6   : > { %8532 = vset.pattern.permute.xlu0 %v11042_v44 }
 0x4d8   : > { %8527 = vset.pattern.permute.xlu1 %v11046_v12  ;;  %v9640_v12 = vld [vmem:[%s10920_s10] ss:$0 sm:$0xff] }
 0x4d9   : > { %6250 = vperm.xlu1 %8527, %v9557_v48  }
 0x4dd   : > { %8528 = vset.pattern.permute.xlu1 %v11045_v3 }
 0x4de   : > { %6272 = vperm.xlu1 %8528, %v9557_v48  }
 0x4e2   : > { %6305 = vbcast.lane.b32.xlu1 %v6303_v4, 256 }
 0x4e3   : > { %8530 = vset.pattern.permute.xlu1 %v11048_v63 }
 0x4e6   : > { %6753 = vbcast.lane.b32.xlu1 %v6751_v2, 256 }
 0x4f4   : > { %v8232_v23 = vpop.f32.mrb[8].mxu0 }
 0x4f5   : > { %v1745_v3 = vadd.f32 %v8232_v23, %v9640_v12  ;;  %v1736_v59 = vpop.f32.mrb[9].mxu0 }
 0x4f6   : > { %v1737_v48 = vadd.f32 %v9640_v12, %v1736_v59  ;;  %v8233_v9 = vpop.f32.mrb[10].mxu0 }
 0x4f7   : > { %vm1753_vm1 = vcmp.gt.f32.partialorder %v1745_v3, 0.0  ;;  %v1757_v37 = vmul.f32 0.01, %v1745_v3  ;;  %v1748_v27 = vadd.f32 %v8233_v9, %v9640_v12  ;;  %v1739_v53 = vpop.f32.mrb[11].mxu0 }
 0x4f8   : > { %vm1751_vm14 = vcmp.gt.f32.partialorder %v1737_v48, 0.0  ;;  %v1755_v47 = vmul.f32 0.01, %v1737_v48  ;;  %v1740_v46 = vadd.f32 %v9640_v12, %v1739_v53 }
 0x4f9   : > { %v1761_v0 = vsel %vm1753_vm1, %v1745_v3, %v1757_v37  ;;  %vm1754_vm15 = vcmp.gt.f32.partialorder %v1748_v27, 0.0  ;;  %v1758_v1 = vmul.f32 0.01, %v1748_v27 }
 0x4fa   : > { %v2070_v26 = vcombine.high %v1761_v0, %v1761_v0  ;;  %v2077_v49 = vrot.slane %v1761_v0, %v9284_v16  ;;  %v1759_v17 = vsel %vm1751_vm14, %v1737_v48, %v1755_v47  ;;  %vm1752_vm3 = vcmp.gt.f32.partialorder %v1740_v46, 0.0 }
 0x4fb   : > { %v1765_v45 = vcombine.high %v1759_v17, %v1759_v17  ;;  %v1762_v4 = vsel %vm1754_vm15, %v1748_v27, %v1758_v1  ;;  %v1756_v2 = vmul.f32 0.01, %v1740_v46  ;;  %v1772_v53 = vrot.slane %v1759_v17, %v9284_v16 }
 0x4fc   : > { %v2084_v23 = vrot.slane %v2070_v26, %v9284_v16  ;;  %v2085_v59 = vcombine.high %v2077_v49, %v2077_v49  ;;  %v2125_v9 = vrot.slane %v1762_v4, %v9284_v16  ;;  %v2093_v19 = vrot.slane %v2077_v49, %v9284_v16 }
 0x4fd   : > { %v1779_v3 = vrot.slane %v1765_v45, %v9284_v16  ;;  %v1760_v37 = vsel %vm1752_vm3, %v1740_v46, %v1756_v2  ;;  %v1780_v29 = vcombine.high %v1772_v53, %v1772_v53 }
 0x4fe   : > { %v2086_v5 = vcombine.high %v2084_v23, %v2084_v23  ;;  %v9653_v0 = vrot.slane %v2085_v59, %v9284_v16  ;;  %v2126_v47 = vcombine.high %v2125_v9, %v2125_v9  ;;  %v9656_v27 = vrot.slane %v2125_v9, %v9284_v16 }
 0x4ff   : > { %v1781_v48 = vcombine.high %v1779_v3, %v1779_v3  ;;  %v1814_v1 = vcombine.high %v1760_v37, %v1760_v37  ;;  %v2115_v26 = vcombine.high %v2093_v19, %v2093_v19  ;;  %v1821_v49 = vrot.slane %v1760_v37, %v9284_v16 }
 0x500   : > { %v2114_v17 = vrot.slane %v2086_v5, %v9284_v16  ;;  %v2140_v46 = vrot.slane %v2126_v47, %v9284_v16  ;;  %v2196_v45 = vcombine.low %v9653_v0, %v9656_v27  ;;  %v8045_v2 = vcombine.high %v9653_v0, %v9656_v27 }
 0x501   : > { %v1809_v4 = vrot.slane %v1781_v48, %v9284_v16  ;;  %v1788_v59 = vrot.slane %v1772_v53, %v9284_v16  ;;  %v1828_v25 = vrot.slane %v1814_v1, %v9284_v16  ;;  %v1829_v35 = vcombine.high %v1821_v49, %v1821_v49 }
 0x502   : > { %v2100_v48 = vrot.slane %v2084_v23, %v9284_v16  ;;  %v2142_v28 = vcombine.high %v2140_v46, %v2140_v46  ;;  %v2214_v37 = vcombine.low %v2115_v26, %v2140_v46  ;;  %v1802_v5 = vrot.slane %v1780_v29, %v9284_v16 }
 0x503   : > { %v1813_v9 = vcombine.high %v1809_v4, %v1809_v4  ;;  %v1830_v47 = vcombine.high %v1828_v25, %v1828_v25  ;;  %v1837_v54 = vrot.slane %v1821_v49, %v9284_v16  ;;  %v2118_v50 = vcombine.high %v2114_v17, %v2114_v17 }
 0x504   : > { %v1795_v40 = vrot.slane %v1779_v3, %v9284_v16  ;;  %v9672_v0 = vcombine.low %v2100_v48, %v2142_v28  ;;  %v1851_v27 = vrot.slane %v1829_v35, %v9284_v16  ;;  %v1810_v1 = vcombine.high %v1788_v59, %v1788_v59 }
 0x505   : > { %v1866_v33 = vcombine.low %v1788_v59, %v1813_v9  ;;  %v1844_v23 = vrot.slane %v1828_v25, %v9284_v16  ;;  %v1858_v26 = vrot.slane %v1830_v47, %v9284_v16  ;;  %v1887_v9 = vcombine.low %v1802_v5, %v1837_v54 }
 0x506   : > { %v1860_v46 = vcombine.high %v1851_v27, %v1851_v27  ;;  %v8459_v49 = vunpack.i.l.bf16 %v9277_v42  ;;  %v2178_v15 = vcombine.low %v2093_v19, %v2118_v50  ;;  %v1811_v18 = vcombine.high %v1795_v40, %v1795_v40 }
 0x507   : > { %v1873_v53 = vrot.slane %v1866_v33, %v9284_v16  ;;  %v1909_v3 = vcombine.low %v1810_v1, %v1851_v27  ;;  %v1894_v28 = vrot.slane %v1887_v9, %v9284_v16  ;;  %v8043_v30 = vcombine.high %v1802_v5, %v1837_v54 }
 0x508   : > { %v1953_v33 = vcombine.low %v1795_v40, %v1860_v46  ;;  %v1975_v59 = vcombine.low %v1809_v4, %v1844_v23  ;;  %v1997_v25 = vcombine.low %v1811_v18, %v1858_v26  ;;  %v2068_v43 = vcombine.high %v1844_v23, %v1844_v23 }
 0x509   : > { %v1880_v29 = vrot.slane %v1873_v53, %v9284_v16  ;;  %v1916_v35 = vrot.slane %v1909_v3, %v9284_v16  ;;  %v1901_v47 = vrot.slane %v1894_v28, %v9284_v16  ;;  %v1938_v53 = vrot.slane %v8043_v30, %v9284_v16 }
 0x50a   : > { %v1960_v36 = vrot.slane %v1953_v33, %v9284_v16  ;;  %v2185_v19 = vrot.slane %v2178_v15, %v9284_v16  ;;  %v8044_v27 = vcombine.high %v1858_v26, %v2100_v48  ;;  %v1982_v5 = vrot.slane %v1975_v59, %v9284_v16 }
 0x50b   : > { %v1882_v41 = vmul.f32 %v8459_v49, %v1880_v29  ;;  %v1923_v50 = vrot.slane %v1916_v35, %v9284_v16  ;;  %v1903_v54 = vmul.f32 %v1901_v47, %v9233_v57  ;;  %v1945_v40 = vrot.slane %v1938_v53, %v9284_v16 }
 0x50c   : > { %v2143_v4 = vcombine.low %v2068_v43, %v2114_v17  ;;  %v2203_v18 = vrot.slane %v2196_v45, %v9284_v16  ;;  %v2004_v1 = vrot.slane %v1997_v25, %v9284_v16  ;;  %v2167_v30 = vrot.slane %v8044_v27, %v9284_v16 }
 0x50d   : > { %v1904_v29 = vadd.f32 %v1903_v54, %v1882_v41  ;;  %v1925_v23 = vmul.f32 %v1923_v50, %v9237_v61  ;;  %v1967_v15 = vrot.slane %v1960_v36, %v9284_v16  ;;  %v2192_v26 = vrot.slane %v2185_v19, %v9284_v16 }
 0x50e   : > { %v2150_v48 = vrot.slane %v2143_v4, %v9284_v16  ;;  %v2221_v46 = vrot.slane %v2214_v37, %v9284_v16  ;;  %v2174_v9 = vrot.slane %v2167_v30, %v9284_v16  ;;  %v1947_v17 = vmul.f32 %v1945_v40, %v9286_v22 }
 0x50f   : > { %v1926_v43 = vadd.f32 %v1925_v23, %v1904_v29  ;;  %v1989_v45 = vrot.slane %v1982_v5, %v9284_v16  ;;  %v2210_v41 = vrot.slane %v2203_v18, %v9284_v16  ;;  %v2239_v28 = vrot.slane %v8045_v2, %v9284_v16 }
 0x510   : > { %v2157_v3 = vrot.slane %v2150_v48, %v9284_v16  ;;  %v2176_v36 = vmul.f32 %v2174_v9, %v9233_v57  ;;  %v1969_v35 = vmul.f32 %v1967_v15, %v9243_v7  ;;  %v2011_v37 = vrot.slane %v2004_v1, %v9284_v16  ;;  %v9713_v57 = vpop.permute.xlu0 %4736 }
 0x511   : > { %v1948_v33 = vadd.f32 %v1947_v17, %v1926_v43  ;;  %v2228_v25 = vrot.slane %v2221_v46, %v9284_v16  ;;  %v2257_v47 = vrot.slane %v9672_v0, %v9284_v16  ;;  %v2194_v53 = vmul.f32 %v2192_v26, %v9237_v61 }
 0x512   : > { %v2159_v59 = vmul.f32 %v8459_v49, %v2157_v3  ;;  %v1991_v50 = vmul.f32 %v1989_v45, %v9258_v20  ;;  %v2246_v2 = vrot.slane %v2239_v28, %v9284_v16  ;;  %v2212_v54 = vmul.f32 %v2210_v41, %v9286_v22 }
 0x513   : > { %v1970_v19 = vadd.f32 %v1969_v35, %v1948_v33  ;;  %v2013_v49 = vmul.f32 %v2011_v37, %v9293_v38  ;;  %v2230_v4 = vmul.f32 %v2228_v25, %v9243_v7  ;;  %v2264_v0 = vrot.slane %v2257_v47, %v9284_v16 }
 0x514   : > { %v2177_v27 = vadd.f32 %v2176_v36, %v2159_v59  ;;  %v2248_v1 = vmul.f32 %v2246_v2, %v9258_v20  ;;  %v9721_v23 = vpop.permute.xlu0 %4802  ;;  %v11065_v36 = vld [vmem:[#allocation17_spill] sm:$0xff]  ;;  %v8460_v25 = vunpack.i.h.bf16 %v9277_v42 }
 0x515   : > { %v1992_v40 = vadd.f32 %v1991_v50, %v1970_v19  ;;  %v2266_v15 = vmul.f32 %v2264_v0, %v9293_v38  ;;  %v11067_v19 = vld [vmem:[#allocation19_spill] sm:$0xff] }
 0x516   : > { %v2195_v5 = vadd.f32 %v2194_v53, %v2177_v27 }
 0x517   : > { %v2014_v18 = vadd.f32 %v2013_v49, %v1992_v40 }
 0x518   : > { %v2213_v61 = vadd.f32 %v2212_v54, %v2195_v5  ;;  %v9730_v45 = vpop.permute.xlu0 %4872 }
 0x519   : > { %v2036_v30 = vrot.slane %v2014_v18, %v9284_v16  ;;  %11064 = vst [vmem:[#allocation50_spill] sm:$0xff] %v9730_v45  ;;  %v11070_v18 = vld [vmem:[#allocation28_spill] sm:$0xff] }
 0x51a   : > { %v2231_v29 = vadd.f32 %v2230_v4, %v2213_v61  ;;  %v11069_v4 = vld [vmem:[#allocation27_spill] sm:$0xff] }
 0x51b   : > { %v2037_v22 = vcombine.high %v2036_v30, %v2036_v30  ;;  %v2044_v48 = vrot.slane %v2036_v30, %v9284_v16  ;;  %v11071_v30 = vld [vmem:[#allocation30_spill] sm:$0xff] }
 0x51c   : > { %v2249_v26 = vadd.f32 %v2248_v1, %v2231_v29  ;;  %v9757_v42 = vpop.permute.xlu0 %5230 }
 0x51d   : > { %v2051_v46 = vrot.slane %v2037_v22, %v9284_v16  ;;  %v2055_v7 = vrot.slane %v2044_v48, %v9065_v13  ;;  %11068 = vst [vmem:[#allocation17_spill] sm:$0xff] %v9757_v42 }
 0x51e   : > { %v2267_v9 = vadd.f32 %v2266_v15, %v2249_v26  ;;  %v11072_v26 = vld [vmem:[#allocation24_spill] sm:$0xff] }
 0x51f   : > { %v2059_v43 = vrot.slane %v2051_v46, %v9065_v13  ;;  %v2062_v20 = vmul.f32 %v2055_v7, %v9272_v39 }
 0x520   : > { %v2275_v17 = vrot.slane %v2267_v9, %v9284_v16 }
 0x521   : > { %v2063_v3 = vmul.f32 %v2059_v43, %v9281_v58  ;;  %v9734_v38 = vadd.f32 %v2062_v20, %v9235_v60  ;;  %v11066_v60 = vld [vmem:[#allocation18_spill] sm:$0xff]  ;;  %v11073_v43 = vld [vmem:[#allocation33_spill] sm:$0xff] }
 0x522   : > { %v2276_v41 = vcombine.high %v2275_v17, %v2275_v17  ;;  %v2283_v28 = vrot.slane %v2275_v17, %v9284_v16  ;;  %v11074_v17 = vld [vmem:[#allocation22_spill] sm:$0xff] }
 0x523   : > { %v9738_v33 = vadd.f32 %v2063_v3, %v11065_v36  ;;  %v2369_v59 = vrot.slane %v9734_v38, %v9065_v13  ;;  %v2384_v47 = vrot.slane %v9734_v38, %v9062_v11  ;;  %v2400_v53 = vrot.slane %v9734_v38, %v11066_v60 }
 0x524   : > { %v2290_v35 = vrot.slane %v2276_v41, %v9284_v16  ;;  %v2294_v37 = vrot.slane %v2283_v28, %v9065_v13  ;;  %v2416_v50 = vrot.slane %v9734_v38, %v11067_v19  ;;  %v11075_v41 = vld [vmem:[#allocation26_spill] sm:$0xff] }
 0x525   : > { %v2373_v54 = vrot.slane %v9738_v33, %v9065_v13  ;;  %v2388_v40 = vrot.slane %v9738_v33, %v9062_v11  ;;  %v2404_v49 = vrot.slane %v9738_v33, %v11066_v60  ;;  %v2420_v5 = vrot.slane %v9738_v33, %v11067_v19 }
 0x526   : > { %v2298_v27 = vrot.slane %v2290_v35, %v9065_v13  ;;  %v2301_v2 = vmul.f32 %v2294_v37, %v9272_v39  ;;  %v2443_v0 = vmul.f32 %v11069_v4, %v2369_v59  ;;  %v2461_v61 = vmul.f32 %v11070_v18, %v2384_v47  ;;  %v11076_v35 = vld [vmem:[#allocation25_spill] sm:$0xff] }
 0x527   : > { %v2374_v15 = vsel %vm912_vm12, %v2373_v54, %v2369_v59  ;;  %v2389_v22 = vsel %vm912_vm12, %v2388_v40, %v2384_v47  ;;  %v2405_v7 = vsel %vm912_vm12, %v2404_v49, %v2400_v53  ;;  %v2421_v9 = vsel %vm912_vm12, %v2420_v5, %v2416_v50 }
 0x528   : > { %v2302_v1 = vmul.f32 %v2298_v27, %v9281_v58  ;;  %v9767_v29 = vadd.f32 %v2301_v2, %v11071_v30  ;;  %v2376_v48 = vmul.f32 %v8460_v25, %v2374_v15  ;;  %v2391_v46 = vmul.f32 %v2389_v22, %v11072_v26  ;;  %v11077_v27 = vld [vmem:[#allocation31_spill] sm:$0xff]  ;;  %v11079_v15 = vld [vmem:[#allocation29_spill] sm:$0xff] }
 0x529   : > { %v2407_v3 = vmul.f32 %v2405_v7, %v11074_v17  ;;  %v2444_v28 = vmul.f32 %v11075_v41, %v2373_v54  ;;  %v2462_v37 = vmul.f32 %v11076_v35, %v2388_v40  ;;  %v2463_v59 = vadd.f32 %v2461_v61, %v2443_v0  ;;  %v11078_v2 = vld [vmem:[#allocation23_spill] sm:$0xff] }
 0x52a   : > { %v9775_v20 = vadd.f32 %v2302_v1, %v11073_v43  ;;  %v2392_v36 = vadd.f32 %v2391_v46, %v2376_v48  ;;  %v2481_v47 = vmul.f32 %v11077_v27, %v2400_v53  ;;  %v2423_v30 = vmul.f32 %v2421_v9, %v11078_v2  ;;  %v11081_v48 = vld [vmem:[#allocation34_spill] sm:$0xff]  ;;  %v11082_v9 = vld [vmem:[#allocation32_spill] sm:$0xff] }
 0x52b   : > { %v2482_v22 = vmul.f32 %v11079_v15, %v2404_v49  ;;  %v2643_v58 = vrot.slane %v9767_v29, %v9065_v13  ;;  %v2464_v43 = vadd.f32 %v2462_v37, %v2444_v28  ;;  %v2654_v40 = vrot.slane %v9767_v29, %v9062_v11 }
 0x52c   : > { %v2408_v1 = vadd.f32 %v2407_v3, %v2392_v36  ;;  %v2483_v7 = vadd.f32 %v2481_v47, %v2463_v59  ;;  %v2647_v54 = vrot.slane %v9775_v20, %v9065_v13  ;;  %v2658_v53 = vrot.slane %v9775_v20, %v9062_v11 }
 0x52d   : > { %v2666_v49 = vrot.slane %v9767_v29, %v11066_v60  ;;  %v2670_v0 = vrot.slane %v9775_v20, %v11066_v60  ;;  %v2501_v46 = vmul.f32 %v11081_v48, %v2416_v50  ;;  %v2502_v3 = vmul.f32 %v11082_v9, %v2420_v5 }
 0x52e   : > { %v2424_v61 = vadd.f32 %v2423_v30, %v2408_v1  ;;  %v2648_v28 = vsel %vm912_vm12, %v2647_v54, %v2643_v58  ;;  %v2484_v36 = vadd.f32 %v2482_v22, %v2464_v43  ;;  %v2659_v59 = vsel %vm912_vm12, %v2658_v53, %v2654_v40 }
 0x52f   : > { %v2650_v37 = vmul.f32 %v8460_v25, %v2648_v28  ;;  %v2671_v47 = vsel %vm912_vm12, %v2670_v0, %v2666_v49  ;;  %v2661_v45 = vmul.f32 %v2659_v59, %v11072_v26  ;;  %v2678_v30 = vrot.slane %v9767_v29, %v11067_v19 }
 0x530   : > { %v2512_v42 = vrot.slane %v2424_v61, %v9284_v16  ;;  %v2673_v50 = vmul.f32 %v2671_v47, %v11074_v17  ;;  %v2682_v5 = vrot.slane %v9775_v20, %v11067_v19  ;;  %v2695_v25 = vmul.f32 %v2643_v58, %v11069_v4 }
 0x531   : > { %v9785_v39 = vpop.permute.xlu0 %5284  ;;  %v2705_v22 = vmul.f32 %v2654_v40, %v11070_v18  ;;  %v2662_v61 = vadd.f32 %v2661_v45, %v2650_v37  ;;  %v2717_v26 = vmul.f32 %v2666_v49, %v11077_v27  ;;  %v2696_v59 = vmul.f32 %v2647_v54, %v11075_v41 }
 0x532   : > { %11080 = vst [vmem:[#allocation18_spill] sm:$0xff] %v9785_v39  ;;  %v2503_v39 = vadd.f32 %v2501_v46, %v2483_v7  ;;  %v2513_v43 = vcombine.high %v2512_v42, %v2512_v42  ;;  %v2520_v7 = vrot.slane %v2512_v42, %v9284_v16  ;;  %v2683_v46 = vsel %vm912_vm12, %v2682_v5, %v2678_v30 }
 0x533   : > { %v2707_v28 = vadd.f32 %v2705_v22, %v2695_v25  ;;  %v2706_v17 = vmul.f32 %v2658_v53, %v11076_v35  ;;  %v2674_v58 = vadd.f32 %v2673_v50, %v2662_v61  ;;  %v2685_v4 = vmul.f32 %v2683_v46, %v11078_v2 }
 0x534   : > { %v2527_v47 = vrot.slane %v2513_v43, %v9284_v16  ;;  %v2718_v45 = vmul.f32 %v2670_v0, %v11079_v15  ;;  %v2504_v27 = vadd.f32 %v2502_v3, %v2484_v36  ;;  %v2729_v35 = vmul.f32 %v2678_v30, %v11081_v48 }
 0x535   : > { %v2719_v18 = vadd.f32 %v2717_v26, %v2707_v28  ;;  %v2708_v40 = vadd.f32 %v2706_v17, %v2696_v59  ;;  %v2686_v41 = vadd.f32 %v2685_v4, %v2674_v58  ;;  %v2730_v53 = vmul.f32 %v2682_v5, %v11082_v9 }
 0x536   : > { %v9806_v1 = vpop.permute.xlu0 %5298  ;;  %v2535_v49 = vrot.slane %v2527_v47, %v9065_v13 }
 0x537   : > { %11083 = vst [vmem:[#allocation19_spill] sm:$0xff] %v9806_v1  ;;  %v2531_v1 = vrot.slane %v2520_v7, %v9065_v13  ;;  %v2720_v54 = vadd.f32 %v2718_v45, %v2708_v40  ;;  %v2740_v22 = vrot.slane %v2686_v41, %v9284_v16  ;;  %v2731_v43 = vadd.f32 %v2729_v35, %v2719_v18 }
 0x538   : > { %v2539_v25 = vmul.f32 %v2535_v49, %v2504_v27 }
 0x539   : > { %v2538_v37 = vmul.f32 %v2531_v1, %v2503_v39  ;;  %v2732_v36 = vadd.f32 %v2730_v53, %v2720_v54  ;;  %v2741_v30 = vcombine.high %v2740_v22, %v2740_v22  ;;  %v2748_v9 = vrot.slane %v2740_v22, %v9284_v16 }
 0x53a   : > { %v2590_v3 = vcombine.high %v2539_v25, %v2539_v25  ;;  %v2597_v48 = vrot.slane %v2539_v25, %v9284_v16 }
 0x53b   : > { %v9822_v42 = vpop.permute.xlu0 %5342  ;;  %v2542_v50 = vcombine.high %v2538_v37, %v2538_v37  ;;  %v2549_v2 = vrot.slane %v2538_v37, %v9284_v16  ;;  %v2759_v59 = vrot.slane %v2748_v9, %v9065_v13  ;;  %v2755_v17 = vrot.slane %v2741_v30, %v9284_v16 }
 0x53c   : > { %11084 = vst [vmem:[#allocation27_spill] sm:$0xff] %v9822_v42  ;;  %v2604_v26 = vrot.slane %v2590_v3, %v9284_v16  ;;  %v2605_v46 = vcombine.high %v2597_v48, %v2597_v48  ;;  %v2613_v28 = vrot.slane %v2597_v48, %v9284_v16 }
 0x53d   : > { %v2556_v15 = vrot.slane %v2542_v50, %v9284_v16  ;;  %v2557_v0 = vcombine.high %v2549_v2, %v2549_v2  ;;  %v2565_v39 = vrot.slane %v2549_v2, %v9284_v16  ;;  %v2766_v27 = vmul.f32 %v2759_v59, %v2731_v43 }
 0x53e   : > { %v2606_v4 = vcombine.high %v2604_v26, %v2604_v26  ;;  %v2620_v18 = vrot.slane %v2604_v26, %v9284_v16  ;;  %v2627_v40 = vrot.slane %v2605_v46, %v9284_v16  ;;  %v2635_v45 = vcombine.high %v2613_v28, %v2613_v28 }
 0x53f   : > { %v2558_v1 = vcombine.high %v2556_v15, %v2556_v15  ;;  %v2572_v5 = vrot.slane %v2556_v15, %v9284_v16  ;;  %v2579_v61 = vrot.slane %v2557_v0, %v9284_v16  ;;  %v2770_v50 = vcombine.high %v2766_v27, %v2766_v27 }
 0x540   : > { %v9830_v7 = vpop.permute.xlu0 %6162  ;;  %v2634_v41 = vrot.slane %v2606_v4, %v9284_v16  ;;  %v2636_v35 = vcombine.high %v2620_v18, %v2620_v18  ;;  %v2637_v25 = vcombine.high %v2627_v40, %v2627_v40  ;;  %v2777_v2 = vrot.slane %v2766_v27, %v9284_v16 }
 0x541   : > { %11085 = vst [vmem:[#allocation28_spill] sm:$0xff] %v9830_v7  ;;  %v2586_v47 = vrot.slane %v2558_v1, %v9284_v16  ;;  %v2588_v58 = vcombine.high %v2572_v5, %v2572_v5  ;;  %v2866_v49 = vcombine.low %v2565_v39, %v2579_v61  ;;  %v8050_v54 = vcombine.high %v2565_v39, %v2579_v61 }
 0x542   : > { %v2915_v43 = vcombine.low %v2627_v40, %v2635_v45  ;;  %v2785_v48 = vcombine.high %v2777_v2, %v2777_v2  ;;  %v2793_v30 = vrot.slane %v2777_v2, %v9284_v16  ;;  %v2916_v1 = vcombine.low %v2637_v25, %v2620_v18 }
 0x543   : > { %v2868_v53 = vcombine.low %v2572_v5, %v2586_v47  ;;  %v2869_v22 = vcombine.low %v2588_v58, %v2613_v28  ;;  %v2876_v15 = vrot.slane %v2866_v49, %v9284_v16  ;;  %v2883_v0 = vrot.slane %v8050_v54, %v9284_v16 }
 0x544   : > { %v2917_v61 = vcombine.low %v2634_v41, %v2636_v35  ;;  %v2924_v26 = vrot.slane %v2915_v43, %v9284_v16  ;;  %v2763_v46 = vrot.slane %v2755_v17, %v9065_v13  ;;  %v2807_v28 = vrot.slane %v2785_v48, %v9284_v16 }
 0x545   : > { %v9844_v37 = vpop.permute.xlu0 %6228  ;;  %v2890_v3 = vrot.slane %v2868_v53, %v9284_v16  ;;  %v2897_v9 = vrot.slane %v2869_v22, %v9284_v16  ;;  %v2898_v5 = vcombine.low %v2876_v15, %v2883_v0  ;;  %v2931_v47 = vrot.slane %v2916_v1, %v9284_v16 }
 0x546   : > { %11086 = vst [vmem:[#allocation30_spill] sm:$0xff] %v9844_v37  ;;  %v2784_v58 = vrot.slane %v2770_v50, %v9284_v16  ;;  %v2938_v4 = vrot.slane %v2917_v61, %v9284_v16  ;;  %v2767_v40 = vmul.f32 %v2763_v46, %v2732_v36  ;;  %v2957_v27 = vcombine.low %v2793_v30, %v2807_v28 }
 0x547   : > { %v2899_v59 = vcombine.low %v2890_v3, %v2897_v9  ;;  %v2906_v18 = vrot.slane %v2898_v5, %v9284_v16  ;;  %v2939_v45 = vcombine.low %v2924_v26, %v2931_v47  ;;  %v8051_v9 = vcombine.high %v2793_v30, %v2807_v28 }
 0x548   : > { %v2786_v49 = vcombine.high %v2784_v58, %v2784_v58  ;;  %v2800_v17 = vrot.slane %v2784_v58, %v9284_v16  ;;  %v2818_v54 = vcombine.high %v2767_v40, %v2767_v40  ;;  %v2825_v53 = vrot.slane %v2767_v40, %v9284_v16 }
 0x549   : > { %v9853_v39 = vpop.permute.xlu0 %6298  ;;  %v2913_v35 = vrot.slane %v2899_v59, %v9284_v16  ;;  %v2946_v25 = vrot.slane %v2939_v45, %v9284_v16  ;;  %v2953_v50 = vrot.slane %v2938_v4, %v9284_v16  ;;  %v2964_v36 = vrot.slane %v2957_v27, %v9284_v16 }
 0x54a   : > { %11087 = vst [vmem:[#allocation24_spill] sm:$0xff] %v9853_v39  ;;  %v2814_v2 = vrot.slane %v2786_v49, %v9284_v16  ;;  %v2816_v22 = vcombine.high %v2800_v17, %v2800_v17  ;;  %v2832_v15 = vrot.slane %v2818_v54, %v9284_v16  ;;  %v2833_v0 = vcombine.high %v2825_v53, %v2825_v53 }
 0x54b   : > { %v2841_v3 = vrot.slane %v2825_v53, %v9284_v16  ;;  %v2954_v43 = vcombine.low %v2946_v25, %v2953_v50  ;;  %v2965_v48 = vcombine.low %v2964_v36, %v2964_v36  ;;  %v2984_v4 = vrot.slane %v8051_v9, %v9284_v16 }
 0x54c   : > { %v2975_v1 = vcombine.low %v2800_v17, %v2814_v2  ;;  %v2834_v5 = vcombine.high %v2832_v15, %v2832_v15  ;;  %v2848_v61 = vrot.slane %v2832_v15, %v9284_v16  ;;  %v2855_v26 = vrot.slane %v2833_v0, %v9284_v16 }
 0x54d   : > { %v9862_v41 = vpop.permute.xlu0 %6746  ;;  %v2863_v46 = vcombine.high %v2841_v3, %v2841_v3  ;;  %v2972_v47 = vrot.slane %v2965_v48, %v9284_v16  ;;  %v2976_v58 = vcombine.low %v2816_v22, %v2841_v3  ;;  %v2914_v25 = vcombine.low %v2906_v18, %v2913_v35 }
 0x54e   : > { %11088 = vst [vmem:[#allocation33_spill] sm:$0xff] %v9862_v41  ;;  %v2991_v40 = vrot.slane %v2975_v1, %v9284_v16  ;;  %v2862_v45 = vrot.slane %v2834_v5, %v9284_v16  ;;  %v2864_v27 = vcombine.high %v2848_v61, %v2848_v61  ;;  %v2865_v49 = vcombine.high %v2855_v26, %v2855_v26 }
 0x54f   : > { %v2977_v30 = vcombine.low %v2855_v26, %v2863_v46  ;;  %v2973_v28 = vcombine.low %v2972_v47, %v2972_v47  ;;  %v2998_v17 = vrot.slane %v2976_v58, %v9284_v16  ;;  %v9899_v26 = vpop.permute.xlu1 %8502  ;;  %v9905_v46 = vld [vmem:[%s10917_s7 + $0x8] sm:$0xff]  }
 0x550   : > { %v3006_v54 = vcombine.low %v2984_v4, %v2991_v40  ;;  %v3023_v36 = vcombine.low %v2865_v49, %v2848_v61  ;;  %v3024_v2 = vcombine.low %v2862_v45, %v2864_v27  ;;  %v9896_v61 = vld [vmem:[%s10917_s7] sm:$0xff]  }
 0x551   : > { %v6898_v59 = vpop.permute.xlu0 %6897  ;;  %v3005_v50 = vrot.slane %v2977_v30, %v9284_v16  ;;  %v3050_v22 = vsel %vm1587_vm8, %v2954_v43, %v2973_v28 }
 0x552   : > { %v6900_v53 = vsub.f32 %v6898_v59, %v9086_v24  ;;  %v3014_v15 = vrot.slane %v3006_v54, %v9284_v16  ;;  %v3051_v3 = vpack.c.bf16 %v3050_v22, %v2914_v25  ;;  %v3031_v9 = vrot.slane %v3023_v36, %v9284_v16 }
 0x553   : > { %v3007_v48 = vcombine.low %v2998_v17, %v3005_v50  ;;  %v3038_v1 = vrot.slane %v3024_v2, %v9284_v16  ;;  %v9911_v59 = vpop.permute.xlu1 %4758 }
 0x554   : > { %v6901_v0 = vmul.f32 %v6900_v53, %v9610_v56  ;;  %8238 = vmatprep.mubr.msk.bf16.mxu1 %vm598_vm2, %v3051_v3 }
 0x555   : > { %v3021_v24 = vrot.slane %v3007_v48, %v9284_v16  ;;  %v3039_v18 = vcombine.low %v3031_v9, %v3038_v1 }
 0x556   : > { %6935 = vperm.xlu0 %8532, %v6901_v0   ;;  %6904 = vperm.xlu1 %8530, %v6901_v0  }
 0x557   : > { %v3022_v35 = vcombine.low %v3014_v15, %v3021_v24  ;;  %v3046_v43 = vrot.slane %v3039_v18, %v9284_v16  ;;  %v9914_v47 = vpop.permute.xlu1 %4780 }
 0x559   : > { %v3052_v5 = vpack.c.bf16 %v3046_v43, %v3022_v35 }
 0x55a   : > { %8531 = vset.pattern.permute.xlu1 %v11047_v14  ;;  %8535 = vset.pattern.permute.xlu0 %v11048_v63 }
 0x55b   : > { %6919 = vperm.xlu1 %8531, %v6901_v0   ;;  %8239 = vmatmul.mubr.msk.bf16.vlgmr.msra.gmra.mrb[12].mxu1 %vm598_vm2, %v3052_v5  ;;  %v9916_v58 = vpop.permute.xlu1 %4824 }
 0x55c   : > { %8251 = vmatpush3.bf16.msra.mxu1 %v9896_v61 }
 0x55d   : > { %8252 = vmatprep.subr.bf16.mxu1 %v9905_v46 }
 0x55f   : > { %8533 = vset.pattern.permute.xlu1 %v11043_v10  ;;  %v9918_v4 = vpop.permute.xlu1 %4846 }
 0x560   : > { %6951 = vperm.xlu1 %8533, %v6901_v0   ;;  %8253 = vmatpush3.bf16.msra.mxu1 %v9905_v46 }
 0x561   : > { %8266 = vmatprep.subr.bf16.mxu1 %v9896_v61 }
 0x563   : > { %v9920_v40 = vpop.permute.xlu1 %4879 }
 0x564   : > { %8534 = vset.pattern.permute.xlu1 %v11047_v14 }
 0x565   : > { %7104 = vperm.xlu1 %8534, %v9621_v51  }
 0x567   : > { %v9922_v45 = vpop.permute.xlu1 %5246 }
 0x56b   : > { %v9924_v27 = vpop.permute.xlu1 %5262 }
 0x56c   : > { %11089 = vst [vmem:[#allocation22_spill] sm:$0xff] %v9924_v27 }
 0x56f   : > { %v9926_v49 = vpop.permute.xlu1 %5302 }
 0x570   : > { %11090 = vst [vmem:[#allocation26_spill] sm:$0xff] %v9926_v49 }
 0x573   : > { %v9928_v30 = vpop.permute.xlu1 %5279 }
 0x577   : > { %v9930_v28 = vpop.permute.xlu1 %5322 }
 0x578   : > { %11091 = vst [vmem:[#allocation25_spill] sm:$0xff] %v9930_v28 }
 0x57b   : > { %v9932_v17 = vpop.permute.xlu1 %5318 }
 0x57c   : > { %11092 = vst [vmem:[#allocation31_spill] sm:$0xff] %v9932_v17 }
 0x57f   : > { %v9934_v54 = vpop.permute.xlu1 %5338 }
 0x580   : > { %11093 = vst [vmem:[#allocation23_spill] sm:$0xff] %v9934_v54 }
 0x583   : > { %v9936_v53 = vpop.permute.xlu1 %6141 }
 0x584   : > { %11094 = vst [vmem:[#allocation29_spill] sm:$0xff] %v9936_v53 }
 0x587   : > { %v9938_v25 = vpop.permute.xlu1 %6184 }
 0x588   : > { %11095 = vst [vmem:[#allocation34_spill] sm:$0xff] %v9938_v25 }
 0x58b   : > { %v9940_v50 = vpop.permute.xlu1 %6206 }
 0x58c   : > { %11096 = vst [vmem:[#allocation32_spill] sm:$0xff] %v9940_v50 }
 0x58f   : > { %v9942_v36 = vpop.permute.xlu1 %6250 }
 0x590   : > { %11097 = vst [vmem:[#allocation51_spill] sm:$0xff] %v9942_v36 }
 0x593   : > { %v9944_v2 = vpop.permute.xlu1 %6272 }
 0x594   : > { %11098 = vst [vmem:[#allocation52_spill] sm:$0xff] %v9944_v2 }
 0x597   : > { %v9946_v22 = vpop.permute.xlu1 %6305 }
 0x598   : > { %11099 = vst [vmem:[#allocation53_spill] sm:$0xff] %v9946_v22 }
 0x59b   : > { %v9948_v15 = vpop.permute.xlu1 %6753 }
 0x59c   : > { %11100 = vst [vmem:[#allocation54_spill] sm:$0xff] %v9948_v15 }
 0x5d5   : > { %v9950_v0 = vpop.permute.xlu1 %6904 }
 0x5d6   : > { %11101 = vst [vmem:[#allocation55_spill] sm:$0xff] %v9950_v0 }
 0x5da   : > { %v9952_v3 = vpop.permute.xlu1 %6919 }
 0x5db   : > { %11102 = vst [vmem:[#allocation56_spill] sm:$0xff] %v9952_v3 }
 0x5df   : > { %v9954_v48 = vpop.permute.xlu1 %6951 }
 0x5e0   : > { %11103 = vst [vmem:[#allocation57_spill] sm:$0xff] %v9954_v48 }
 0x5e4   : > { %v7105_v9 = vpop.permute.xlu1 %7104 }
 0x5e5   : > { %v7107_v1 = vsub.f32 %v7105_v9, %v9149_v62  ;;  %v9966_v62 = vld [vmem:[%s10918_s8] ss:$0 sm:$0xff] }
 0x5e7   : > { %v7108_v24 = vmul.f32 %v7107_v1, %v9610_v56 }
 0x5e9   : > { %7126 = vperm.xlu1 %8534, %v7108_v24   ;;  %7111 = vperm.xlu0 %8535, %v7108_v24  }
 0x5ed   : > { %8536 = vset.pattern.permute.xlu1 %v11042_v44  ;;  %8537 = vset.pattern.permute.xlu0 %v11043_v10 }
 0x5ee   : > { %7142 = vperm.xlu1 %8536, %v7108_v24   ;;  %7158 = vperm.xlu0 %8537, %v7108_v24  }
 0x5f2   : > { %7311 = vperm.xlu1 %8536, %v9621_v51   ;;  %8539 = vset.pattern.permute.xlu0 %v11047_v14 }
 0x5f6   : > { %8538 = vset.pattern.permute.xlu1 %v11048_v63 }
 0x62e   : > { %v8240_v18 = vpop.f32.mrb[12].mxu1 }
 0x62f   : > { %v3102_v35 = vadd.f32 %v9966_v62, %v8240_v18  ;;  %v3093_v43 = vpop.f32.mrb[13].mxu1 }
 0x630   : > { %v3094_v5 = vadd.f32 %v9966_v62, %v3093_v43  ;;  %v8241_v9 = vpop.f32.mrb[14].mxu1 }
 0x631   : > { %v3114_v1 = vmul.f32 0.01, %v3102_v35  ;;  %v3105_v24 = vadd.f32 %v9966_v62, %v8241_v9  ;;  %v3096_v48 = vpop.f32.mrb[15].mxu1  ;;  %vm3110_vm4 = vcmp.gt.f32.partialorder %v3102_v35, 0.0  ;;  %v9974_v9 = vld [vmem:[#allocation8] sm:$0xff]  }
 0x632   : > { %v3112_v3 = vmul.f32 0.01, %v3094_v5  ;;  %v3097_v0 = vadd.f32 %v9966_v62, %v3096_v48  ;;  %vm3108_vm5 = vcmp.gt.f32.partialorder %v3094_v5, 0.0  ;;  %v9977_v48 = vld [vmem:[#allocation8 + $0x8] sm:$0xff]  }
 0x633   : > { %vm3111_vm6 = vcmp.gt.f32.partialorder %v3105_v24, 0.0  ;;  %v3115_v15 = vmul.f32 0.01, %v3105_v24  ;;  %v3118_v22 = vsel %vm3110_vm4, %v3102_v35, %v3114_v1 }
 0x634   : > { %vm3109_vm7 = vcmp.gt.f32.partialorder %v3097_v0, 0.0  ;;  %v3113_v41 = vmul.f32 0.01, %v3097_v0  ;;  %v3116_v18 = vsel %vm3108_vm5, %v3094_v5, %v3112_v3 }
 0x635   : > { %v3119_v39 = vsel %vm3111_vm6, %v3105_v24, %v3115_v15 }
 0x636   : > { %v3121_v2 = vpack.c.bf16 %v3119_v39, %v3118_v22  ;;  %v3117_v36 = vsel %vm3109_vm7, %v3097_v0, %v3113_v41  ;;  %v9994_v22 = vpop.permute.xlu0 %6935 }
 0x637   : > { %v3120_v43 = vpack.c.bf16 %v3117_v36, %v3116_v18  ;;  %11106 = vst [vmem:[#allocation60_spill] sm:$0xff] %v9994_v22 }
 0x639   : > { %8246 = vmatprep.mubr.msk.bf16.mxu0 %vm598_vm2, %v3120_v43 }
 0x63a   : > { %8247 = vmatmul.mubr.msk.bf16.vlgmr.msra.gmra.mrb[12].mxu0 %vm598_vm2, %v3121_v2 }
 0x63b   : > { %8259 = vmatpush3.bf16.msra.mxu0 %v9974_v9 }
 0x63c   : > { %8260 = vmatprep.subr.bf16.mxu0 %v9977_v48 }
 0x63f   : > { %8261 = vmatpush3.bf16.msra.mxu0 %v9977_v48 }
 0x640   : > { %8274 = vmatprep.subr.bf16.mxu0 %v9974_v9 }
 0x668   : > { %v9982_v15 = vpop.permute.xlu1 %7126 }
 0x669   : > { %11104 = vst [vmem:[#allocation58_spill] sm:$0xff] %v9982_v15 }
 0x66d   : > { %v9984_v39 = vpop.permute.xlu1 %7142 }
 0x66e   : > { %11105 = vst [vmem:[#allocation59_spill] sm:$0xff] %v9984_v39 }
 0x671   : > { %v7312_v41 = vpop.permute.xlu1 %7311 }
 0x672   : > { %v7314_v36 = vsub.f32 %v7312_v41, %v9408_v34  ;;  %v9996_v34 = vpop.permute.xlu0 %7111 }
 0x673   : > { %11107 = vst [vmem:[#allocation61_spill] sm:$0xff] %v9996_v34 }
 0x674   : > { %v7315_v2 = vmul.f32 %v7314_v36, %v9610_v56 }
 0x676   : > { %7318 = vperm.xlu1 %8538, %v7315_v2   ;;  %7333 = vperm.xlu0 %8539, %v7315_v2   ;;  %v9998_v0 = vpop.permute.xlu0 %7158 }
 0x677   : > { %11108 = vst [vmem:[#allocation62_spill] sm:$0xff] %v9998_v0 }
 0x67a   : > { %8540 = vset.pattern.permute.xlu1 %v11042_v44  ;;  %8542 = vset.pattern.permute.xlu0 %v11043_v10 }
 0x67b   : > { %7349 = vperm.xlu1 %8540, %v7315_v2   ;;  %7518 = vperm.xlu0 %8542, %v9621_v51  }
 0x67f   : > { %8541 = vset.pattern.permute.xlu1 %v11043_v10  ;;  %8545 = vset.pattern.permute.xlu0 %v11042_v44 }
 0x680   : > { %7365 = vperm.xlu1 %8541, %v7315_v2  }
 0x684   : > { %8543 = vset.pattern.permute.xlu1 %v11048_v63 }
 0x6f5   : > { %v10000_v3 = vpop.permute.xlu0 %7333 }
 0x6f6   : > { %11109 = vst [vmem:[#allocation63_spill] sm:$0xff] %v10000_v3 }
 0x6fa   : > { %v7519_v35 = vpop.permute.xlu0 %7518 }
 0x6fb   : > { %v7521_v5 = vsub.f32 %v7519_v35, %v9564_v21 }
 0x6fd   : > { %v7522_v1 = vmul.f32 %v7521_v5, %v9610_v56 }
 0x6ff   : > { %7556 = vperm.xlu0 %8545, %v7522_v1   ;;  %7525 = vperm.xlu1 %8543, %v7522_v1  }
 0x703   : > { %8548 = vset.pattern.permute.xlu0 %v11047_v14  ;;  %8544 = vset.pattern.permute.xlu1 %v11047_v14 }
 0x704   : > { %7643 = vperm.xlu0 %8548, %v9610_v56   ;;  %7540 = vperm.xlu1 %8544, %v7522_v1  }
 0x708   : > { %8546 = vset.pattern.permute.xlu1 %v11043_v10  ;;  %8551 = vset.pattern.permute.xlu0 %v11048_v63 }
 0x709   : > { %7572 = vperm.xlu1 %8546, %v7522_v1  }
 0x70d   : > { %8547 = vset.pattern.permute.xlu1 %v11048_v63  ;;  %v8248_v21 = vpop.f32.mrb[12].mxu0 }
 0x70e   : > { %7626 = vperm.xlu1 %8547, %v9610_v56   ;;  %v3171_v24 = vadd.f32 %v8248_v21, %v9640_v12  ;;  %v3162_v18 = vpop.f32.mrb[13].mxu0 }
 0x70f   : > { %v3163_v43 = vadd.f32 %v9640_v12, %v3162_v18  ;;  %v8249_v41 = vpop.f32.mrb[14].mxu0 }
 0x710   : > { %vm3179_vm9 = vcmp.gt.f32.partialorder %v3171_v24, 0.0  ;;  %v3183_v14 = vmul.f32 0.01, %v3171_v24  ;;  %v3174_v36 = vadd.f32 %v8249_v41, %v9640_v12  ;;  %v3165_v2 = vpop.f32.mrb[15].mxu0 }
 0x711   : > { %vm3177_vm10 = vcmp.gt.f32.partialorder %v3163_v43, 0.0  ;;  %v3181_v35 = vmul.f32 0.01, %v3163_v43  ;;  %v3166_v5 = vadd.f32 %v9640_v12, %v3165_v2 }
 0x712   : > { %8549 = vset.pattern.permute.xlu1 %v11042_v44  ;;  %v3187_v1 = vsel %vm3179_vm9, %v3171_v24, %v3183_v14  ;;  %vm3180_vm11 = vcmp.gt.f32.partialorder %v3174_v36, 0.0  ;;  %v3184_v21 = vmul.f32 0.01, %v3174_v36 }
 0x713   : > { %7659 = vperm.xlu1 %8549, %v9610_v56   ;;  %v3496_v3 = vcombine.high %v3187_v1, %v3187_v1  ;;  %v3503_v18 = vrot.slane %v3187_v1, %v9284_v16  ;;  %v3185_v0 = vsel %vm3177_vm10, %v3163_v43, %v3181_v35  ;;  %vm3178_vm13 = vcmp.gt.f32.partialorder %v3166_v5, 0.0 }
 0x714   : > { %v3191_v39 = vcombine.high %v3185_v0, %v3185_v0  ;;  %v3188_v15 = vsel %vm3180_vm11, %v3174_v36, %v3184_v21  ;;  %v3182_v41 = vmul.f32 0.01, %v3166_v5  ;;  %v3198_v24 = vrot.slane %v3185_v0, %v9284_v16 }
 0x715   : > { %v3510_v34 = vrot.slane %v3496_v3, %v9284_v16  ;;  %v3511_v44 = vcombine.high %v3503_v18, %v3503_v18  ;;  %v3551_v22 = vrot.slane %v3188_v15, %v9284_v16  ;;  %v3519_v12 = vrot.slane %v3503_v18, %v9284_v16 }
 0x716   : > { %v3205_v14 = vrot.slane %v3191_v39, %v9284_v16  ;;  %v3186_v2 = vsel %vm3178_vm13, %v3166_v5, %v3182_v41  ;;  %v3206_v21 = vcombine.high %v3198_v24, %v3198_v24  ;;  %v3214_v41 = vrot.slane %v3198_v24, %v9284_v16 }
 0x717   : > { %8550 = vset.pattern.permute.xlu1 %v11043_v10  ;;  %v3512_v43 = vcombine.high %v3510_v34, %v3510_v34  ;;  %v10026_v36 = vrot.slane %v3511_v44, %v9284_v16  ;;  %v3552_v3 = vcombine.high %v3551_v22, %v3551_v22  ;;  %v10029_v1 = vrot.slane %v3551_v22, %v9284_v16 }
 0x718   : > { %7675 = vperm.xlu1 %8550, %v9610_v56   ;;  %v3207_v35 = vcombine.high %v3205_v14, %v3205_v14  ;;  %v3240_v15 = vcombine.high %v3186_v2, %v3186_v2  ;;  %v3541_v10 = vcombine.high %v3519_v12, %v3519_v12  ;;  %v3247_v0 = vrot.slane %v3186_v2, %v9284_v16 }
 0x719   : > { %v3540_v56 = vrot.slane %v3512_v43, %v9284_v16  ;;  %v3566_v39 = vrot.slane %v3552_v3, %v9284_v16  ;;  %v3622_v5 = vcombine.low %v10026_v36, %v10029_v1  ;;  %v8058_v22 = vcombine.high %v10026_v36, %v10029_v1 }
 0x71a   : > { %v3235_v18 = vrot.slane %v3207_v35, %v9284_v16  ;;  %v3254_v51 = vrot.slane %v3240_v15, %v9284_v16  ;;  %v3255_v35 = vcombine.high %v3247_v0, %v3247_v0  ;;  %v3526_v2 = vrot.slane %v3510_v34, %v9284_v16 }
 0x71b   : > { %v3568_v37 = vcombine.high %v3566_v39, %v3566_v39  ;;  %v3228_v43 = vrot.slane %v3206_v21, %v9284_v16  ;;  %v3263_v25 = vrot.slane %v3247_v0, %v9284_v16  ;;  %v3544_v7 = vcombine.high %v3540_v56, %v3540_v56 }
 0x71c   : > { %8552 = vset.pattern.permute.xlu1 %v11048_v63  ;;  %v3239_v44 = vcombine.high %v3235_v18, %v3235_v18  ;;  %v3640_v63 = vcombine.low %v3541_v10, %v3566_v39  ;;  %v3256_v3 = vcombine.high %v3254_v51, %v3254_v51  ;;  %v3221_v53 = vrot.slane %v3205_v14, %v9284_v16 }
 0x71d   : > { %v10046_v36 = vcombine.low %v3526_v2, %v3568_v37  ;;  %v3277_v1 = vrot.slane %v3255_v35, %v9284_v16  ;;  %v3236_v15 = vcombine.high %v3214_v41, %v3214_v41  ;;  %v3270_v34 = vrot.slane %v3254_v51, %v9284_v16 }
 0x71e   : > { %v3292_v50 = vcombine.low %v3214_v41, %v3239_v44  ;;  %v3284_v10 = vrot.slane %v3256_v3, %v9284_v16  ;;  %v8482_v21 = vunpack.i.l.bf16 %v9516_v31  ;;  %v3313_v0 = vcombine.low %v3228_v43, %v3263_v25 }
 0x71f   : > { %v3286_v44 = vcombine.high %v3277_v1, %v3277_v1  ;;  %v3604_v42 = vcombine.low %v3519_v12, %v3544_v7  ;;  %v3237_v54 = vcombine.high %v3221_v53, %v3221_v53  ;;  %v3335_v14 = vcombine.low %v3236_v15, %v3277_v1 }
 0x720   : > { %v3299_v24 = vrot.slane %v3292_v50, %v9284_v16  ;;  %v3320_v28 = vrot.slane %v3313_v0, %v9284_v16  ;;  %v8056_v50 = vcombine.high %v3228_v43, %v3263_v25  ;;  %v3401_v35 = vcombine.low %v3235_v18, %v3270_v34 }
 0x721   : > { %v3379_v27 = vcombine.low %v3221_v53, %v3286_v44  ;;  %v3342_v41 = vrot.slane %v3335_v14, %v9284_v16  ;;  %v3423_v51 = vcombine.low %v3237_v54, %v3284_v10  ;;  %v3494_v49 = vcombine.high %v3270_v34, %v3270_v34 }
 0x722   : > { %v3306_v39 = vrot.slane %v3299_v24, %v9284_v16  ;;  %v3327_v3 = vrot.slane %v3320_v28, %v9284_v16  ;;  %v3364_v17 = vrot.slane %v8056_v50, %v9284_v16  ;;  %v3611_v7 = vrot.slane %v3604_v42, %v9284_v16 }
 0x723   : > { %v3386_v24 = vrot.slane %v3379_v27, %v9284_v16  ;;  %v3349_v12 = vrot.slane %v3342_v41, %v9284_v16  ;;  %v8057_v1 = vcombine.high %v3284_v10, %v3526_v2  ;;  %v3408_v25 = vrot.slane %v3401_v35, %v9284_v16 }
 0x724   : > { %v3308_v37 = vmul.f32 %v8482_v21, %v3306_v39  ;;  %v3329_v15 = vmul.f32 %v3327_v3, %v9506_v8  ;;  %v3371_v53 = vrot.slane %v3364_v17, %v9284_v16  ;;  %v3569_v18 = vcombine.low %v3494_v49, %v3540_v56 }
 0x725   : > { %v3629_v54 = vrot.slane %v3622_v5, %v9284_v16  ;;  %v3430_v28 = vrot.slane %v3423_v51, %v9284_v16  ;;  %v3593_v43 = vrot.slane %v8057_v1, %v9284_v16  ;;  %v3351_v34 = vmul.f32 %v3349_v12, %v9508_v52 }
 0x726   : > { %v3330_v27 = vadd.f32 %v3329_v15, %v3308_v37  ;;  %v3393_v42 = vrot.slane %v3386_v24, %v9284_v16  ;;  %v3576_v2 = vrot.slane %v3569_v18, %v9284_v16  ;;  %v3618_v10 = vrot.slane %v3611_v7, %v9284_v16 }
 0x727   : > { %v3647_v17 = vrot.slane %v3640_v63, %v9284_v16  ;;  %v3600_v39 = vrot.slane %v3593_v43, %v9284_v16  ;;  %v3373_v56 = vmul.f32 %v3371_v53, %v9520_v55  ;;  %v3415_v5 = vrot.slane %v3408_v25, %v9284_v16  ;;  %v11110_v53 = vld [vmem:[#allocation38_spill] sm:$0xff] }
 0x728   : > { %v3352_v49 = vadd.f32 %v3351_v34, %v3330_v27  ;;  %v3583_v44 = vrot.slane %v3576_v2, %v9284_v16  ;;  %v3636_v0 = vrot.slane %v3629_v54, %v9284_v16  ;;  %v3665_v14 = vrot.slane %v8058_v22, %v9284_v16 }
 0x729   : > { %v3602_v37 = vmul.f32 %v3600_v39, %v9506_v8  ;;  %v3395_v41 = vmul.f32 %v3393_v42, %v9510_v6  ;;  %v3437_v63 = vrot.slane %v3430_v28, %v9284_v16  ;;  %v3654_v51 = vrot.slane %v3647_v17, %v9284_v16 }
 0x72a   : > { %v3374_v50 = vadd.f32 %v3373_v56, %v3352_v49  ;;  %v3585_v35 = vmul.f32 %v8482_v21, %v3583_v44  ;;  %v3683_v3 = vrot.slane %v10046_v36, %v9284_v16  ;;  %v3620_v24 = vmul.f32 %v3618_v10, %v9508_v52  ;;  %v11111_v49 = vld [vmem:[#allocation35_spill] sm:$0xff] }
 0x72b   : > { %v3417_v12 = vmul.f32 %v3415_v5, %v9512_v32  ;;  %v3672_v22 = vrot.slane %v3665_v14, %v9284_v16  ;;  %v3638_v8 = vmul.f32 %v3636_v0, %v9520_v55  ;;  %v3439_v25 = vmul.f32 %v3437_v63, %v11110_v53  ;;  %v11112_v5 = vld [vmem:[#allocation36_spill] sm:$0xff] }
 0x72c   : > { %v3396_v7 = vadd.f32 %v3395_v41, %v3374_v50  ;;  %v3603_v1 = vadd.f32 %v3602_v37, %v3585_v35  ;;  %v3656_v21 = vmul.f32 %v3654_v51, %v9510_v6  ;;  %v3690_v54 = vrot.slane %v3683_v3, %v9284_v16 }
 0x72d   : > { %v3674_v52 = vmul.f32 %v3672_v22, %v9512_v32  ;;  %v8483_v51 = vunpack.i.h.bf16 %v9516_v31 }
 0x72e   : > { %v3418_v15 = vadd.f32 %v3417_v12, %v3396_v7  ;;  %v3621_v18 = vadd.f32 %v3620_v24, %v3603_v1  ;;  %v3692_v34 = vmul.f32 %v3690_v54, %v11110_v53  ;;  %v11114_v53 = vld [vmem:[#allocation44_spill] sm:$0xff] }
 0x730   : > { %v3440_v28 = vadd.f32 %v3439_v25, %v3418_v15  ;;  %v3639_v36 = vadd.f32 %v3638_v8, %v3621_v18  ;;  %v11113_v8 = vld [vmem:[#allocation43_spill] sm:$0xff] }
 0x732   : > { %v3462_v43 = vrot.slane %v3440_v28, %v9284_v16  ;;  %v3657_v27 = vadd.f32 %v3656_v21, %v3639_v36 }
 0x734   : > { %v3463_v42 = vcombine.high %v3462_v43, %v3462_v43  ;;  %v3470_v55 = vrot.slane %v3462_v43, %v9284_v16  ;;  %v3675_v2 = vadd.f32 %v3674_v52, %v3657_v27  ;;  %v11115_v52 = vld [vmem:[#allocation40_spill] sm:$0xff] }
 0x736   : > { %v3477_v10 = vrot.slane %v3463_v42, %v9284_v16  ;;  %v3481_v17 = vrot.slane %v3470_v55, %v9065_v13  ;;  %v3693_v6 = vadd.f32 %v3692_v34, %v3675_v2  ;;  %v11116_v55 = vld [vmem:[#allocation37_spill] sm:$0xff] }
 0x738   : > { %v3485_v39 = vrot.slane %v3477_v10, %v9065_v13  ;;  %v3488_v56 = vmul.f32 %v3481_v17, %v11111_v49  ;;  %v3701_v32 = vrot.slane %v3693_v6, %v9284_v16  ;;  %v11117_v10 = vld [vmem:[#allocation42_spill] sm:$0xff]  ;;  %v11118_v6 = vld [vmem:[#allocation41_spill] sm:$0xff] }
 0x73a   : > { %v3489_v44 = vmul.f32 %v3485_v39, %v11112_v5  ;;  %v10102_v0 = vadd.f32 %v3488_v56, %v9734_v38  ;;  %v3702_v14 = vcombine.high %v3701_v32, %v3701_v32  ;;  %v3709_v37 = vrot.slane %v3701_v32, %v9284_v16  ;;  %v11119_v32 = vld [vmem:[#allocation47_spill] sm:$0xff] }
 0x73c   : > { %v10106_v50 = vadd.f32 %v3489_v44, %v9738_v33  ;;  %v3716_v41 = vrot.slane %v3702_v14, %v9284_v16  ;;  %v3720_v63 = vrot.slane %v3709_v37, %v9065_v13  ;;  %v3795_v35 = vrot.slane %v10102_v0, %v9065_v13  ;;  %v11120_v14 = vld [vmem:[#allocation39_spill] sm:$0xff] }
 0x73d   : > { %v3810_v3 = vrot.slane %v10102_v0, %v9062_v11  ;;  %v3826_v38 = vrot.slane %v10102_v0, %v11066_v60  ;;  %v3842_v24 = vrot.slane %v10102_v0, %v11067_v19 }
 0x73e   : > { %v3724_v33 = vrot.slane %v3716_v41, %v9065_v13  ;;  %v3727_v7 = vmul.f32 %v3720_v63, %v11111_v49  ;;  %v3799_v12 = vrot.slane %v10106_v50, %v9065_v13  ;;  %v3814_v1 = vrot.slane %v10106_v50, %v9062_v11  ;;  %v11121_v41 = vld [vmem:[#allocation45_spill] sm:$0xff] }
 0x73f   : > { %v3830_v31 = vrot.slane %v10106_v50, %v11066_v60  ;;  %v3846_v22 = vrot.slane %v10106_v50, %v11067_v19  ;;  %v3869_v15 = vmul.f32 %v11113_v8, %v3795_v35  ;;  %v3887_v25 = vmul.f32 %v11114_v53, %v3810_v3 }
 0x740   : > { %v3728_v18 = vmul.f32 %v3724_v33, %v11112_v5  ;;  %v10133_v21 = vadd.f32 %v3727_v7, %v9767_v29  ;;  %v3800_v54 = vsel %vm912_vm12, %v3799_v12, %v3795_v35  ;;  %v3815_v28 = vsel %vm912_vm12, %v3814_v1, %v3810_v3 }
 0x741   : > { %v3802_v36 = vmul.f32 %v8483_v51, %v3800_v54  ;;  %v3817_v43 = vmul.f32 %v3815_v28, %v11115_v52  ;;  %v3831_v27 = vsel %vm912_vm12, %v3830_v31, %v3826_v38  ;;  %v3847_v34 = vsel %vm912_vm12, %v3846_v22, %v3842_v24  ;;  %v11123_v54 = vld [vmem:[#allocation46_spill] sm:$0xff] }
 0x742   : > { %v10141_v42 = vadd.f32 %v3728_v18, %v9775_v20  ;;  %v3833_v2 = vmul.f32 %v3831_v27, %v11116_v55  ;;  %v3870_v17 = vmul.f32 %v11117_v10, %v3799_v12  ;;  %v3888_v39 = vmul.f32 %v11118_v6, %v3814_v1 }
 0x743   : > { %v3818_v29 = vadd.f32 %v3817_v43, %v3802_v36  ;;  %v3889_v56 = vadd.f32 %v3887_v25, %v3869_v15  ;;  %v3907_v44 = vmul.f32 %v11119_v32, %v3826_v38  ;;  %v3849_v37 = vmul.f32 %v3847_v34, %v11120_v14  ;;  %v11122_v25 = vld [vmem:[#allocation48_spill] sm:$0xff] }
 0x744   : > { %v3908_v63 = vmul.f32 %v11121_v41, %v3830_v31  ;;  %v4069_v35 = vrot.slane %v10133_v21, %v9065_v13  ;;  %v3890_v20 = vadd.f32 %v3888_v39, %v3870_v17  ;;  %v4073_v7 = vrot.slane %v10141_v42, %v9065_v13 }
 0x745   : > { %v3834_v3 = vadd.f32 %v3833_v2, %v3818_v29  ;;  %v3909_v33 = vadd.f32 %v3907_v44, %v3889_v56  ;;  %v4080_v12 = vrot.slane %v10133_v21, %v9062_v11  ;;  %v4084_v1 = vrot.slane %v10141_v42, %v9062_v11 }
 0x746   : > { %v4092_v38 = vrot.slane %v10133_v21, %v11066_v60  ;;  %v4096_v31 = vrot.slane %v10141_v42, %v11066_v60  ;;  %v3927_v18 = vmul.f32 %v11122_v25, %v3842_v24  ;;  %v3928_v28 = vmul.f32 %v11123_v54, %v3846_v22 }
 0x747   : > { %v3850_v15 = vadd.f32 %v3849_v37, %v3834_v3  ;;  %v4074_v36 = vsel %vm912_vm12, %v4073_v7, %v4069_v35  ;;  %v3910_v43 = vadd.f32 %v3908_v63, %v3890_v20  ;;  %v4085_v34 = vsel %vm912_vm12, %v4084_v1, %v4080_v12 }
 0x748   : > { %v4076_v27 = vmul.f32 %v8483_v51, %v4074_v36  ;;  %v4097_v2 = vsel %vm912_vm12, %v4096_v31, %v4092_v38  ;;  %v3929_v17 = vadd.f32 %v3927_v18, %v3909_v33  ;;  %v4087_v39 = vmul.f32 %v4085_v34, %v11115_v52 }
 0x749   : > { %v3938_v29 = vrot.slane %v3850_v15, %v9284_v16  ;;  %v4104_v56 = vrot.slane %v10133_v21, %v11067_v19  ;;  %v4099_v24 = vmul.f32 %v4097_v2, %v11116_v55  ;;  %v4108_v22 = vrot.slane %v10141_v42, %v11067_v19 }
 0x74a   : > { %v4121_v44 = vmul.f32 %v4069_v35, %v11113_v8  ;;  %v4131_v51 = vmul.f32 %v4080_v12, %v11114_v53  ;;  %v4088_v3 = vadd.f32 %v4087_v39, %v4076_v27  ;;  %v4143_v20 = vmul.f32 %v4092_v38, %v11119_v32 }
 0x74b   : > { %v3939_v37 = vcombine.high %v3938_v29, %v3938_v29  ;;  %v3946_v63 = vrot.slane %v3938_v29, %v9284_v16  ;;  %v4109_v52 = vsel %vm912_vm12, %v4108_v22, %v4104_v56  ;;  %v4122_v15 = vmul.f32 %v4073_v7, %v11117_v10 }
 0x74c   : > { %v4133_v33 = vadd.f32 %v4131_v51, %v4121_v44  ;;  %v4132_v55 = vmul.f32 %v4084_v1, %v11118_v6  ;;  %v4100_v8 = vadd.f32 %v4099_v24, %v4088_v3  ;;  %v4111_v53 = vmul.f32 %v4109_v52, %v11120_v14 }
 0x74d   : > { %v3953_v18 = vrot.slane %v3939_v37, %v9284_v16  ;;  %v3957_v36 = vrot.slane %v3946_v63, %v9065_v13  ;;  %v4144_v27 = vmul.f32 %v4096_v31, %v11121_v41  ;;  %v3930_v34 = vadd.f32 %v3928_v28, %v3910_v43 }
 0x74e   : > { %v4145_v35 = vadd.f32 %v4143_v20, %v4133_v33  ;;  %v4134_v12 = vadd.f32 %v4132_v55, %v4122_v15  ;;  %v4112_v2 = vadd.f32 %v4111_v53, %v4100_v8  ;;  %v4155_v10 = vmul.f32 %v4104_v56, %v11122_v25 }
 0x74f   : > { %v3961_v32 = vrot.slane %v3953_v18, %v9065_v13  ;;  %v3964_v38 = vmul.f32 %v3957_v36, %v3929_v17  ;;  %v4156_v6 = vmul.f32 %v4108_v22, %v11123_v54 }
 0x750   : > { %v4146_v7 = vadd.f32 %v4144_v27, %v4134_v12  ;;  %v4166_v14 = vrot.slane %v4112_v2, %v9284_v16  ;;  %v4157_v24 = vadd.f32 %v4155_v10, %v4145_v35 }
 0x751   : > { %v3965_v1 = vmul.f32 %v3961_v32, %v3930_v34  ;;  %v3968_v29 = vcombine.high %v3964_v38, %v3964_v38  ;;  %v3975_v39 = vrot.slane %v3964_v38, %v9284_v16 }
 0x752   : > { %v4158_v28 = vadd.f32 %v4156_v6, %v4146_v7  ;;  %v4167_v25 = vcombine.high %v4166_v14, %v4166_v14  ;;  %v4174_v56 = vrot.slane %v4166_v14, %v9284_v16 }
 0x753   : > { %v3982_v44 = vrot.slane %v3968_v29, %v9284_v16  ;;  %v3983_v41 = vcombine.high %v3975_v39, %v3975_v39  ;;  %v4016_v31 = vcombine.high %v3965_v1, %v3965_v1  ;;  %v3991_v43 = vrot.slane %v3975_v39, %v9284_v16 }
 0x754   : > { %v4023_v17 = vrot.slane %v3965_v1, %v9284_v16  ;;  %v4185_v20 = vrot.slane %v4174_v56, %v9065_v13  ;;  %v4181_v52 = vrot.slane %v4167_v25, %v9284_v16 }
 0x755   : > { %v3984_v54 = vcombine.high %v3982_v44, %v3982_v44  ;;  %v3998_v22 = vrot.slane %v3982_v44, %v9284_v16  ;;  %v4005_v51 = vrot.slane %v3983_v41, %v9284_v16  ;;  %v4030_v37 = vrot.slane %v4016_v31, %v9284_v16 }
 0x756   : > { %v4031_v63 = vcombine.high %v4023_v17, %v4023_v17  ;;  %v4039_v3 = vrot.slane %v4023_v17, %v9284_v16  ;;  %v4192_v53 = vmul.f32 %v4185_v20, %v4157_v24  ;;  %v4189_v25 = vrot.slane %v4181_v52, %v9065_v13 }
 0x757   : > { %v4012_v33 = vrot.slane %v3984_v54, %v9284_v16  ;;  %v4014_v15 = vcombine.high %v3998_v22, %v3998_v22  ;;  %v4032_v55 = vcombine.high %v4030_v37, %v4030_v37  ;;  %v4046_v18 = vrot.slane %v4030_v37, %v9284_v16 }
 0x758   : > { %v4053_v36 = vrot.slane %v4031_v63, %v9284_v16  ;;  %v4061_v8 = vcombine.high %v4039_v3, %v4039_v3  ;;  %v4292_v35 = vcombine.low %v3991_v43, %v4005_v51  ;;  %v8063_v34 = vcombine.high %v3991_v43, %v4005_v51 }
 0x759   : > { %v4060_v12 = vrot.slane %v4032_v55, %v9284_v16  ;;  %v4062_v27 = vcombine.high %v4046_v18, %v4046_v18  ;;  %v4294_v32 = vcombine.low %v3998_v22, %v4012_v33  ;;  %v4196_v2 = vcombine.high %v4192_v53, %v4192_v53 }
 0x75a   : > { %v4063_v38 = vcombine.high %v4053_v36, %v4053_v36  ;;  %v4203_v10 = vrot.slane %v4192_v53, %v9284_v16  ;;  %v4295_v7 = vcombine.low %v4014_v15, %v4039_v3  ;;  %v4302_v6 = vrot.slane %v4292_v35, %v9284_v16 }
 0x75b   : > { %v4309_v1 = vrot.slane %v8063_v34, %v9284_v16  ;;  %v4316_v29 = vrot.slane %v4294_v32, %v9284_v16  ;;  %v4341_v39 = vcombine.low %v4053_v36, %v4061_v8  ;;  %v4343_v43 = vcombine.low %v4060_v12, %v4062_v27 }
 0x75c   : > { %v4211_v14 = vcombine.high %v4203_v10, %v4203_v10  ;;  %v4219_v24 = vrot.slane %v4203_v10, %v9284_v16  ;;  %v4323_v44 = vrot.slane %v4295_v7, %v9284_v16  ;;  %v4342_v41 = vcombine.low %v4063_v38, %v4046_v18 }
 0x75d   : > { %v4324_v31 = vcombine.low %v4302_v6, %v4309_v1  ;;  %v4350_v17 = vrot.slane %v4341_v39, %v9284_v16  ;;  %v4210_v51 = vrot.slane %v4196_v2, %v9284_v16  ;;  %v4364_v37 = vrot.slane %v4343_v43, %v9284_v16 }
 0x75e   : > { %v4233_v56 = vrot.slane %v4211_v14, %v9284_v16  ;;  %v4325_v54 = vcombine.low %v4316_v29, %v4323_v44  ;;  %v4357_v22 = vrot.slane %v4342_v41, %v9284_v16  ;;  %v4193_v63 = vmul.f32 %v4189_v25, %v4158_v28 }
 0x75f   : > { %v4332_v3 = vrot.slane %v4324_v31, %v9284_v16  ;;  %v4212_v15 = vcombine.high %v4210_v51, %v4210_v51  ;;  %v4226_v18 = vrot.slane %v4210_v51, %v9284_v16  ;;  %v4379_v53 = vrot.slane %v4364_v37, %v9284_v16 }
 0x760   : > { %v4365_v20 = vcombine.low %v4350_v17, %v4357_v22  ;;  %v4383_v33 = vcombine.low %v4219_v24, %v4233_v56  ;;  %v4339_v55 = vrot.slane %v4325_v54, %v9284_v16  ;;  %v4244_v52 = vcombine.high %v4193_v63, %v4193_v63 }
 0x761   : > { %v4251_v36 = vrot.slane %v4193_v63, %v9284_v16  ;;  %v4240_v28 = vrot.slane %v4212_v15, %v9284_v16  ;;  %v4242_v12 = vcombine.high %v4226_v18, %v4226_v18  ;;  %v8064_v10 = vcombine.high %v4219_v24, %v4233_v56 }
 0x762   : > { %v4372_v8 = vrot.slane %v4365_v20, %v9284_v16  ;;  %v4390_v35 = vrot.slane %v4383_v33, %v9284_v16  ;;  %v4258_v27 = vrot.slane %v4244_v52, %v9284_v16  ;;  %v4340_v51 = vcombine.low %v4332_v3, %v4339_v55 }
 0x763   : > { %v4259_v34 = vcombine.high %v4251_v36, %v4251_v36  ;;  %v4267_v32 = vrot.slane %v4251_v36, %v9284_v16  ;;  %v4401_v7 = vcombine.low %v4226_v18, %v4240_v28  ;;  %v4410_v41 = vrot.slane %v8064_v10, %v9284_v16 }
 0x764   : > { %v4380_v38 = vcombine.low %v4372_v8, %v4379_v53  ;;  %v4391_v2 = vcombine.low %v4390_v35, %v4390_v35  ;;  %v4260_v6 = vcombine.high %v4258_v27, %v4258_v27  ;;  %v4274_v1 = vrot.slane %v4258_v27, %v9284_v16 }
 0x765   : > { %v4281_v29 = vrot.slane %v4259_v34, %v9284_v16  ;;  %v4289_v39 = vcombine.high %v4267_v32, %v4267_v32  ;;  %v4402_v44 = vcombine.low %v4242_v12, %v4267_v32  ;;  %v4417_v31 = vrot.slane %v4401_v7, %v9284_v16 }
 0x766   : > { %v4398_v14 = vrot.slane %v4391_v2, %v9284_v16  ;;  %v4288_v43 = vrot.slane %v4260_v6, %v9284_v16  ;;  %v4290_v17 = vcombine.high %v4274_v1, %v4274_v1  ;;  %v11124_v12 = vmov 0.0  }
 0x767   : > { %v4291_v25 = vcombine.high %v4281_v29, %v4281_v29  ;;  %v4403_v54 = vcombine.low %v4281_v29, %v4289_v39  ;;  %v4424_v56 = vrot.slane %v4402_v44, %v9284_v16  ;;  %v4432_v22 = vcombine.low %v4410_v41, %v4417_v31 }
 0x768   : > { %v4399_v24 = vcombine.low %v4398_v14, %v4398_v14  ;;  %v4450_v20 = vcombine.low %v4288_v43, %v4290_v17  ;;  %v10258_v17 = vld [vmem:[%s10920_s10] ss:$0 sm:$0xff] }
 0x769   : > { %v4431_v37 = vrot.slane %v4403_v54, %v9284_v16  ;;  %v4449_v63 = vcombine.low %v4291_v25, %v4274_v1  ;;  %v4440_v15 = vrot.slane %v4432_v22, %v9284_v16 }
 0x76a   : > { %v4476_v33 = vsel %vm1587_vm8, %v4380_v38, %v4399_v24  ;;  %v4464_v8 = vrot.slane %v4450_v20, %v9284_v16 }
 0x76b   : > { %v4477_v18 = vpack.c.bf16 %v4476_v33, %v4340_v51  ;;  %v4433_v52 = vcombine.low %v4424_v56, %v4431_v37  ;;  %v4457_v36 = vrot.slane %v4449_v63, %v9284_v16 }
 0x76d   : > { %8254 = vmatprep.mubr.msk.bf16.mxu1 %vm598_vm2, %v4477_v18  ;;  %v4447_v53 = vrot.slane %v4433_v52, %v9284_v16  ;;  %v4465_v35 = vcombine.low %v4457_v36, %v4464_v8 }
 0x76f   : > { %v4448_v3 = vcombine.low %v4440_v15, %v4447_v53  ;;  %v4472_v55 = vrot.slane %v4465_v35, %v9284_v16 }
 0x771   : > { %v4478_v28 = vpack.c.bf16 %v4472_v55, %v4448_v3 }
 0x773   : > { %8255 = vmatmul.mubr.msk.bf16.vlgmr.msra.gmra.mrb[16].mxu1 %vm598_vm2, %v4478_v28 }
 0x774   : > { %8267 = vmatpush3.bf16.msra.mxu1 %v9896_v61 }
 0x775   : > { %8268 = vmatprep.subr.bf16.mxu1 %v9905_v46 }
 0x778   : > { %8269 = vmatpush3.bf16.msra.mxu1 %v9905_v46 }
 0x779   : > { %8282 = vmatprep.subr.bf16.mxu1 %v11124_v12 }
 0x846   : > { %v8256_v27 = vpop.f32.mrb[16].mxu1 }
 0x847   : > { %v4528_v34 = vadd.f32 %v9966_v62, %v8256_v27  ;;  %v4519_v32 = vpop.f32.mrb[17].mxu1 }
 0x848   : > { %v4520_v38 = vadd.f32 %v9966_v62, %v4519_v32  ;;  %v8257_v2 = vpop.f32.mrb[18].mxu1 }
 0x849   : > { %v4540_v10 = vmul.f32 0.01, %v4528_v34  ;;  %v4531_v7 = vadd.f32 %v9966_v62, %v8257_v2  ;;  %v4522_v6 = vpop.f32.mrb[19].mxu1  ;;  %vm4536_vm1 = vcmp.gt.f32.partialorder %v4528_v34, 0.0 }
 0x84a   : > { %v4538_v1 = vmul.f32 0.01, %v4520_v38  ;;  %v4523_v61 = vadd.f32 %v9966_v62, %v4522_v6  ;;  %vm4534_vm14 = vcmp.gt.f32.partialorder %v4520_v38, 0.0 }
 0x84b   : > { %vm4537_vm15 = vcmp.gt.f32.partialorder %v4531_v7, 0.0  ;;  %v4541_v46 = vmul.f32 0.01, %v4531_v7  ;;  %v4544_v39 = vsel %vm4536_vm1, %v4528_v34, %v4540_v10 }
 0x84c   : > { %vm4535_vm3 = vcmp.gt.f32.partialorder %v4523_v61, 0.0  ;;  %v4539_v29 = vmul.f32 0.01, %v4523_v61  ;;  %v4542_v44 = vsel %vm4534_vm14, %v4520_v38, %v4538_v1 }
 0x84d   : > { %v4545_v14 = vsel %vm4537_vm15, %v4531_v7, %v4541_v46 }
 0x84e   : > { %v4547_v41 = vpack.c.bf16 %v4545_v14, %v4544_v39  ;;  %v4543_v31 = vsel %vm4535_vm3, %v4523_v61, %v4539_v29  ;;  %vm7718_vm3 = vcmask 257024  }
 0x84f   : > { %v4546_v43 = vpack.c.bf16 %v4543_v31, %v4542_v44 }
 0x851   : > { %8262 = vmatprep.mubr.msk.bf16.mxu0 %vm598_vm2, %v4546_v43 }
 0x852   : > { %8263 = vmatmul.mubr.msk.bf16.vlgmr.msra.gmra.mrb[16].mxu0 %vm598_vm2, %v4547_v41 }
 0x853   : > { %8275 = vmatpush3.bf16.msra.mxu0 %v9974_v9 }
 0x854   : > { %8276 = vmatprep.subr.bf16.mxu0 %v9977_v48 }
 0x857   : > { %8277 = vmatpush3.bf16.msra.mxu0 %v9977_v48 }
 0x858   : > { %8290 = vmatprep.subr.bf16.mxu0 %v11124_v12 }
 0x925   : > { %v8264_v62 = vpop.f32.mrb[16].mxu0 }
 0x926   : > { %v4597_v25 = vadd.f32 %v10258_v17, %v8264_v62  ;;  %v4588_v54 = vpop.f32.mrb[17].mxu0 }
 0x927   : > { %v4589_v24 = vadd.f32 %v10258_v17, %v4588_v54  ;;  %v8265_v56 = vpop.f32.mrb[18].mxu0 }
 0x928   : > { %vm4605_vm4 = vcmp.gt.f32.partialorder %v4597_v25, 0.0  ;;  %v4609_v9 = vmul.f32 0.01, %v4597_v25  ;;  %v4600_v22 = vadd.f32 %v10258_v17, %v8265_v56  ;;  %v4591_v51 = vpop.f32.mrb[19].mxu0 }
 0x929   : > { %vm4603_vm5 = vcmp.gt.f32.partialorder %v4589_v24, 0.0  ;;  %v4607_v48 = vmul.f32 0.01, %v4589_v24  ;;  %v4592_v37 = vadd.f32 %v10258_v17, %v4591_v51 }
 0x92a   : > { %v4613_v63 = vsel %vm4605_vm4, %v4597_v25, %v4609_v9  ;;  %vm4606_vm6 = vcmp.gt.f32.partialorder %v4600_v22, 0.0  ;;  %v4610_v20 = vmul.f32 0.01, %v4600_v22 }
 0x92b   : > { %v4922_v33 = vcombine.high %v4613_v63, %v4613_v63  ;;  %v4929_v15 = vrot.slane %v4613_v63, %v9284_v16  ;;  %v4611_v18 = vsel %vm4603_vm5, %v4589_v24, %v4607_v48  ;;  %vm4604_vm7 = vcmp.gt.f32.partialorder %v4592_v37, 0.0 }
 0x92c   : > { %v4617_v52 = vcombine.high %v4611_v18, %v4611_v18  ;;  %v4614_v36 = vsel %vm4606_vm6, %v4600_v22, %v4610_v20  ;;  %v4608_v8 = vmul.f32 0.01, %v4592_v37  ;;  %v4624_v28 = vrot.slane %v4611_v18, %v9284_v16 }
 0x92d   : > { %v4936_v53 = vrot.slane %v4922_v33, %v9284_v16  ;;  %v4937_v35 = vcombine.high %v4929_v15, %v4929_v15  ;;  %v4977_v3 = vrot.slane %v4614_v36, %v9284_v16  ;;  %v4945_v55 = vrot.slane %v4929_v15, %v9284_v16 }
 0x92e   : > { %v4631_v27 = vrot.slane %v4617_v52, %v9284_v16  ;;  %v4612_v34 = vsel %vm4604_vm7, %v4592_v37, %v4608_v8  ;;  %v4632_v61 = vcombine.high %v4624_v28, %v4624_v28  ;;  %v4640_v31 = vrot.slane %v4624_v28, %v9284_v16 }
 0x92f   : > { %v4938_v32 = vcombine.high %v4936_v53, %v4936_v53  ;;  %v10271_v38 = vrot.slane %v4937_v35, %v9284_v16  ;;  %v4978_v10 = vcombine.high %v4977_v3, %v4977_v3  ;;  %v10274_v7 = vrot.slane %v4977_v3, %v9284_v16 }
 0x930   : > { %v4633_v2 = vcombine.high %v4631_v27, %v4631_v27  ;;  %v4666_v6 = vcombine.high %v4612_v34, %v4612_v34  ;;  %v4967_v1 = vcombine.high %v4945_v55, %v4945_v55  ;;  %v4673_v29 = vrot.slane %v4612_v34, %v9284_v16 }
 0x931   : > { %v4966_v39 = vrot.slane %v4938_v32, %v9284_v16  ;;  %v4992_v14 = vrot.slane %v4978_v10, %v9284_v16  ;;  %v5048_v44 = vcombine.low %v10271_v38, %v10274_v7  ;;  %v8071_v41 = vcombine.high %v10271_v38, %v10274_v7 }
 0x932   : > { %v4661_v46 = vrot.slane %v4633_v2, %v9284_v16  ;;  %v4680_v62 = vrot.slane %v4666_v6, %v9284_v16  ;;  %v4681_v25 = vcombine.high %v4673_v29, %v4673_v29  ;;  %v4952_v54 = vrot.slane %v4936_v53, %v9284_v16 }
 0x933   : > { %v4994_v24 = vcombine.high %v4992_v14, %v4992_v14  ;;  %v5066_v56 = vcombine.low %v4967_v1, %v4992_v14  ;;  %v4654_v9 = vrot.slane %v4632_v61, %v9284_v16  ;;  %v4689_v48 = vrot.slane %v4673_v29, %v9284_v16 }
 0x934   : > { %v4665_v43 = vcombine.high %v4661_v46, %v4661_v46  ;;  %v4682_v51 = vcombine.high %v4680_v62, %v4680_v62  ;;  %v4970_v37 = vcombine.high %v4966_v39, %v4966_v39  ;;  %v4647_v63 = vrot.slane %v4631_v27, %v9284_v16 }
 0x935   : > { %v10290_v20 = vcombine.low %v4952_v54, %v4994_v24  ;;  %v4703_v15 = vrot.slane %v4681_v25, %v9284_v16  ;;  %v4662_v18 = vcombine.high %v4640_v31, %v4640_v31  ;;  %v4696_v52 = vrot.slane %v4680_v62, %v9284_v16 }
 0x936   : > { %v4718_v22 = vcombine.low %v4640_v31, %v4665_v43  ;;  %v4710_v36 = vrot.slane %v4682_v51, %v9284_v16  ;;  %v8504_v8 = vunpack.i.l.bf16 %v9899_v26  ;;  %v4739_v3 = vcombine.low %v4654_v9, %v4689_v48 }
 0x937   : > { %v4712_v35 = vcombine.high %v4703_v15, %v4703_v15  ;;  %v5030_v28 = vcombine.low %v4945_v55, %v4970_v37  ;;  %v4663_v34 = vcombine.high %v4647_v63, %v4647_v63  ;;  %v4761_v27 = vcombine.low %v4662_v18, %v4703_v15 }
 0x938   : > { %v4725_v33 = vrot.slane %v4718_v22, %v9284_v16  ;;  %v4746_v38 = vrot.slane %v4739_v3, %v9284_v16  ;;  %v8069_v2 = vcombine.high %v4654_v9, %v4689_v48  ;;  %v4827_v6 = vcombine.low %v4661_v46, %v4696_v52 }
 0x939   : > { %v4805_v10 = vcombine.low %v4647_v63, %v4712_v35  ;;  %v4768_v7 = vrot.slane %v4761_v27, %v9284_v16  ;;  %v4849_v1 = vcombine.low %v4663_v34, %v4710_v36  ;;  %v4920_v31 = vcombine.high %v4696_v52, %v4696_v52 }
 0x93a   : > { %v4732_v53 = vrot.slane %v4725_v33, %v9284_v16  ;;  %v4753_v61 = vrot.slane %v4746_v38, %v9284_v16  ;;  %v4790_v29 = vrot.slane %v8069_v2, %v9284_v16  ;;  %v5037_v55 = vrot.slane %v5030_v28, %v9284_v16 }
 0x93b   : > { %v4812_v14 = vrot.slane %v4805_v10, %v9284_v16  ;;  %v4775_v43 = vrot.slane %v4768_v7, %v9284_v16  ;;  %v8070_v62 = vcombine.high %v4710_v36, %v4952_v54  ;;  %v4834_v9 = vrot.slane %v4827_v6, %v9284_v16 }
 0x93c   : > { %v4734_v32 = vmul.f32 %v8504_v8, %v4732_v53  ;;  %v4755_v25 = vmul.f32 %v4753_v61, %v9713_v57  ;;  %v4797_v24 = vrot.slane %v4790_v29, %v9284_v16  ;;  %v4995_v46 = vcombine.low %v4920_v31, %v4966_v39 }
 0x93d   : > { %v5055_v22 = vrot.slane %v5048_v44, %v9284_v16  ;;  %v4856_v51 = vrot.slane %v4849_v1, %v9284_v16  ;;  %v5019_v48 = vrot.slane %v8070_v62, %v9284_v16  ;;  %v4777_v63 = vmul.f32 %v4775_v43, %v9911_v59 }
 0x93e   : > { %v4756_v37 = vadd.f32 %v4755_v25, %v4734_v32  ;;  %v4819_v33 = vrot.slane %v4812_v14, %v9284_v16  ;;  %v5002_v54 = vrot.slane %v4995_v46, %v9284_v16  ;;  %v5044_v15 = vrot.slane %v5037_v55, %v9284_v16 }
 0x93f   : > { %v5073_v18 = vrot.slane %v5066_v56, %v9284_v16  ;;  %v5026_v52 = vrot.slane %v5019_v48, %v9284_v16  ;;  %v4799_v44 = vmul.f32 %v4797_v24, %v9914_v47  ;;  %v4841_v36 = vrot.slane %v4834_v9, %v9284_v16  ;;  %v11125_v48 = vld [vmem:[#allocation50_spill] sm:$0xff] }
 0x940   : > { %v4778_v39 = vadd.f32 %v4777_v63, %v4756_v37  ;;  %v5009_v53 = vrot.slane %v5002_v54, %v9284_v16  ;;  %v5062_v35 = vrot.slane %v5055_v22, %v9284_v16  ;;  %v5091_v3 = vrot.slane %v8071_v41, %v9284_v16 }
 0x941   : > { %v5028_v28 = vmul.f32 %v5026_v52, %v9713_v57  ;;  %v4821_v27 = vmul.f32 %v4819_v33, %v9721_v23  ;;  %v4863_v56 = vrot.slane %v4856_v51, %v9284_v16  ;;  %v5080_v38 = vrot.slane %v5073_v18, %v9284_v16 }
 0x942   : > { %v4800_v34 = vadd.f32 %v4799_v44, %v4778_v39  ;;  %v5011_v32 = vmul.f32 %v8504_v8, %v5009_v53  ;;  %v5109_v2 = vrot.slane %v10290_v20, %v9284_v16  ;;  %v5046_v10 = vmul.f32 %v5044_v15, %v9911_v59 }
 0x943   : > { %v4843_v6 = vmul.f32 %v4841_v36, %v9916_v58  ;;  %v5098_v41 = vrot.slane %v5091_v3, %v9284_v16  ;;  %v5064_v57 = vmul.f32 %v5062_v35, %v9914_v47  ;;  %v4865_v29 = vmul.f32 %v4863_v56, %v9918_v4  ;;  %v11126_v56 = vld [vmem:[#allocation19_spill] sm:$0xff] }
 0x944   : > { %v4822_v7 = vadd.f32 %v4821_v27, %v4800_v34  ;;  %v5029_v1 = vadd.f32 %v5028_v28, %v5011_v32  ;;  %v5082_v8 = vmul.f32 %v5080_v38, %v9721_v23  ;;  %v5116_v31 = vrot.slane %v5109_v2, %v9284_v16 }
 0x945   : > { %v5100_v59 = vmul.f32 %v5098_v41, %v9916_v58  ;;  %v8505_v44 = vunpack.i.h.bf16 %v9899_v26  ;;  %vm7765_vm6 = vcmask 25600  }
 0x946   : > { %v4844_v61 = vadd.f32 %v4843_v6, %v4822_v7  ;;  %v5047_v14 = vadd.f32 %v5046_v10, %v5029_v1  ;;  %v5118_v25 = vmul.f32 %v5116_v31, %v9918_v4  ;;  %v11127_v1 = vld [vmem:[#allocation17_spill] sm:$0xff] }
 0x948   : > { %v4866_v55 = vadd.f32 %v4865_v29, %v4844_v61  ;;  %v5065_v20 = vadd.f32 %v5064_v57, %v5047_v14 }
 0x94a   : > { %v4888_v43 = vrot.slane %v4866_v55, %v9284_v16  ;;  %v5083_v62 = vadd.f32 %v5082_v8, %v5065_v20  ;;  %v11128_v8 = vld [vmem:[#allocation18_spill] sm:$0xff] }
 0x94b   : > { %v11129_v55 = vld [vmem:[#allocation26_spill] sm:$0xff] }
 0x94c   : > { %v4889_v24 = vcombine.high %v4888_v43, %v4888_v43  ;;  %v4896_v47 = vrot.slane %v4888_v43, %v9284_v16  ;;  %v5101_v9 = vadd.f32 %v5100_v59, %v5083_v62  ;;  %v11130_v43 = vld [vmem:[#allocation31_spill] sm:$0xff] }
 0x94e   : > { %v4903_v46 = vrot.slane %v4889_v24, %v9284_v16  ;;  %v4907_v22 = vrot.slane %v4896_v47, %v9065_v13  ;;  %v5119_v23 = vadd.f32 %v5118_v25, %v5101_v9  ;;  %v11131_v25 = vld [vmem:[#allocation22_spill] sm:$0xff]  ;;  %v11132_v47 = vld [vmem:[#allocation25_spill] sm:$0xff] }
 0x950   : > { %v4911_v51 = vrot.slane %v4903_v46, %v9065_v13  ;;  %v4914_v37 = vmul.f32 %v4907_v22, %v11125_v48  ;;  %v5127_v58 = vrot.slane %v5119_v23, %v9284_v16 }
 0x952   : > { %v4915_v63 = vmul.f32 %v4911_v51, %v9920_v40  ;;  %v10346_v33 = vadd.f32 %v4914_v37, %v10102_v0  ;;  %v5128_v4 = vcombine.high %v5127_v58, %v5127_v58  ;;  %v5135_v54 = vrot.slane %v5127_v58, %v9284_v16 }
 0x954   : > { %v10350_v15 = vadd.f32 %v4915_v63, %v10106_v50  ;;  %v5142_v18 = vrot.slane %v5128_v4, %v9284_v16  ;;  %v5146_v52 = vrot.slane %v5135_v54, %v9065_v13  ;;  %v5221_v39 = vrot.slane %v10346_v33, %v9065_v13 }
 0x955   : > { %v5236_v36 = vrot.slane %v10346_v33, %v9062_v11  ;;  %v5252_v0 = vrot.slane %v10346_v33, %v11066_v60  ;;  %v5268_v53 = vrot.slane %v10346_v33, %v11067_v19 }
 0x956   : > { %v5150_v50 = vrot.slane %v5142_v18, %v9065_v13  ;;  %v5153_v35 = vmul.f32 %v5146_v52, %v11125_v48  ;;  %v5225_v3 = vrot.slane %v10350_v15, %v9065_v13  ;;  %v5240_v28 = vrot.slane %v10350_v15, %v9062_v11  ;;  %v11133_v18 = vld [vmem:[#allocation23_spill] sm:$0xff] }
 0x957   : > { %v5256_v26 = vrot.slane %v10350_v15, %v11066_v60  ;;  %v5272_v34 = vrot.slane %v10350_v15, %v11067_v19  ;;  %v5295_v27 = vmul.f32 %v9928_v30, %v5221_v39  ;;  %v5313_v32 = vmul.f32 %v11126_v56, %v5236_v36 }
 0x958   : > { %v5154_v38 = vmul.f32 %v5150_v50, %v9920_v40  ;;  %v10377_v2 = vadd.f32 %v5153_v35, %v10133_v21  ;;  %v5226_v10 = vsel %vm912_vm12, %v5225_v3, %v5221_v39  ;;  %v5241_v7 = vsel %vm912_vm12, %v5240_v28, %v5236_v36  ;;  %v11134_v39 = vld [vmem:[#allocation27_spill] sm:$0xff] }
 0x959   : > { %v5228_v6 = vmul.f32 %v8505_v44, %v5226_v10  ;;  %v5243_v41 = vmul.f32 %v5241_v7, %v11127_v1  ;;  %v5257_v57 = vsel %vm912_vm12, %v5256_v26, %v5252_v0  ;;  %v5273_v61 = vsel %vm912_vm12, %v5272_v34, %v5268_v53 }
 0x95a   : > { %v10385_v29 = vadd.f32 %v5154_v38, %v10141_v42  ;;  %v5259_v14 = vmul.f32 %v5257_v57, %v9922_v45  ;;  %v5296_v31 = vmul.f32 %v11128_v8, %v5225_v3  ;;  %v5314_v20 = vmul.f32 %v11129_v55, %v5240_v28 }
 0x95b   : > { %v5244_v21 = vadd.f32 %v5243_v41, %v5228_v6  ;;  %v5315_v59 = vadd.f32 %v5313_v32, %v5295_v27  ;;  %v5333_v62 = vmul.f32 %v11130_v43, %v5252_v0  ;;  %v5275_v24 = vmul.f32 %v5273_v61, %v11131_v25 }
 0x95c   : > { %v5334_v9 = vmul.f32 %v11132_v47, %v5256_v26  ;;  %v5495_v46 = vrot.slane %v10377_v2, %v9065_v13  ;;  %v5316_v42 = vadd.f32 %v5314_v20, %v5296_v31  ;;  %v5499_v51 = vrot.slane %v10385_v29, %v9065_v13 }
 0x95d   : > { %v5260_v22 = vadd.f32 %v5259_v14, %v5244_v21  ;;  %v5335_v23 = vadd.f32 %v5333_v62, %v5315_v59  ;;  %v5506_v37 = vrot.slane %v10377_v2, %v9062_v11  ;;  %v5510_v58 = vrot.slane %v10385_v29, %v9062_v11 }
 0x95e   : > { %v5518_v63 = vrot.slane %v10377_v2, %v11066_v60  ;;  %v5522_v4 = vrot.slane %v10385_v29, %v11066_v60  ;;  %v5353_v52 = vmul.f32 %v11133_v18, %v5268_v53  ;;  %v5354_v36 = vmul.f32 %v11134_v39, %v5272_v34 }
 0x95f   : > { %v5276_v54 = vadd.f32 %v5275_v24, %v5260_v22  ;;  %v5500_v0 = vsel %vm912_vm12, %v5499_v51, %v5495_v46  ;;  %v5336_v50 = vadd.f32 %v5334_v9, %v5316_v42  ;;  %v5511_v3 = vsel %vm912_vm12, %v5510_v58, %v5506_v37 }
 0x960   : > { %v5502_v35 = vmul.f32 %v8505_v44, %v5500_v0  ;;  %v5523_v28 = vsel %vm912_vm12, %v5522_v4, %v5518_v63  ;;  %v5355_v26 = vadd.f32 %v5353_v52, %v5335_v23  ;;  %v5513_v32 = vmul.f32 %v5511_v3, %v11127_v1 }
 0x961   : > { %v5364_v27 = vrot.slane %v5276_v54, %v9284_v16  ;;  %v5530_v38 = vrot.slane %v10377_v2, %v11067_v19  ;;  %v5525_v53 = vmul.f32 %v5523_v28, %v9922_v45  ;;  %v5534_v34 = vrot.slane %v10385_v29, %v11067_v19 }
 0x962   : > { %v5547_v10 = vmul.f32 %v5495_v46, %v9928_v30  ;;  %v5557_v44 = vmul.f32 %v5506_v37, %v11126_v56  ;;  %v5514_v41 = vadd.f32 %v5513_v32, %v5502_v35  ;;  %v5569_v57 = vmul.f32 %v5518_v63, %v11130_v43 }
 0x963   : > { %v5365_v7 = vcombine.high %v5364_v27, %v5364_v27  ;;  %v5372_v6 = vrot.slane %v5364_v27, %v9284_v16  ;;  %v5535_v1 = vsel %vm912_vm12, %v5534_v34, %v5530_v38  ;;  %v5548_v14 = vmul.f32 %v5499_v51, %v11128_v8 }
 0x964   : > { %v5559_v61 = vadd.f32 %v5557_v44, %v5547_v10  ;;  %v5558_v45 = vmul.f32 %v5510_v58, %v11129_v55  ;;  %v5526_v30 = vadd.f32 %v5525_v53, %v5514_v41  ;;  %v5537_v56 = vmul.f32 %v5535_v1, %v11131_v25 }
 0x965   : > { %v5379_v31 = vrot.slane %v5365_v7, %v9284_v16  ;;  %v5383_v21 = vrot.slane %v5372_v6, %v9065_v13  ;;  %v5570_v62 = vmul.f32 %v5522_v4, %v11132_v47  ;;  %v5356_v24 = vadd.f32 %v5354_v36, %v5336_v50 }
 0x966   : > { %v5571_v20 = vadd.f32 %v5569_v57, %v5559_v61  ;;  %v5560_v59 = vadd.f32 %v5558_v45, %v5548_v14  ;;  %v5538_v46 = vadd.f32 %v5537_v56, %v5526_v30  ;;  %v5581_v8 = vmul.f32 %v5530_v38, %v11133_v18 }
 0x967   : > { %v5387_v43 = vrot.slane %v5379_v31, %v9065_v13  ;;  %v5390_v9 = vmul.f32 %v5383_v21, %v5355_v26  ;;  %v5582_v55 = vmul.f32 %v5534_v34, %v11134_v39 }
 0x968   : > { %v5572_v22 = vadd.f32 %v5570_v62, %v5560_v59  ;;  %v5592_v25 = vrot.slane %v5538_v46, %v9284_v16  ;;  %v5583_v37 = vadd.f32 %v5581_v8, %v5571_v20 }
 0x969   : > { %v5391_v42 = vmul.f32 %v5387_v43, %v5356_v24  ;;  %v5394_v23 = vcombine.high %v5390_v9, %v5390_v9  ;;  %v5401_v51 = vrot.slane %v5390_v9, %v9284_v16 }
 0x96a   : > { %v5584_v4 = vadd.f32 %v5582_v55, %v5572_v22  ;;  %v5593_v18 = vcombine.high %v5592_v25, %v5592_v25  ;;  %v5600_v36 = vrot.slane %v5592_v25, %v9284_v16 }
 0x96b   : > { %v5408_v58 = vrot.slane %v5394_v23, %v9284_v16  ;;  %v5409_v47 = vcombine.high %v5401_v51, %v5401_v51  ;;  %v5442_v63 = vcombine.high %v5391_v42, %v5391_v42  ;;  %v5417_v54 = vrot.slane %v5401_v51, %v9284_v16 }
 0x96c   : > { %v5449_v52 = vrot.slane %v5391_v42, %v9284_v16  ;;  %v5611_v26 = vrot.slane %v5600_v36, %v9065_v13  ;;  %v5607_v27 = vrot.slane %v5593_v18, %v9284_v16 }
 0x96d   : > { %v5410_v39 = vcombine.high %v5408_v58, %v5408_v58  ;;  %v5424_v0 = vrot.slane %v5408_v58, %v9284_v16  ;;  %v5431_v50 = vrot.slane %v5409_v47, %v9284_v16  ;;  %v5456_v35 = vrot.slane %v5442_v63, %v9284_v16 }
 0x96e   : > { %v5457_v3 = vcombine.high %v5449_v52, %v5449_v52  ;;  %v5465_v28 = vrot.slane %v5449_v52, %v9284_v16  ;;  %v5618_v7 = vmul.f32 %v5611_v26, %v5583_v37  ;;  %v5615_v55 = vrot.slane %v5607_v27, %v9065_v13 }
 0x96f   : > { %v5438_v32 = vrot.slane %v5410_v39, %v9284_v16  ;;  %v5440_v38 = vcombine.high %v5424_v0, %v5424_v0  ;;  %v5458_v53 = vcombine.high %v5456_v35, %v5456_v35  ;;  %v5472_v34 = vrot.slane %v5456_v35, %v9284_v16 }
 0x970   : > { %v5479_v10 = vrot.slane %v5457_v3, %v9284_v16  ;;  %v5487_v44 = vcombine.high %v5465_v28, %v5465_v28  ;;  %v5718_v6 = vcombine.low %v5417_v54, %v5431_v50  ;;  %v8076_v1 = vcombine.high %v5417_v54, %v5431_v50 }
 0x971   : > { %v5486_v41 = vrot.slane %v5458_v53, %v9284_v16  ;;  %v5488_v57 = vcombine.high %v5472_v34, %v5472_v34  ;;  %v5720_v61 = vcombine.low %v5424_v0, %v5438_v32  ;;  %v5622_v45 = vcombine.high %v5618_v7, %v5618_v7 }
 0x972   : > { %v5489_v14 = vcombine.high %v5479_v10, %v5479_v10  ;;  %v5629_v31 = vrot.slane %v5618_v7, %v9284_v16  ;;  %v5721_v21 = vcombine.low %v5440_v38, %v5465_v28  ;;  %v5728_v30 = vrot.slane %v5718_v6, %v9284_v16 }
 0x973   : > { %v5735_v56 = vrot.slane %v8076_v1, %v9284_v16  ;;  %v5742_v20 = vrot.slane %v5720_v61, %v9284_v16  ;;  %v5767_v59 = vcombine.low %v5479_v10, %v5487_v44  ;;  %v5769_v8 = vcombine.low %v5486_v41, %v5488_v57 }
 0x974   : > { %v5637_v62 = vcombine.high %v5629_v31, %v5629_v31  ;;  %v5645_v24 = vrot.slane %v5629_v31, %v9284_v16  ;;  %v5749_v43 = vrot.slane %v5721_v21, %v9284_v16  ;;  %v5768_v9 = vcombine.low %v5489_v14, %v5472_v34 }
 0x975   : > { %v5750_v46 = vcombine.low %v5728_v30, %v5735_v56  ;;  %v5776_v22 = vrot.slane %v5767_v59, %v9284_v16  ;;  %v5636_v25 = vrot.slane %v5622_v45, %v9284_v16  ;;  %v5790_v37 = vrot.slane %v5769_v8, %v9284_v16 }
 0x976   : > { %v5659_v42 = vrot.slane %v5637_v62, %v9284_v16  ;;  %v5751_v23 = vcombine.low %v5742_v20, %v5749_v43  ;;  %v5783_v51 = vrot.slane %v5768_v9, %v9284_v16  ;;  %v5619_v58 = vmul.f32 %v5615_v55, %v5584_v4 }
 0x977   : > { %v5758_v47 = vrot.slane %v5750_v46, %v9284_v16  ;;  %v5638_v52 = vcombine.high %v5636_v25, %v5636_v25  ;;  %v5652_v36 = vrot.slane %v5636_v25, %v9284_v16  ;;  %v5805_v35 = vrot.slane %v5790_v37, %v9284_v16 }
 0x978   : > { %v5791_v63 = vcombine.low %v5776_v22, %v5783_v51  ;;  %v5809_v54 = vcombine.low %v5645_v24, %v5659_v42  ;;  %v5765_v18 = vrot.slane %v5751_v23, %v9284_v16  ;;  %v5670_v39 = vcombine.high %v5619_v58, %v5619_v58 }
 0x979   : > { %v5677_v0 = vrot.slane %v5619_v58, %v9284_v16  ;;  %v5666_v4 = vrot.slane %v5638_v52, %v9284_v16  ;;  %v5668_v28 = vcombine.high %v5652_v36, %v5652_v36  ;;  %v8077_v34 = vcombine.high %v5645_v24, %v5659_v42 }
 0x97a   : > { %v5798_v50 = vrot.slane %v5791_v63, %v9284_v16  ;;  %v5816_v3 = vrot.slane %v5809_v54, %v9284_v16  ;;  %v5684_v26 = vrot.slane %v5670_v39, %v9284_v16  ;;  %v5766_v62 = vcombine.low %v5758_v47, %v5765_v18  ;;  %v8583_v54 = vld [vmem:[%s10918_s8] ss:$0 sm:$0xff] }
 0x97b   : > { %v5685_v27 = vcombine.high %v5677_v0, %v5677_v0  ;;  %v5693_v32 = vrot.slane %v5677_v0, %v9284_v16  ;;  %v5827_v10 = vcombine.low %v5652_v36, %v5666_v4  ;;  %v5836_v61 = vrot.slane %v8077_v34, %v9284_v16 }
 0x97c   : > { %v5806_v38 = vcombine.low %v5798_v50, %v5805_v35  ;;  %v5817_v53 = vcombine.low %v5816_v3, %v5816_v3  ;;  %v5686_v44 = vcombine.high %v5684_v26, %v5684_v26  ;;  %v5700_v7 = vrot.slane %v5684_v26, %v9284_v16 }
 0x97d   : > { %v5707_v6 = vrot.slane %v5685_v27, %v9284_v16  ;;  %v5715_v41 = vcombine.high %v5693_v32, %v5693_v32  ;;  %v5828_v1 = vcombine.low %v5668_v28, %v5693_v32  ;;  %v5843_v14 = vrot.slane %v5827_v10, %v9284_v16 }
 0x97e   : > { %v5824_v57 = vrot.slane %v5817_v53, %v9284_v16  ;;  %v5714_v45 = vrot.slane %v5686_v44, %v9284_v16  ;;  %v5716_v31 = vcombine.high %v5700_v7, %v5700_v7  ;;  %v8564_v44 = vld [vmem:[%s10917_s7 + $0x10] sm:$0xff]  }
 0x97f   : > { %v5717_v21 = vcombine.high %v5707_v6, %v5707_v6  ;;  %v5829_v30 = vcombine.low %v5707_v6, %v5715_v41  ;;  %v5850_v20 = vrot.slane %v5828_v1, %v9284_v16  ;;  %v5858_v59 = vcombine.low %v5836_v61, %v5843_v14 }
 0x980   : > { %v5825_v56 = vcombine.low %v5824_v57, %v5824_v57  ;;  %v5876_v9 = vcombine.low %v5714_v45, %v5716_v31 }
 0x981   : > { %v5857_v24 = vrot.slane %v5829_v30, %v9284_v16  ;;  %v5875_v43 = vcombine.low %v5717_v21, %v5700_v7  ;;  %v5866_v8 = vrot.slane %v5858_v59, %v9284_v16  ;;  %v8565_v7 = vld [vmem:[%s10917_s7 + $0x18] sm:$0xff]  }
 0x982   : > { %v5902_v46 = vsel %vm1587_vm8, %v5806_v38, %v5825_v56  ;;  %v5890_v23 = vrot.slane %v5876_v9, %v9284_v16 }
 0x983   : > { %v5903_v22 = vpack.c.bf16 %v5902_v46, %v5766_v62  ;;  %v5859_v55 = vcombine.low %v5850_v20, %v5857_v24  ;;  %v5883_v42 = vrot.slane %v5875_v43, %v9284_v16 }
 0x985   : > { %8270 = vmatprep.mubr.msk.bf16.mxu1 %vm598_vm2, %v5903_v22  ;;  %v5873_v51 = vrot.slane %v5859_v55, %v9284_v16  ;;  %v5891_v25 = vcombine.low %v5883_v42, %v5890_v23 }
 0x987   : > { %v5874_v37 = vcombine.low %v5866_v8, %v5873_v51  ;;  %v5898_v58 = vrot.slane %v5891_v25, %v9284_v16 }
 0x989   : > { %v5904_v47 = vpack.c.bf16 %v5898_v58, %v5874_v37 }
 0x98b   : > { %8271 = vmatmul.mubr.msk.bf16.vlgmr.msra.gmra.mrb[20].mxu1 %vm598_vm2, %v5904_v47 }
 0x98c   : > { %8286 = vmatprep.mubr.msk.bf16.mxu1 %vm8752_vm0, %v11124_v12  ;;  %8283 = vmatpush3.bf16.msra.mxu1 %v8564_v44 }
 0x98d   : > { %8284 = vmatprep.subr.bf16.mxu1 %v11124_v12 }
 0x990   : > { %8285 = vmatpush3.bf16.msra.mxu1 %v8565_v7 }
 0x991   : > { %8298 = vmatprep.subr.bf16.mxu1 %v11124_v12 }
 0xa5e   : > { %v8272_v63 = vpop.f32.mrb[20].mxu1 }
 0xa5f   : > { %v5954_v52 = vadd.f32 %v8583_v54, %v8272_v63  ;;  %v5945_v18 = vpop.f32.mrb[21].mxu1 }
 0xa60   : > { %v5946_v36 = vadd.f32 %v8583_v54, %v5945_v18  ;;  %v8273_v39 = vpop.f32.mrb[22].mxu1 }
 0xa61   : > { %v5966_v0 = vmul.f32 0.01, %v5954_v52  ;;  %v5957_v50 = vadd.f32 %v8583_v54, %v8273_v39  ;;  %v5948_v35 = vpop.f32.mrb[23].mxu1  ;;  %vm5962_vm8 = vcmp.gt.f32.partialorder %v5954_v52, 0.0 }
 0xa62   : > { %v5964_v3 = vmul.f32 0.01, %v5946_v36  ;;  %v5949_v4 = vadd.f32 %v8583_v54, %v5948_v35  ;;  %vm5960_vm9 = vcmp.gt.f32.partialorder %v5946_v36, 0.0 }
 0xa63   : > { %vm5963_vm10 = vcmp.gt.f32.partialorder %v5957_v50, 0.0  ;;  %v5967_v28 = vmul.f32 0.01, %v5957_v50  ;;  %v5970_v27 = vsel %vm5962_vm8, %v5954_v52, %v5966_v0 }
 0xa64   : > { %vm5961_vm11 = vcmp.gt.f32.partialorder %v5949_v4, 0.0  ;;  %v5965_v26 = vmul.f32 0.01, %v5949_v4  ;;  %v5968_v38 = vsel %vm5960_vm9, %v5946_v36, %v5964_v3 }
 0xa65   : > { %v5971_v32 = vsel %vm5963_vm10, %v5957_v50, %v5967_v28 }
 0xa66   : > { %v5973_v53 = vpack.c.bf16 %v5971_v32, %v5970_v27  ;;  %v5969_v34 = vsel %vm5961_vm11, %v5949_v4, %v5965_v26 }
 0xa67   : > { %v5972_v10 = vpack.c.bf16 %v5969_v34, %v5968_v38 }
 0xa69   : > { %8278 = vmatprep.mubr.msk.bf16.mxu0 %vm598_vm2, %v5972_v10 }
 0xa6a   : > { %8279 = vmatmul.mubr.msk.bf16.vlgmr.msra.gmra.mrb[20].mxu0 %vm598_vm2, %v5973_v53 }
 0xa6b   : > { %8294 = vmatprep.mubr.msk.bf16.mxu0 %vm8752_vm0, %v11124_v12 }
 0xb3d   : > { %v8280_v6 = vpop.f32.mrb[20].mxu0 }
 0xb3e   : > { %v6023_v41 = vadd.f32 %v10258_v17, %v8280_v6  ;;  %v6014_v57 = vpop.f32.mrb[21].mxu0 }
 0xb3f   : > { %v6015_v1 = vadd.f32 %v10258_v17, %v6014_v57  ;;  %v8281_v61 = vpop.f32.mrb[22].mxu0 }
 0xb40   : > { %vm6031_vm13 = vcmp.gt.f32.partialorder %v6023_v41, 0.0  ;;  %v6035_v14 = vmul.f32 0.01, %v6023_v41  ;;  %v6026_v45 = vadd.f32 %v10258_v17, %v8281_v61  ;;  %v6017_v31 = vpop.f32.mrb[23].mxu0 }
 0xb41   : > { %vm6029_vm1 = vcmp.gt.f32.partialorder %v6015_v1, 0.0  ;;  %v6033_v21 = vmul.f32 0.01, %v6015_v1  ;;  %v6018_v30 = vadd.f32 %v10258_v17, %v6017_v31 }
 0xb42   : > { %v6039_v56 = vsel %vm6031_vm13, %v6023_v41, %v6035_v14  ;;  %vm6032_vm14 = vcmp.gt.f32.partialorder %v6026_v45, 0.0  ;;  %v6036_v20 = vmul.f32 0.01, %v6026_v45 }
 0xb43   : > { %v6348_v59 = vcombine.high %v6039_v56, %v6039_v56  ;;  %v6355_v62 = vrot.slane %v6039_v56, %v9284_v16  ;;  %v6037_v24 = vsel %vm6029_vm1, %v6015_v1, %v6033_v21  ;;  %vm6030_vm15 = vcmp.gt.f32.partialorder %v6018_v30, 0.0 }
 0xb44   : > { %v6043_v43 = vcombine.high %v6037_v24, %v6037_v24  ;;  %v6040_v9 = vsel %vm6032_vm14, %v6026_v45, %v6036_v20  ;;  %v6034_v46 = vmul.f32 0.01, %v6018_v30  ;;  %v6050_v17 = vrot.slane %v6037_v24, %v9284_v16 }
 0xb45   : > { %v6362_v8 = vrot.slane %v6348_v59, %v9284_v16  ;;  %v6363_v22 = vcombine.high %v6355_v62, %v6355_v62  ;;  %v6403_v55 = vrot.slane %v6040_v9, %v9284_v16  ;;  %v6371_v42 = vrot.slane %v6355_v62, %v9284_v16 }
 0xb46   : > { %v6057_v23 = vrot.slane %v6043_v43, %v9284_v16  ;;  %v6038_v51 = vsel %vm6030_vm15, %v6018_v30, %v6034_v46  ;;  %v6058_v18 = vcombine.high %v6050_v17, %v6050_v17  ;;  %v6066_v4 = vrot.slane %v6050_v17, %v9284_v16  ;;  %v11135_v46 = vld [vmem:[#allocation29_spill] sm:$0xff] }
 0xb47   : > { %v6364_v25 = vcombine.high %v6362_v8, %v6362_v8  ;;  %v10513_v37 = vrot.slane %v6363_v22, %v9284_v16  ;;  %v6404_v47 = vcombine.high %v6403_v55, %v6403_v55  ;;  %v10516_v63 = vrot.slane %v6403_v55, %v9284_v16 }
 0xb48   : > { %v6059_v58 = vcombine.high %v6057_v23, %v6057_v23  ;;  %v6092_v54 = vcombine.high %v6038_v51, %v6038_v51  ;;  %v6393_v52 = vcombine.high %v6371_v42, %v6371_v42  ;;  %v6099_v39 = vrot.slane %v6038_v51, %v9284_v16 }
 0xb49   : > { %v6392_v0 = vrot.slane %v6364_v25, %v9284_v16  ;;  %v6418_v50 = vrot.slane %v6404_v47, %v9284_v16  ;;  %v6474_v35 = vcombine.low %v10513_v37, %v10516_v63  ;;  %v8084_v3 = vcombine.high %v10513_v37, %v10516_v63  ;;  %v11136_v63 = vld [vmem:[#allocation28_spill] sm:$0xff] }
 0xb4a   : > { %v6087_v36 = vrot.slane %v6059_v58, %v9284_v16  ;;  %v6106_v26 = vrot.slane %v6092_v54, %v9284_v16  ;;  %v6107_v27 = vcombine.high %v6099_v39, %v6099_v39  ;;  %v6378_v32 = vrot.slane %v6362_v8, %v9284_v16 }
 0xb4b   : > { %v6420_v38 = vcombine.high %v6418_v50, %v6418_v50  ;;  %v6492_v53 = vcombine.low %v6393_v52, %v6418_v50  ;;  %v6080_v34 = vrot.slane %v6058_v18, %v9284_v16  ;;  %v6115_v7 = vrot.slane %v6099_v39, %v9284_v16 }
 0xb4c   : > { %v6091_v28 = vcombine.high %v6087_v36, %v6087_v36  ;;  %v6108_v44 = vcombine.high %v6106_v26, %v6106_v26  ;;  %v6396_v6 = vcombine.high %v6392_v0, %v6392_v0  ;;  %v6073_v41 = vrot.slane %v6057_v23, %v9284_v16 }
 0xb4d   : > { %v10532_v57 = vcombine.low %v6378_v32, %v6420_v38  ;;  %v6129_v61 = vrot.slane %v6107_v27, %v9284_v16  ;;  %v6088_v14 = vcombine.high %v6066_v4, %v6066_v4  ;;  %v6122_v45 = vrot.slane %v6106_v26, %v9284_v16  ;;  %v11137_v26 = vld [vmem:[#allocation34_spill] sm:$0xff] }
 0xb4e   : > { %v6144_v10 = vcombine.low %v6066_v4, %v6091_v28  ;;  %v6136_v31 = vrot.slane %v6108_v44, %v9284_v16  ;;  %v6165_v56 = vcombine.low %v6080_v34, %v6115_v7  ;;  %v6456_v20 = vcombine.low %v6371_v42, %v6396_v6 }
 0xb4f   : > { %v6138_v30 = vcombine.high %v6129_v61, %v6129_v61  ;;  %v6089_v59 = vcombine.high %v6073_v41, %v6073_v41  ;;  %v6187_v62 = vcombine.low %v6088_v14, %v6129_v61  ;;  %v8082_v43 = vcombine.high %v6080_v34, %v6115_v7  ;;  %v11138_v7 = vld [vmem:[#allocation32_spill] sm:$0xff] }
 0xb50   : > { %v6151_v1 = vrot.slane %v6144_v10, %v9284_v16  ;;  %v6172_v24 = vrot.slane %v6165_v56, %v9284_v16  ;;  %v6253_v55 = vcombine.low %v6087_v36, %v6122_v45  ;;  %v6346_v37 = vcombine.high %v6122_v45, %v6122_v45 }
 0xb51   : > { %v6231_v9 = vcombine.low %v6073_v41, %v6138_v30  ;;  %v6194_v22 = vrot.slane %v6187_v62, %v9284_v16  ;;  %v6275_v17 = vcombine.low %v6089_v59, %v6136_v31  ;;  %v6216_v51 = vrot.slane %v8082_v43, %v9284_v16 }
 0xb52   : > { %v6158_v21 = vrot.slane %v6151_v1, %v9284_v16  ;;  %v6179_v23 = vrot.slane %v6172_v24, %v9284_v16  ;;  %v6463_v42 = vrot.slane %v6456_v20, %v9284_v16  ;;  %v8083_v47 = vcombine.high %v6136_v31, %v6378_v32  ;;  %v11139_v31 = vld [vmem:[#allocation30_spill] sm:$0xff]  ;;  %v11140_v24 = vld [vmem:[#allocation51_spill] sm:$0xff] }
 0xb53   : > { %v6238_v25 = vrot.slane %v6231_v9, %v9284_v16  ;;  %v6201_v58 = vrot.slane %v6194_v22, %v9284_v16  ;;  %v6223_v52 = vrot.slane %v6216_v51, %v9284_v16  ;;  %v6260_v18 = vrot.slane %v6253_v55, %v9284_v16 }
 0xb54   : > { %v6160_v8 = vmul.f32 %v6158_v21, %v11135_v46  ;;  %v6181_v54 = vmul.f32 %v6179_v23, %v11136_v63  ;;  %v6421_v36 = vcombine.low %v6346_v37, %v6392_v0  ;;  %v6481_v39 = vrot.slane %v6474_v35, %v9284_v16 }
 0xb55   : > { %v6282_v50 = vrot.slane %v6275_v17, %v9284_v16  ;;  %v6445_v4 = vrot.slane %v8083_v47, %v9284_v16  ;;  %v6203_v27 = vmul.f32 %v6201_v58, %v11137_v26  ;;  %v6245_v38 = vrot.slane %v6238_v25, %v9284_v16  ;;  %v11141_v17 = vld [vmem:[#allocation52_spill] sm:$0xff] }
 0xb56   : > { %v6182_v28 = vadd.f32 %v6181_v54, %v6160_v8  ;;  %v6428_v32 = vrot.slane %v6421_v36, %v9284_v16  ;;  %v6470_v34 = vrot.slane %v6463_v42, %v9284_v16  ;;  %v6499_v10 = vrot.slane %v6492_v53, %v9284_v16 }
 0xb57   : > { %v6452_v44 = vrot.slane %v6445_v4, %v9284_v16  ;;  %v6225_v35 = vmul.f32 %v6223_v52, %v11138_v7  ;;  %v6267_v6 = vrot.slane %v6260_v18, %v9284_v16  ;;  %v6488_v1 = vrot.slane %v6481_v39, %v9284_v16  ;;  %v11142_v4 = vld [vmem:[#allocation24_spill] sm:$0xff] }
 0xb58   : > { %v6204_v0 = vadd.f32 %v6203_v27, %v6182_v28  ;;  %v6435_v41 = vrot.slane %v6428_v32, %v9284_v16  ;;  %v6517_v61 = vrot.slane %v8084_v3, %v9284_v16  ;;  %v6247_v21 = vmul.f32 %v6245_v38, %v11139_v31 }
 0xb59   : > { %v6454_v14 = vmul.f32 %v6452_v44, %v11136_v63  ;;  %v6289_v53 = vrot.slane %v6282_v50, %v9284_v16  ;;  %v6506_v56 = vrot.slane %v6499_v10, %v9284_v16  ;;  %v6535_v20 = vrot.slane %v10532_v57, %v9284_v16 }
 0xb5a   : > { %v6226_v45 = vadd.f32 %v6225_v35, %v6204_v0  ;;  %v6437_v30 = vmul.f32 %v6435_v41, %v11135_v46  ;;  %v6472_v59 = vmul.f32 %v6470_v34, %v11137_v26  ;;  %v6269_v43 = vmul.f32 %v6267_v6, %v11140_v24  ;;  %v11143_v34 = vld [vmem:[#allocation53_spill] sm:$0xff] }
 0xb5b   : > { %v6524_v9 = vrot.slane %v6517_v61, %v9284_v16  ;;  %v6490_v8 = vmul.f32 %v6488_v1, %v11138_v7  ;;  %v6291_v23 = vmul.f32 %v6289_v53, %v11141_v17  ;;  %v6508_v46 = vmul.f32 %v6506_v56, %v11139_v31 }
 0xb5c   : > { %v6248_v62 = vadd.f32 %v6247_v21, %v6226_v45  ;;  %v6455_v3 = vadd.f32 %v6454_v14, %v6437_v30  ;;  %v6542_v51 = vrot.slane %v6535_v20, %v9284_v16 }
 0xb5d   : > { %v6526_v37 = vmul.f32 %v6524_v9, %v11140_v24 }
 0xb5e   : > { %v6473_v22 = vadd.f32 %v6472_v59, %v6455_v3  ;;  %v6270_v55 = vadd.f32 %v6269_v43, %v6248_v62  ;;  %v6544_v47 = vmul.f32 %v6542_v51, %v11141_v17  ;;  %v11144_v43 = vld [vmem:[#allocation49_spill] sm:$0xff] }
 0xb5f   : > { %v7732_v3 = vrot.slane %v11144_v43, %v9065_v13  ;;  %v7739_v9 = vrot.slane %v11144_v43, %v9062_v11 }
 0xb60   : > { %v6491_v25 = vadd.f32 %v6490_v8, %v6473_v22  ;;  %v6292_v57 = vadd.f32 %v6291_v23, %v6270_v55  ;;  %v8566_v8 = vld [vmem:[#allocation8 + $0x10] sm:$0xff]   ;;  %v10611_v22 = vpop.permute.xlu1 %7318  ;;  %v8567_v55 = vld [vmem:[#allocation8 + $0x18] sm:$0xff]  }
 0xb61   : > { %8291 = vmatpush3.bf16.msra.mxu0 %v8566_v8 }
 0xb62   : > { %v6509_v42 = vadd.f32 %v6508_v46, %v6491_v25  ;;  %v6314_v58 = vrot.slane %v6292_v57, %v9284_v16  ;;  %8292 = vmatprep.subr.bf16.mxu0 %v11124_v12  ;;  %v10625_v57 = vpop.permute.xlu0 %7556 }
 0xb64   : > { %v6527_v63 = vadd.f32 %v6526_v37, %v6509_v42  ;;  %v6322_v54 = vrot.slane %v6314_v58, %v9284_v16  ;;  %v6315_v52 = vcombine.high %v6314_v58, %v6314_v58  ;;  %v10615_v17 = vpop.permute.xlu1 %7349 }
 0xb65   : > { %8293 = vmatpush3.bf16.msra.mxu0 %v8567_v55 }
 0xb66   : > { %v6545_v18 = vadd.f32 %v6544_v47, %v6527_v63  ;;  %v6333_v36 = vrot.slane %v6322_v54, %v9065_v13  ;;  %v6329_v39 = vrot.slane %v6315_v52, %v9284_v16  ;;  %8306 = vmatprep.subr.bf16.mxu0 %v11124_v12  ;;  %v10629_v42 = vpop.permute.xlu0 %7643 }
 0xb68   : > { %v6553_v50 = vrot.slane %v6545_v18, %v9284_v16  ;;  %v6340_v28 = vmul.f32 %v6333_v36, %v11142_v4  ;;  %v6337_v26 = vrot.slane %v6329_v39, %v9065_v13  ;;  %v10617_v23 = vpop.permute.xlu1 %7365 }
 0xb6a   : > { %v6561_v27 = vrot.slane %v6553_v50, %v9284_v16  ;;  %v6554_v38 = vcombine.high %v6553_v50, %v6553_v50  ;;  %v6342_v32 = vadd.f32 %v6340_v28, %v10346_v33  ;;  %v6341_v10 = vmul.f32 %v6337_v26, %v11143_v34 }
 0xb6c   : > { %v6572_v44 = vrot.slane %v6561_v27, %v9065_v13  ;;  %v6568_v0 = vrot.slane %v6554_v38, %v9284_v16  ;;  %v7716_v7 = vmul.f32 %v6342_v32, %v6342_v32  ;;  %v6343_v1 = vadd.f32 %v6341_v10, %v10350_v15  ;;  %v10619_v46 = vpop.permute.xlu1 %7525 }
 0xb6e   : > { %v6579_v35 = vmul.f32 %v6572_v44, %v11142_v4  ;;  %v6576_v6 = vrot.slane %v6568_v0, %v9065_v13  ;;  %v7719_v41 = vsel %vm7718_vm3, %v7716_v7, 0.0  ;;  %v6586_v31 = vcombine.low %v6342_v32, %v6343_v1 }
 0xb6f   : > { %7720 = vadd.xlane.f32.xlu0 %v7719_v41  ;;  %v7717_v53 = vmul.f32 %v6343_v1, %v6343_v1 }
 0xb70   : > { %v6581_v61 = vadd.f32 %v6579_v35, %v10377_v2  ;;  %v6580_v33 = vmul.f32 %v6576_v6, %v11143_v34  ;;  %v10621_v51 = vpop.permute.xlu1 %7540 }
 0xb71   : > { %v7722_v2 = vsel %vm7718_vm3, %v7717_v53, 0.0 }
 0xb72   : > { %v7805_v14 = vmul.f32 %v6581_v61, %v6581_v61  ;;  %v6582_v45 = vadd.f32 %v6580_v33, %v10385_v29  ;;  %v7770_v21 = vmul.f32 %v6581_v61, %v6342_v32 }
 0xb74   : > { %v7807_v30 = vsel %vm7718_vm3, %v7805_v14, 0.0  ;;  %v6590_v56 = vcombine.low %v6581_v61, %v6582_v45  ;;  %v7772_v20 = vsel %vm7718_vm3, %v7770_v21, 0.0  ;;  %v7771_v59 = vmul.f32 %v6582_v45, %v6343_v1  ;;  %v10623_v25 = vpop.permute.xlu1 %7572 }
 0xb75   : > { %7808 = vadd.xlane.f32.xlu1 %v7807_v30  ;;  %7773 = vadd.xlane.f32.xlu0 %v7772_v20  ;;  %v7806_v24 = vmul.f32 %v6582_v45, %v6582_v45 }
 0xb76   : > { %v6592_v15 = vpack.c.bf16 %v6590_v56, %v6586_v31  ;;  %v7775_v62 = vsel %vm7718_vm3, %v7771_v59, 0.0  ;;  %v8085_v31 = vld [vmem:[%s10918_s8 + $0x1] ss:$0 sm:$0xff] }
 0xb77   : > { %v7810_v29 = vsel %vm7718_vm3, %v7806_v24, 0.0 }
 0xb78   : > { %8287 = vmatmul.mubr.msk.bf16.vlgmr.msra.gmra.mrb[24].mxu1 %vm598_vm2, %v6592_v15  ;;  %v10627_v37 = vpop.permute.xlu1 %7626 }
 0xb79   : > { %7723 = vadd.xlane.f32.xlu1 %v7722_v2  ;;  %7776 = vadd.xlane.f32.xlu0 %v7775_v62 }
 0xb7a   : > { %8302 = vmatprep.mubr.msk.bf16.mxu1 %vm8752_vm0, %v11124_v12 }
 0xb7c   : > { %v10631_v58 = vpop.permute.xlu1 %7659 }
 0xb7d   : > { %7811 = vadd.xlane.f32.xlu0 %v7810_v29 }
 0xb80   : > { %v10633_v63 = vpop.permute.xlu1 %7675 }
 0xb8a   : > { %7734 = vbcast.lane.b32.xlu1 %v7732_v3, 256  ;;  %v11145_v3 = vld [vmem:[#allocation15_spill] sm:$0xff] }
 0xb93   : > { %7741 = vbcast.lane.b32.xlu0 %v7739_v9, 256  ;;  %v11146_v9 = vld [vmem:[#allocation16_spill] sm:$0xff] }
 0xb94   : > { %v7757_v8 = vsub.s32 %v11146_v9, %v11145_v3  ;;  %v11148_v3 = vld [vmem:[#allocation54_spill] sm:$0xff]  ;;  %vm7848_vm3 = vcmp.eq.s32.totalorder %v11146_v9, 1 }
 0xbfc   : > { %v7721_v47 = vpop.xlane.xlu0 %7720 }
 0xbfd   : > { %v8109_v18 = vadd.f32 -1.0, %v7721_v47 }
 0xbff   : > { %v7727_v50 = vmul.f32 %v8109_v18, %v8109_v18 }
 0xc02   : > { %v7809_v54 = vpop.xlane.xlu1 %7808  ;;  %v7774_v52 = vpop.xlane.xlu0 %7773 }
 0xc03   : > { %v7778_v0 = vmul.f32 %v7774_v52, %v7774_v52  ;;  %v8111_v35 = vadd.f32 -1.0, %v7809_v54 }
 0xc05   : > { %v7815_v61 = vmul.f32 %v8111_v35, %v8111_v35  ;;  %v10653_v35 = vld [vmem:[%s10917_s7 + $0x20] sm:$0xff]  }
 0xc06   : > { %v7724_v36 = vpop.xlane.xlu1 %7723  ;;  %v7777_v39 = vpop.xlane.xlu0 %7776  ;;  %8299 = vmatpush3.bf16.msra.mxu1 %v10653_v35 }
 0xc07   : > { %v8110_v28 = vadd.f32 -1.0, %v7724_v36  ;;  %v7779_v6 = vmul.f32 %v7777_v39, %v7777_v39  ;;  %8300 = vmatprep.subr.bf16.mxu1 %v11124_v12 }
 0xc09   : > { %v7728_v32 = vmul.f32 %v8110_v28, %v8110_v28 }
 0xc0a   : > { %v7735_v26 = vpop.permute.xlu1 %7734  ;;  %v7812_v27 = vpop.xlane.xlu0 %7811 }
 0xc0b   : > { %v7745_v38 = vmul.f32 %v7735_v26, %v7727_v50  ;;  %v7780_v7 = vmul.f32 %v7778_v0, %v7735_v26  ;;  %v8112_v41 = vadd.f32 -1.0, %v7812_v27  ;;  %v7817_v33 = vmul.f32 %v7815_v61, %v7735_v26 }
 0xc0d   : > { %7750 = vperm.xlu0 %8551, %v7745_v38   ;;  %v7816_v14 = vmul.f32 %v8112_v41, %v8112_v41  ;;  %v8089_v41 = vld [vmem:[%s10920_s10 + $0x1] ss:$0 sm:$0xff] }
 0xc0e   : > { %v7742_v10 = vpop.permute.xlu0 %7741 }
 0xc0f   : > { %v7746_v44 = vmul.f32 %v7742_v10, %v7728_v32  ;;  %v7781_v1 = vmul.f32 %v7779_v6, %v7742_v10  ;;  %v7818_v45 = vmul.f32 %v7816_v14, %v7742_v10  ;;  %v10660_v6 = vld [vmem:[%s10917_s7 + $0x28] sm:$0xff]  }
 0xc10   : > { %8301 = vmatpush3.bf16.msra.mxu1 %v10660_v6 }
 0xc11   : > { %7753 = vperm.xlu0 %8551, %v7746_v44   ;;  %8314 = vmatprep.subr.bf16.mxu1 %v11124_v12 }
 0xc15   : > { %7785 = vperm.xlu0 %8551, %v7780_v7  }
 0xc19   : > { %7788 = vperm.xlu0 %8551, %v7781_v1  }
 0xc1d   : > { %7822 = vperm.xlu0 %8551, %v7817_v33  }
 0xc21   : > { %7825 = vperm.xlu0 %8551, %v7818_v45  }
 0xc4b   : > { %v6648_v21 = vpop.f32.mrb[24].mxu1 }
 0xc4c   : > { %v6649_v53 = vadd.f32 %v8085_v31, %v6648_v21  ;;  %v8288_v30 = vpop.f32.mrb[25].mxu1 }
 0xc4d   : > { %v6651_v56 = vpop.f32.mrb[26].mxu1 }
 0xc4e   : > { %v6657_v20 = vmul.f32 0.01, %v6649_v53  ;;  %v6652_v59 = vadd.f32 %v8085_v31, %v6651_v56  ;;  %v8289_v15 = vpop.f32.mrb[27].mxu1  ;;  %vm6655_vm4 = vcmp.gt.f32.partialorder %v6649_v53, 0.0 }
 0xc50   : > { %vm6656_vm5 = vcmp.gt.f32.partialorder %v6652_v59, 0.0  ;;  %v6658_v2 = vmul.f32 0.01, %v6652_v59  ;;  %v6659_v62 = vsel %vm6655_vm4, %v6649_v53, %v6657_v20 }
 0xc52   : > { %v6660_v24 = vsel %vm6656_vm5, %v6652_v59, %v6658_v2  ;;  %v8584_v2 = vld [vmem:[%s9040_s16] sm:$0xff] }
 0xc53   : > { %v6661_v29 = vpack.c.bf16 %v6660_v24, %v6659_v62  ;;  %v6739_v62 = vcombine.high %v8584_v2, %v8584_v2 }
 0xc55   : > { %8295 = vmatmul.mubr.msk.bf16.vlgmr.msra.gmra.mrb[24].mxu0 %vm598_vm2, %v6661_v29  ;;  %v11147_v29 = vld [vmem:[#allocation33_spill] sm:$0xff] }
 0xc56   : > { %8310 = vmatprep.mubr.msk.bf16.mxu0 %vm8752_vm0, %v11124_v12 }
 0xc8c   : > { %v7751_v43 = vpop.permute.xlu0 %7750 }
 0xc8d   : > { %v7758_v47 = vrot.slane %v7751_v43, %v7757_v8 }
 0xc90   : > { %v7754_v55 = vpop.permute.xlu0 %7753 }
 0xc91   : > { %v7762_v54 = vrot.slane %v7754_v55, %v7757_v8 }
 0xc93   : > { %v7763_v52 = vsel %vm912_vm12, %v7762_v54, %v7758_v47 }
 0xc94   : > { %v7786_v18 = vpop.permute.xlu0 %7785  ;;  %v7766_v36 = vsel %vm7765_vm6, %v7763_v52, 0.0 }
 0xc95   : > { %7767 = vadd.xlane.f32.xlu0 %v7766_v36  ;;  %v7793_v50 = vrot.slane %v7786_v18, %v7757_v8  ;;  %v10683_v18 = vld [vmem:[#allocation8 + $0x20] sm:$0xff]   ;;  %v10687_v36 = vld [vmem:[#allocation8 + $0x28] sm:$0xff]  }
 0xc96   : > { %8307 = vmatpush3.bf16.msra.mxu0 %v10683_v18 }
 0xc97   : > { %8308 = vmatprep.subr.bf16.mxu0 %v11124_v12 }
 0xc98   : > { %v7789_v39 = vpop.permute.xlu0 %7788 }
 0xc99   : > { %v7797_v28 = vrot.slane %v7789_v39, %v7757_v8  ;;  %v10694_v39 = vld [vmem:[%s10918_s8 + $0x2] ss:$0 sm:$0xff] }
 0xc9a   : > { %8309 = vmatpush3.bf16.msra.mxu0 %v10687_v36 }
 0xc9b   : > { %v7798_v26 = vsel %vm912_vm12, %v7797_v28, %v7793_v50  ;;  %8322 = vmatprep.subr.bf16.mxu0 %v11124_v12 }
 0xc9c   : > { %v7823_v27 = vpop.permute.xlu0 %7822  ;;  %v10645_v38 = vsel %vm7765_vm6, %v7798_v26, 0.0 }
 0xc9d   : > { %v7830_v10 = vrot.slane %v7823_v27, %v7757_v8 }
 0xca0   : > { %v7826_v32 = vpop.permute.xlu0 %7825 }
 0xca1   : > { %v7834_v44 = vrot.slane %v7826_v32, %v7757_v8 }
 0xca3   : > { %v7835_v0 = vsel %vm912_vm12, %v7834_v44, %v7830_v10 }
 0xca4   : > { %v10648_v7 = vsel %vm7765_vm6, %v7835_v0, 0.0 }
 0xd28   : > { %v6717_v1 = vpop.f32.mrb[24].mxu0 }
 0xd29   : > { %v6718_v61 = vadd.f32 %v8089_v41, %v6717_v1  ;;  %v8296_v33 = vpop.f32.mrb[25].mxu0 }
 0xd2a   : > { %v6720_v14 = vpop.f32.mrb[26].mxu0 }
 0xd2b   : > { %vm6724_vm7 = vcmp.gt.f32.partialorder %v6718_v61, 0.0  ;;  %v6726_v45 = vmul.f32 0.01, %v6718_v61  ;;  %v6721_v31 = vadd.f32 %v8089_v41, %v6720_v14  ;;  %v8297_v21 = vpop.f32.mrb[27].mxu0  ;;  %v10707_v41 = vld [vmem:[%s10920_s10 + $0x2] ss:$0 sm:$0xff] }
 0xd2d   : > { %v6728_v53 = vsel %vm6724_vm7, %v6718_v61, %v6726_v45  ;;  %vm6725_vm8 = vcmp.gt.f32.partialorder %v6721_v31, 0.0  ;;  %v6727_v30 = vmul.f32 0.01, %v6721_v31 }
 0xd2e   : > { %v6731_v20 = vcombine.high %v6728_v53, %v6728_v53 }
 0xd2f   : > { %v6729_v56 = vsel %vm6725_vm8, %v6721_v31, %v6727_v30 }
 0xd30   : > { %v6734_v59 = vcombine.high %v6729_v56, %v6729_v56  ;;  %v6736_v15 = vadd.f32 %v6729_v56, %v6728_v53 }
 0xd32   : > { %v6737_v24 = vadd.f32 %v6734_v59, %v6731_v20  ;;  %v6755_v43 = vmul.f32 %v11147_v29, %v6736_v15 }
 0xd34   : > { %v6756_v8 = vmul.f32 %v11148_v3, %v6737_v24  ;;  %v10670_v55 = vadd.f32 %v8584_v2, %v6755_v43 }
 0xd36   : > { %v10672_v47 = vadd.f32 %v6756_v8, %v6739_v62  ;;  %v11149_v8 = vld [vmem:[#allocation55_spill] sm:$0xff] }
 0xd38   : > { %v6761_v54 = vcombine.low %v10670_v55, %v10672_v47 }
 0xd3a   : > { %v6763_v52 = vpack.c.bf16 %v6761_v54, %v6761_v54 }
 0xd3c   : > { %8303 = vmatmul.mubr.msk.bf16.vlgmr.msra.gmra.mrb[28].mxu1 %vm598_vm2, %v6763_v52  ;;  %v11150_v52 = vld [vmem:[#allocation56_spill] sm:$0xff] }
 0xd3d   : > { %8315 = vmatpush3.bf16.msra.mxu1 %v10653_v35  ;;  %8318 = vmatprep.mubr.msk.bf16.mxu1 %vm8752_vm0, %v11124_v12 }
 0xd3e   : > { %8316 = vmatprep.subr.bf16.mxu1 %v11124_v12 }
 0xd41   : > { %8317 = vmatpush3.bf16.msra.mxu1 %v10660_v6 }
 0xd42   : > { %8330 = vmatprep.subr.bf16.mxu1 %v11124_v12 }
 0xe0f   : > { %v6819_v50 = vpop.f32.mrb[28].mxu1 }
 0xe10   : > { %v6820_v28 = vadd.f32 %v10694_v39, %v6819_v50  ;;  %v8304_v26 = vpop.f32.mrb[29].mxu1 }
 0xe11   : > { %v6822_v27 = vpop.f32.mrb[30].mxu1 }
 0xe12   : > { %vm6825_vm9 = vcmp.gt.f32.partialorder %v6820_v28, 0.0  ;;  %v6826_v32 = vmul.f32 0.01, %v6820_v28  ;;  %v8305_v10 = vpop.f32.mrb[31].mxu1  ;;  %v11151_v27 = vld [vmem:[#allocation60_spill] sm:$0xff] }
 0xe14   : > { %v6827_v44 = vsel %vm6825_vm9, %v6820_v28, %v6826_v32 }
 0xe15   : > { %v6828_v0 = vpack.c.bf16 %v6827_v44, %v6827_v44  ;;  %v11152_v44 = vld [vmem:[#allocation57_spill] sm:$0xff] }
 0xe17   : > { %8311 = vmatmul.mubr.msk.bf16.vlgmr.msra.gmra.mrb[28].mxu0 %vm598_vm2, %v6828_v0 }
 0xe18   : > { %8323 = vmatpush3.bf16.msra.mxu0 %v10683_v18  ;;  %8326 = vmatprep.mubr.msk.bf16.mxu0 %vm8752_vm0, %v11124_v12 }
 0xe19   : > { %8324 = vmatprep.subr.bf16.mxu0 %v11124_v12 }
 0xe1c   : > { %8325 = vmatpush3.bf16.msra.mxu0 %v10687_v36 }
 0xe1d   : > { %8338 = vmatprep.subr.bf16.mxu0 %v11124_v12 }
 0xeea   : > { %v6884_v1 = vpop.f32.mrb[28].mxu0 }
 0xeeb   : > { %v6885_v61 = vadd.f32 %v10707_v41, %v6884_v1  ;;  %v8312_v33 = vpop.f32.mrb[29].mxu0 }
 0xeec   : > { %v6887_v14 = vpop.f32.mrb[30].mxu0 }
 0xeed   : > { %vm6890_vm10 = vcmp.gt.f32.partialorder %v6885_v61, 0.0  ;;  %v6891_v45 = vmul.f32 0.01, %v6885_v61  ;;  %v8313_v31 = vpop.f32.mrb[31].mxu0 }
 0xeef   : > { %v6892_v21 = vsel %vm6890_vm10, %v6885_v61, %v6891_v45 }
 0xef0   : > { %v6894_v53 = vcombine.high %v6892_v21, %v6892_v21  ;;  %v6910_v30 = vrot.slane %v6892_v21, %v9065_v13  ;;  %v6925_v56 = vrot.slane %v6892_v21, %v9062_v11  ;;  %v6941_v20 = vrot.slane %v6892_v21, %v11066_v60 }
 0xef1   : > { %v6957_v3 = vrot.slane %v6892_v21, %v11067_v19 }
 0xef2   : > { %v6914_v59 = vrot.slane %v6894_v53, %v9065_v13  ;;  %v6929_v15 = vrot.slane %v6894_v53, %v9062_v11  ;;  %v6945_v2 = vrot.slane %v6894_v53, %v11066_v60  ;;  %v6961_v62 = vrot.slane %v6894_v53, %v11067_v19  ;;  %v11153_v53 = vld [vmem:[#allocation20_spill] sm:$0xff] }
 0xef4   : > { %v6915_v24 = vsel %vm912_vm12, %v6914_v59, %v6910_v30  ;;  %v6930_v29 = vsel %vm912_vm12, %v6929_v15, %v6925_v56  ;;  %v6946_v43 = vsel %vm912_vm12, %v6945_v2, %v6941_v20  ;;  %v6962_v28 = vsel %vm912_vm12, %v6961_v62, %v6957_v3  ;;  %v11154_v56 = vld [vmem:[#allocation21_spill] sm:$0xff] }
 0xef5   : > { %v6917_v54 = vmul.f32 %v6915_v24, %v11149_v8  ;;  %v6932_v50 = vmul.f32 %v6930_v29, %v11150_v52  ;;  %v6948_v32 = vmul.f32 %v6946_v43, %v11151_v27  ;;  %v6964_v0 = vmul.f32 %v6962_v28, %v11152_v44 }
 0xef7   : > { %v6933_v26 = vadd.f32 %v6932_v50, %v6917_v54 }
 0xef9   : > { %v6949_v10 = vadd.f32 %v6948_v32, %v6933_v26 }
 0xefb   : > { %v6965_v1 = vadd.f32 %v6964_v0, %v6949_v10 }
 0xefd   : > { %v6973_v61 = vrot.slane %v6965_v1, %v9284_v16 }
 0xeff   : > { %v6974_v33 = vcombine.high %v6973_v61, %v6973_v61  ;;  %v6981_v14 = vrot.slane %v6973_v61, %v9284_v16 }
 0xf01   : > { %v6988_v45 = vrot.slane %v6974_v33, %v9284_v16  ;;  %v6992_v31 = vrot.slane %v6981_v14, %v9065_v13 }
 0xf03   : > { %v6996_v21 = vrot.slane %v6988_v45, %v9065_v13  ;;  %v6999_v30 = vmul.f32 %v6992_v31, %v11153_v53 }
 0xf05   : > { %v7000_v20 = vmul.f32 %v6996_v21, %v11154_v56  ;;  %v7001_v59 = vadd.f32 %v6999_v30, %v10670_v55 }
 0xf07   : > { %v7002_v15 = vadd.f32 %v7000_v20, %v10672_v47  ;;  %v11155_v20 = vld [vmem:[#allocation61_spill] sm:$0xff] }
 0xf09   : > { %v7005_v2 = vcombine.low %v7001_v59, %v7002_v15 }
 0xf0b   : > { %v7007_v62 = vpack.c.bf16 %v7005_v2, %v7005_v2 }
 0xf0d   : > { %8319 = vmatmul.mubr.msk.bf16.vlgmr.msra.gmra.mrb[32].mxu1 %vm598_vm2, %v7007_v62  ;;  %v11156_v62 = vld [vmem:[#allocation58_spill] sm:$0xff] }
 0xf0e   : > { %8331 = vmatpush3.bf16.msra.mxu1 %v10653_v35  ;;  %8334 = vmatprep.mubr.msk.bf16.mxu1 %vm8752_vm0, %v11124_v12 }
 0xf0f   : > { %8332 = vmatprep.subr.bf16.mxu1 %v11124_v12 }
 0xf12   : > { %8333 = vmatpush3.bf16.msra.mxu1 %v10660_v6 }
 0xf13   : > { %8346 = vmatprep.subr.bf16.mxu1 %v11124_v12 }
 0xfe0   : > { %v7045_v24 = vpop.f32.mrb[32].mxu1 }
 0xfe1   : > { %v7046_v55 = vadd.f32 %v10694_v39, %v7045_v24  ;;  %v8320_v29 = vpop.f32.mrb[33].mxu1 }
 0xfe2   : > { %v7048_v47 = vpop.f32.mrb[34].mxu1 }
 0xfe3   : > { %vm7051_vm11 = vcmp.gt.f32.partialorder %v7046_v55, 0.0  ;;  %v7052_v43 = vmul.f32 0.01, %v7046_v55  ;;  %v8321_v3 = vpop.f32.mrb[35].mxu1  ;;  %v11157_v47 = vld [vmem:[#allocation59_spill] sm:$0xff] }
 0xfe5   : > { %v7053_v8 = vsel %vm7051_vm11, %v7046_v55, %v7052_v43 }
 0xfe6   : > { %v7054_v54 = vpack.c.bf16 %v7053_v8, %v7053_v8  ;;  %v11158_v8 = vld [vmem:[#allocation62_spill] sm:$0xff] }
 0xfe8   : > { %8327 = vmatmul.mubr.msk.bf16.vlgmr.msra.gmra.mrb[32].mxu0 %vm598_vm2, %v7054_v54 }
 0xfe9   : > { %8339 = vmatpush3.bf16.msra.mxu0 %v10683_v18  ;;  %8342 = vmatprep.mubr.msk.bf16.mxu0 %vm8752_vm0, %v11124_v12 }
 0xfea   : > { %8340 = vmatprep.subr.bf16.mxu0 %v11124_v12 }
 0xfed   : > { %8341 = vmatpush3.bf16.msra.mxu0 %v10687_v36 }
 0xfee   : > { %8354 = vmatprep.subr.bf16.mxu0 %v11124_v12 }
0x10bb   : > { %v7092_v52 = vpop.f32.mrb[32].mxu0 }
0x10bc   : > { %v7093_v50 = vadd.f32 %v10707_v41, %v7092_v52  ;;  %v8328_v28 = vpop.f32.mrb[33].mxu0 }
0x10bd   : > { %v7095_v26 = vpop.f32.mrb[34].mxu0 }
0x10be   : > { %vm7098_vm13 = vcmp.gt.f32.partialorder %v7093_v50, 0.0  ;;  %v7099_v27 = vmul.f32 0.01, %v7093_v50  ;;  %v8329_v32 = vpop.f32.mrb[35].mxu0 }
0x10c0   : > { %v7100_v10 = vsel %vm7098_vm13, %v7093_v50, %v7099_v27 }
0x10c1   : > { %v7102_v44 = vcombine.high %v7100_v10, %v7100_v10  ;;  %v7117_v0 = vrot.slane %v7100_v10, %v9065_v13  ;;  %v7132_v1 = vrot.slane %v7100_v10, %v9062_v11  ;;  %v7148_v61 = vrot.slane %v7100_v10, %v11066_v60 }
0x10c2   : > { %v7164_v56 = vrot.slane %v7100_v10, %v11067_v19 }
0x10c3   : > { %v7121_v33 = vrot.slane %v7102_v44, %v9065_v13  ;;  %v7136_v14 = vrot.slane %v7102_v44, %v9062_v11  ;;  %v7152_v45 = vrot.slane %v7102_v44, %v11066_v60  ;;  %v7168_v31 = vrot.slane %v7102_v44, %v11067_v19 }
0x10c5   : > { %v7122_v21 = vsel %vm912_vm12, %v7121_v33, %v7117_v0  ;;  %v7137_v53 = vsel %vm912_vm12, %v7136_v14, %v7132_v1  ;;  %v7153_v30 = vsel %vm912_vm12, %v7152_v45, %v7148_v61  ;;  %v7169_v55 = vsel %vm912_vm12, %v7168_v31, %v7164_v56 }
0x10c6   : > { %v7124_v2 = vmul.f32 %v7122_v21, %v11155_v20  ;;  %v7139_v24 = vmul.f32 %v7137_v53, %v11156_v62  ;;  %v7155_v43 = vmul.f32 %v7153_v30, %v11157_v47  ;;  %v7171_v54 = vmul.f32 %v7169_v55, %v11158_v8 }
0x10c8   : > { %v7140_v29 = vadd.f32 %v7139_v24, %v7124_v2 }
0x10ca   : > { %v7156_v3 = vadd.f32 %v7155_v43, %v7140_v29 }
0x10cc   : > { %v7172_v52 = vadd.f32 %v7171_v54, %v7156_v3 }
0x10ce   : > { %v7180_v50 = vrot.slane %v7172_v52, %v9284_v16 }
0x10d0   : > { %v7181_v28 = vcombine.high %v7180_v50, %v7180_v50  ;;  %v7188_v26 = vrot.slane %v7180_v50, %v9284_v16 }
0x10d2   : > { %v7195_v27 = vrot.slane %v7181_v28, %v9284_v16  ;;  %v7199_v32 = vrot.slane %v7188_v26, %v9065_v13  ;;  %v11159_v28 = vld [vmem:[#allocation63_spill] sm:$0xff] }
0x10d4   : > { %v7203_v10 = vrot.slane %v7195_v27, %v9065_v13  ;;  %v7206_v44 = vmul.f32 %v7199_v32, %v11111_v49 }
0x10d6   : > { %v7207_v0 = vmul.f32 %v7203_v10, %v11112_v5  ;;  %v7208_v1 = vadd.f32 %v7206_v44, %v7001_v59 }
0x10d8   : > { %v7209_v61 = vadd.f32 %v7207_v0, %v7002_v15 }
0x10da   : > { %v7212_v33 = vcombine.low %v7208_v1, %v7209_v61 }
0x10dc   : > { %v7214_v14 = vpack.c.bf16 %v7212_v33, %v7212_v33 }
0x10de   : > { %8335 = vmatmul.mubr.msk.bf16.vlgmr.msra.gmra.mrb[36].mxu1 %vm598_vm2, %v7214_v14 }
0x10df   : > { %8347 = vmatpush3.bf16.msra.mxu1 %v10653_v35  ;;  %8350 = vmatprep.mubr.msk.bf16.mxu1 %vm8752_vm0, %v11124_v12 }
0x10e0   : > { %8348 = vmatprep.subr.bf16.mxu1 %v11124_v12 }
0x10e3   : > { %8349 = vmatpush3.bf16.msra.mxu1 %v10660_v6 }
0x11b1   : > { %v7252_v45 = vpop.f32.mrb[36].mxu1 }
0x11b2   : > { %v7253_v49 = vadd.f32 %v10694_v39, %v7252_v45  ;;  %v8336_v31 = vpop.f32.mrb[37].mxu1 }
0x11b3   : > { %v7255_v5 = vpop.f32.mrb[38].mxu1 }
0x11b4   : > { %vm7258_vm1 = vcmp.gt.f32.partialorder %v7253_v49, 0.0  ;;  %v7259_v59 = vmul.f32 0.01, %v7253_v49  ;;  %v8337_v15 = vpop.f32.mrb[39].mxu1 }
0x11b6   : > { %v7260_v21 = vsel %vm7258_vm1, %v7253_v49, %v7259_v59 }
0x11b7   : > { %v7261_v53 = vpack.c.bf16 %v7260_v21, %v7260_v21 }
0x11b9   : > { %8343 = vmatmul.mubr.msk.bf16.vlgmr.msra.gmra.mrb[36].mxu0 %vm598_vm2, %v7261_v53 }
0x11ba   : > { %8355 = vmatpush3.bf16.msra.mxu0 %v10683_v18  ;;  %8358 = vmatprep.mubr.msk.bf16.mxu0 %vm8752_vm0, %v11124_v12 }
0x11bb   : > { %8356 = vmatprep.subr.bf16.mxu0 %v11124_v12 }
0x11be   : > { %8357 = vmatpush3.bf16.msra.mxu0 %v10687_v36 }
0x128c   : > { %v7299_v35 = vpop.f32.mrb[36].mxu0 }
0x128d   : > { %v7300_v6 = vadd.f32 %v10707_v41, %v7299_v35  ;;  %v8344_v30 = vpop.f32.mrb[37].mxu0 }
0x128e   : > { %v7302_v56 = vpop.f32.mrb[38].mxu0 }
0x128f   : > { %vm7305_vm14 = vcmp.gt.f32.partialorder %v7300_v6, 0.0  ;;  %v7306_v20 = vmul.f32 0.01, %v7300_v6  ;;  %v8345_v2 = vpop.f32.mrb[39].mxu0 }
0x1291   : > { %v7307_v62 = vsel %vm7305_vm14, %v7300_v6, %v7306_v20 }
0x1292   : > { %v7309_v24 = vcombine.high %v7307_v62, %v7307_v62  ;;  %v7324_v55 = vrot.slane %v7307_v62, %v9065_v13  ;;  %v7339_v18 = vrot.slane %v7307_v62, %v9062_v11  ;;  %v7355_v29 = vrot.slane %v7307_v62, %v11066_v60 }
0x1293   : > { %v7371_v52 = vrot.slane %v7307_v62, %v11067_v19 }
0x1294   : > { %v7328_v12 = vrot.slane %v7309_v24, %v9065_v13  ;;  %v7343_v36 = vrot.slane %v7309_v24, %v9062_v11  ;;  %v7359_v47 = vrot.slane %v7309_v24, %v11066_v60  ;;  %v7375_v43 = vrot.slane %v7309_v24, %v11067_v19 }
0x1296   : > { %v7329_v3 = vsel %vm912_vm12, %v7328_v12, %v7324_v55  ;;  %v7344_v8 = vsel %vm912_vm12, %v7343_v36, %v7339_v18  ;;  %v7360_v54 = vsel %vm912_vm12, %v7359_v47, %v7355_v29  ;;  %v7376_v27 = vsel %vm912_vm12, %v7375_v43, %v7371_v52 }
0x1297   : > { %v7331_v50 = vmul.f32 %v7329_v3, %v10611_v22  ;;  %v7346_v26 = vmul.f32 %v7344_v8, %v11159_v28  ;;  %v7362_v10 = vmul.f32 %v7360_v54, %v10615_v17  ;;  %v7378_v0 = vmul.f32 %v7376_v27, %v10617_v23 }
0x1299   : > { %v7347_v32 = vadd.f32 %v7346_v26, %v7331_v50 }
0x129b   : > { %v7363_v44 = vadd.f32 %v7362_v10, %v7347_v32 }
0x129d   : > { %v7379_v33 = vadd.f32 %v7378_v0, %v7363_v44 }
0x129f   : > { %v7387_v14 = vrot.slane %v7379_v33, %v9284_v16 }
0x12a1   : > { %v7388_v45 = vcombine.high %v7387_v14, %v7387_v14  ;;  %v7395_v49 = vrot.slane %v7387_v14, %v9284_v16 }
0x12a3   : > { %v7402_v31 = vrot.slane %v7388_v45, %v9284_v16  ;;  %v7406_v22 = vrot.slane %v7395_v49, %v9065_v13 }
0x12a5   : > { %v7410_v5 = vrot.slane %v7402_v31, %v9065_v13  ;;  %v7413_v59 = vmul.f32 %v7406_v22, %v11125_v48 }
0x12a7   : > { %v7414_v15 = vmul.f32 %v7410_v5, %v9920_v40  ;;  %v7415_v17 = vadd.f32 %v7413_v59, %v7208_v1 }
0x12a9   : > { %v7416_v21 = vadd.f32 %v7414_v15, %v7209_v61 }
0x12ab   : > { %v7419_v53 = vcombine.low %v7415_v17, %v7416_v21 }
0x12ad   : > { %v7421_v23 = vpack.c.bf16 %v7419_v53, %v7419_v53 }
0x12af   : > { %8351 = vmatmul.mubr.msk.bf16.vlgmr.msra.gmra.mrb[40].mxu1 %vm598_vm2, %v7421_v23 }
0x1382   : > { %v7459_v35 = vpop.f32.mrb[40].mxu1 }
0x1383   : > { %v7460_v6 = vadd.f32 %v10694_v39, %v7459_v35  ;;  %v8352_v30 = vpop.f32.mrb[41].mxu1 }
0x1384   : > { %v7462_v56 = vpop.f32.mrb[42].mxu1 }
0x1385   : > { %vm7465_vm0 = vcmp.gt.f32.partialorder %v7460_v6, 0.0  ;;  %v7466_v20 = vmul.f32 0.01, %v7460_v6  ;;  %v8353_v2 = vpop.f32.mrb[43].mxu1 }
0x1387   : > { %v7467_v62 = vsel %vm7465_vm0, %v7460_v6, %v7466_v20 }
0x1388   : > { %v7468_v24 = vpack.c.bf16 %v7467_v62, %v7467_v62 }
0x138a   : > { %8359 = vmatmul.mubr.msk.bf16.vlgmr.msra.gmra.mrb[40].mxu0 %vm598_vm2, %v7468_v24  ;;  %v8107_v24 = vld [vmem:[%s11160_s14] ss:$0 sm:$0xff]  ;;  %vm7698_vm2 = vcmask 254976   ;;  %s8677_s14 = scalar_lea.vmem %s8676_s24, 64 }
0x138b   : > { %p8679_p12 = scmp.lt.s32.totalorder %s8677_s14, %s8671_s23 }
0x138d   : > { %p8680_p2 = por %p8679_p12, %p8678_p9 }
0x138f   : > { %p8681_p13 = pnand %p8680_p2, %p8674_p7 }
0x145d   : > { %v7506_v48 = vpop.f32.mrb[40].mxu0 }
0x145e   : > { %v7507_v40 = vadd.f32 %v10707_v41, %v7506_v48  ;;  %v8360_v1 = vpop.f32.mrb[41].mxu0 }
0x145f   : > { %v7509_v61 = vpop.f32.mrb[42].mxu0 }
0x1460   : > { %vm7512_vm15 = vcmp.gt.f32.partialorder %v7507_v40, 0.0  ;;  %v7513_v55 = vmul.f32 0.01, %v7507_v40  ;;  %v8361_v18 = vpop.f32.mrb[43].mxu0 }
0x1462   : > { %v7514_v29 = vsel %vm7512_vm15, %v7507_v40, %v7513_v55 }
0x1463   : > { %v7516_v12 = vcombine.high %v7514_v29, %v7514_v29  ;;  %v7531_v39 = vrot.slane %v7514_v29, %v9065_v13  ;;  %v7546_v36 = vrot.slane %v7514_v29, %v9062_v11  ;;  %v7562_v47 = vrot.slane %v7514_v29, %v11066_v60 }
0x1464   : > { %v7578_v28 = vrot.slane %v7514_v29, %v11067_v19 }
0x1465   : > { %v7535_v43 = vrot.slane %v7516_v12, %v9065_v13  ;;  %v7550_v3 = vrot.slane %v7516_v12, %v9062_v11  ;;  %v7566_v8 = vrot.slane %v7516_v12, %v11066_v60  ;;  %v7582_v41 = vrot.slane %v7516_v12, %v11067_v19  ;;  %v7768_v12 = vpop.xlane.xlu0 %7767 }
0x1467   : > { %v7536_v54 = vsel %vm912_vm12, %v7535_v43, %v7531_v39  ;;  %v7551_v52 = vsel %vm912_vm12, %v7550_v3, %v7546_v36  ;;  %v7567_v50 = vsel %vm912_vm12, %v7566_v8, %v7562_v47  ;;  %v7583_v32 = vsel %vm912_vm12, %v7582_v41, %v7578_v28 }
0x1468   : > { %v7538_v26 = vmul.f32 %v7536_v54, %v10619_v46  ;;  %v7553_v27 = vmul.f32 %v7551_v52, %v10621_v51  ;;  %v7569_v44 = vmul.f32 %v7567_v50, %v10625_v57  ;;  %v7585_v33 = vmul.f32 %v7583_v32, %v10623_v25 }
0x146a   : > { %v7554_v10 = vadd.f32 %v7553_v27, %v7538_v26 }
0x146c   : > { %v7570_v0 = vadd.f32 %v7569_v44, %v7554_v10 }
0x146e   : > { %v7586_v14 = vadd.f32 %v7585_v33, %v7570_v0 }
0x1470   : > { %v7594_v45 = vrot.slane %v7586_v14, %v9284_v16 }
0x1472   : > { %v7595_v49 = vcombine.high %v7594_v45, %v7594_v45  ;;  %v7602_v31 = vrot.slane %v7594_v45, %v9284_v16 }
0x1474   : > { %v7609_v22 = vrot.slane %v7595_v49, %v9284_v16  ;;  %v7613_v46 = vrot.slane %v7602_v31, %v9065_v13 }
0x1476   : > { %v7617_v51 = vrot.slane %v7609_v22, %v9065_v13  ;;  %v7620_v5 = vmul.f32 %v7613_v46, %v11142_v4 }
0x1478   : > { %v7621_v59 = vmul.f32 %v7617_v51, %v11143_v34  ;;  %v7622_v57 = vadd.f32 %v7620_v5, %v7415_v17 }
0x147a   : > { %v7623_v15 = vadd.f32 %v7621_v59, %v7416_v21  ;;  %v7634_v25 = vrot.slane %v7622_v57, %v9065_v13  ;;  %v7649_v53 = vrot.slane %v7622_v57, %v9062_v11  ;;  %v7665_v23 = vrot.slane %v7622_v57, %v11066_v60 }
0x147b   : > { %v7681_v21 = vrot.slane %v7622_v57, %v11067_v19 }
0x147c   : > { %v7638_v35 = vrot.slane %v7623_v15, %v9065_v13  ;;  %v7653_v16 = vrot.slane %v7623_v15, %v9062_v11  ;;  %v7669_v6 = vrot.slane %v7623_v15, %v11066_v60  ;;  %v7685_v30 = vrot.slane %v7623_v15, %v11067_v19 }
0x147e   : > { %v7639_v4 = vsel %vm912_vm12, %v7638_v35, %v7634_v25  ;;  %v7654_v34 = vsel %vm912_vm12, %v7653_v16, %v7649_v53  ;;  %v7670_v17 = vsel %vm912_vm12, %v7669_v6, %v7665_v23  ;;  %v7686_v13 = vsel %vm912_vm12, %v7685_v30, %v7681_v21 }
0x147f   : > { %v7641_v56 = vmul.f32 %v7639_v4, %v10627_v37  ;;  %v7656_v20 = vmul.f32 %v7654_v34, %v10629_v42  ;;  %v7672_v11 = vmul.f32 %v7670_v17, %v10631_v58  ;;  %v7688_v62 = vmul.f32 %v7686_v13, %v10633_v63  ;;  %v8108_v37 = vld [vmem:[#allocation2] ss:$0 sm:$0xff] }
0x1480   : > { %vm7841_vm12 = vcmp.eq.s32.totalorder %v11146_v9, 0 }
0x1481   : > { %v7657_v2 = vadd.f32 %v7656_v20, %v7641_v56 }
0x1483   : > { %v7673_v60 = vadd.f32 %v7672_v11, %v7657_v2 }
0x1485   : > { %v7689_v48 = vadd.f32 %v7688_v62, %v7673_v60 }
0x1487   : > { %v7697_v40 = vmul.f32 %v8107_v24, %v7689_v48 }
0x1489   : > { %v7699_v19 = vsel %vm7698_vm2, %v7697_v40, 0.0 }
0x148a   : > { %7700 = vadd.xlane.f32.xlu1 %v7699_v19 }
0x148e   : > { %7801 = vadd.xlane.f32.xlu1 %v10645_v38 }
0x1492   : > { %7838 = vadd.xlane.f32.xlu1 %v10648_v7 }
0x1517   : > { %v7701_v42 = vpop.xlane.xlu1 %7700 }
0x1518   : > { %v7709_v58 = vadd.f32 %v8108_v37, %v7701_v42 }
0x151a   : > { %v7710_v1 = vsub.f32 0.0, %v7709_v58 }
0x151b   : > { %v7802_v29 = vpop.xlane.xlu1 %7801 }
0x151c   : > { %v7711_v61 = vmul.f32 1.442695, %v7710_v1  ;;  %v7803_v39 = vadd.f32 %v7802_v29, %v7768_v12 }
0x151e   : > { %8572 = vpow2.f32 %v7711_v61  ;;  %v7804_v36 = vadd.f32 %v7803_v39, %v7802_v29 }
0x151f   : > { %v7839_v38 = vpop.xlane.xlu1 %7838 }
0x1520   : > { %v7840_v7 = vadd.f32 %v7839_v38, %v7804_v36 }
0x1522   : > { %v7849_v43 = vsel %vm7848_vm3, %v7840_v7, 0.0 }
0x1528   : > { %v8573_v63 = vpop.eup %8572 }
0x1529   : > { %v7713_v55 = vadd.f32 1.0, %v8573_v63 }
0x152b   : > { %8574 = vrcp.f32 %v7713_v55 }
0x1535   : > { %v8575_v18 = vpop.eup %8574 }
0x1536   : > { %7844 = vperm.xlu1 %8552, %v8575_v18  }
0x15b5   : > { %v7845_v47 = vpop.permute.xlu1 %7844 }
0x15b6   : > { %v7847_v3 = vsel %vm7841_vm12, %v7845_v47, 0.0 }
0x15b7   : > { %v7850_v8 = vadd.f32 %v7849_v43, %v7847_v3 }
0x15b9   : > { %7851 = vst [vmem:[%s515_s20] sm:$0x3] %v7850_v8 }
0x15ba   : > { %8684 = shalt.err (!%p8681_p13)
}
0x15bb   : > { %s8685_s19 = scalar_lea.hbm %s10866_s11, 32  ;;  %s8689_s20 = scalar_lea.hbm %s11161_s21, 64 }
0x15bc   : > { %p8686_p6 = scmp.ne.s32.totalorder %s10866_s11, %s8685_s19  ;;  %p8690_p5 = scmp.lt.u32.totalorder %s10866_s11, %s11161_s21 }
0x15bd   : > { %p8691_p8 = scmp.lt.u32.totalorder %s8689_s20, %s8685_s19  ;;  %p8693_p0 = scmp.lt.u32.totalorder %s8685_s19, %s10866_s11 }
0x15be   : > { %p8687_p10 = pnand %p8686_p6, %p11162_p1 }
0x15bf   : > { %p8692_p11 = por %p8691_p8, %p8690_p5 }
0x15c0   : > { %p8688_p4 = pneg %p8687_p10 }
0x15c1   : > { %p8694_p3 = por %p8693_p0, %p8692_p11 }
0x15c3   : > { %p8695_p7 = pnand %p8694_p3, %p8688_p4 }
0x15c5   : > { %8698 = shalt.err (!%p8695_p7)
}
0x15c6   : > { %8372 = dma.vmem_to_hbm [thread:$0]  (%p11162_p1), %s10868_s17, 32, %s10866_s11, %s7853_s13  }
0x15c7 PF: > { %s11163_s23 = sld [smem:[#allocation13_spill]]  ;;  %s11164_s12 = sld [smem:[#allocation14_spill]] }
0x15c8   : > { %p11166_p12 = scmp.ge.s32.totalorder %s8741_s30, 2 }
0x15cd   : > { %s7878_s24 = sand.u32 1, %s11163_s23   ;;  %p11165_p9 = scmp.ne.s32.totalorder %s11164_s12, 0 }
0x15ce   : > { %s7879_s14 = scalar_lea.sflag [#allocation5], %s7878_s24 }
0x15cf   : > { %p8386_p2 = pnand %p11166_p12, %p11165_p9 }
0x15d1   : > { %8724 = dma.done.wait (!%p8386_p2), %s7879_s14, 32  }
0x15d2   : > { %8726 = vsyncadd (!%p8386_p2), %s7879_s14, 4294967264  ;;  %s11167_s19 = smov %s8944_s27  ;;  %p29_p13 = scmp.ge.s32.totalorder %s8944_s27, 4  }
0x15d3   : > { %s11168_s27 = smov %s8733_s28  ;;  %s11169_s28 = smov %s8737_s29 }
0x15d4   : > { %s11170_s29 = smov %s8960_s26  ;;  %s11171_s30 = smov %s11167_s19 }
0x15d5   :  { %31 = sbr.rel (!%p29_p13) target bundleno = 9 (0x9), region = 143 }
0x15dc   :  { %7884 = vsyncpa [#allocation4], 1 }
0x15dd   :  { %7886 = vsyncpa [#allocation4 + $0x1], 1 }
0x15de   :  { %7887 = vsyncpa [#allocation7], 1 }
0x15df   :  { %7888 = vsyncpa [#allocation5], 1 }
0x15e0   :  { %7890 = vsyncpa [#allocation5 + $0x1], 1 }

</bundles_post_ra>
